<compile_context>
chip_gen: v6e
topology: v6e:2x2x1
jax: 0.10.0
libtpu: 0.0.40
codegen_flags: <defaults>
</compile_context>

<pallas_src>
import functools

import jax
import jax.numpy as jnp
from jax.experimental import pallas as pl
from jax.experimental.pallas import tpu as pltpu

# ---- static shape constants implied by the module ----
L_IN = 300
C0, C1, C2, C3 = 5, 32, 8, 8
K1, K2, K3 = 7, 4, 3
FC1_IN, FC1_OUT, OUT = 280, 32, 2
L3P = 35                        # pooled length feeding the flatten (35*8 = 280)

# Per-sample row strides inside the kernel -- all true multiples of 8.
S1 = 320                        # conv1 rows / sample    (valid 0..299)
S1P = S1 // 2                   # 160 = conv2 rows/sample (valid 0..146)
S2P = S1P // 2                  # 80  = conv3 rows/sample (valid 0..70)
S3P = S2P // 2                  # 40  = pool3 rows/sample (valid 0..34)


def edeepvpp_kernel(x_ref, w1_ref, b1_ref, w2_ref, b2_ref, w3_ref, b3_ref,
                    wf1_ref, bf1_ref, wf2_ref, bf2_ref, out_ref,
                    s1, s2, s3, s3p, *, T):
    f32 = jnp.float32
    bf16 = jnp.bfloat16

    # ---- conv1 (5->32, k=7, 'same'): in-kernel im2col, K = 35 ----
    # x_ref rows per sample: [3 zeros | 300 data | 17 zeros]; output row r uses
    # padded rows r..r+6.  Only the last 8 rows of the block (garbage tail of
    # the last sample) are left uncomputed; they are never read downstream.
    n1 = T * S1 - 8
    c1 = jnp.concatenate([x_ref[pl.ds(k, n1), :] for k in range(K1)],
                         axis=1).astype(bf16)                       # (n1, 35)
    h1 = jnp.dot(c1, w1_ref[...], preferred_element_type=f32)
    s1[pl.ds(0, n1), :] = jnp.maximum(h1 + b1_ref[...], 0.0)        # (n1, 32)

    # ---- pool1 fused into conv2 (32->8, k=4, valid) im2col, K = 128 ----
    # tap k of conv2 row j is max(s1[2(j+k)], s1[2(j+k)+1]); all reads stay
    # inside the computed region of s1.
    n2 = T * S1P - 8
    taps2 = [jnp.maximum(s1[pl.ds(2 * k, n2, stride=2), :],
                         s1[pl.ds(2 * k + 1, n2, stride=2), :]).astype(bf16)
             for k in range(K2)]
    h2 = jnp.dot(jnp.concatenate(taps2, axis=1), w2_ref[...],
                 preferred_element_type=f32)
    s2[pl.ds(0, n2), :] = jnp.maximum(h2 + b2_ref[...], 0.0)        # (n2, 8)

    # ---- pool2 fused into conv3 (8->8, k=3, valid) im2col, K = 24 ----
    n3 = T * S2P - 8
    taps3 = [jnp.maximum(s2[pl.ds(2 * k, n3, stride=2), :],
                         s2[pl.ds(2 * k + 1, n3, stride=2), :]).astype(bf16)
             for k in range(K3)]
    h3 = jnp.dot(jnp.concatenate(taps3, axis=1), w3_ref[...],
                 preferred_element_type=f32)
    s3[pl.ds(0, n3), :] = jnp.maximum(h3 + b3_ref[...], 0.0)        # (n3, 8)
    # Zero the 8 uncomputed (garbage) tail rows so pool3 never reads
    # uninitialized VMEM.
    s3[pl.ds(n3, 8), :] = jnp.zeros((8, C3), f32)

    # ---- pool3: per-sample stride 80 -> 40 ----
    n3p = T * S3P
    s3p[...] = jnp.maximum(s3[pl.ds(0, n3p, stride=2), :],
                           s3[pl.ds(1, n3p, stride=2), :])           # (T*40, 8)

    # ---- flatten -> (T, 280): column l*8 + c (fc1 weight regrouped) ----
    # Row l of every sample sits at rows l, l+40, l+80, ... (stride 40 is a
    # multiple of 8 -> each gather keeps a fixed sublane phase).
    flat = jnp.concatenate(
        [s3p[pl.ds(l, T, stride=S3P), :] for l in range(L3P)],
        axis=1).astype(bf16)                                         # (T, 280)

    # ---- fc1 + ReLU, fc2.  Dropout(p=0.2) is identity in eval mode ----
    h = jnp.maximum(
        jnp.dot(flat, wf1_ref[...], preferred_element_type=f32) + bf1_ref[...],
        0.0)
    out_ref[...] = (jnp.dot(h.astype(bf16), wf2_ref[...],
                            preferred_element_type=f32) + bf2_ref[...])


def _choose_tb(B, tb_max=16):
    """Default batch tile: small batches in one step (full-dim out block),
    larger batches in 8-aligned tiles with >= 2 grid steps (megacore)."""
    if B <= 8:
        return B
    return min(tb_max, 8 * pl.cdiv(B, 16))


def my_edeepvpp_forward(x, params, block_batch=None):
    """x: (B, 300, 5) float32 (same tensor the PyTorch forward receives)."""
    B, L, C = x.shape
    assert (L, C) == (L_IN, C0), (L, C)
    tb = _choose_tb(B) if block_batch is None else block_batch
    nblk = pl.cdiv(B, tb)
    Bp = nblk * tb
    if Bp != B:
        x = jnp.pad(x, ((0, Bp - B), (0, 0), (0, 0)))

    # Per-sample zero padding for the 'same' conv1 (3 front) plus tail padding
    # up to the 8-aligned per-sample stride S1=320.  Raw data only -- the
    # 7-tap im2col is built inside the kernel (no 7x HBM blow-up).
    xpad = jnp.pad(x.astype(jnp.float32),
                   ((0, 0), (3, S1 - L_IN - 3), (0, 0))).reshape(Bp * S1, C0)

    # Re-layout PyTorch-shaped parameters as single-matmul bf16 weights.
    bf16 = jnp.bfloat16
    w1 = jnp.transpose(params["conv1_w"], (2, 1, 0)).reshape(K1 * C0, C1).astype(bf16)
    w2 = jnp.transpose(params["conv2_w"], (2, 1, 0)).reshape(K2 * C1, C2).astype(bf16)
    w3 = jnp.transpose(params["conv3_w"], (2, 1, 0)).reshape(K3 * C2, C3).astype(bf16)
    # PyTorch Flatten of (C=8, L=35) is channel-major (col = c*35 + l); the
    # kernel flattens l-major (col = l*8 + c) -> regroup fc1's weight.
    wf1 = jnp.transpose(params["fc1_w"].reshape(FC1_OUT, C3, L3P),
                        (2, 1, 0)).reshape(FC1_IN, FC1_OUT).astype(bf16)
    wf2 = params["fc2_w"].T.astype(bf16)
    b1 = params["conv1_b"].reshape(1, C1).astype(jnp.float32)
    b2 = params["conv2_b"].reshape(1, C2).astype(jnp.float32)
    b3 = params["conv3_b"].reshape(1, C3).astype(jnp.float32)
    bf1 = params["fc1_b"].reshape(1, FC1_OUT).astype(jnp.float32)
    bf2 = params["fc2_b"].reshape(1, OUT).astype(jnp.float32)

    flops = 2 * Bp * (300 * (K1 * C0) * C1 + 147 * (K2 * C1) * C2
                      + 71 * (K3 * C2) * C3 + FC1_IN * FC1_OUT + FC1_OUT * OUT)
    bytes_accessed = (xpad.size * 4 + Bp * OUT * 4
                      + 2 * (w1.size + w2.size + w3.size + wf1.size + wf2.size)
                      + 4 * (b1.size + b2.size + b3.size + bf1.size + bf2.size))

    out = pl.pallas_call(
        functools.partial(edeepvpp_kernel, T=tb),
        out_shape=jax.ShapeDtypeStruct((Bp, OUT), jnp.float32),
        grid=(nblk,),
        in_specs=[
            pl.BlockSpec((tb * S1, C0), lambda b: (b, 0)),      # raw padded input
            pl.BlockSpec((K1 * C0, C1), lambda b: (0, 0)),      # conv1 w (bf16)
            pl.BlockSpec((1, C1), lambda b: (0, 0)),            # conv1 b
            pl.BlockSpec((K2 * C1, C2), lambda b: (0, 0)),      # conv2 w
            pl.BlockSpec((1, C2), lambda b: (0, 0)),            # conv2 b
            pl.BlockSpec((K3 * C2, C3), lambda b: (0, 0)),      # conv3 w
            pl.BlockSpec((1, C3), lambda b: (0, 0)),            # conv3 b
            pl.BlockSpec((FC1_IN, FC1_OUT), lambda b: (0, 0)),  # fc1 w (regrouped)
            pl.BlockSpec((1, FC1_OUT), lambda b: (0, 0)),       # fc1 b
            pl.BlockSpec((FC1_OUT, OUT), lambda b: (0, 0)),     # fc2 w^T
            pl.BlockSpec((1, OUT), lambda b: (0, 0)),           # fc2 b
        ],
        out_specs=pl.BlockSpec((tb, OUT), lambda b: (b, 0)),
        scratch_shapes=[
            pltpu.VMEM((tb * S1, C1), jnp.float32),    # conv1+relu (pool1 source)
            pltpu.VMEM((tb * S1P, C2), jnp.float32),   # conv2+relu (pool2 source)
            pltpu.VMEM((tb * S2P, C3), jnp.float32),   # conv3+relu (pool3 source)
            pltpu.VMEM((tb * S3P, C3), jnp.float32),   # pooled3 (flatten source)
        ],
        compiler_params=pltpu.CompilerParams(
            dimension_semantics=("parallel",),
            vmem_limit_bytes=48 * 1024 * 1024),
        cost_estimate=pl.CostEstimate(flops=flops, transcendentals=0,
                                      bytes_accessed=bytes_accessed),
    )(xpad, w1, b1, w2, b2, w3, b3, wf1, bf1, wf2, bf2)
    return out[:B]                                               # (B, 2)


def init_params(key):
    """Deterministic synthetic parameters in PyTorch shapes."""
    ks = jax.random.split(key, 10)

    def u(k, shape, scale):
        return jax.random.uniform(k, shape, jnp.float32, -1.0, 1.0) * scale

    return {
        "conv1_w": u(ks[0], (32, 5, 7), 0.15),
        "conv1_b": u(ks[1], (32,), 0.10),
        "conv2_w": u(ks[2], (8, 32, 4), 0.08),
        "conv2_b": u(ks[3], (8,), 0.10),
        "conv3_w": u(ks[4], (8, 8, 3), 0.20),
        "conv3_b": u(ks[5], (8,), 0.10),
        "fc1_w":   u(ks[6], (32, 280), 0.05),
        "fc1_b":   u(ks[7], (32,), 0.10),
        "fc2_w":   u(ks[8], (2, 32), 0.15),
        "fc2_b":   u(ks[9], (2,), 0.10),
    }


def ref_forward(x, params):
    """Pure-JAX f32 reference mirroring the PyTorch module (eval mode)."""
    def conv_relu_pool(inp, w_pt, b, l_out):
        w = jnp.transpose(w_pt, (2, 1, 0))                    # (K, Cin, Cout)
        out = sum(jnp.einsum('blc,co->blo', inp[:, k:k + l_out, :], w[k])
                  for k in range(w.shape[0])) + b[None, None, :]
        h = jax.nn.relu(out)
        lp = h.shape[1] // 2
        return jnp.maximum(h[:, 0:2 * lp:2, :], h[:, 1:2 * lp:2, :])

    xp = jnp.pad(x, ((0, 0), (3, 3), (0, 0)))
    p1 = conv_relu_pool(xp, params["conv1_w"], params["conv1_b"], 300)
    p2 = conv_relu_pool(p1, params["conv2_w"], params["conv2_b"], 147)
    p3 = conv_relu_pool(p2, params["conv3_w"], params["conv3_b"], 71)
    # PyTorch Flatten of (B, C=8, L=35) is channel-major.
    flat = jnp.transpose(p3, (0, 2, 1)).reshape(x.shape[0], FC1_IN)
    h = jax.nn.relu(flat @ params["fc1_w"].T + params["fc1_b"])
    return h @ params["fc2_w"].T + params["fc2_b"]


if __name__ == "__main__":
    key = jax.random.PRNGKey(0)
    kx, kp = jax.random.split(key)
    x = jax.random.normal(kx, (2, L_IN, C0), jnp.float32)     # (B=2, L=300, C=5)
    params = init_params(kp)

    y = my_edeepvpp_forward(x, params)
    y = jax.block_until_ready(y)
    assert y.shape == (2, OUT), y.shape

    y_ref = ref_forward(x, params)
    # bf16 matmul operands with f32 accumulation -> small, bounded error.
    if not bool(jnp.allclose(y, y_ref, atol=2e-2, rtol=2e-2)):
        raise AssertionError(f"kernel/ref mismatch: {y} vs {y_ref}")

    print("KERNEL_OK")
</pallas_src>

<mosaic_0001>
module attributes {stable_mosaic.version = 11 : i64} {
  func.func @edeepvpp_kernel(%arg0: i32, %arg1: memref<640x5xf32, #tpu.memory_space<vmem>>, %arg2: memref<35x32xbf16, #tpu.memory_space<vmem>>, %arg3: memref<1x32xf32, #tpu.memory_space<vmem>>, %arg4: memref<128x8xbf16, #tpu.memory_space<vmem>>, %arg5: memref<1x8xf32, #tpu.memory_space<vmem>>, %arg6: memref<24x8xbf16, #tpu.memory_space<vmem>>, %arg7: memref<1x8xf32, #tpu.memory_space<vmem>>, %arg8: memref<280x32xbf16, #tpu.memory_space<vmem>>, %arg9: memref<1x32xf32, #tpu.memory_space<vmem>>, %arg10: memref<32x2xbf16, #tpu.memory_space<vmem>>, %arg11: memref<1x2xf32, #tpu.memory_space<vmem>>, %arg12: memref<2x2xf32, #tpu.memory_space<vmem>>, %arg13: memref<640x32xf32, #tpu.memory_space<vmem>>, %arg14: memref<320x8xf32, #tpu.memory_space<vmem>>, %arg15: memref<160x8xf32, #tpu.memory_space<vmem>>, %arg16: memref<80x8xf32, #tpu.memory_space<vmem>>) attributes {dimension_semantics = [#tpu.dimension_semantics<parallel>], iteration_bounds = array<i64: 1>, scalar_prefetch = 0 : i64, scratch_operands = 4 : i64, tpu.core_type = #tpu.core_type<tc>, window_params = [{transform_indices = @transform_0, window_bounds = array<i64: 640, 5>}, {pipeline_mode = #tpu.pipeline_mode<synchronous>, transform_indices = @transform_1, window_bounds = array<i64: 35, 32>}, {pipeline_mode = #tpu.pipeline_mode<synchronous>, transform_indices = @transform_2, window_bounds = array<i64: 1, 32>}, {pipeline_mode = #tpu.pipeline_mode<synchronous>, transform_indices = @transform_3, window_bounds = array<i64: 128, 8>}, {pipeline_mode = #tpu.pipeline_mode<synchronous>, transform_indices = @transform_4, window_bounds = array<i64: 1, 8>}, {pipeline_mode = #tpu.pipeline_mode<synchronous>, transform_indices = @transform_5, window_bounds = array<i64: 24, 8>}, {pipeline_mode = #tpu.pipeline_mode<synchronous>, transform_indices = @transform_6, window_bounds = array<i64: 1, 8>}, {pipeline_mode = #tpu.pipeline_mode<synchronous>, transform_indices = @transform_7, window_bounds = array<i64: 280, 32>}, {pipeline_mode = #tpu.pipeline_mode<synchronous>, transform_indices = @transform_8, window_bounds = array<i64: 1, 32>}, {pipeline_mode = #tpu.pipeline_mode<synchronous>, transform_indices = @transform_9, window_bounds = array<i64: 32, 2>}, {pipeline_mode = #tpu.pipeline_mode<synchronous>, transform_indices = @transform_10, window_bounds = array<i64: 1, 2>}, {transform_indices = @transform_11, window_bounds = array<i64: 2, 2>}]} {
    %c0 = arith.constant 0 : index
    %c0_0 = arith.constant 0 : index
    %0 = vector.load %arg1[%c0, %c0_0] : memref<640x5xf32, #tpu.memory_space<vmem>>, vector<632x5xf32>
    %c1 = arith.constant 1 : index
    %c0_1 = arith.constant 0 : index
    %1 = vector.load %arg1[%c1, %c0_1] : memref<640x5xf32, #tpu.memory_space<vmem>>, vector<632x5xf32>
    %c2 = arith.constant 2 : index
    %c0_2 = arith.constant 0 : index
    %2 = vector.load %arg1[%c2, %c0_2] : memref<640x5xf32, #tpu.memory_space<vmem>>, vector<632x5xf32>
    %c3 = arith.constant 3 : index
    %c0_3 = arith.constant 0 : index
    %3 = vector.load %arg1[%c3, %c0_3] : memref<640x5xf32, #tpu.memory_space<vmem>>, vector<632x5xf32>
    %c4 = arith.constant 4 : index
    %c0_4 = arith.constant 0 : index
    %4 = vector.load %arg1[%c4, %c0_4] : memref<640x5xf32, #tpu.memory_space<vmem>>, vector<632x5xf32>
    %c5 = arith.constant 5 : index
    %c0_5 = arith.constant 0 : index
    %5 = vector.load %arg1[%c5, %c0_5] : memref<640x5xf32, #tpu.memory_space<vmem>>, vector<632x5xf32>
    %c6 = arith.constant 6 : index
    %c0_6 = arith.constant 0 : index
    %6 = vector.load %arg1[%c6, %c0_6] : memref<640x5xf32, #tpu.memory_space<vmem>>, vector<632x5xf32>
    %7 = tpu.concatenate %0, %1, %2, %3, %4, %5, %6 in 1 : vector<632x5xf32>, vector<632x5xf32>, vector<632x5xf32>, vector<632x5xf32>, vector<632x5xf32>, vector<632x5xf32>, vector<632x5xf32> -> vector<632x35xf32>
    %8 = arith.truncf %7 : vector<632x35xf32> to vector<632x35xbf16>
    %c0_7 = arith.constant 0 : index
    %c0_8 = arith.constant 0 : index
    %9 = vector.load %arg2[%c0_7, %c0_8] : memref<35x32xbf16, #tpu.memory_space<vmem>>, vector<35x32xbf16>
    %cst = arith.constant dense<0.000000e+00> : vector<632x32xf32>
    %10 = tpu.matmul %8, %9, %cst {dimension_numbers = #tpu.dot_dimension_numbers<[1], [0], [0], [1], [0, 0, 1, 1], [], []>} : vector<632x35xbf16>, vector<35x32xbf16>, vector<632x32xf32> -> vector<632x32xf32>
    %c0_9 = arith.constant 0 : index
    %c0_10 = arith.constant 0 : index
    %11 = vector.load %arg3[%c0_9, %c0_10] : memref<1x32xf32, #tpu.memory_space<vmem>>, vector<1x32xf32>
    %12 = vector.broadcast %11 : vector<1x32xf32> to vector<632x32xf32>
    %13 = arith.addf %10, %12 : vector<632x32xf32>
    %cst_11 = arith.constant 0.000000e+00 : f32
    %14 = vector.broadcast %cst_11 : f32 to vector<632x32xf32>
    %15 = arith.maximumf %13, %14 : vector<632x32xf32>
    %c0_12 = arith.constant 0 : index
    %c0_13 = arith.constant 0 : index
    %16 = vector.load %arg13[%c0_12, %c0_13] : memref<640x32xf32, #tpu.memory_space<vmem>>, vector<632x32xf32>
    tpu.vector_store %arg13[%c0_12, %c0_13], %15 {strides = array<i32>} : memref<640x32xf32, #tpu.memory_space<vmem>>, vector<632x32xf32>,
    %c0_14 = arith.constant 0 : index
    %c0_15 = arith.constant 0 : index
    %17 = tpu.strided_load %arg13[%c0_14, %c0_15] {strides = array<i32: 2, 1>} : memref<640x32xf32, #tpu.memory_space<vmem>>, vector<312x32xf32>
    %c1_16 = arith.constant 1 : index
    %c0_17 = arith.constant 0 : index
    %18 = tpu.strided_load %arg13[%c1_16, %c0_17] {strides = array<i32: 2, 1>} : memref<640x32xf32, #tpu.memory_space<vmem>>, vector<312x32xf32>
    %19 = arith.maximumf %17, %18 : vector<312x32xf32>
    %20 = arith.truncf %19 : vector<312x32xf32> to vector<312x32xbf16>
    %c2_18 = arith.constant 2 : index
    %c0_19 = arith.constant 0 : index
    %21 = tpu.strided_load %arg13[%c2_18, %c0_19] {strides = array<i32: 2, 1>} : memref<640x32xf32, #tpu.memory_space<vmem>>, vector<312x32xf32>
    %c3_20 = arith.constant 3 : index
    %c0_21 = arith.constant 0 : index
    %22 = tpu.strided_load %arg13[%c3_20, %c0_21] {strides = array<i32: 2, 1>} : memref<640x32xf32, #tpu.memory_space<vmem>>, vector<312x32xf32>
    %23 = arith.maximumf %21, %22 : vector<312x32xf32>
    %24 = arith.truncf %23 : vector<312x32xf32> to vector<312x32xbf16>
    %c4_22 = arith.constant 4 : index
    %c0_23 = arith.constant 0 : index
    %25 = tpu.strided_load %arg13[%c4_22, %c0_23] {strides = array<i32: 2, 1>} : memref<640x32xf32, #tpu.memory_space<vmem>>, vector<312x32xf32>
    %c5_24 = arith.constant 5 : index
    %c0_25 = arith.constant 0 : index
    %26 = tpu.strided_load %arg13[%c5_24, %c0_25] {strides = array<i32: 2, 1>} : memref<640x32xf32, #tpu.memory_space<vmem>>, vector<312x32xf32>
    %27 = arith.maximumf %25, %26 : vector<312x32xf32>
    %28 = arith.truncf %27 : vector<312x32xf32> to vector<312x32xbf16>
    %c6_26 = arith.constant 6 : index
    %c0_27 = arith.constant 0 : index
    %29 = tpu.strided_load %arg13[%c6_26, %c0_27] {strides = array<i32: 2, 1>} : memref<640x32xf32, #tpu.memory_space<vmem>>, vector<312x32xf32>
    %c7 = arith.constant 7 : index
    %c0_28 = arith.constant 0 : index
    %30 = tpu.strided_load %arg13[%c7, %c0_28] {strides = array<i32: 2, 1>} : memref<640x32xf32, #tpu.memory_space<vmem>>, vector<312x32xf32>
    %31 = arith.maximumf %29, %30 : vector<312x32xf32>
    %32 = arith.truncf %31 : vector<312x32xf32> to vector<312x32xbf16>
    %33 = tpu.concatenate %20, %24, %28, %32 in 1 : vector<312x32xbf16>, vector<312x32xbf16>, vector<312x32xbf16>, vector<312x32xbf16> -> vector<312x128xbf16>
    %c0_29 = arith.constant 0 : index
    %c0_30 = arith.constant 0 : index
    %34 = vector.load %arg4[%c0_29, %c0_30] : memref<128x8xbf16, #tpu.memory_space<vmem>>, vector<128x8xbf16>
    %cst_31 = arith.constant dense<0.000000e+00> : vector<312x8xf32>
    %35 = tpu.matmul %33, %34, %cst_31 {dimension_numbers = #tpu.dot_dimension_numbers<[1], [0], [0], [1], [0, 0, 1, 1], [], []>} : vector<312x128xbf16>, vector<128x8xbf16>, vector<312x8xf32> -> vector<312x8xf32>
    %c0_32 = arith.constant 0 : index
    %c0_33 = arith.constant 0 : index
    %36 = vector.load %arg5[%c0_32, %c0_33] : memref<1x8xf32, #tpu.memory_space<vmem>>, vector<1x8xf32>
    %37 = vector.broadcast %36 : vector<1x8xf32> to vector<312x8xf32>
    %38 = arith.addf %35, %37 : vector<312x8xf32>
    %cst_34 = arith.constant 0.000000e+00 : f32
    %39 = vector.broadcast %cst_34 : f32 to vector<312x8xf32>
    %40 = arith.maximumf %38, %39 : vector<312x8xf32>
    %c0_35 = arith.constant 0 : index
    %c0_36 = arith.constant 0 : index
    %41 = vector.load %arg14[%c0_35, %c0_36] : memref<320x8xf32, #tpu.memory_space<vmem>>, vector<312x8xf32>
    tpu.vector_store %arg14[%c0_35, %c0_36], %40 {strides = array<i32>} : memref<320x8xf32, #tpu.memory_space<vmem>>, vector<312x8xf32>,
    %c0_37 = arith.constant 0 : index
    %c0_38 = arith.constant 0 : index
    %42 = tpu.strided_load %arg14[%c0_37, %c0_38] {strides = array<i32: 2, 1>} : memref<320x8xf32, #tpu.memory_space<vmem>>, vector<152x8xf32>
    %c1_39 = arith.constant 1 : index
    %c0_40 = arith.constant 0 : index
    %43 = tpu.strided_load %arg14[%c1_39, %c0_40] {strides = array<i32: 2, 1>} : memref<320x8xf32, #tpu.memory_space<vmem>>, vector<152x8xf32>
    %44 = arith.maximumf %42, %43 : vector<152x8xf32>
    %45 = arith.truncf %44 : vector<152x8xf32> to vector<152x8xbf16>
    %c2_41 = arith.constant 2 : index
    %c0_42 = arith.constant 0 : index
    %46 = tpu.strided_load %arg14[%c2_41, %c0_42] {strides = array<i32: 2, 1>} : memref<320x8xf32, #tpu.memory_space<vmem>>, vector<152x8xf32>
    %c3_43 = arith.constant 3 : index
    %c0_44 = arith.constant 0 : index
    %47 = tpu.strided_load %arg14[%c3_43, %c0_44] {strides = array<i32: 2, 1>} : memref<320x8xf32, #tpu.memory_space<vmem>>, vector<152x8xf32>
    %48 = arith.maximumf %46, %47 : vector<152x8xf32>
    %49 = arith.truncf %48 : vector<152x8xf32> to vector<152x8xbf16>
    %c4_45 = arith.constant 4 : index
    %c0_46 = arith.constant 0 : index
    %50 = tpu.strided_load %arg14[%c4_45, %c0_46] {strides = array<i32: 2, 1>} : memref<320x8xf32, #tpu.memory_space<vmem>>, vector<152x8xf32>
    %c5_47 = arith.constant 5 : index
    %c0_48 = arith.constant 0 : index
    %51 = tpu.strided_load %arg14[%c5_47, %c0_48] {strides = array<i32: 2, 1>} : memref<320x8xf32, #tpu.memory_space<vmem>>, vector<152x8xf32>
    %52 = arith.maximumf %50, %51 : vector<152x8xf32>
    %53 = arith.truncf %52 : vector<152x8xf32> to vector<152x8xbf16>
    %54 = tpu.concatenate %45, %49, %53 in 1 : vector<152x8xbf16>, vector<152x8xbf16>, vector<152x8xbf16> -> vector<152x24xbf16>
    %c0_49 = arith.constant 0 : index
    %c0_50 = arith.constant 0 : index
    %55 = vector.load %arg6[%c0_49, %c0_50] : memref<24x8xbf16, #tpu.memory_space<vmem>>, vector<24x8xbf16>
    %cst_51 = arith.constant dense<0.000000e+00> : vector<152x8xf32>
    %56 = tpu.matmul %54, %55, %cst_51 {dimension_numbers = #tpu.dot_dimension_numbers<[1], [0], [0], [1], [0, 0, 1, 1], [], []>} : vector<152x24xbf16>, vector<24x8xbf16>, vector<152x8xf32> -> vector<152x8xf32>
    %c0_52 = arith.constant 0 : index
    %c0_53 = arith.constant 0 : index
    %57 = vector.load %arg7[%c0_52, %c0_53] : memref<1x8xf32, #tpu.memory_space<vmem>>, vector<1x8xf32>
    %58 = vector.broadcast %57 : vector<1x8xf32> to vector<152x8xf32>
    %59 = arith.addf %56, %58 : vector<152x8xf32>
    %cst_54 = arith.constant 0.000000e+00 : f32
    %60 = vector.broadcast %cst_54 : f32 to vector<152x8xf32>
    %61 = arith.maximumf %59, %60 : vector<152x8xf32>
    %c0_55 = arith.constant 0 : index
    %c0_56 = arith.constant 0 : index
    %62 = vector.load %arg15[%c0_55, %c0_56] : memref<160x8xf32, #tpu.memory_space<vmem>>, vector<152x8xf32>
    tpu.vector_store %arg15[%c0_55, %c0_56], %61 {strides = array<i32>} : memref<160x8xf32, #tpu.memory_space<vmem>>, vector<152x8xf32>,
    %cst_57 = arith.constant 0.000000e+00 : f32
    %63 = vector.broadcast %cst_57 : f32 to vector<8x8xf32>
    %c152 = arith.constant 152 : index
    %c0_58 = arith.constant 0 : index
    %64 = vector.load %arg15[%c152, %c0_58] : memref<160x8xf32, #tpu.memory_space<vmem>>, vector<8x8xf32>
    tpu.vector_store %arg15[%c152, %c0_58], %63 {strides = array<i32>} : memref<160x8xf32, #tpu.memory_space<vmem>>, vector<8x8xf32>,
    %c0_59 = arith.constant 0 : index
    %c0_60 = arith.constant 0 : index
    %65 = tpu.strided_load %arg15[%c0_59, %c0_60] {strides = array<i32: 2, 1>} : memref<160x8xf32, #tpu.memory_space<vmem>>, vector<80x8xf32>
    %c1_61 = arith.constant 1 : index
    %c0_62 = arith.constant 0 : index
    %66 = tpu.strided_load %arg15[%c1_61, %c0_62] {strides = array<i32: 2, 1>} : memref<160x8xf32, #tpu.memory_space<vmem>>, vector<80x8xf32>
    %67 = arith.maximumf %65, %66 : vector<80x8xf32>
    %c0_63 = arith.constant 0 : index
    %c0_64 = arith.constant 0 : index
    %68 = vector.load %arg16[%c0_63, %c0_64] : memref<80x8xf32, #tpu.memory_space<vmem>>, vector<80x8xf32>
    tpu.vector_store %arg16[%c0_63, %c0_64], %67 {strides = array<i32>} : memref<80x8xf32, #tpu.memory_space<vmem>>, vector<80x8xf32>,
    %c0_65 = arith.constant 0 : index
    %c0_66 = arith.constant 0 : index
    %69 = tpu.strided_load %arg16[%c0_65, %c0_66] {strides = array<i32: 40, 1>} : memref<80x8xf32, #tpu.memory_space<vmem>>, vector<2x8xf32>
    %c1_67 = arith.constant 1 : index
    %c0_68 = arith.constant 0 : index
    %70 = tpu.strided_load %arg16[%c1_67, %c0_68] {strides = array<i32: 40, 1>} : memref<80x8xf32, #tpu.memory_space<vmem>>, vector<2x8xf32>
    %c2_69 = arith.constant 2 : index
    %c0_70 = arith.constant 0 : index
    %71 = tpu.strided_load %arg16[%c2_69, %c0_70] {strides = array<i32: 40, 1>} : memref<80x8xf32, #tpu.memory_space<vmem>>, vector<2x8xf32>
    %c3_71 = arith.constant 3 : index
    %c0_72 = arith.constant 0 : index
    %72 = tpu.strided_load %arg16[%c3_71, %c0_72] {strides = array<i32: 40, 1>} : memref<80x8xf32, #tpu.memory_space<vmem>>, vector<2x8xf32>
    %c4_73 = arith.constant 4 : index
    %c0_74 = arith.constant 0 : index
    %73 = tpu.strided_load %arg16[%c4_73, %c0_74] {strides = array<i32: 40, 1>} : memref<80x8xf32, #tpu.memory_space<vmem>>, vector<2x8xf32>
    %c5_75 = arith.constant 5 : index
    %c0_76 = arith.constant 0 : index
    %74 = tpu.strided_load %arg16[%c5_75, %c0_76] {strides = array<i32: 40, 1>} : memref<80x8xf32, #tpu.memory_space<vmem>>, vector<2x8xf32>
    %c6_77 = arith.constant 6 : index
    %c0_78 = arith.constant 0 : index
    %75 = tpu.strided_load %arg16[%c6_77, %c0_78] {strides = array<i32: 40, 1>} : memref<80x8xf32, #tpu.memory_space<vmem>>, vector<2x8xf32>
    %c7_79 = arith.constant 7 : index
    %c0_80 = arith.constant 0 : index
    %76 = tpu.strided_load %arg16[%c7_79, %c0_80] {strides = array<i32: 40, 1>} : memref<80x8xf32, #tpu.memory_space<vmem>>, vector<2x8xf32>
    %c8 = arith.constant 8 : index
    %c0_81 = arith.constant 0 : index
    %77 = tpu.strided_load %arg16[%c8, %c0_81] {strides = array<i32: 40, 1>} : memref<80x8xf32, #tpu.memory_space<vmem>>, vector<2x8xf32>
    %c9 = arith.constant 9 : index
    %c0_82 = arith.constant 0 : index
    %78 = tpu.strided_load %arg16[%c9, %c0_82] {strides = array<i32: 40, 1>} : memref<80x8xf32, #tpu.memory_space<vmem>>, vector<2x8xf32>
    %c10 = arith.constant 10 : index
    %c0_83 = arith.constant 0 : index
    %79 = tpu.strided_load %arg16[%c10, %c0_83] {strides = array<i32: 40, 1>} : memref<80x8xf32, #tpu.memory_space<vmem>>, vector<2x8xf32>
    %c11 = arith.constant 11 : index
    %c0_84 = arith.constant 0 : index
    %80 = tpu.strided_load %arg16[%c11, %c0_84] {strides = array<i32: 40, 1>} : memref<80x8xf32, #tpu.memory_space<vmem>>, vector<2x8xf32>
    %c12 = arith.constant 12 : index
    %c0_85 = arith.constant 0 : index
    %81 = tpu.strided_load %arg16[%c12, %c0_85] {strides = array<i32: 40, 1>} : memref<80x8xf32, #tpu.memory_space<vmem>>, vector<2x8xf32>
    %c13 = arith.constant 13 : index
    %c0_86 = arith.constant 0 : index
    %82 = tpu.strided_load %arg16[%c13, %c0_86] {strides = array<i32: 40, 1>} : memref<80x8xf32, #tpu.memory_space<vmem>>, vector<2x8xf32>
    %c14 = arith.constant 14 : index
    %c0_87 = arith.constant 0 : index
    %83 = tpu.strided_load %arg16[%c14, %c0_87] {strides = array<i32: 40, 1>} : memref<80x8xf32, #tpu.memory_space<vmem>>, vector<2x8xf32>
    %c15 = arith.constant 15 : index
    %c0_88 = arith.constant 0 : index
    %84 = tpu.strided_load %arg16[%c15, %c0_88] {strides = array<i32: 40, 1>} : memref<80x8xf32, #tpu.memory_space<vmem>>, vector<2x8xf32>
    %c16 = arith.constant 16 : index
    %c0_89 = arith.constant 0 : index
    %85 = tpu.strided_load %arg16[%c16, %c0_89] {strides = array<i32: 40, 1>} : memref<80x8xf32, #tpu.memory_space<vmem>>, vector<2x8xf32>
    %c17 = arith.constant 17 : index
    %c0_90 = arith.constant 0 : index
    %86 = tpu.strided_load %arg16[%c17, %c0_90] {strides = array<i32: 40, 1>} : memref<80x8xf32, #tpu.memory_space<vmem>>, vector<2x8xf32>
    %c18 = arith.constant 18 : index
    %c0_91 = arith.constant 0 : index
    %87 = tpu.strided_load %arg16[%c18, %c0_91] {strides = array<i32: 40, 1>} : memref<80x8xf32, #tpu.memory_space<vmem>>, vector<2x8xf32>
    %c19 = arith.constant 19 : index
    %c0_92 = arith.constant 0 : index
    %88 = tpu.strided_load %arg16[%c19, %c0_92] {strides = array<i32: 40, 1>} : memref<80x8xf32, #tpu.memory_space<vmem>>, vector<2x8xf32>
    %c20 = arith.constant 20 : index
    %c0_93 = arith.constant 0 : index
    %89 = tpu.strided_load %arg16[%c20, %c0_93] {strides = array<i32: 40, 1>} : memref<80x8xf32, #tpu.memory_space<vmem>>, vector<2x8xf32>
    %c21 = arith.constant 21 : index
    %c0_94 = arith.constant 0 : index
    %90 = tpu.strided_load %arg16[%c21, %c0_94] {strides = array<i32: 40, 1>} : memref<80x8xf32, #tpu.memory_space<vmem>>, vector<2x8xf32>
    %c22 = arith.constant 22 : index
    %c0_95 = arith.constant 0 : index
    %91 = tpu.strided_load %arg16[%c22, %c0_95] {strides = array<i32: 40, 1>} : memref<80x8xf32, #tpu.memory_space<vmem>>, vector<2x8xf32>
    %c23 = arith.constant 23 : index
    %c0_96 = arith.constant 0 : index
    %92 = tpu.strided_load %arg16[%c23, %c0_96] {strides = array<i32: 40, 1>} : memref<80x8xf32, #tpu.memory_space<vmem>>, vector<2x8xf32>
    %c24 = arith.constant 24 : index
    %c0_97 = arith.constant 0 : index
    %93 = tpu.strided_load %arg16[%c24, %c0_97] {strides = array<i32: 40, 1>} : memref<80x8xf32, #tpu.memory_space<vmem>>, vector<2x8xf32>
    %c25 = arith.constant 25 : index
    %c0_98 = arith.constant 0 : index
    %94 = tpu.strided_load %arg16[%c25, %c0_98] {strides = array<i32: 40, 1>} : memref<80x8xf32, #tpu.memory_space<vmem>>, vector<2x8xf32>
    %c26 = arith.constant 26 : index
    %c0_99 = arith.constant 0 : index
    %95 = tpu.strided_load %arg16[%c26, %c0_99] {strides = array<i32: 40, 1>} : memref<80x8xf32, #tpu.memory_space<vmem>>, vector<2x8xf32>
    %c27 = arith.constant 27 : index
    %c0_100 = arith.constant 0 : index
    %96 = tpu.strided_load %arg16[%c27, %c0_100] {strides = array<i32: 40, 1>} : memref<80x8xf32, #tpu.memory_space<vmem>>, vector<2x8xf32>
    %c28 = arith.constant 28 : index
    %c0_101 = arith.constant 0 : index
    %97 = tpu.strided_load %arg16[%c28, %c0_101] {strides = array<i32: 40, 1>} : memref<80x8xf32, #tpu.memory_space<vmem>>, vector<2x8xf32>
    %c29 = arith.constant 29 : index
    %c0_102 = arith.constant 0 : index
    %98 = tpu.strided_load %arg16[%c29, %c0_102] {strides = array<i32: 40, 1>} : memref<80x8xf32, #tpu.memory_space<vmem>>, vector<2x8xf32>
    %c30 = arith.constant 30 : index
    %c0_103 = arith.constant 0 : index
    %99 = tpu.strided_load %arg16[%c30, %c0_103] {strides = array<i32: 40, 1>} : memref<80x8xf32, #tpu.memory_space<vmem>>, vector<2x8xf32>
    %c31 = arith.constant 31 : index
    %c0_104 = arith.constant 0 : index
    %100 = tpu.strided_load %arg16[%c31, %c0_104] {strides = array<i32: 40, 1>} : memref<80x8xf32, #tpu.memory_space<vmem>>, vector<2x8xf32>
    %c32 = arith.constant 32 : index
    %c0_105 = arith.constant 0 : index
    %101 = tpu.strided_load %arg16[%c32, %c0_105] {strides = array<i32: 40, 1>} : memref<80x8xf32, #tpu.memory_space<vmem>>, vector<2x8xf32>
    %c33 = arith.constant 33 : index
    %c0_106 = arith.constant 0 : index
    %102 = tpu.strided_load %arg16[%c33, %c0_106] {strides = array<i32: 40, 1>} : memref<80x8xf32, #tpu.memory_space<vmem>>, vector<2x8xf32>
    %c34 = arith.constant 34 : index
    %c0_107 = arith.constant 0 : index
    %103 = tpu.strided_load %arg16[%c34, %c0_107] {strides = array<i32: 40, 1>} : memref<80x8xf32, #tpu.memory_space<vmem>>, vector<2x8xf32>
    %104 = tpu.concatenate %69, %70, %71, %72, %73, %74, %75, %76, %77, %78, %79, %80, %81, %82, %83, %84 in 1 : vector<2x8xf32>, vector<2x8xf32>, vector<2x8xf32>, vector<2x8xf32>, vector<2x8xf32>, vector<2x8xf32>, vector<2x8xf32>, vector<2x8xf32>, vector<2x8xf32>, vector<2x8xf32>, vector<2x8xf32>, vector<2x8xf32>, vector<2x8xf32>, vector<2x8xf32>, vector<2x8xf32>, vector<2x8xf32> -> vector<2x128xf32>
    %105 = tpu.concatenate %85, %86, %87, %88, %89, %90, %91, %92, %93, %94, %95, %96, %97, %98, %99, %100 in 1 : vector<2x8xf32>, vector<2x8xf32>, vector<2x8xf32>, vector<2x8xf32>, vector<2x8xf32>, vector<2x8xf32>, vector<2x8xf32>, vector<2x8xf32>, vector<2x8xf32>, vector<2x8xf32>, vector<2x8xf32>, vector<2x8xf32>, vector<2x8xf32>, vector<2x8xf32>, vector<2x8xf32>, vector<2x8xf32> -> vector<2x128xf32>
    %106 = tpu.concatenate %101, %102, %103 in 1 : vector<2x8xf32>, vector<2x8xf32>, vector<2x8xf32> -> vector<2x24xf32>
    %107 = tpu.concatenate %104, %105, %106 in 1 : vector<2x128xf32>, vector<2x128xf32>, vector<2x24xf32> -> vector<2x280xf32>
    %108 = arith.truncf %107 : vector<2x280xf32> to vector<2x280xbf16>
    %c0_108 = arith.constant 0 : index
    %c0_109 = arith.constant 0 : index
    %109 = vector.load %arg8[%c0_108, %c0_109] : memref<280x32xbf16, #tpu.memory_space<vmem>>, vector<280x32xbf16>
    %cst_110 = arith.constant dense<0.000000e+00> : vector<2x32xf32>
    %110 = tpu.matmul %108, %109, %cst_110 {dimension_numbers = #tpu.dot_dimension_numbers<[1], [0], [0], [1], [0, 0, 1, 1], [], []>} : vector<2x280xbf16>, vector<280x32xbf16>, vector<2x32xf32> -> vector<2x32xf32>
    %c0_111 = arith.constant 0 : index
    %c0_112 = arith.constant 0 : index
    %111 = vector.load %arg9[%c0_111, %c0_112] : memref<1x32xf32, #tpu.memory_space<vmem>>, vector<1x32xf32>
    %112 = vector.broadcast %111 : vector<1x32xf32> to vector<2x32xf32>
    %113 = arith.addf %110, %112 : vector<2x32xf32>
    %cst_113 = arith.constant 0.000000e+00 : f32
    %114 = vector.broadcast %cst_113 : f32 to vector<2x32xf32>
    %115 = arith.maximumf %113, %114 : vector<2x32xf32>
    %116 = arith.truncf %115 : vector<2x32xf32> to vector<2x32xbf16>
    %c0_114 = arith.constant 0 : index
    %c0_115 = arith.constant 0 : index
    %117 = vector.load %arg10[%c0_114, %c0_115] : memref<32x2xbf16, #tpu.memory_space<vmem>>, vector<32x2xbf16>
    %cst_116 = arith.constant dense<0.000000e+00> : vector<2x2xf32>
    %118 = tpu.matmul %116, %117, %cst_116 {dimension_numbers = #tpu.dot_dimension_numbers<[1], [0], [0], [1], [0, 0, 1, 1], [], []>} : vector<2x32xbf16>, vector<32x2xbf16>, vector<2x2xf32> -> vector<2x2xf32>
    %c0_117 = arith.constant 0 : index
    %c0_118 = arith.constant 0 : index
    %119 = vector.load %arg11[%c0_117, %c0_118] : memref<1x2xf32, #tpu.memory_space<vmem>>, vector<1x2xf32>
    %120 = vector.broadcast %119 : vector<1x2xf32> to vector<2x2xf32>
    %121 = arith.addf %118, %120 : vector<2x2xf32>
    %c0_119 = arith.constant 0 : index
    %c0_120 = arith.constant 0 : index
    %122 = vector.load %arg12[%c0_119, %c0_120] : memref<2x2xf32, #tpu.memory_space<vmem>>, vector<2x2xf32>
    tpu.vector_store %arg12[%c0_119, %c0_120], %121 {strides = array<i32>} : memref<2x2xf32, #tpu.memory_space<vmem>>, vector<2x2xf32>,
    return
  }
  func.func @transform_0(%arg0: i32) -> (i32, i32) {
    %c0_i32 = arith.constant 0 : i32
    %c0_i32_0 = arith.constant 0 : i32
    return %arg0, %c0_i32 : i32, i32
  }
  func.func @transform_1(%arg0: i32) -> (i32, i32) {
    %c0_i32 = arith.constant 0 : i32
    %c0_i32_0 = arith.constant 0 : i32
    %c0_i32_1 = arith.constant 0 : i32
    return %c0_i32, %c0_i32_0 : i32, i32
  }
  func.func @transform_2(%arg0: i32) -> (i32, i32) {
    %c0_i32 = arith.constant 0 : i32
    %c0_i32_0 = arith.constant 0 : i32
    %c0_i32_1 = arith.constant 0 : i32
    return %c0_i32, %c0_i32_0 : i32, i32
  }
  func.func @transform_3(%arg0: i32) -> (i32, i32) {
    %c0_i32 = arith.constant 0 : i32
    %c0_i32_0 = arith.constant 0 : i32
    %c0_i32_1 = arith.constant 0 : i32
    return %c0_i32, %c0_i32_0 : i32, i32
  }
  func.func @transform_4(%arg0: i32) -> (i32, i32) {
    %c0_i32 = arith.constant 0 : i32
    %c0_i32_0 = arith.constant 0 : i32
    %c0_i32_1 = arith.constant 0 : i32
    return %c0_i32, %c0_i32_0 : i32, i32
  }
  func.func @transform_5(%arg0: i32) -> (i32, i32) {
    %c0_i32 = arith.constant 0 : i32
    %c0_i32_0 = arith.constant 0 : i32
    %c0_i32_1 = arith.constant 0 : i32
    return %c0_i32, %c0_i32_0 : i32, i32
  }
  func.func @transform_6(%arg0: i32) -> (i32, i32) {
    %c0_i32 = arith.constant 0 : i32
    %c0_i32_0 = arith.constant 0 : i32
    %c0_i32_1 = arith.constant 0 : i32
    return %c0_i32, %c0_i32_0 : i32, i32
  }
  func.func @transform_7(%arg0: i32) -> (i32, i32) {
    %c0_i32 = arith.constant 0 : i32
    %c0_i32_0 = arith.constant 0 : i32
    %c0_i32_1 = arith.constant 0 : i32
    return %c0_i32, %c0_i32_0 : i32, i32
  }
  func.func @transform_8(%arg0: i32) -> (i32, i32) {
    %c0_i32 = arith.constant 0 : i32
    %c0_i32_0 = arith.constant 0 : i32
    %c0_i32_1 = arith.constant 0 : i32
    return %c0_i32, %c0_i32_0 : i32, i32
  }
  func.func @transform_9(%arg0: i32) -> (i32, i32) {
    %c0_i32 = arith.constant 0 : i32
    %c0_i32_0 = arith.constant 0 : i32
    %c0_i32_1 = arith.constant 0 : i32
    return %c0_i32, %c0_i32_0 : i32, i32
  }
  func.func @transform_10(%arg0: i32) -> (i32, i32) {
    %c0_i32 = arith.constant 0 : i32
    %c0_i32_0 = arith.constant 0 : i32
    %c0_i32_1 = arith.constant 0 : i32
    return %c0_i32, %c0_i32_0 : i32, i32
  }
  func.func @transform_11(%arg0: i32) -> (i32, i32) {
    %c0_i32 = arith.constant 0 : i32
    %c0_i32_0 = arith.constant 0 : i32
    return %arg0, %c0_i32 : i32, i32
  }
}

</mosaic_0001>

<bundles_post_ra>
// kernel: tpu_custom_call.1
= control target key start
LH: loop header
LB: loop body
LE: loop exit
PB: predicated region body
PF: predicated region fallthrough
CT: control target
= control target key end

     0   :  { %s8167_s14 = smov 10   ;;  %s8168_s15 = smov 5   ;;  %vm3157_vm0 = vcmask 1040384   ;;  %vm3158_vm1 = vcmask 1041408   ;;  %s12291_s0 = inlined_call_operand.vmem [shape: f32[640,5], index: 0, kind: input, shape index: {}]   ;;  %s12292_s1 = inlined_call_operand.vmem [shape: bf16[35,32], index: 1, kind: input, shape index: {}]   ;;  %s12293_s2 = inlined_call_operand.vmem [shape: f32[1,32], index: 2, kind: input, shape index: {}]   ;;  %s12294_s3 = inlined_call_operand.vmem [shape: bf16[128,8], index: 3, kind: input, shape index: {}]   ;;  %s12295_s4 = inlined_call_operand.vmem [shape: f32[1,8], index: 4, kind: input, shape index: {}]   ;;  %s12296_s5 = inlined_call_operand.vmem [shape: bf16[24,8], index: 5, kind: input, shape index: {}]   ;;  %s12297_s6 = inlined_call_operand.vmem [shape: f32[1,8], index: 6, kind: input, shape index: {}]   ;;  %s12298_s7 = inlined_call_operand.vmem [shape: bf16[280,32], index: 7, kind: input, shape index: {}]   ;;  %s12299_s8 = inlined_call_operand.vmem [shape: f32[1,32], index: 8, kind: input, shape index: {}]   ;;  %s12300_s9 = inlined_call_operand.vmem [shape: bf16[32,2], index: 9, kind: input, shape index: {}]   ;;  %s12301_s10 = inlined_call_operand.vmem [shape: f32[1,2], index: 10, kind: input, shape index: {}]   ;;  %s12302_s11 = inlined_call_operand.hbm [shape: f32[2,2], index: 11, kind: output, shape index: {}]  }
   0x1   :  { %v198_v0 = vld [vmem:[%s12291_s0 + $0x2] sm:$0xff]  ;;  %v199_v1 = vld [vmem:[%s12291_s0 + $0xa] sm:$0xff]  ;;  %v200_v5 = vld [vmem:[%s12291_s0 + $0x12] sm:$0xff]  ;;  %s8169_s13 = smov 15   ;;  %s8170_s24 = smov 20  }
   0x2   :  { %v119_v2 = vld [vmem:[%s12291_s0 + $0x1] sm:$0xff]  ;;  %v6874_v3 = vpack.i.bf16 %v199_v1, %v198_v0  ;;  %v120_v4 = vld [vmem:[%s12291_s0 + $0x9] sm:$0xff]  ;;  %v121_v8 = vld [vmem:[%s12291_s0 + $0x11] sm:$0xff]  ;;  %s8171_s17 = smov 25   ;;  %s8172_s27 = smov 30  }
   0x3   :  { %v201_v6 = vld [vmem:[%s12291_s0 + $0x1a] sm:$0xff]  ;;  %v6864_v7 = vpack.i.bf16 %v120_v4, %v119_v2  ;;  %v277_v14 = vld [vmem:[%s12291_s0 + $0x3] sm:$0xff]  ;;  %v278_v15 = vld [vmem:[%s12291_s0 + $0xb] sm:$0xff] }
   0x4   :  { %v122_v9 = vld [vmem:[%s12291_s0 + $0x19] sm:$0xff]  ;;  %6875 = vrot.lane.b32.xlu1 %v6874_v3, %s8167_s14  ;;  %v6879_v10 = vpack.i.bf16 %v201_v6, %v200_v5  ;;  %v6884_v17 = vpack.i.bf16 %v278_v15, %v277_v14  ;;  %v356_v20 = vld [vmem:[%s12291_s0 + $0x4] sm:$0xff]  ;;  %v357_v21 = vld [vmem:[%s12291_s0 + $0xc] sm:$0xff]  ;;  %v8173_v6 = vmov 65535  }
   0x5   :  { %6865 = vrot.lane.b32.xlu0 %v6864_v7, %s8168_s15  ;;  %v6869_v11 = vpack.i.bf16 %v122_v9, %v121_v8  ;;  %v279_v12 = vld [vmem:[%s12291_s0 + $0x13] sm:$0xff]  ;;  %v280_v13 = vld [vmem:[%s12291_s0 + $0x1b] sm:$0xff]  ;;  %v6894_v23 = vpack.i.bf16 %v357_v21, %v356_v20  ;;  %v435_v26 = vld [vmem:[%s12291_s0 + $0x5] sm:$0xff]  ;;  %v3159_v7 = vsel %vm3157_vm0, 4294967295, %v8173_v6 }
   0x6   :  { %v6889_v16 = vpack.i.bf16 %v280_v13, %v279_v12  ;;  %v358_v18 = vld [vmem:[%s12291_s0 + $0x14] sm:$0xff]  ;;  %v359_v19 = vld [vmem:[%s12291_s0 + $0x1c] sm:$0xff]  ;;  %v514_v32 = vld [vmem:[%s12291_s0 + $0x6] sm:$0xff]  ;;  %v3160_v13 = vsel %vm3158_vm1, %v3159_v7, 0 }
   0x7   :  { %v6899_v22 = vpack.i.bf16 %v359_v19, %v358_v18  ;;  %v437_v24 = vld [vmem:[%s12291_s0 + $0x15] sm:$0xff]  ;;  %v438_v25 = vld [vmem:[%s12291_s0 + $0x1d] sm:$0xff]  ;;  %v436_v27 = vld [vmem:[%s12291_s0 + $0xd] sm:$0xff] }
   0x8   :  { %6880 = vrot.lane.b32.xlu1 %v6879_v10, %s8167_s14  ;;  %v6909_v28 = vpack.i.bf16 %v438_v25, %v437_v24  ;;  %v6904_v29 = vpack.i.bf16 %v436_v27, %v435_v26  ;;  %v516_v30 = vld [vmem:[%s12291_s0 + $0x16] sm:$0xff]  ;;  %v517_v31 = vld [vmem:[%s12291_s0 + $0x1e] sm:$0xff]  ;;  %v515_v33 = vld [vmem:[%s12291_s0 + $0xe] sm:$0xff] }
   0x9   :  { %6870 = vrot.lane.b32.xlu0 %v6869_v11, %s8168_s15  ;;  %v6919_v34 = vpack.i.bf16 %v517_v31, %v516_v30  ;;  %v6914_v35 = vpack.i.bf16 %v515_v33, %v514_v32  ;;  %v125_v36 = vld [vmem:[%s12291_s0 + $0x31] sm:$0xff]  ;;  %v126_v37 = vld [vmem:[%s12291_s0 + $0x39] sm:$0xff]  ;;  %v123_v38 = vld [vmem:[%s12291_s0 + $0x21] sm:$0xff] }
   0xa   :  { %v124_v39 = vld [vmem:[%s12291_s0 + $0x29] sm:$0xff]  ;;  %v6929_v40 = vpack.i.bf16 %v126_v37, %v125_v36  ;;  %v204_v42 = vld [vmem:[%s12291_s0 + $0x32] sm:$0xff]  ;;  %v205_v43 = vld [vmem:[%s12291_s0 + $0x3a] sm:$0xff] }
   0xb   :  { %v6924_v41 = vpack.i.bf16 %v124_v39, %v123_v38  ;;  %v202_v44 = vld [vmem:[%s12291_s0 + $0x22] sm:$0xff]  ;;  %v203_v45 = vld [vmem:[%s12291_s0 + $0x2a] sm:$0xff]  ;;  %v6939_v46 = vpack.i.bf16 %v205_v43, %v204_v42  ;;  %v283_v48 = vld [vmem:[%s12291_s0 + $0x33] sm:$0xff] }
   0xc   :  { %6890 = vrot.lane.b32.xlu1 %v6889_v16, %s8169_s13  ;;  %v6934_v47 = vpack.i.bf16 %v203_v45, %v202_v44  ;;  %v284_v49 = vld [vmem:[%s12291_s0 + $0x3b] sm:$0xff]  ;;  %v281_v50 = vld [vmem:[%s12291_s0 + $0x23] sm:$0xff]  ;;  %v282_v51 = vld [vmem:[%s12291_s0 + $0x2b] sm:$0xff] }
   0xd   :  { %6885 = vrot.lane.b32.xlu0 %v6884_v17, %s8169_s13  ;;  %v6949_v52 = vpack.i.bf16 %v284_v49, %v283_v48  ;;  %v6944_v53 = vpack.i.bf16 %v282_v51, %v281_v50  ;;  %v362_v54 = vld [vmem:[%s12291_s0 + $0x34] sm:$0xff]  ;;  %v363_v55 = vld [vmem:[%s12291_s0 + $0x3c] sm:$0xff]  ;;  %v360_v56 = vld [vmem:[%s12291_s0 + $0x24] sm:$0xff] }
   0xe   :  { %v361_v57 = vld [vmem:[%s12291_s0 + $0x2c] sm:$0xff]  ;;  %v6959_v58 = vpack.i.bf16 %v363_v55, %v362_v54  ;;  %v441_v60 = vld [vmem:[%s12291_s0 + $0x35] sm:$0xff]  ;;  %v442_v61 = vld [vmem:[%s12291_s0 + $0x3d] sm:$0xff] }
   0xf   :  { %v6954_v59 = vpack.i.bf16 %v361_v57, %v360_v56  ;;  %v439_v62 = vld [vmem:[%s12291_s0 + $0x25] sm:$0xff]  ;;  %v440_v63 = vld [vmem:[%s12291_s0 + $0x2d] sm:$0xff]  ;;  %v6969_v0 = vpack.i.bf16 %v442_v61, %v441_v60  ;;  %v520_v2 = vld [vmem:[%s12291_s0 + $0x36] sm:$0xff] }
  0x10   :  { %6900 = vrot.lane.b32.xlu1 %v6899_v22, %s8170_s24  ;;  %v6964_v1 = vpack.i.bf16 %v440_v63, %v439_v62  ;;  %v521_v3 = vld [vmem:[%s12291_s0 + $0x3e] sm:$0xff]  ;;  %v518_v4 = vld [vmem:[%s12291_s0 + $0x26] sm:$0xff]  ;;  %v519_v5 = vld [vmem:[%s12291_s0 + $0x2e] sm:$0xff] }
  0x11   :  { %6895 = vrot.lane.b32.xlu0 %v6894_v23, %s8170_s24  ;;  %v6979_v8 = vpack.i.bf16 %v521_v3, %v520_v2  ;;  %v6974_v9 = vpack.i.bf16 %v519_v5, %v518_v4  ;;  %v129_v10 = vld [vmem:[%s12291_s0 + $0x51] sm:$0xff]  ;;  %v130_v11 = vld [vmem:[%s12291_s0 + $0x59] sm:$0xff]  ;;  %v127_v12 = vld [vmem:[%s12291_s0 + $0x41] sm:$0xff] }
  0x12   :  { %v128_v14 = vld [vmem:[%s12291_s0 + $0x49] sm:$0xff]  ;;  %v6989_v16 = vpack.i.bf16 %v130_v11, %v129_v10  ;;  %v208_v19 = vld [vmem:[%s12291_s0 + $0x52] sm:$0xff]  ;;  %v209_v20 = vld [vmem:[%s12291_s0 + $0x5a] sm:$0xff] }
  0x13   :  { %v8109_v15 = vld [vmem:[%s12292_s1 + $0x10] ss:$0 sps:$4 sm:$0x33]   ;;  %v6984_v18 = vpack.i.bf16 %v128_v14, %v127_v12  ;;  %v8110_v21 = vld [vmem:[%s12292_s1 + $0x8] sm:$0xff]   ;;  %v6999_v24 = vpack.i.bf16 %v209_v20, %v208_v19  ;;  %v8111_v25 = vld [vmem:[%s12292_s1] sm:$0xff]  }
  0x14   :  { %6910 = vrot.lane.b32.xlu1 %v6909_v28, %s8171_s17  ;;  %v3162_v17 = vand.u32 %v8109_v15, %v3160_v13  ;;  %v206_v22 = vld [vmem:[%s12291_s0 + $0x42] sm:$0xff]  ;;  %v207_v23 = vld [vmem:[%s12291_s0 + $0x4a] sm:$0xff]  ;;  %v287_v27 = vld [vmem:[%s12291_s0 + $0x53] sm:$0xff] }
  0x15   :  { %6905 = vrot.lane.b32.xlu0 %v6904_v29, %s8171_s17  ;;  %v6994_v26 = vpack.i.bf16 %v207_v23, %v206_v22  ;;  %v288_v28 = vld [vmem:[%s12291_s0 + $0x5b] sm:$0xff]  ;;  %v285_v29 = vld [vmem:[%s12291_s0 + $0x43] sm:$0xff]  ;;  %v286_v30 = vld [vmem:[%s12291_s0 + $0x4b] sm:$0xff] }
  0x16   :  { %6656 = vmatprep.subr.bf16.mxu0 %v3162_v17  ;;  %v7009_v31 = vpack.i.bf16 %v288_v28, %v287_v27  ;;  %v7004_v32 = vpack.i.bf16 %v286_v30, %v285_v29  ;;  %v366_v33 = vld [vmem:[%s12291_s0 + $0x54] sm:$0xff]  ;;  %v365_v36 = vld [vmem:[%s12291_s0 + $0x4c] sm:$0xff]  ;;  %v371_v4 = vld [vmem:[%s12291_s0 + $0x7c] sm:$0xff] }
  0x17   :  { %6657 = vmatpush3.bf16.msra.mxu0 %v3162_v17  ;;  %v445_v39 = vld [vmem:[%s12291_s0 + $0x55] sm:$0xff]  ;;  %v444_v42 = vld [vmem:[%s12291_s0 + $0x4d] sm:$0xff]  ;;  %v368_v7 = vld [vmem:[%s12291_s0 + $0x64] sm:$0xff] }
  0x18   :  { %6920 = vrot.lane.b32.xlu1 %v6919_v34, %s8172_s27  ;;  %6658 = vmatprep.subr.bf16.mxu0 %v8110_v21  ;;  %v367_v34 = vld [vmem:[%s12291_s0 + $0x5c] sm:$0xff]  ;;  %v523_v48 = vld [vmem:[%s12291_s0 + $0x4e] sm:$0xff]  ;;  %v447_v13 = vld [vmem:[%s12291_s0 + $0x65] sm:$0xff] }
  0x19   :  { %6915 = vrot.lane.b32.xlu0 %v6914_v35, %s8172_s27  ;;  %v364_v35 = vld [vmem:[%s12291_s0 + $0x44] sm:$0xff]  ;;  %v7019_v37 = vpack.i.bf16 %v367_v34, %v366_v33  ;;  %v524_v45 = vld [vmem:[%s12291_s0 + $0x56] sm:$0xff]  ;;  %v448_v14 = vld [vmem:[%s12291_s0 + $0x6d] sm:$0xff] }
  0x1a   :  { %v7014_v38 = vpack.i.bf16 %v365_v36, %v364_v35  ;;  %v133_v51 = vld [vmem:[%s12291_s0 + $0x71] sm:$0xff]  ;;  %v132_v54 = vld [vmem:[%s12291_s0 + $0x69] sm:$0xff]  ;;  %v292_v63 = vld [vmem:[%s12291_s0 + $0x7b] sm:$0xff] }
  0x1b   :  { %6659 = vmatpush3.bf16.msra.mxu0 %v8110_v21  ;;  %v212_v57 = vld [vmem:[%s12291_s0 + $0x72] sm:$0xff]  ;;  %v211_v60 = vld [vmem:[%s12291_s0 + $0x6a] sm:$0xff]  ;;  %v450_v10 = vld [vmem:[%s12291_s0 + $0x7d] sm:$0xff] }
  0x1c   :  { %6930 = vrot.lane.b32.xlu1 %v6929_v40, %s8168_s15  ;;  %6660 = vmatprep.subr.bf16.mxu0 %v8111_v25  ;;  %v446_v40 = vld [vmem:[%s12291_s0 + $0x5d] sm:$0xff]  ;;  %v291_v62 = vld [vmem:[%s12291_s0 + $0x73] sm:$0xff]  ;;  %v290_v2 = vld [vmem:[%s12291_s0 + $0x6b] sm:$0xff] }
  0x1d   :  { %6925 = vrot.lane.b32.xlu0 %v6924_v41, %s8168_s15  ;;  %v443_v41 = vld [vmem:[%s12291_s0 + $0x45] sm:$0xff]  ;;  %v7029_v43 = vpack.i.bf16 %v446_v40, %v445_v39  ;;  %v370_v3 = vld [vmem:[%s12291_s0 + $0x74] sm:$0xff]  ;;  %v7069_v5 = vpack.i.bf16 %v292_v63, %v291_v62  ;;  %v375_v40 = vld [vmem:[%s12291_s0 + $0x9c] sm:$0xff] }
  0x1e   :  { %v7024_v44 = vpack.i.bf16 %v444_v42, %v443_v41  ;;  %v7079_v11 = vpack.i.bf16 %v371_v4, %v370_v3  ;;  %v528_v17 = vld [vmem:[%s12291_s0 + $0x76] sm:$0xff]  ;;  %v526_v19 = vld [vmem:[%s12291_s0 + $0x66] sm:$0xff]  ;;  %v527_v20 = vld [vmem:[%s12291_s0 + $0x6e] sm:$0xff] }
  0x1f   :  { %6661 = vmatpush3.bf16.msra.mxu0 %v8111_v25  ;;  %v137_v21 = vld [vmem:[%s12291_s0 + $0x91] sm:$0xff]  ;;  %v138_v22 = vld [vmem:[%s12291_s0 + $0x99] sm:$0xff]  ;;  %v135_v25 = vld [vmem:[%s12291_s0 + $0x81] sm:$0xff] }
  0x20   :  { %6940 = vrot.lane.b32.xlu1 %v6939_v46, %s8167_s14  ;;  %v525_v46 = vld [vmem:[%s12291_s0 + $0x5e] sm:$0xff]  ;;  %v216_v27 = vld [vmem:[%s12291_s0 + $0x92] sm:$0xff]  ;;  %v7109_v29 = vpack.i.bf16 %v138_v22, %v137_v21 }
  0x21   :  { %6935 = vrot.lane.b32.xlu0 %v6934_v47, %s8167_s14  ;;  %v522_v47 = vld [vmem:[%s12291_s0 + $0x46] sm:$0xff]  ;;  %v7039_v49 = vpack.i.bf16 %v525_v46, %v524_v45  ;;  %v217_v28 = vld [vmem:[%s12291_s0 + $0x9a] sm:$0xff] }
  0x22   :  { %v7034_v50 = vpack.i.bf16 %v523_v48, %v522_v47  ;;  %v295_v33 = vld [vmem:[%s12291_s0 + $0x93] sm:$0xff]  ;;  %v296_v34 = vld [vmem:[%s12291_s0 + $0x9b] sm:$0xff]  ;;  %v7119_v35 = vpack.i.bf16 %v217_v28, %v216_v27 }
  0x23   :  { %v374_v39 = vld [vmem:[%s12291_s0 + $0x94] sm:$0xff]  ;;  %v7129_v41 = vpack.i.bf16 %v296_v34, %v295_v33 }
  0x24   :  { %6950 = vrot.lane.b32.xlu1 %v6949_v52, %s8169_s13  ;;  %v134_v52 = vld [vmem:[%s12291_s0 + $0x79] sm:$0xff]  ;;  %v7139_v45 = vpack.i.bf16 %v375_v40, %v374_v39 }
  0x25   :  { %6945 = vrot.lane.b32.xlu0 %v6944_v53, %s8169_s13  ;;  %v131_v53 = vld [vmem:[%s12291_s0 + $0x61] sm:$0xff]  ;;  %v7049_v55 = vpack.i.bf16 %v134_v52, %v133_v51 }
  0x26   :  { %v7044_v56 = vpack.i.bf16 %v132_v54, %v131_v53 }
  0x28   :  { %6960 = vrot.lane.b32.xlu1 %v6959_v58, %s8170_s24  ;;  %v213_v58 = vld [vmem:[%s12291_s0 + $0x7a] sm:$0xff] }
  0x29   :  { %6955 = vrot.lane.b32.xlu0 %v6954_v59, %s8170_s24  ;;  %v210_v59 = vld [vmem:[%s12291_s0 + $0x62] sm:$0xff]  ;;  %v7059_v61 = vpack.i.bf16 %v213_v58, %v212_v57 }
  0x2c   :  { %6970 = vrot.lane.b32.xlu1 %v6969_v0, %s8171_s17  ;;  %v7054_v0 = vpack.i.bf16 %v211_v60, %v210_v59 }
  0x2d   :  { %6965 = vrot.lane.b32.xlu0 %v6964_v1, %s8171_s17  ;;  %v289_v1 = vld [vmem:[%s12291_s0 + $0x63] sm:$0xff] }
  0x2e   :  { %v7064_v6 = vpack.i.bf16 %v290_v2, %v289_v1 }
  0x30   :  { %6980 = vrot.lane.b32.xlu1 %v6979_v8, %s8172_s27  ;;  %v369_v8 = vld [vmem:[%s12291_s0 + $0x6c] sm:$0xff] }
  0x31   :  { %6975 = vrot.lane.b32.xlu0 %v6974_v9, %s8172_s27  ;;  %v449_v9 = vld [vmem:[%s12291_s0 + $0x75] sm:$0xff]  ;;  %v7074_v12 = vpack.i.bf16 %v369_v8, %v368_v7 }
  0x32   :  { %v7089_v15 = vpack.i.bf16 %v450_v10, %v449_v9 }
  0x34   :  { %6990 = vrot.lane.b32.xlu1 %v6989_v16, %s8168_s15  ;;  %v7084_v16 = vpack.i.bf16 %v448_v14, %v447_v13 }
  0x35   :  { %6985 = vrot.lane.b32.xlu0 %v6984_v18, %s8168_s15  ;;  %v529_v18 = vld [vmem:[%s12291_s0 + $0x7e] sm:$0xff] }
  0x36   :  { %v7099_v23 = vpack.i.bf16 %v529_v18, %v528_v17 }
  0x38   :  { %7000 = vrot.lane.b32.xlu1 %v6999_v24, %s8167_s14  ;;  %v7094_v24 = vpack.i.bf16 %v527_v20, %v526_v19 }
  0x39   :  { %6995 = vrot.lane.b32.xlu0 %v6994_v26, %s8167_s14  ;;  %v136_v26 = vld [vmem:[%s12291_s0 + $0x89] sm:$0xff] }
  0x3a   :  { %v7104_v30 = vpack.i.bf16 %v136_v26, %v135_v25 }
  0x3c   :  { %7010 = vrot.lane.b32.xlu1 %v7009_v31, %s8169_s13  ;;  %v214_v31 = vld [vmem:[%s12291_s0 + $0x82] sm:$0xff] }
  0x3d   :  { %7005 = vrot.lane.b32.xlu0 %v7004_v32, %s8169_s13  ;;  %v215_v32 = vld [vmem:[%s12291_s0 + $0x8a] sm:$0xff] }
  0x3e   :  { %v7114_v36 = vpack.i.bf16 %v215_v32, %v214_v31 }
  0x40   :  { %7020 = vrot.lane.b32.xlu1 %v7019_v37, %s8170_s24  ;;  %v293_v37 = vld [vmem:[%s12291_s0 + $0x83] sm:$0xff] }
  0x41   :  { %7015 = vrot.lane.b32.xlu0 %v7014_v38, %s8170_s24  ;;  %v294_v38 = vld [vmem:[%s12291_s0 + $0x8b] sm:$0xff] }
  0x42   :  { %v7124_v42 = vpack.i.bf16 %v294_v38, %v293_v37 }
  0x44   :  { %7030 = vrot.lane.b32.xlu1 %v7029_v43, %s8171_s17  ;;  %v372_v43 = vld [vmem:[%s12291_s0 + $0x84] sm:$0xff] }
  0x45   :  { %7025 = vrot.lane.b32.xlu0 %v7024_v44, %s8171_s17  ;;  %v373_v44 = vld [vmem:[%s12291_s0 + $0x8c] sm:$0xff] }
  0x48   :  { %7040 = vrot.lane.b32.xlu1 %v7039_v49, %s8172_s27 }
  0x49   :  { %7035 = vrot.lane.b32.xlu0 %v7034_v50, %s8172_s27 }
  0x4c   :  { %7050 = vrot.lane.b32.xlu1 %v7049_v55, %s8168_s15 }
  0x4d   :  { %7045 = vrot.lane.b32.xlu0 %v7044_v56, %s8168_s15 }
  0x50   :  { %7060 = vrot.lane.b32.xlu1 %v7059_v61, %s8167_s14 }
  0x51   :  { %7055 = vrot.lane.b32.xlu0 %v7054_v0, %s8167_s14 }
  0x54   :  { %7070 = vrot.lane.b32.xlu1 %v7069_v5, %s8169_s13 }
  0x55   :  { %7065 = vrot.lane.b32.xlu0 %v7064_v6, %s8169_s13 }
  0x58   :  { %7080 = vrot.lane.b32.xlu1 %v7079_v11, %s8170_s24 }
  0x59   :  { %7075 = vrot.lane.b32.xlu0 %v7074_v12, %s8170_s24 }
  0x5c   :  { %7090 = vrot.lane.b32.xlu1 %v7089_v15, %s8171_s17 }
  0x5d   :  { %7085 = vrot.lane.b32.xlu0 %v7084_v16, %s8171_s17 }
  0x60   :  { %7100 = vrot.lane.b32.xlu1 %v7099_v23, %s8172_s27 }
  0x61   :  { %7095 = vrot.lane.b32.xlu0 %v7094_v24, %s8172_s27 }
  0x64   :  { %7110 = vrot.lane.b32.xlu1 %v7109_v29, %s8168_s15 }
  0x65   :  { %7105 = vrot.lane.b32.xlu0 %v7104_v30, %s8168_s15 }
  0x68   :  { %7120 = vrot.lane.b32.xlu1 %v7119_v35, %s8167_s14 }
  0x69   :  { %7115 = vrot.lane.b32.xlu0 %v7114_v36, %s8167_s14 }
  0x6c   :  { %7130 = vrot.lane.b32.xlu1 %v7129_v41, %s8169_s13 }
  0x6d   :  { %16 = vsyncpa [#allocation7], 0  ;;  %7125 = vrot.lane.b32.xlu0 %v7124_v42, %s8169_s13  ;;  %v7134_v46 = vpack.i.bf16 %v373_v44, %v372_v43  ;;  %v453_v47 = vld [vmem:[%s12291_s0 + $0x95] sm:$0xff]  ;;  %v454_v48 = vld [vmem:[%s12291_s0 + $0x9d] sm:$0xff]  ;;  %vm2489_vm2 = vcmask 39936   ;;  %vm2569_vm3 = vcmask 80896  }
  0x6e   :  { %v451_v49 = vld [vmem:[%s12291_s0 + $0x85] sm:$0xff]  ;;  %v452_v50 = vld [vmem:[%s12291_s0 + $0x8d] sm:$0xff]  ;;  %v7149_v51 = vpack.i.bf16 %v454_v48, %v453_v47  ;;  %v532_v53 = vld [vmem:[%s12291_s0 + $0x96] sm:$0xff]  ;;  %vm2649_vm4 = vcmask 121856   ;;  %vm2729_vm5 = vcmask 162816   ;;  %vm2809_vm6 = vcmask 203776  }
  0x6f   :  { %v7144_v52 = vpack.i.bf16 %v452_v50, %v451_v49  ;;  %v533_v54 = vld [vmem:[%s12291_s0 + $0x9e] sm:$0xff]  ;;  %v530_v55 = vld [vmem:[%s12291_s0 + $0x86] sm:$0xff]  ;;  %v531_v56 = vld [vmem:[%s12291_s0 + $0x8e] sm:$0xff]  ;;  %vm2889_vm7 = vcmask 244736   ;;  %vm3036_vm8 = vcmask 285696   ;;  %vm3595_vm9 = vcmask 261120  }
  0x70   :  { %7140 = vrot.lane.b32.xlu1 %v7139_v45, %s8170_s24  ;;  %v7159_v57 = vpack.i.bf16 %v533_v54, %v532_v53  ;;  %v7154_v58 = vpack.i.bf16 %v531_v56, %v530_v55  ;;  %v141_v59 = vld [vmem:[%s12291_s0 + $0xb1] sm:$0xff]  ;;  %v142_v60 = vld [vmem:[%s12291_s0 + $0xb9] sm:$0xff]  ;;  %v139_v62 = vld [vmem:[%s12291_s0 + $0xa1] sm:$0xff]  ;;  %s8176_s19 = smov 96   ;;  %vm4774_vm10 = vcmask 523264   ;;  %vm4815_vm11 = vcmask 785408  }
  0x71   :  { %7135 = vrot.lane.b32.xlu0 %v7134_v46, %s8170_s24  ;;  %v140_v63 = vld [vmem:[%s12291_s0 + $0xa9] sm:$0xff]  ;;  %v7169_v1 = vpack.i.bf16 %v142_v60, %v141_v59  ;;  %v220_v3 = vld [vmem:[%s12291_s0 + $0xb2] sm:$0xff]  ;;  %v221_v4 = vld [vmem:[%s12291_s0 + $0xba] sm:$0xff]  ;;  %vm5178_vm12 = vcmask 64512   ;;  %vm5683_vm13 = vcmask 1043456   ;;  %s8177_s18 = smov 8  }
  0x72   :  { %v7164_v2 = vpack.i.bf16 %v140_v63, %v139_v62  ;;  %v218_v6 = vld [vmem:[%s12291_s0 + $0xa2] sm:$0xff]  ;;  %v219_v7 = vld [vmem:[%s12291_s0 + $0xaa] sm:$0xff]  ;;  %v299_v9 = vld [vmem:[%s12291_s0 + $0xb3] sm:$0xff]  ;;  %v7179_v10 = vpack.i.bf16 %v221_v4, %v220_v3  ;;  %vm5622_vm14 = vcmask 130048   ;;  %vm5662_vm15 = vcmask 195584   ;;  %s8181_s28 = smov 48  }
  0x73   :  { %v300_v11 = vld [vmem:[%s12291_s0 + $0xbb] sm:$0xff]  ;;  %v297_v12 = vld [vmem:[%s12291_s0 + $0xa3] sm:$0xff]  ;;  %v298_v13 = vld [vmem:[%s12291_s0 + $0xab] sm:$0xff]  ;;  %v7174_v14 = vpack.i.bf16 %v219_v7, %v218_v6  ;;  %s8183_s16 = smov 56   ;;  %s8188_s1 = smov 112   ;;  %vm6030_vm0 = vcmask 326656  }
  0x74   :  { %7150 = vrot.lane.b32.xlu1 %v7149_v51, %s8171_s17  ;;  %v8728_v15 = vld [vmem:[%s12291_s0 + $0xb4] sm:$0xff]  ;;  %v8733_v16 = vld [vmem:[%s12291_s0 + $0xbc] sm:$0xff]  ;;  %v8738_v17 = vld [vmem:[%s12291_s0 + $0xa4] sm:$0xff]  ;;  %v7189_v28 = vpack.i.bf16 %v300_v11, %v299_v9  ;;  %v7184_v36 = vpack.i.bf16 %v298_v13, %v297_v12  ;;  %s8189_s20 = smov 120   ;;  %vm6032_vm1 = vcmask 392192   ;;  %s8191_s26 = smov [#allocation6]  }
  0x75   :  { %7145 = vrot.lane.b32.xlu0 %v7144_v52, %s8171_s17  ;;  %v8745_v19 = vld [vmem:[%s12291_s0 + $0xac] sm:$0xff]  ;;  %v8750_v20 = vld [vmem:[%s12291_s0 + $0xb5] sm:$0xff]  ;;  %v8755_v21 = vld [vmem:[%s12291_s0 + $0xbd] sm:$0xff]  ;;  %v7199_v40 = vpack.i.bf16 %v8733_v16, %v8728_v15 }
  0x76   :  { %v8685_v61 = vpop.permute.xlu1 %6875  ;;  %v8762_v23 = vld [vmem:[%s12291_s0 + $0xa5] sm:$0xff]  ;;  %v8767_v24 = vld [vmem:[%s12291_s0 + $0xad] sm:$0xff]  ;;  %v8772_v25 = vld [vmem:[%s12291_s0 + $0xb6] sm:$0xff]  ;;  %v7194_v41 = vpack.i.bf16 %v8745_v19, %v8738_v17  ;;  %v7209_v42 = vpack.i.bf16 %v8755_v21, %v8750_v20 }
  0x77   :  { %v8693_v0 = vpop.permute.xlu0 %6865  ;;  %v8780_v29 = vld [vmem:[%s12291_s0 + $0xbe] sm:$0xff]  ;;  %v8785_v30 = vld [vmem:[%s12291_s0 + $0xa6] sm:$0xff]  ;;  %v8790_v31 = vld [vmem:[%s12291_s0 + $0xae] sm:$0xff]  ;;  %v7204_v43 = vpack.i.bf16 %v8767_v24, %v8762_v23  ;;  %v6878_v44 = vunpack.i.h.bf16 %v8685_v61  ;;  %v6877_v45 = vunpack.i.l.bf16 %v8685_v61 }
  0x78   :  { %7160 = vrot.lane.b32.xlu1 %v7159_v57, %s8172_s27  ;;  %v6868_v26 = vunpack.i.h.bf16 %v8693_v0  ;;  %v6867_v27 = vunpack.i.l.bf16 %v8693_v0  ;;  %v40_v32 = vld [vmem:[%s12291_s0] sm:$0xff]  ;;  %v41_v33 = vld [vmem:[%s12291_s0 + $0x8] sm:$0xff]  ;;  %v42_v37 = vld [vmem:[%s12291_s0 + $0x10] sm:$0xff]  ;;  %v7219_v47 = vpack.i.bf16 %v8780_v29, %v8772_v25  ;;  %v7214_v48 = vpack.i.bf16 %v8790_v31, %v8785_v30 }
  0x79   :  { %7155 = vrot.lane.b32.xlu0 %v7154_v58, %s8172_s27  ;;  %v43_v38 = vld [vmem:[%s12291_s0 + $0x18] sm:$0xff]  ;;  %v222_v29 = vld [vmem:[%s12291_s0 + $0xc2] sm:$0xff]  ;;  %v223_v30 = vld [vmem:[%s12291_s0 + $0xca] sm:$0xff] }
  0x7a   :  { %v8703_v5 = vpop.permute.xlu1 %6880  ;;  %v2490_v49 = vsel %vm2489_vm2, %v40_v32, %v6867_v27  ;;  %v2491_v50 = vsel %vm2489_vm2, %v41_v33, %v6868_v26  ;;  %v145_v33 = vld [vmem:[%s12291_s0 + $0xd1] sm:$0xff] }
  0x7b   :  { %v6871_v8 = vpop.permute.xlu0 %6870  ;;  %v6883_v51 = vunpack.i.h.bf16 %v8703_v5  ;;  %v6882_v52 = vunpack.i.l.bf16 %v8703_v5  ;;  %v2570_v62 = vsel %vm2569_vm3, %v2490_v49, %v6877_v45  ;;  %v2571_v63 = vsel %vm2569_vm3, %v2491_v50, %v6878_v44  ;;  %v224_v45 = vld [vmem:[%s12291_s0 + $0xd2] sm:$0xff]  ;;  %v304_v49 = vld [vmem:[%s12291_s0 + $0xdb] sm:$0xff]  ;;  %v301_v50 = vld [vmem:[%s12291_s0 + $0xc3] sm:$0xff] }
  0x7c   :  { %7170 = vrot.lane.b32.xlu1 %v7169_v1, %s8168_s15  ;;  %v6873_v34 = vunpack.i.h.bf16 %v6871_v8  ;;  %v6872_v35 = vunpack.i.l.bf16 %v6871_v8 }
  0x7d   :  { %7165 = vrot.lane.b32.xlu0 %v7164_v2, %s8168_s15 }
  0x7e   :  { %v8740_v18 = vpop.permute.xlu1 %6890  ;;  %v2492_v53 = vsel %vm2489_vm2, %v42_v37, %v6872_v35  ;;  %v2493_v54 = vsel %vm2489_vm2, %v43_v38, %v6873_v34  ;;  %v146_v34 = vld [vmem:[%s12291_s0 + $0xd9] sm:$0xff] }
  0x7f   :  { %v8757_v22 = vpop.permute.xlu0 %6885  ;;  %v6893_v55 = vunpack.i.h.bf16 %v8740_v18  ;;  %v6892_v56 = vunpack.i.l.bf16 %v8740_v18  ;;  %v2572_v3 = vsel %vm2569_vm3, %v2492_v53, %v6882_v52  ;;  %v2573_v4 = vsel %vm2569_vm3, %v2493_v54, %v6883_v51  ;;  %v302_v51 = vld [vmem:[%s12291_s0 + $0xcb] sm:$0xff]  ;;  %v382_v53 = vld [vmem:[%s12291_s0 + $0xd4] sm:$0xff]  ;;  %v383_v54 = vld [vmem:[%s12291_s0 + $0xdc] sm:$0xff] }
  0x80   :  { %7180 = vrot.lane.b32.xlu1 %v7179_v10, %s8167_s14  ;;  %v6888_v57 = vunpack.i.h.bf16 %v8757_v22  ;;  %v6887_v58 = vunpack.i.l.bf16 %v8757_v22  ;;  %v7234_v52 = vpack.i.bf16 %v223_v30, %v222_v29 }
  0x81   :  { %7175 = vrot.lane.b32.xlu0 %v7174_v14, %s8167_s14  ;;  %v2652_v7 = vsel %vm2649_vm4, %v2572_v3, %v6892_v56  ;;  %v2653_v8 = vsel %vm2649_vm4, %v2573_v4, %v6893_v55  ;;  %v8920_v55 = vld [vmem:[%s12291_s0 + $0xc4] sm:$0xff] }
  0x82   :  { %v6901_v39 = vpop.permute.xlu1 %6900  ;;  %v2650_v11 = vsel %vm2649_vm4, %v2570_v62, %v6887_v58  ;;  %v2651_v12 = vsel %vm2649_vm4, %v2571_v63, %v6888_v57  ;;  %v381_v57 = vld [vmem:[%s12291_s0 + $0xcc] sm:$0xff]  ;;  %v8928_v58 = vld [vmem:[%s12291_s0 + $0xd5] sm:$0xff]  ;;  %v8956_v3 = vld [vmem:[%s12291_s0 + $0xde] sm:$0xff] }
  0x83   :  { %v6896_v46 = vpop.permute.xlu0 %6895  ;;  %v6903_v59 = vunpack.i.h.bf16 %v6901_v39  ;;  %v6902_v60 = vunpack.i.l.bf16 %v6901_v39  ;;  %v143_v39 = vld [vmem:[%s12291_s0 + $0xc1] sm:$0xff]  ;;  %v8943_v62 = vld [vmem:[%s12291_s0 + $0xcd] sm:$0xff]  ;;  %v8948_v63 = vld [vmem:[%s12291_s0 + $0xd6] sm:$0xff] }
  0x84   :  { %7190 = vrot.lane.b32.xlu1 %v7189_v28, %s8169_s13  ;;  %v6898_v0 = vunpack.i.h.bf16 %v6896_v46  ;;  %v6897_v1 = vunpack.i.l.bf16 %v6896_v46  ;;  %v225_v46 = vld [vmem:[%s12291_s0 + $0xda] sm:$0xff]  ;;  %v8961_v4 = vld [vmem:[%s12291_s0 + $0xc6] sm:$0xff] }
  0x85   :  { %7185 = vrot.lane.b32.xlu0 %v7184_v36, %s8169_s13  ;;  %v2732_v13 = vsel %vm2729_vm5, %v2652_v7, %v6902_v60  ;;  %v2733_v14 = vsel %vm2729_vm5, %v2653_v8, %v6903_v59  ;;  %v8933_v59 = vld [vmem:[%s12291_s0 + $0xdd] sm:$0xff] }
  0x86   :  { %v6911_v61 = vpop.permute.xlu1 %6910  ;;  %v2730_v19 = vsel %vm2729_vm5, %v2650_v11, %v6897_v1  ;;  %v2731_v20 = vsel %vm2729_vm5, %v2651_v12, %v6898_v0  ;;  %v47_v7 = vld [vmem:[%s12291_s0 + $0x38] sm:$0xff]  ;;  %v44_v11 = vld [vmem:[%s12291_s0 + $0x20] sm:$0xff]  ;;  %v45_v12 = vld [vmem:[%s12291_s0 + $0x28] sm:$0xff] }
  0x87   :  { %v6906_v2 = vpop.permute.xlu0 %6905  ;;  %v6913_v5 = vunpack.i.h.bf16 %v6911_v61  ;;  %v6912_v6 = vunpack.i.l.bf16 %v6911_v61  ;;  %v8938_v61 = vld [vmem:[%s12291_s0 + $0xc5] sm:$0xff] }
  0x88   :  { %7200 = vrot.lane.b32.xlu1 %v7199_v40, %s8170_s24  ;;  %v6908_v9 = vunpack.i.h.bf16 %v6906_v2  ;;  %v6907_v10 = vunpack.i.l.bf16 %v6906_v2  ;;  %v144_v40 = vld [vmem:[%s12291_s0 + $0xc9] sm:$0xff] }
  0x89   :  { %7195 = vrot.lane.b32.xlu0 %v7194_v41, %s8170_s24  ;;  %v2812_v21 = vsel %vm2809_vm6, %v2732_v13, %v6912_v6  ;;  %v2813_v22 = vsel %vm2809_vm6, %v2733_v14, %v6913_v5  ;;  %v7224_v44 = vpack.i.bf16 %v144_v40, %v143_v39  ;;  %v8966_v5 = vld [vmem:[%s12291_s0 + $0xce] sm:$0xff]  ;;  %v7259_v14 = vpack.i.bf16 %v383_v54, %v382_v53 }
  0x8a   :  { %v6921_v15 = vpop.permute.xlu1 %6920  ;;  %v2810_v28 = vsel %vm2809_vm6, %v2730_v19, %v6907_v10  ;;  %v2811_v32 = vsel %vm2809_vm6, %v2731_v20, %v6908_v9  ;;  %v46_v6 = vld [vmem:[%s12291_s0 + $0x30] sm:$0xff]  ;;  %v7244_v10 = vpack.i.bf16 %v302_v51, %v301_v50 }
  0x8b   :  { %v6923_v16 = vunpack.i.h.bf16 %v6921_v15  ;;  %v6922_v17 = vunpack.i.l.bf16 %v6921_v15  ;;  %v6916_v18 = vpop.permute.xlu0 %6915  ;;  %v7254_v15 = vpack.i.bf16 %v381_v57, %v8920_v55 }
  0x8c   :  { %v6918_v23 = vunpack.i.h.bf16 %v6916_v18  ;;  %v6917_v24 = vunpack.i.l.bf16 %v6916_v18  ;;  %7210 = vrot.lane.b32.xlu1 %v7209_v42, %s8171_s17 }
  0x8d   :  { %v2892_v26 = vsel %vm2889_vm7, %v2812_v21, %v6922_v17  ;;  %v2893_v27 = vsel %vm2889_vm7, %v2813_v22, %v6923_v16  ;;  %7205 = vrot.lane.b32.xlu0 %v7204_v43, %s8171_s17  ;;  %v7229_v43 = vpack.i.bf16 %v146_v34, %v145_v33  ;;  %v7269_v16 = vpack.i.bf16 %v8933_v59, %v8928_v58 }
  0x8e   :  { %v8859_v35 = vpop.permute.xlu1 %6930  ;;  %v2890_v36 = vsel %vm2889_vm7, %v2810_v28, %v6917_v24  ;;  %v2891_v37 = vsel %vm2889_vm7, %v2811_v32, %v6918_v23  ;;  %v2970_v38 = vpack.c.bf16 %v2893_v27, %v2892_v26  ;;  %v7264_v17 = vpack.i.bf16 %v8943_v62, %v8938_v61 }
  0x8f   :  { %v8869_v41 = vpop.permute.xlu0 %6925  ;;  %v2969_v42 = vpack.c.bf16 %v2891_v37, %v2890_v36  ;;  %v6933_v0 = vunpack.i.h.bf16 %v8859_v35  ;;  %v6932_v1 = vunpack.i.l.bf16 %v8859_v35  ;;  %v7279_v21 = vpack.i.bf16 %v8956_v3, %v8948_v63  ;;  %v149_v3 = vld [vmem:[%s12291_s0 + $0xf1] sm:$0xff] }
  0x90   :  { %7220 = vrot.lane.b32.xlu1 %v7219_v47, %s8172_s27  ;;  %v303_v47 = vld [vmem:[%s12291_s0 + $0xd3] sm:$0xff]  ;;  %v6928_v8 = vunpack.i.h.bf16 %v8869_v41  ;;  %v6927_v9 = vunpack.i.l.bf16 %v8869_v41  ;;  %v7274_v22 = vpack.i.bf16 %v8966_v5, %v8961_v4  ;;  %v226_v4 = vld [vmem:[%s12291_s0 + $0xe2] sm:$0xff]  ;;  %v227_v5 = vld [vmem:[%s12291_s0 + $0xea] sm:$0xff] }
  0x91   :  { %7215 = vrot.lane.b32.xlu0 %v7214_v48, %s8172_s27  ;;  %6662 = vmatprep.mubr.msk.bf16.mxu0 %vm3036_vm8, %v2969_v42  ;;  %v7239_v48 = vpack.i.bf16 %v225_v46, %v224_v45  ;;  %v7249_v2 = vpack.i.bf16 %v304_v49, %v303_v47  ;;  %v2496_v23 = vsel %vm2489_vm2, %v46_v6, %v6932_v1  ;;  %v150_v6 = vld [vmem:[%s12291_s0 + $0xf9] sm:$0xff] }
  0x92   :  { %6663 = vmatmul.mubr.msk.bf16.vlgmr.msra.gmra.mxu0 %vm3036_vm8, %v2970_v38  ;;  %v8887_v25 = vpop.permute.xlu1 %6940  ;;  %v2497_v24 = vsel %vm2489_vm2, %v47_v7, %v6933_v0  ;;  %v2494_v28 = vsel %vm2489_vm2, %v44_v11, %v6927_v9  ;;  %v2495_v32 = vsel %vm2489_vm2, %v45_v12, %v6928_v8  ;;  %v147_v11 = vld [vmem:[%s12291_s0 + $0xe1] sm:$0xff]  ;;  %v148_v12 = vld [vmem:[%s12291_s0 + $0xe9] sm:$0xff] }
  0x93   :  { %v8895_v31 = vpop.permute.xlu0 %6935  ;;  %v6943_v18 = vunpack.i.h.bf16 %v8887_v25  ;;  %v6942_v19 = vunpack.i.l.bf16 %v8887_v25 }
  0x94   :  { %7230 = vrot.lane.b32.xlu1 %v7229_v43, %s8168_s15  ;;  %v6938_v26 = vunpack.i.h.bf16 %v8895_v31  ;;  %v6937_v27 = vunpack.i.l.bf16 %v8895_v31 }
  0x95   :  { %7225 = vrot.lane.b32.xlu0 %v7224_v44, %s8168_s15  ;;  %v2576_v40 = vsel %vm2569_vm3, %v2496_v23, %v6942_v19  ;;  %v2577_v41 = vsel %vm2569_vm3, %v2497_v24, %v6943_v18  ;;  %v229_v18 = vld [vmem:[%s12291_s0 + $0xfa] sm:$0xff]  ;;  %v305_v24 = vld [vmem:[%s12291_s0 + $0xe3] sm:$0xff] }
  0x96   :  { %v6951_v56 = vpop.permute.xlu1 %6950  ;;  %v2574_v45 = vsel %vm2569_vm3, %v2494_v28, %v6937_v27  ;;  %v2575_v46 = vsel %vm2569_vm3, %v2495_v32, %v6938_v26  ;;  %v308_v23 = vld [vmem:[%s12291_s0 + $0xfb] sm:$0xff]  ;;  %v306_v26 = vld [vmem:[%s12291_s0 + $0xeb] sm:$0xff]  ;;  %v7294_v27 = vpack.i.bf16 %v227_v5, %v226_v4 }
  0x97   :  { %v6946_v60 = vpop.permute.xlu0 %6945  ;;  %v6953_v33 = vunpack.i.h.bf16 %v6951_v56  ;;  %v6952_v34 = vunpack.i.l.bf16 %v6951_v56  ;;  %v386_v28 = vld [vmem:[%s12291_s0 + $0xf4] sm:$0xff]  ;;  %v387_v32 = vld [vmem:[%s12291_s0 + $0xfc] sm:$0xff] }
  0x98   :  { %7240 = vrot.lane.b32.xlu1 %v7239_v48, %s8167_s14  ;;  %v6948_v35 = vunpack.i.h.bf16 %v6946_v60  ;;  %v6947_v36 = vunpack.i.l.bf16 %v6946_v60 }
  0x99   :  { %7235 = vrot.lane.b32.xlu0 %v7234_v52, %s8167_s14  ;;  %v2656_v30 = vsel %vm2649_vm4, %v2576_v40, %v6952_v34  ;;  %v2657_v31 = vsel %vm2649_vm4, %v2577_v41, %v6953_v33  ;;  %v9088_v33 = vld [vmem:[%s12291_s0 + $0xe4] sm:$0xff]  ;;  %v9111_v40 = vld [vmem:[%s12291_s0 + $0xed] sm:$0xff]  ;;  %v9116_v41 = vld [vmem:[%s12291_s0 + $0xf6] sm:$0xff] }
  0x9a   :  { %v6961_v13 = vpop.permute.xlu1 %6960  ;;  %v2654_v49 = vsel %vm2649_vm4, %v2574_v45, %v6947_v36  ;;  %v2655_v50 = vsel %vm2649_vm4, %v2575_v46, %v6948_v35  ;;  %v385_v35 = vld [vmem:[%s12291_s0 + $0xec] sm:$0xff]  ;;  %v9096_v36 = vld [vmem:[%s12291_s0 + $0xf5] sm:$0xff]  ;;  %v9124_v45 = vld [vmem:[%s12291_s0 + $0xfe] sm:$0xff] }
  0x9b   :  { %v6956_v20 = vpop.permute.xlu0 %6955  ;;  %v6963_v37 = vunpack.i.h.bf16 %v6961_v13  ;;  %v6962_v38 = vunpack.i.l.bf16 %v6961_v13  ;;  %v9129_v46 = vld [vmem:[%s12291_s0 + $0xe6] sm:$0xff] }
  0x9c   :  { %7250 = vrot.lane.b32.xlu1 %v7249_v2, %s8169_s13  ;;  %v6958_v42 = vunpack.i.h.bf16 %v6956_v20  ;;  %v6957_v43 = vunpack.i.l.bf16 %v6956_v20 }
  0x9d   :  { %7245 = vrot.lane.b32.xlu0 %v7244_v10, %s8169_s13  ;;  %v2736_v51 = vsel %vm2729_vm5, %v2656_v30, %v6962_v38  ;;  %v2737_v52 = vsel %vm2729_vm5, %v2657_v31, %v6963_v37  ;;  %v9101_v37 = vld [vmem:[%s12291_s0 + $0xfd] sm:$0xff] }
  0x9e   :  { %v6971_v39 = vpop.permute.xlu1 %6970  ;;  %v2734_v54 = vsel %vm2729_vm5, %v2654_v49, %v6957_v43  ;;  %v2735_v55 = vsel %vm2729_vm5, %v2655_v50, %v6958_v42  ;;  %v51_v30 = vld [vmem:[%s12291_s0 + $0x58] sm:$0xff]  ;;  %v48_v49 = vld [vmem:[%s12291_s0 + $0x40] sm:$0xff]  ;;  %v49_v50 = vld [vmem:[%s12291_s0 + $0x48] sm:$0xff] }
  0x9f   :  { %v6966_v44 = vpop.permute.xlu0 %6965  ;;  %v6973_v25 = vunpack.i.h.bf16 %v6971_v39  ;;  %v6972_v29 = vunpack.i.l.bf16 %v6971_v39  ;;  %v9106_v39 = vld [vmem:[%s12291_s0 + $0xe5] sm:$0xff] }
  0xa0   :  { %7260 = vrot.lane.b32.xlu1 %v7259_v14, %s8170_s24  ;;  %v6968_v47 = vunpack.i.h.bf16 %v6966_v44  ;;  %v6967_v48 = vunpack.i.l.bf16 %v6966_v44 }
  0xa1   :  { %7255 = vrot.lane.b32.xlu0 %v7254_v15, %s8170_s24  ;;  %v2816_v59 = vsel %vm2809_vm6, %v2736_v51, %v6972_v29  ;;  %v2817_v60 = vsel %vm2809_vm6, %v2737_v52, %v6973_v25  ;;  %v7289_v15 = vpack.i.bf16 %v150_v6, %v149_v3  ;;  %v9134_v25 = vld [vmem:[%s12291_s0 + $0xee] sm:$0xff]  ;;  %v7319_v52 = vpack.i.bf16 %v387_v32, %v386_v28 }
  0xa2   :  { %v6981_v53 = vpop.permute.xlu1 %6980  ;;  %v2814_v63 = vsel %vm2809_vm6, %v2734_v54, %v6967_v48  ;;  %v2815_v0 = vsel %vm2809_vm6, %v2735_v55, %v6968_v47  ;;  %v50_v29 = vld [vmem:[%s12291_s0 + $0x50] sm:$0xff]  ;;  %v7304_v48 = vpack.i.bf16 %v306_v26, %v305_v24  ;;  %v7329_v54 = vpack.i.bf16 %v9101_v37, %v9096_v36 }
  0xa3   :  { %v6983_v56 = vunpack.i.h.bf16 %v6981_v53  ;;  %v6982_v57 = vunpack.i.l.bf16 %v6981_v53  ;;  %v6976_v58 = vpop.permute.xlu0 %6975  ;;  %v7314_v53 = vpack.i.bf16 %v385_v35, %v9088_v33  ;;  %v7324_v55 = vpack.i.bf16 %v9111_v40, %v9106_v39 }
  0xa4   :  { %v6978_v61 = vunpack.i.h.bf16 %v6976_v58  ;;  %v6977_v62 = vunpack.i.l.bf16 %v6976_v58  ;;  %7270 = vrot.lane.b32.xlu1 %v7269_v16, %s8171_s17  ;;  %v7284_v16 = vpack.i.bf16 %v148_v12, %v147_v11 }
  0xa5   :  { %v2896_v1 = vsel %vm2889_vm7, %v2816_v59, %v6982_v57  ;;  %v2897_v2 = vsel %vm2889_vm7, %v2817_v60, %v6983_v56  ;;  %7265 = vrot.lane.b32.xlu0 %v7264_v17, %s8171_s17  ;;  %v228_v17 = vld [vmem:[%s12291_s0 + $0xf2] sm:$0xff]  ;;  %v7339_v59 = vpack.i.bf16 %v9124_v45, %v9116_v41  ;;  %v7334_v60 = vpack.i.bf16 %v9134_v25, %v9129_v46  ;;  %v230_v46 = vld [vmem:[%s12291_s0 + $0x102] sm:$0xff]  ;;  %v231_v25 = vld [vmem:[%s12291_s0 + $0x10a] sm:$0xff] }
  0xa6   :  { %v2894_v7 = vsel %vm2889_vm7, %v2814_v63, %v6977_v62  ;;  %v2895_v8 = vsel %vm2889_vm7, %v2815_v0, %v6978_v61  ;;  %v9032_v9 = vpop.permute.xlu1 %6990  ;;  %v2972_v10 = vpack.c.bf16 %v2897_v2, %v2896_v1  ;;  %v153_v45 = vld [vmem:[%s12291_s0 + $0x111] sm:$0xff] }
  0xa7   :  { %v9040_v13 = vpop.permute.xlu0 %6985  ;;  %v2971_v14 = vpack.c.bf16 %v2895_v8, %v2894_v7  ;;  %v6993_v42 = vunpack.i.h.bf16 %v9032_v9  ;;  %v6992_v43 = vunpack.i.l.bf16 %v9032_v9 }
  0xa8   :  { %7280 = vrot.lane.b32.xlu1 %v7279_v21, %s8172_s27  ;;  %v307_v21 = vld [vmem:[%s12291_s0 + $0xf3] sm:$0xff]  ;;  %v6988_v31 = vunpack.i.h.bf16 %v9040_v13  ;;  %v6987_v47 = vunpack.i.l.bf16 %v9040_v13 }
  0xa9   :  { %7275 = vrot.lane.b32.xlu0 %v7274_v22, %s8172_s27  ;;  %6666 = vmatprep.mubr.msk.bf16.mxu0 %vm3036_vm8, %v2971_v14  ;;  %v7299_v22 = vpack.i.bf16 %v229_v18, %v228_v17  ;;  %v7309_v44 = vpack.i.bf16 %v308_v23, %v307_v21  ;;  %v2500_v61 = vsel %vm2489_vm2, %v50_v29, %v6992_v43  ;;  %v154_v29 = vld [vmem:[%s12291_s0 + $0x119] sm:$0xff] }
  0xaa   :  { %6667 = vmatmul.mubr.msk.bf16.gmra.mxu0 %vm3036_vm8, %v2972_v10  ;;  %v9055_v19 = vpop.permute.xlu1 %7000  ;;  %v2501_v62 = vsel %vm2489_vm2, %v51_v30, %v6993_v42  ;;  %v2498_v1 = vsel %vm2489_vm2, %v48_v49, %v6987_v47  ;;  %v2499_v2 = vsel %vm2489_vm2, %v49_v50, %v6988_v31  ;;  %v151_v49 = vld [vmem:[%s12291_s0 + $0x101] sm:$0xff]  ;;  %v152_v50 = vld [vmem:[%s12291_s0 + $0x109] sm:$0xff] }
  0xab   :  { %v9063_v20 = vpop.permute.xlu0 %6995  ;;  %v7003_v56 = vunpack.i.h.bf16 %v9055_v19  ;;  %v7002_v57 = vunpack.i.l.bf16 %v9055_v19 }
  0xac   :  { %7290 = vrot.lane.b32.xlu1 %v7289_v15, %s8168_s15  ;;  %v6998_v63 = vunpack.i.h.bf16 %v9063_v20  ;;  %v6997_v0 = vunpack.i.l.bf16 %v9063_v20 }
  0xad   :  { %7285 = vrot.lane.b32.xlu0 %v7284_v16, %s8168_s15  ;;  %v2580_v12 = vsel %vm2569_vm3, %v2500_v61, %v7002_v57  ;;  %v2581_v13 = vsel %vm2569_vm3, %v2501_v62, %v7003_v56  ;;  %v233_v56 = vld [vmem:[%s12291_s0 + $0x11a] sm:$0xff]  ;;  %v309_v62 = vld [vmem:[%s12291_s0 + $0x103] sm:$0xff] }
  0xae   :  { %v7011_v34 = vpop.permute.xlu1 %7010  ;;  %v2578_v17 = vsel %vm2569_vm3, %v2498_v1, %v6997_v0  ;;  %v2579_v18 = vsel %vm2569_vm3, %v2499_v2, %v6998_v63  ;;  %v312_v61 = vld [vmem:[%s12291_s0 + $0x11b] sm:$0xff]  ;;  %v310_v63 = vld [vmem:[%s12291_s0 + $0x10b] sm:$0xff]  ;;  %v7354_v0 = vpack.i.bf16 %v231_v25, %v230_v46 }
  0xaf   :  { %v7006_v38 = vpop.permute.xlu0 %7005  ;;  %v7013_v3 = vunpack.i.h.bf16 %v7011_v34  ;;  %v7012_v6 = vunpack.i.l.bf16 %v7011_v34  ;;  %v390_v1 = vld [vmem:[%s12291_s0 + $0x114] sm:$0xff]  ;;  %v391_v2 = vld [vmem:[%s12291_s0 + $0x11c] sm:$0xff] }
  0xb0   :  { %7300 = vrot.lane.b32.xlu1 %v7299_v22, %s8167_s14  ;;  %v7008_v7 = vunpack.i.h.bf16 %v7006_v38  ;;  %v7007_v8 = vunpack.i.l.bf16 %v7006_v38 }
  0xb1   :  { %7295 = vrot.lane.b32.xlu0 %v7294_v27, %s8167_s14  ;;  %v2660_v5 = vsel %vm2649_vm4, %v2580_v12, %v7012_v6  ;;  %v2661_v20 = vsel %vm2649_vm4, %v2581_v13, %v7013_v3  ;;  %v9256_v3 = vld [vmem:[%s12291_s0 + $0x104] sm:$0xff]  ;;  %v9279_v12 = vld [vmem:[%s12291_s0 + $0x10d] sm:$0xff]  ;;  %v9284_v13 = vld [vmem:[%s12291_s0 + $0x116] sm:$0xff] }
  0xb2   :  { %v7021_v51 = vpop.permute.xlu1 %7020  ;;  %v2658_v23 = vsel %vm2649_vm4, %v2578_v17, %v7007_v8  ;;  %v2659_v24 = vsel %vm2649_vm4, %v2579_v18, %v7008_v7  ;;  %v389_v7 = vld [vmem:[%s12291_s0 + $0x10c] sm:$0xff]  ;;  %v9264_v8 = vld [vmem:[%s12291_s0 + $0x115] sm:$0xff]  ;;  %v9292_v17 = vld [vmem:[%s12291_s0 + $0x11e] sm:$0xff] }
  0xb3   :  { %v7016_v58 = vpop.permute.xlu0 %7015  ;;  %v7023_v9 = vunpack.i.h.bf16 %v7021_v51  ;;  %v7022_v10 = vunpack.i.l.bf16 %v7021_v51  ;;  %v9297_v18 = vld [vmem:[%s12291_s0 + $0x106] sm:$0xff] }
  0xb4   :  { %7310 = vrot.lane.b32.xlu1 %v7309_v44, %s8169_s13  ;;  %v7018_v14 = vunpack.i.h.bf16 %v7016_v58  ;;  %v7017_v15 = vunpack.i.l.bf16 %v7016_v58 }
  0xb5   :  { %7305 = vrot.lane.b32.xlu0 %v7304_v48, %s8169_s13  ;;  %v2740_v26 = vsel %vm2729_vm5, %v2660_v5, %v7022_v10  ;;  %v2741_v27 = vsel %vm2729_vm5, %v2661_v20, %v7023_v9  ;;  %v9269_v9 = vld [vmem:[%s12291_s0 + $0x11d] sm:$0xff] }
  0xb6   :  { %v7031_v11 = vpop.permute.xlu1 %7030  ;;  %v2738_v32 = vsel %vm2729_vm5, %v2658_v23, %v7017_v15  ;;  %v2739_v33 = vsel %vm2729_vm5, %v2659_v24, %v7018_v14  ;;  %v55_v5 = vld [vmem:[%s12291_s0 + $0x78] sm:$0xff]  ;;  %v52_v23 = vld [vmem:[%s12291_s0 + $0x60] sm:$0xff]  ;;  %v53_v24 = vld [vmem:[%s12291_s0 + $0x68] sm:$0xff] }
  0xb7   :  { %v7026_v16 = vpop.permute.xlu0 %7025  ;;  %v7033_v19 = vunpack.i.h.bf16 %v7031_v11  ;;  %v7032_v4 = vunpack.i.l.bf16 %v7031_v11  ;;  %v9274_v11 = vld [vmem:[%s12291_s0 + $0x105] sm:$0xff] }
  0xb8   :  { %7320 = vrot.lane.b32.xlu1 %v7319_v52, %s8170_s24  ;;  %v7028_v21 = vunpack.i.h.bf16 %v7026_v16  ;;  %v7027_v22 = vunpack.i.l.bf16 %v7026_v16 }
  0xb9   :  { %7315 = vrot.lane.b32.xlu0 %v7314_v53, %s8170_s24  ;;  %v2820_v37 = vsel %vm2809_vm6, %v2740_v26, %v7032_v4  ;;  %v2821_v38 = vsel %vm2809_vm6, %v2741_v27, %v7033_v19  ;;  %v7349_v53 = vpack.i.bf16 %v154_v29, %v153_v45  ;;  %v9302_v19 = vld [vmem:[%s12291_s0 + $0x10e] sm:$0xff]  ;;  %v7379_v27 = vpack.i.bf16 %v391_v2, %v390_v1 }
  0xba   :  { %v7041_v28 = vpop.permute.xlu1 %7040  ;;  %v2818_v41 = vsel %vm2809_vm6, %v2738_v32, %v7027_v22  ;;  %v2819_v42 = vsel %vm2809_vm6, %v2739_v33, %v7028_v21  ;;  %v54_v4 = vld [vmem:[%s12291_s0 + $0x70] sm:$0xff]  ;;  %v7364_v22 = vpack.i.bf16 %v310_v63, %v309_v62  ;;  %v7389_v32 = vpack.i.bf16 %v9269_v9, %v9264_v8 }
  0xbb   :  { %v7043_v34 = vunpack.i.h.bf16 %v7041_v28  ;;  %v7042_v35 = vunpack.i.l.bf16 %v7041_v28  ;;  %v7036_v36 = vpop.permute.xlu0 %7035  ;;  %v7374_v28 = vpack.i.bf16 %v389_v7, %v9256_v3  ;;  %v7384_v33 = vpack.i.bf16 %v9279_v12, %v9274_v11 }
  0xbc   :  { %v7038_v39 = vunpack.i.h.bf16 %v7036_v36  ;;  %v7037_v40 = vunpack.i.l.bf16 %v7036_v36  ;;  %7330 = vrot.lane.b32.xlu1 %v7329_v54, %s8171_s17  ;;  %v7344_v54 = vpack.i.bf16 %v152_v50, %v151_v49 }
  0xbd   :  { %v2900_v43 = vsel %vm2889_vm7, %v2820_v37, %v7042_v35  ;;  %v2901_v44 = vsel %vm2889_vm7, %v2821_v38, %v7043_v34  ;;  %7325 = vrot.lane.b32.xlu0 %v7324_v55, %s8171_s17  ;;  %v232_v55 = vld [vmem:[%s12291_s0 + $0x112] sm:$0xff]  ;;  %v7399_v37 = vpack.i.bf16 %v9292_v17, %v9284_v13  ;;  %v7394_v38 = vpack.i.bf16 %v9302_v19, %v9297_v18  ;;  %v234_v18 = vld [vmem:[%s12291_s0 + $0x122] sm:$0xff]  ;;  %v235_v19 = vld [vmem:[%s12291_s0 + $0x12a] sm:$0xff] }
  0xbe   :  { %v2898_v30 = vsel %vm2889_vm7, %v2818_v41, %v7037_v40  ;;  %v2899_v31 = vsel %vm2889_vm7, %v2819_v42, %v7038_v39  ;;  %v9200_v47 = vpop.permute.xlu1 %7050  ;;  %v2974_v48 = vpack.c.bf16 %v2901_v44, %v2900_v43  ;;  %v157_v17 = vld [vmem:[%s12291_s0 + $0x131] sm:$0xff] }
  0xbf   :  { %v9208_v51 = vpop.permute.xlu0 %7045  ;;  %v2973_v52 = vpack.c.bf16 %v2899_v31, %v2898_v30  ;;  %v7053_v14 = vunpack.i.h.bf16 %v9200_v47  ;;  %v7052_v15 = vunpack.i.l.bf16 %v9200_v47 }
  0xc0   :  { %7340 = vrot.lane.b32.xlu1 %v7339_v59, %s8172_s27  ;;  %v311_v59 = vld [vmem:[%s12291_s0 + $0x113] sm:$0xff]  ;;  %v7048_v20 = vunpack.i.h.bf16 %v9208_v51  ;;  %v7047_v21 = vunpack.i.l.bf16 %v9208_v51 }
  0xc1   :  { %7335 = vrot.lane.b32.xlu0 %v7334_v60, %s8172_s27  ;;  %6670 = vmatprep.mubr.msk.bf16.mxu0 %vm3036_vm8, %v2973_v52  ;;  %v7359_v60 = vpack.i.bf16 %v233_v56, %v232_v55  ;;  %v7369_v16 = vpack.i.bf16 %v312_v61, %v311_v59  ;;  %v2504_v39 = vsel %vm2489_vm2, %v54_v4, %v7052_v15  ;;  %v158_v4 = vld [vmem:[%s12291_s0 + $0x139] sm:$0xff] }
  0xc2   :  { %6671 = vmatmul.mubr.msk.bf16.gmra.mxu0 %vm3036_vm8, %v2974_v48  ;;  %v9223_v57 = vpop.permute.xlu1 %7060  ;;  %v2505_v40 = vsel %vm2489_vm2, %v55_v5, %v7053_v14  ;;  %v2502_v43 = vsel %vm2489_vm2, %v52_v23, %v7047_v21  ;;  %v2503_v44 = vsel %vm2489_vm2, %v53_v24, %v7048_v20  ;;  %v155_v23 = vld [vmem:[%s12291_s0 + $0x121] sm:$0xff]  ;;  %v156_v24 = vld [vmem:[%s12291_s0 + $0x129] sm:$0xff] }
  0xc3   :  { %v9231_v58 = vpop.permute.xlu0 %7055  ;;  %v7063_v34 = vunpack.i.h.bf16 %v9223_v57  ;;  %v7062_v35 = vunpack.i.l.bf16 %v9223_v57 }
  0xc4   :  { %7350 = vrot.lane.b32.xlu1 %v7349_v53, %s8168_s15  ;;  %v7058_v41 = vunpack.i.h.bf16 %v9231_v58  ;;  %v7057_v42 = vunpack.i.l.bf16 %v9231_v58 }
  0xc5   :  { %7345 = vrot.lane.b32.xlu0 %v7344_v54, %s8168_s15  ;;  %v2584_v50 = vsel %vm2569_vm3, %v2504_v39, %v7062_v35  ;;  %v2585_v51 = vsel %vm2569_vm3, %v2505_v40, %v7063_v34  ;;  %v237_v34 = vld [vmem:[%s12291_s0 + $0x13a] sm:$0xff]  ;;  %v313_v40 = vld [vmem:[%s12291_s0 + $0x123] sm:$0xff] }
  0xc6   :  { %v7071_v6 = vpop.permute.xlu1 %7070  ;;  %v2582_v55 = vsel %vm2569_vm3, %v2502_v43, %v7057_v42  ;;  %v2583_v56 = vsel %vm2569_vm3, %v2503_v44, %v7058_v41  ;;  %v316_v39 = vld [vmem:[%s12291_s0 + $0x13b] sm:$0xff]  ;;  %v314_v41 = vld [vmem:[%s12291_s0 + $0x12b] sm:$0xff]  ;;  %v7414_v42 = vpack.i.bf16 %v235_v19, %v234_v18 }
  0xc7   :  { %v7066_v10 = vpop.permute.xlu0 %7065  ;;  %v7073_v45 = vunpack.i.h.bf16 %v7071_v6  ;;  %v7072_v29 = vunpack.i.l.bf16 %v7071_v6  ;;  %v394_v43 = vld [vmem:[%s12291_s0 + $0x134] sm:$0xff]  ;;  %v395_v44 = vld [vmem:[%s12291_s0 + $0x13c] sm:$0xff] }
  0xc8   :  { %7360 = vrot.lane.b32.xlu1 %v7359_v60, %s8167_s14  ;;  %v7068_v30 = vunpack.i.h.bf16 %v7066_v10  ;;  %v7067_v31 = vunpack.i.l.bf16 %v7066_v10 }
  0xc9   :  { %7355 = vrot.lane.b32.xlu0 %v7354_v0, %s8167_s14  ;;  %v2664_v25 = vsel %vm2649_vm4, %v2584_v50, %v7072_v29  ;;  %v2665_v58 = vsel %vm2649_vm4, %v2585_v51, %v7073_v45  ;;  %v9424_v45 = vld [vmem:[%s12291_s0 + $0x124] sm:$0xff]  ;;  %v9447_v50 = vld [vmem:[%s12291_s0 + $0x12d] sm:$0xff]  ;;  %v9452_v51 = vld [vmem:[%s12291_s0 + $0x136] sm:$0xff] }
  0xca   :  { %v7081_v26 = vpop.permute.xlu1 %7080  ;;  %v2662_v61 = vsel %vm2649_vm4, %v2582_v55, %v7067_v31  ;;  %v2663_v62 = vsel %vm2649_vm4, %v2583_v56, %v7068_v30  ;;  %v393_v30 = vld [vmem:[%s12291_s0 + $0x12c] sm:$0xff]  ;;  %v9432_v31 = vld [vmem:[%s12291_s0 + $0x135] sm:$0xff]  ;;  %v9460_v55 = vld [vmem:[%s12291_s0 + $0x13e] sm:$0xff] }
  0xcb   :  { %v7076_v36 = vpop.permute.xlu0 %7075  ;;  %v7083_v47 = vunpack.i.h.bf16 %v7081_v26  ;;  %v7082_v48 = vunpack.i.l.bf16 %v7081_v26  ;;  %v9465_v56 = vld [vmem:[%s12291_s0 + $0x126] sm:$0xff] }
  0xcc   :  { %7370 = vrot.lane.b32.xlu1 %v7369_v16, %s8169_s13  ;;  %v7078_v52 = vunpack.i.h.bf16 %v7076_v36  ;;  %v7077_v53 = vunpack.i.l.bf16 %v7076_v36 }
  0xcd   :  { %7365 = vrot.lane.b32.xlu0 %v7364_v22, %s8169_s13  ;;  %v2744_v63 = vsel %vm2729_vm5, %v2664_v25, %v7082_v48  ;;  %v2745_v0 = vsel %vm2729_vm5, %v2665_v58, %v7083_v47  ;;  %v9437_v47 = vld [vmem:[%s12291_s0 + $0x13d] sm:$0xff] }
  0xce   :  { %v7091_v49 = vpop.permute.xlu1 %7090  ;;  %v2742_v2 = vsel %vm2729_vm5, %v2662_v61, %v7077_v53  ;;  %v2743_v3 = vsel %vm2729_vm5, %v2663_v62, %v7078_v52  ;;  %v59_v25 = vld [vmem:[%s12291_s0 + $0x98] sm:$0xff]  ;;  %v56_v61 = vld [vmem:[%s12291_s0 + $0x80] sm:$0xff]  ;;  %v57_v62 = vld [vmem:[%s12291_s0 + $0x88] sm:$0xff] }
  0xcf   :  { %v7086_v54 = vpop.permute.xlu0 %7085  ;;  %v7093_v57 = vunpack.i.h.bf16 %v7091_v49  ;;  %v7092_v46 = vunpack.i.l.bf16 %v7091_v49  ;;  %v9442_v49 = vld [vmem:[%s12291_s0 + $0x125] sm:$0xff] }
  0xd0   :  { %7380 = vrot.lane.b32.xlu1 %v7379_v27, %s8170_s24  ;;  %v7088_v59 = vunpack.i.h.bf16 %v7086_v54  ;;  %v7087_v60 = vunpack.i.l.bf16 %v7086_v54 }
  0xd1   :  { %7375 = vrot.lane.b32.xlu0 %v7374_v28, %s8170_s24  ;;  %v2824_v9 = vsel %vm2809_vm6, %v2744_v63, %v7092_v46  ;;  %v2825_v10 = vsel %vm2809_vm6, %v2745_v0, %v7093_v57  ;;  %v7409_v28 = vpack.i.bf16 %v158_v4, %v157_v17  ;;  %v9470_v57 = vld [vmem:[%s12291_s0 + $0x12e] sm:$0xff]  ;;  %v7439_v0 = vpack.i.bf16 %v395_v44, %v394_v43 }
  0xd2   :  { %v7101_v1 = vpop.permute.xlu1 %7100  ;;  %v2822_v13 = vsel %vm2809_vm6, %v2742_v2, %v7087_v60  ;;  %v2823_v14 = vsel %vm2809_vm6, %v2743_v3, %v7088_v59  ;;  %v58_v46 = vld [vmem:[%s12291_s0 + $0x90] sm:$0xff]  ;;  %v7424_v60 = vpack.i.bf16 %v314_v41, %v313_v40  ;;  %v7449_v2 = vpack.i.bf16 %v9437_v47, %v9432_v31 }
  0xd3   :  { %v7103_v6 = vunpack.i.h.bf16 %v7101_v1  ;;  %v7102_v7 = vunpack.i.l.bf16 %v7101_v1  ;;  %v7096_v8 = vpop.permute.xlu0 %7095  ;;  %v7434_v1 = vpack.i.bf16 %v393_v30, %v9424_v45  ;;  %v7444_v3 = vpack.i.bf16 %v9447_v50, %v9442_v49 }
  0xd4   :  { %v7098_v11 = vunpack.i.h.bf16 %v7096_v8  ;;  %v7097_v12 = vunpack.i.l.bf16 %v7096_v8  ;;  %7390 = vrot.lane.b32.xlu1 %v7389_v32, %s8171_s17  ;;  %v7404_v32 = vpack.i.bf16 %v156_v24, %v155_v23 }
  0xd5   :  { %v2904_v15 = vsel %vm2889_vm7, %v2824_v9, %v7102_v7  ;;  %v2905_v16 = vsel %vm2889_vm7, %v2825_v10, %v7103_v6  ;;  %7385 = vrot.lane.b32.xlu0 %v7384_v33, %s8171_s17  ;;  %v236_v33 = vld [vmem:[%s12291_s0 + $0x132] sm:$0xff]  ;;  %v7459_v9 = vpack.i.bf16 %v9460_v55, %v9452_v51  ;;  %v7454_v10 = vpack.i.bf16 %v9470_v57, %v9465_v56  ;;  %v238_v56 = vld [vmem:[%s12291_s0 + $0x142] sm:$0xff]  ;;  %v239_v57 = vld [vmem:[%s12291_s0 + $0x14a] sm:$0xff] }
  0xd6   :  { %v2902_v5 = vsel %vm2889_vm7, %v2822_v13, %v7097_v12  ;;  %v2903_v20 = vsel %vm2889_vm7, %v2823_v14, %v7098_v11  ;;  %v9368_v21 = vpop.permute.xlu1 %7110  ;;  %v2976_v22 = vpack.c.bf16 %v2905_v16, %v2904_v15  ;;  %v161_v55 = vld [vmem:[%s12291_s0 + $0x151] sm:$0xff] }
  0xd7   :  { %v9376_v26 = vpop.permute.xlu0 %7105  ;;  %v2975_v27 = vpack.c.bf16 %v2903_v20, %v2902_v5  ;;  %v7113_v52 = vunpack.i.h.bf16 %v9368_v21  ;;  %v7112_v53 = vunpack.i.l.bf16 %v9368_v21 }
  0xd8   :  { %7400 = vrot.lane.b32.xlu1 %v7399_v37, %s8172_s27  ;;  %v315_v37 = vld [vmem:[%s12291_s0 + $0x133] sm:$0xff]  ;;  %v7108_v58 = vunpack.i.h.bf16 %v9376_v26  ;;  %v7107_v59 = vunpack.i.l.bf16 %v9376_v26 }
  0xd9   :  { %7395 = vrot.lane.b32.xlu0 %v7394_v38, %s8172_s27  ;;  %6674 = vmatprep.mubr.msk.bf16.mxu0 %vm3036_vm8, %v2975_v27  ;;  %v7419_v38 = vpack.i.bf16 %v237_v34, %v236_v33  ;;  %v7429_v54 = vpack.i.bf16 %v316_v39, %v315_v37  ;;  %v2508_v11 = vsel %vm2489_vm2, %v58_v46, %v7112_v53  ;;  %v162_v46 = vld [vmem:[%s12291_s0 + $0x159] sm:$0xff] }
  0xda   :  { %6675 = vmatmul.mubr.msk.bf16.gmra.mxu0 %vm3036_vm8, %v2976_v22  ;;  %v9391_v35 = vpop.permute.xlu1 %7120  ;;  %v2509_v12 = vsel %vm2489_vm2, %v59_v25, %v7113_v52  ;;  %v2506_v15 = vsel %vm2489_vm2, %v56_v61, %v7107_v59  ;;  %v2507_v16 = vsel %vm2489_vm2, %v57_v62, %v7108_v58  ;;  %v159_v61 = vld [vmem:[%s12291_s0 + $0x141] sm:$0xff]  ;;  %v160_v62 = vld [vmem:[%s12291_s0 + $0x149] sm:$0xff] }
  0xdb   :  { %v9399_v36 = vpop.permute.xlu0 %7115  ;;  %v7123_v6 = vunpack.i.h.bf16 %v9391_v35  ;;  %v7122_v7 = vunpack.i.l.bf16 %v9391_v35 }
  0xdc   :  { %7410 = vrot.lane.b32.xlu1 %v7409_v28, %s8168_s15  ;;  %v7118_v13 = vunpack.i.h.bf16 %v9399_v36  ;;  %v7117_v14 = vunpack.i.l.bf16 %v9399_v36 }
  0xdd   :  { %7405 = vrot.lane.b32.xlu0 %v7404_v32, %s8168_s15  ;;  %v2588_v24 = vsel %vm2569_vm3, %v2508_v11, %v7122_v7  ;;  %v2589_v26 = vsel %vm2569_vm3, %v2509_v12, %v7123_v6  ;;  %v241_v6 = vld [vmem:[%s12291_s0 + $0x15a] sm:$0xff]  ;;  %v317_v12 = vld [vmem:[%s12291_s0 + $0x143] sm:$0xff] }
  0xde   :  { %v7131_v29 = vpop.permute.xlu1 %7130  ;;  %v2586_v33 = vsel %vm2569_vm3, %v2506_v15, %v7117_v14  ;;  %v2587_v34 = vsel %vm2569_vm3, %v2507_v16, %v7118_v13  ;;  %v320_v11 = vld [vmem:[%s12291_s0 + $0x15b] sm:$0xff]  ;;  %v318_v13 = vld [vmem:[%s12291_s0 + $0x14b] sm:$0xff]  ;;  %v7474_v14 = vpack.i.bf16 %v239_v57, %v238_v56 }
  0xdf   :  { %v7126_v48 = vpop.permute.xlu0 %7125  ;;  %v7133_v17 = vunpack.i.h.bf16 %v7131_v29  ;;  %v7132_v4 = vunpack.i.l.bf16 %v7131_v29  ;;  %v398_v15 = vld [vmem:[%s12291_s0 + $0x154] sm:$0xff]  ;;  %v399_v16 = vld [vmem:[%s12291_s0 + $0x15c] sm:$0xff] }
  0xe0   :  { %7420 = vrot.lane.b32.xlu1 %v7419_v38, %s8167_s14  ;;  %v7128_v5 = vunpack.i.h.bf16 %v7126_v48  ;;  %v7127_v20 = vunpack.i.l.bf16 %v7126_v48 }
  0xe1   :  { %7415 = vrot.lane.b32.xlu0 %v7414_v42, %s8167_s14  ;;  %v2668_v19 = vsel %vm2649_vm4, %v2588_v24, %v7132_v4  ;;  %v2669_v36 = vsel %vm2649_vm4, %v2589_v26, %v7133_v17  ;;  %v9592_v17 = vld [vmem:[%s12291_s0 + $0x144] sm:$0xff]  ;;  %v9615_v24 = vld [vmem:[%s12291_s0 + $0x14d] sm:$0xff]  ;;  %v9620_v26 = vld [vmem:[%s12291_s0 + $0x156] sm:$0xff] }
  0xe2   :  { %v7141_v63 = vpop.permute.xlu1 %7140  ;;  %v2666_v39 = vsel %vm2649_vm4, %v2586_v33, %v7127_v20  ;;  %v2667_v40 = vsel %vm2649_vm4, %v2587_v34, %v7128_v5  ;;  %v397_v5 = vld [vmem:[%s12291_s0 + $0x14c] sm:$0xff]  ;;  %v9600_v20 = vld [vmem:[%s12291_s0 + $0x155] sm:$0xff]  ;;  %v9628_v33 = vld [vmem:[%s12291_s0 + $0x15e] sm:$0xff] }
  0xe3   :  { %v7136_v8 = vpop.permute.xlu0 %7135  ;;  %v7143_v21 = vunpack.i.h.bf16 %v7141_v63  ;;  %v7142_v22 = vunpack.i.l.bf16 %v7141_v63  ;;  %v9633_v34 = vld [vmem:[%s12291_s0 + $0x146] sm:$0xff] }
  0xe4   :  { %7430 = vrot.lane.b32.xlu1 %v7429_v54, %s8169_s13  ;;  %v7138_v27 = vunpack.i.h.bf16 %v7136_v8  ;;  %v7137_v28 = vunpack.i.l.bf16 %v7136_v8 }
  0xe5   :  { %7425 = vrot.lane.b32.xlu0 %v7424_v60, %s8169_s13  ;;  %v2748_v41 = vsel %vm2729_vm5, %v2668_v19, %v7142_v22  ;;  %v2749_v42 = vsel %vm2729_vm5, %v2669_v36, %v7143_v21  ;;  %v9605_v21 = vld [vmem:[%s12291_s0 + $0x15d] sm:$0xff] }
  0xe6   :  { %v7151_v23 = vpop.permute.xlu1 %7150  ;;  %v2746_v44 = vsel %vm2729_vm5, %v2666_v39, %v7137_v28  ;;  %v2747_v45 = vsel %vm2729_vm5, %v2667_v40, %v7138_v27  ;;  %v63_v19 = vld [vmem:[%s12291_s0 + $0xb8] sm:$0xff]  ;;  %v60_v39 = vld [vmem:[%s12291_s0 + $0xa0] sm:$0xff]  ;;  %v61_v40 = vld [vmem:[%s12291_s0 + $0xa8] sm:$0xff] }
  0xe7   :  { %v7146_v32 = vpop.permute.xlu0 %7145  ;;  %v7153_v35 = vunpack.i.h.bf16 %v7151_v23  ;;  %v7152_v18 = vunpack.i.l.bf16 %v7151_v23  ;;  %v9610_v23 = vld [vmem:[%s12291_s0 + $0x145] sm:$0xff] }
  0xe8   :  { %7440 = vrot.lane.b32.xlu1 %v7439_v0, %s8170_s24  ;;  %v7148_v37 = vunpack.i.h.bf16 %v7146_v32  ;;  %v7147_v38 = vunpack.i.l.bf16 %v7146_v32 }
  0xe9   :  { %7435 = vrot.lane.b32.xlu0 %v7434_v1, %s8170_s24  ;;  %v2828_v47 = vsel %vm2809_vm6, %v2748_v41, %v7152_v18  ;;  %v2829_v48 = vsel %vm2809_vm6, %v2749_v42, %v7153_v35  ;;  %v7469_v1 = vpack.i.bf16 %v162_v46, %v161_v55  ;;  %v9638_v35 = vld [vmem:[%s12291_s0 + $0x14e] sm:$0xff]  ;;  %v7499_v42 = vpack.i.bf16 %v399_v16, %v398_v15 }
  0xea   :  { %v7161_v43 = vpop.permute.xlu1 %7160  ;;  %v2826_v51 = vsel %vm2809_vm6, %v2746_v44, %v7147_v38  ;;  %v2827_v52 = vsel %vm2809_vm6, %v2747_v45, %v7148_v37  ;;  %v62_v18 = vld [vmem:[%s12291_s0 + $0xb0] sm:$0xff]  ;;  %v7484_v38 = vpack.i.bf16 %v318_v13, %v317_v12  ;;  %v7509_v44 = vpack.i.bf16 %v9605_v21, %v9600_v20 }
  0xeb   :  { %v7163_v29 = vunpack.i.h.bf16 %v7161_v43  ;;  %v7162_v30 = vunpack.i.l.bf16 %v7161_v43  ;;  %v7156_v31 = vpop.permute.xlu0 %7155  ;;  %v7494_v43 = vpack.i.bf16 %v397_v5, %v9592_v17  ;;  %v7504_v45 = vpack.i.bf16 %v9615_v24, %v9610_v23 }
  0xec   :  { %v7158_v49 = vunpack.i.h.bf16 %v7156_v31  ;;  %v7157_v50 = vunpack.i.l.bf16 %v7156_v31  ;;  %7450 = vrot.lane.b32.xlu1 %v7449_v2, %s8171_s17  ;;  %v7464_v2 = vpack.i.bf16 %v160_v62, %v159_v61 }
  0xed   :  { %v2908_v53 = vsel %vm2889_vm7, %v2828_v47, %v7162_v30  ;;  %v2909_v54 = vsel %vm2889_vm7, %v2829_v48, %v7163_v29  ;;  %7445 = vrot.lane.b32.xlu0 %v7444_v3, %s8171_s17  ;;  %v240_v3 = vld [vmem:[%s12291_s0 + $0x152] sm:$0xff]  ;;  %v7519_v47 = vpack.i.bf16 %v9628_v33, %v9620_v26  ;;  %v7514_v48 = vpack.i.bf16 %v9638_v35, %v9633_v34  ;;  %v242_v34 = vld [vmem:[%s12291_s0 + $0x162] sm:$0xff]  ;;  %v243_v35 = vld [vmem:[%s12291_s0 + $0x16a] sm:$0xff] }
  0xee   :  { %v2906_v25 = vsel %vm2889_vm7, %v2826_v51, %v7157_v50  ;;  %v2907_v58 = vsel %vm2889_vm7, %v2827_v52, %v7158_v49  ;;  %v9536_v59 = vpop.permute.xlu1 %7170  ;;  %v2978_v60 = vpack.c.bf16 %v2909_v54, %v2908_v53  ;;  %v165_v33 = vld [vmem:[%s12291_s0 + $0x171] sm:$0xff] }
  0xef   :  { %v9544_v63 = vpop.permute.xlu0 %7165  ;;  %v2977_v0 = vpack.c.bf16 %v2907_v58, %v2906_v25  ;;  %v7173_v27 = vunpack.i.h.bf16 %v9536_v59  ;;  %v7172_v28 = vunpack.i.l.bf16 %v9536_v59 }
  0xf0   :  { %7460 = vrot.lane.b32.xlu1 %v7459_v9, %s8172_s27  ;;  %v319_v9 = vld [vmem:[%s12291_s0 + $0x153] sm:$0xff]  ;;  %v7168_v36 = vunpack.i.h.bf16 %v9544_v63  ;;  %v7167_v37 = vunpack.i.l.bf16 %v9544_v63 }
  0xf1   :  { %7455 = vrot.lane.b32.xlu0 %v7454_v10, %s8172_s27  ;;  %6678 = vmatprep.mubr.msk.bf16.mxu0 %vm3036_vm8, %v2977_v0  ;;  %v7479_v10 = vpack.i.bf16 %v241_v6, %v240_v3  ;;  %v7489_v32 = vpack.i.bf16 %v320_v11, %v319_v9  ;;  %v2512_v49 = vsel %vm2489_vm2, %v62_v18, %v7172_v28  ;;  %v166_v18 = vld [vmem:[%s12291_s0 + $0x179] sm:$0xff] }
  0xf2   :  { %6679 = vmatmul.mubr.msk.bf16.gmra.mxu0 %vm3036_vm8, %v2978_v60  ;;  %v9559_v7 = vpop.permute.xlu1 %7180  ;;  %v2513_v50 = vsel %vm2489_vm2, %v63_v19, %v7173_v27  ;;  %v2510_v53 = vsel %vm2489_vm2, %v60_v39, %v7167_v37  ;;  %v2511_v54 = vsel %vm2489_vm2, %v61_v40, %v7168_v36  ;;  %v163_v39 = vld [vmem:[%s12291_s0 + $0x161] sm:$0xff]  ;;  %v164_v40 = vld [vmem:[%s12291_s0 + $0x169] sm:$0xff] }
  0xf3   :  { %v9567_v8 = vpop.permute.xlu0 %7175  ;;  %v7183_v29 = vunpack.i.h.bf16 %v9559_v7  ;;  %v7182_v30 = vunpack.i.l.bf16 %v9559_v7 }
  0xf4   :  { %7470 = vrot.lane.b32.xlu1 %v7469_v1, %s8168_s15  ;;  %v7178_v51 = vunpack.i.h.bf16 %v9567_v8  ;;  %v7177_v52 = vunpack.i.l.bf16 %v9567_v8 }
  0xf5   :  { %7465 = vrot.lane.b32.xlu0 %v7464_v2, %s8168_s15  ;;  %v2592_v62 = vsel %vm2569_vm3, %v2512_v49, %v7182_v30  ;;  %v2593_v63 = vsel %vm2569_vm3, %v2513_v50, %v7183_v29  ;;  %v245_v29 = vld [vmem:[%s12291_s0 + $0x17a] sm:$0xff]  ;;  %v321_v50 = vld [vmem:[%s12291_s0 + $0x163] sm:$0xff] }
  0xf6   :  { %v7191_v4 = vpop.permute.xlu1 %7190  ;;  %v2590_v3 = vsel %vm2569_vm3, %v2510_v53, %v7177_v52  ;;  %v2591_v6 = vsel %vm2569_vm3, %v2511_v54, %v7178_v51  ;;  %v324_v49 = vld [vmem:[%s12291_s0 + $0x17b] sm:$0xff]  ;;  %v322_v51 = vld [vmem:[%s12291_s0 + $0x16b] sm:$0xff]  ;;  %v7534_v52 = vpack.i.bf16 %v243_v35, %v242_v34 }
  0xf7   :  { %v7186_v22 = vpop.permute.xlu0 %7185  ;;  %v7193_v55 = vunpack.i.h.bf16 %v7191_v4  ;;  %v7192_v46 = vunpack.i.l.bf16 %v7191_v4  ;;  %v402_v53 = vld [vmem:[%s12291_s0 + $0x174] sm:$0xff]  ;;  %v403_v54 = vld [vmem:[%s12291_s0 + $0x17c] sm:$0xff] }
  0xf8   :  { %7480 = vrot.lane.b32.xlu1 %v7479_v10, %s8167_s14  ;;  %v7188_v25 = vunpack.i.h.bf16 %v7186_v22  ;;  %v7187_v58 = vunpack.i.l.bf16 %v7186_v22 }
  0xf9   :  { %7475 = vrot.lane.b32.xlu0 %v7474_v14, %s8167_s14  ;;  %v2672_v57 = vsel %vm2649_vm4, %v2592_v62, %v7192_v46  ;;  %v2673_v8 = vsel %vm2649_vm4, %v2593_v63, %v7193_v55  ;;  %v9760_v55 = vld [vmem:[%s12291_s0 + $0x164] sm:$0xff]  ;;  %v9783_v62 = vld [vmem:[%s12291_s0 + $0x16d] sm:$0xff]  ;;  %v9788_v63 = vld [vmem:[%s12291_s0 + $0x176] sm:$0xff] }
  0xfa   :  { %v7201_v41 = vpop.permute.xlu1 %7200  ;;  %v2670_v11 = vsel %vm2649_vm4, %v2590_v3, %v7187_v58  ;;  %v2671_v12 = vsel %vm2649_vm4, %v2591_v6, %v7188_v25  ;;  %v401_v25 = vld [vmem:[%s12291_s0 + $0x16c] sm:$0xff]  ;;  %v9768_v58 = vld [vmem:[%s12291_s0 + $0x175] sm:$0xff]  ;;  %v9796_v3 = vld [vmem:[%s12291_s0 + $0x17e] sm:$0xff] }
  0xfb   :  { %v7196_v31 = vpop.permute.xlu0 %7195  ;;  %v7203_v59 = vunpack.i.h.bf16 %v7201_v41  ;;  %v7202_v60 = vunpack.i.l.bf16 %v7201_v41  ;;  %v9801_v6 = vld [vmem:[%s12291_s0 + $0x166] sm:$0xff] }
  0xfc   :  { %7490 = vrot.lane.b32.xlu1 %v7489_v32, %s8169_s13  ;;  %v7198_v0 = vunpack.i.h.bf16 %v7196_v31  ;;  %v7197_v1 = vunpack.i.l.bf16 %v7196_v31 }
  0xfd   :  { %7485 = vrot.lane.b32.xlu0 %v7484_v38, %s8169_s13  ;;  %v2752_v13 = vsel %vm2729_vm5, %v2672_v57, %v7202_v60  ;;  %v2753_v14 = vsel %vm2729_vm5, %v2673_v8, %v7203_v59  ;;  %v9773_v59 = vld [vmem:[%s12291_s0 + $0x17d] sm:$0xff] }
  0xfe   :  { %v7211_v61 = vpop.permute.xlu1 %7210  ;;  %v2750_v16 = vsel %vm2729_vm5, %v2670_v11, %v7197_v1  ;;  %v2751_v17 = vsel %vm2729_vm5, %v2671_v12, %v7198_v0  ;;  %v67_v57 = vld [vmem:[%s12291_s0 + $0xd8] sm:$0xff]  ;;  %v64_v11 = vld [vmem:[%s12291_s0 + $0xc0] sm:$0xff]  ;;  %v65_v12 = vld [vmem:[%s12291_s0 + $0xc8] sm:$0xff] }
  0xff   :  { %v7206_v2 = vpop.permute.xlu0 %7205  ;;  %v7213_v7 = vunpack.i.h.bf16 %v7211_v61  ;;  %v7212_v56 = vunpack.i.l.bf16 %v7211_v61  ;;  %v9778_v61 = vld [vmem:[%s12291_s0 + $0x165] sm:$0xff] }
 0x100   :  { %7500 = vrot.lane.b32.xlu1 %v7499_v42, %s8170_s24  ;;  %v7208_v9 = vunpack.i.h.bf16 %v7206_v2  ;;  %v7207_v10 = vunpack.i.l.bf16 %v7206_v2 }
 0x101   :  { %7495 = vrot.lane.b32.xlu0 %v7494_v43, %s8170_s24  ;;  %v2832_v21 = vsel %vm2809_vm6, %v2752_v13, %v7212_v56  ;;  %v2833_v22 = vsel %vm2809_vm6, %v2753_v14, %v7213_v7  ;;  %v7529_v43 = vpack.i.bf16 %v166_v18, %v165_v33  ;;  %v9806_v7 = vld [vmem:[%s12291_s0 + $0x16e] sm:$0xff]  ;;  %v7559_v14 = vpack.i.bf16 %v403_v54, %v402_v53 }
 0x102   :  { %v7221_v15 = vpop.permute.xlu1 %7220  ;;  %v2830_v26 = vsel %vm2809_vm6, %v2750_v16, %v7207_v10  ;;  %v2831_v27 = vsel %vm2809_vm6, %v2751_v17, %v7208_v9  ;;  %v66_v56 = vld [vmem:[%s12291_s0 + $0xd0] sm:$0xff]  ;;  %v7544_v10 = vpack.i.bf16 %v322_v51, %v321_v50  ;;  %v7569_v16 = vpack.i.bf16 %v9773_v59, %v9768_v58 }
 0x103   :  { %v7223_v4 = vunpack.i.h.bf16 %v7221_v15  ;;  %v7222_v5 = vunpack.i.l.bf16 %v7221_v15  ;;  %v7216_v20 = vpop.permute.xlu0 %7215  ;;  %v7554_v15 = vpack.i.bf16 %v401_v25, %v9760_v55  ;;  %v7564_v17 = vpack.i.bf16 %v9783_v62, %v9778_v61 }
 0x104   :  { %v7218_v23 = vunpack.i.h.bf16 %v7216_v20  ;;  %v7217_v24 = vunpack.i.l.bf16 %v7216_v20  ;;  %7510 = vrot.lane.b32.xlu1 %v7509_v44, %s8171_s17  ;;  %v7524_v44 = vpack.i.bf16 %v164_v40, %v163_v39 }
 0x105   :  { %v2912_v28 = vsel %vm2889_vm7, %v2832_v21, %v7222_v5  ;;  %v2913_v32 = vsel %vm2889_vm7, %v2833_v22, %v7223_v4  ;;  %7505 = vrot.lane.b32.xlu0 %v7504_v45, %s8171_s17  ;;  %v244_v45 = vld [vmem:[%s12291_s0 + $0x172] sm:$0xff]  ;;  %v7579_v21 = vpack.i.bf16 %v9796_v3, %v9788_v63  ;;  %v7574_v22 = vpack.i.bf16 %v9806_v7, %v9801_v6  ;;  %v246_v6 = vld [vmem:[%s12291_s0 + $0x182] sm:$0xff]  ;;  %v247_v7 = vld [vmem:[%s12291_s0 + $0x18a] sm:$0xff] }
 0x106   :  { %v2910_v19 = vsel %vm2889_vm7, %v2830_v26, %v7217_v24  ;;  %v2911_v36 = vsel %vm2889_vm7, %v2831_v27, %v7218_v23  ;;  %v9704_v37 = vpop.permute.xlu1 %7230  ;;  %v2980_v38 = vpack.c.bf16 %v2913_v32, %v2912_v28  ;;  %v169_v3 = vld [vmem:[%s12291_s0 + $0x191] sm:$0xff] }
 0x107   :  { %v9712_v41 = vpop.permute.xlu0 %7225  ;;  %v2979_v42 = vpack.c.bf16 %v2911_v36, %v2910_v19  ;;  %v7233_v0 = vunpack.i.h.bf16 %v9704_v37  ;;  %v7232_v1 = vunpack.i.l.bf16 %v9704_v37 }
 0x108   :  { %7520 = vrot.lane.b32.xlu1 %v7519_v47, %s8172_s27  ;;  %v323_v47 = vld [vmem:[%s12291_s0 + $0x173] sm:$0xff]  ;;  %v7228_v8 = vunpack.i.h.bf16 %v9712_v41  ;;  %v7227_v9 = vunpack.i.l.bf16 %v9712_v41 }
 0x109   :  { %7515 = vrot.lane.b32.xlu0 %v7514_v48, %s8172_s27  ;;  %6682 = vmatprep.mubr.msk.bf16.mxu0 %vm3036_vm8, %v2979_v42  ;;  %v7539_v48 = vpack.i.bf16 %v245_v29, %v244_v45  ;;  %v7549_v2 = vpack.i.bf16 %v324_v49, %v323_v47  ;;  %v2516_v23 = vsel %vm2489_vm2, %v66_v56, %v7232_v1  ;;  %v170_v56 = vld [vmem:[%s12291_s0 + $0x199] sm:$0xff] }
 0x10a   :  { %6683 = vmatmul.mubr.msk.bf16.gmra.mxu0 %vm3036_vm8, %v2980_v38  ;;  %v9727_v30 = vpop.permute.xlu1 %7240  ;;  %v2517_v24 = vsel %vm2489_vm2, %v67_v57, %v7233_v0  ;;  %v2514_v28 = vsel %vm2489_vm2, %v64_v11, %v7227_v9  ;;  %v2515_v32 = vsel %vm2489_vm2, %v65_v12, %v7228_v8  ;;  %v167_v11 = vld [vmem:[%s12291_s0 + $0x181] sm:$0xff]  ;;  %v168_v12 = vld [vmem:[%s12291_s0 + $0x189] sm:$0xff] }
 0x10b   :  { %v9735_v31 = vpop.permute.xlu0 %7235  ;;  %v7243_v4 = vunpack.i.h.bf16 %v9727_v30  ;;  %v7242_v5 = vunpack.i.l.bf16 %v9727_v30 }
 0x10c   :  { %7530 = vrot.lane.b32.xlu1 %v7529_v43, %s8168_s15  ;;  %v7238_v26 = vunpack.i.h.bf16 %v9735_v31  ;;  %v7237_v27 = vunpack.i.l.bf16 %v9735_v31 }
 0x10d   :  { %7525 = vrot.lane.b32.xlu0 %v7524_v44, %s8168_s15  ;;  %v2596_v40 = vsel %vm2569_vm3, %v2516_v23, %v7242_v5  ;;  %v2597_v41 = vsel %vm2569_vm3, %v2517_v24, %v7243_v4  ;;  %v249_v4 = vld [vmem:[%s12291_s0 + $0x19a] sm:$0xff]  ;;  %v325_v24 = vld [vmem:[%s12291_s0 + $0x183] sm:$0xff] }
 0x10e   :  { %v7251_v46 = vpop.permute.xlu1 %7250  ;;  %v2594_v45 = vsel %vm2569_vm3, %v2514_v28, %v7237_v27  ;;  %v2595_v29 = vsel %vm2569_vm3, %v2515_v32, %v7238_v26  ;;  %v328_v23 = vld [vmem:[%s12291_s0 + $0x19b] sm:$0xff]  ;;  %v326_v26 = vld [vmem:[%s12291_s0 + $0x18b] sm:$0xff]  ;;  %v7594_v27 = vpack.i.bf16 %v247_v7, %v246_v6 }
 0x10f   :  { %v7246_v60 = vpop.permute.xlu0 %7245  ;;  %v7253_v33 = vunpack.i.h.bf16 %v7251_v46  ;;  %v7252_v18 = vunpack.i.l.bf16 %v7251_v46  ;;  %v406_v28 = vld [vmem:[%s12291_s0 + $0x194] sm:$0xff]  ;;  %v407_v32 = vld [vmem:[%s12291_s0 + $0x19c] sm:$0xff] }
 0x110   :  { %7540 = vrot.lane.b32.xlu1 %v7539_v48, %s8167_s14  ;;  %v7248_v19 = vunpack.i.h.bf16 %v7246_v60  ;;  %v7247_v36 = vunpack.i.l.bf16 %v7246_v60 }
 0x111   :  { %7535 = vrot.lane.b32.xlu0 %v7534_v52, %s8167_s14  ;;  %v2676_v35 = vsel %vm2649_vm4, %v2596_v40, %v7252_v18  ;;  %v2677_v31 = vsel %vm2649_vm4, %v2597_v41, %v7253_v33  ;;  %v9928_v33 = vld [vmem:[%s12291_s0 + $0x184] sm:$0xff]  ;;  %v9951_v40 = vld [vmem:[%s12291_s0 + $0x18d] sm:$0xff]  ;;  %v9956_v41 = vld [vmem:[%s12291_s0 + $0x196] sm:$0xff] }
 0x112   :  { %v7261_v13 = vpop.permute.xlu1 %7260  ;;  %v2674_v49 = vsel %vm2649_vm4, %v2594_v45, %v7247_v36  ;;  %v2675_v50 = vsel %vm2649_vm4, %v2595_v29, %v7248_v19  ;;  %v405_v19 = vld [vmem:[%s12291_s0 + $0x18c] sm:$0xff]  ;;  %v9936_v36 = vld [vmem:[%s12291_s0 + $0x195] sm:$0xff]  ;;  %v9964_v45 = vld [vmem:[%s12291_s0 + $0x19e] sm:$0xff] }
 0x113   :  { %v7256_v20 = vpop.permute.xlu0 %7255  ;;  %v7263_v37 = vunpack.i.h.bf16 %v7261_v13  ;;  %v7262_v38 = vunpack.i.l.bf16 %v7261_v13  ;;  %v9969_v29 = vld [vmem:[%s12291_s0 + $0x186] sm:$0xff] }
 0x114   :  { %7550 = vrot.lane.b32.xlu1 %v7549_v2, %s8169_s13  ;;  %v7258_v42 = vunpack.i.h.bf16 %v7256_v20  ;;  %v7257_v43 = vunpack.i.l.bf16 %v7256_v20 }
 0x115   :  { %7545 = vrot.lane.b32.xlu0 %v7544_v10, %s8169_s13  ;;  %v2756_v51 = vsel %vm2729_vm5, %v2676_v35, %v7262_v38  ;;  %v2757_v52 = vsel %vm2729_vm5, %v2677_v31, %v7263_v37  ;;  %v9941_v37 = vld [vmem:[%s12291_s0 + $0x19d] sm:$0xff] }
 0x116   :  { %v7271_v39 = vpop.permute.xlu1 %7270  ;;  %v2754_v54 = vsel %vm2729_vm5, %v2674_v49, %v7257_v43  ;;  %v2755_v55 = vsel %vm2729_vm5, %v2675_v50, %v7258_v42  ;;  %v71_v35 = vld [vmem:[%s12291_s0 + $0xf8] sm:$0xff]  ;;  %v68_v49 = vld [vmem:[%s12291_s0 + $0xe0] sm:$0xff]  ;;  %v69_v50 = vld [vmem:[%s12291_s0 + $0xe8] sm:$0xff] }
 0x117   :  { %v7266_v44 = vpop.permute.xlu0 %7265  ;;  %v7273_v30 = vunpack.i.h.bf16 %v7271_v39  ;;  %v7272_v34 = vunpack.i.l.bf16 %v7271_v39  ;;  %v9946_v39 = vld [vmem:[%s12291_s0 + $0x185] sm:$0xff] }
 0x118   :  { %7560 = vrot.lane.b32.xlu1 %v7559_v14, %s8170_s24  ;;  %v7268_v47 = vunpack.i.h.bf16 %v7266_v44  ;;  %v7267_v48 = vunpack.i.l.bf16 %v7266_v44 }
 0x119   :  { %7555 = vrot.lane.b32.xlu0 %v7554_v15, %s8170_s24  ;;  %v2836_v59 = vsel %vm2809_vm6, %v2756_v51, %v7272_v34  ;;  %v2837_v60 = vsel %vm2809_vm6, %v2757_v52, %v7273_v30  ;;  %v7589_v15 = vpack.i.bf16 %v170_v56, %v169_v3  ;;  %v9974_v30 = vld [vmem:[%s12291_s0 + $0x18e] sm:$0xff]  ;;  %v7619_v52 = vpack.i.bf16 %v407_v32, %v406_v28 }
 0x11a   :  { %v7281_v53 = vpop.permute.xlu1 %7280  ;;  %v2834_v63 = vsel %vm2809_vm6, %v2754_v54, %v7267_v48  ;;  %v2835_v0 = vsel %vm2809_vm6, %v2755_v55, %v7268_v47  ;;  %v70_v34 = vld [vmem:[%s12291_s0 + $0xf0] sm:$0xff]  ;;  %v7604_v48 = vpack.i.bf16 %v326_v26, %v325_v24  ;;  %v7629_v54 = vpack.i.bf16 %v9941_v37, %v9936_v36 }
 0x11b   :  { %v7283_v46 = vunpack.i.h.bf16 %v7281_v53  ;;  %v7282_v25 = vunpack.i.l.bf16 %v7281_v53  ;;  %v7276_v58 = vpop.permute.xlu0 %7275  ;;  %v7614_v53 = vpack.i.bf16 %v405_v19, %v9928_v33  ;;  %v7624_v55 = vpack.i.bf16 %v9951_v40, %v9946_v39 }
 0x11c   :  { %v7278_v61 = vunpack.i.h.bf16 %v7276_v58  ;;  %v7277_v62 = vunpack.i.l.bf16 %v7276_v58  ;;  %7570 = vrot.lane.b32.xlu1 %v7569_v16, %s8171_s17  ;;  %v7584_v16 = vpack.i.bf16 %v168_v12, %v167_v11 }
 0x11d   :  { %v2916_v1 = vsel %vm2889_vm7, %v2836_v59, %v7282_v25  ;;  %v2917_v2 = vsel %vm2889_vm7, %v2837_v60, %v7283_v46  ;;  %7565 = vrot.lane.b32.xlu0 %v7564_v17, %s8171_s17  ;;  %v248_v17 = vld [vmem:[%s12291_s0 + $0x192] sm:$0xff]  ;;  %v7639_v59 = vpack.i.bf16 %v9964_v45, %v9956_v41  ;;  %v7634_v60 = vpack.i.bf16 %v9974_v30, %v9969_v29  ;;  %v250_v29 = vld [vmem:[%s12291_s0 + $0x1a2] sm:$0xff]  ;;  %v251_v30 = vld [vmem:[%s12291_s0 + $0x1aa] sm:$0xff] }
 0x11e   :  { %v2914_v57 = vsel %vm2889_vm7, %v2834_v63, %v7277_v62  ;;  %v2915_v8 = vsel %vm2889_vm7, %v2835_v0, %v7278_v61  ;;  %v9872_v9 = vpop.permute.xlu1 %7290  ;;  %v2982_v10 = vpack.c.bf16 %v2917_v2, %v2916_v1  ;;  %v173_v45 = vld [vmem:[%s12291_s0 + $0x1b1] sm:$0xff] }
 0x11f   :  { %v9880_v13 = vpop.permute.xlu0 %7285  ;;  %v2981_v14 = vpack.c.bf16 %v2915_v8, %v2914_v57  ;;  %v7293_v42 = vunpack.i.h.bf16 %v9872_v9  ;;  %v7292_v43 = vunpack.i.l.bf16 %v9872_v9 }
 0x120   :  { %7580 = vrot.lane.b32.xlu1 %v7579_v21, %s8172_s27  ;;  %v327_v21 = vld [vmem:[%s12291_s0 + $0x193] sm:$0xff]  ;;  %v7288_v31 = vunpack.i.h.bf16 %v9880_v13  ;;  %v7287_v47 = vunpack.i.l.bf16 %v9880_v13 }
 0x121   :  { %7575 = vrot.lane.b32.xlu0 %v7574_v22, %s8172_s27  ;;  %6686 = vmatprep.mubr.msk.bf16.mxu0 %vm3036_vm8, %v2981_v14  ;;  %v7599_v22 = vpack.i.bf16 %v249_v4, %v248_v17  ;;  %v7609_v44 = vpack.i.bf16 %v328_v23, %v327_v21  ;;  %v2520_v61 = vsel %vm2489_vm2, %v70_v34, %v7292_v43  ;;  %v174_v34 = vld [vmem:[%s12291_s0 + $0x1b9] sm:$0xff] }
 0x122   :  { %6687 = vmatmul.mubr.msk.bf16.gmra.mxu0 %vm3036_vm8, %v2982_v10  ;;  %v9895_v5 = vpop.permute.xlu1 %7300  ;;  %v2521_v62 = vsel %vm2489_vm2, %v71_v35, %v7293_v42  ;;  %v2518_v1 = vsel %vm2489_vm2, %v68_v49, %v7287_v47  ;;  %v2519_v2 = vsel %vm2489_vm2, %v69_v50, %v7288_v31  ;;  %v171_v49 = vld [vmem:[%s12291_s0 + $0x1a1] sm:$0xff]  ;;  %v172_v50 = vld [vmem:[%s12291_s0 + $0x1a9] sm:$0xff] }
 0x123   :  { %v9903_v20 = vpop.permute.xlu0 %7295  ;;  %v7303_v46 = vunpack.i.h.bf16 %v9895_v5  ;;  %v7302_v25 = vunpack.i.l.bf16 %v9895_v5 }
 0x124   :  { %7590 = vrot.lane.b32.xlu1 %v7589_v15, %s8168_s15  ;;  %v7298_v63 = vunpack.i.h.bf16 %v9903_v20  ;;  %v7297_v0 = vunpack.i.l.bf16 %v9903_v20 }
 0x125   :  { %7585 = vrot.lane.b32.xlu0 %v7584_v16, %s8168_s15  ;;  %v2600_v12 = vsel %vm2569_vm3, %v2520_v61, %v7302_v25  ;;  %v2601_v13 = vsel %vm2569_vm3, %v2521_v62, %v7303_v46  ;;  %v253_v46 = vld [vmem:[%s12291_s0 + $0x1ba] sm:$0xff]  ;;  %v329_v62 = vld [vmem:[%s12291_s0 + $0x1a3] sm:$0xff] }
 0x126   :  { %v7311_v18 = vpop.permute.xlu1 %7310  ;;  %v2598_v17 = vsel %vm2569_vm3, %v2518_v1, %v7297_v0  ;;  %v2599_v4 = vsel %vm2569_vm3, %v2519_v2, %v7298_v63  ;;  %v332_v61 = vld [vmem:[%s12291_s0 + $0x1bb] sm:$0xff]  ;;  %v330_v63 = vld [vmem:[%s12291_s0 + $0x1ab] sm:$0xff]  ;;  %v7654_v0 = vpack.i.bf16 %v251_v30, %v250_v29 }
 0x127   :  { %v7306_v38 = vpop.permute.xlu0 %7305  ;;  %v7313_v3 = vunpack.i.h.bf16 %v7311_v18  ;;  %v7312_v56 = vunpack.i.l.bf16 %v7311_v18  ;;  %v410_v1 = vld [vmem:[%s12291_s0 + $0x1b4] sm:$0xff]  ;;  %v411_v2 = vld [vmem:[%s12291_s0 + $0x1bc] sm:$0xff] }
 0x128   :  { %7600 = vrot.lane.b32.xlu1 %v7599_v22, %s8167_s14  ;;  %v7308_v57 = vunpack.i.h.bf16 %v7306_v38  ;;  %v7307_v8 = vunpack.i.l.bf16 %v7306_v38 }
 0x129   :  { %7595 = vrot.lane.b32.xlu0 %v7594_v27, %s8167_s14  ;;  %v2680_v7 = vsel %vm2649_vm4, %v2600_v12, %v7312_v56  ;;  %v2681_v20 = vsel %vm2649_vm4, %v2601_v13, %v7313_v3  ;;  %v10096_v3 = vld [vmem:[%s12291_s0 + $0x1a4] sm:$0xff]  ;;  %v10119_v12 = vld [vmem:[%s12291_s0 + $0x1ad] sm:$0xff]  ;;  %v10124_v13 = vld [vmem:[%s12291_s0 + $0x1b6] sm:$0xff] }
 0x12a   :  { %v7321_v51 = vpop.permute.xlu1 %7320  ;;  %v2678_v23 = vsel %vm2649_vm4, %v2598_v17, %v7307_v8  ;;  %v2679_v24 = vsel %vm2649_vm4, %v2599_v4, %v7308_v57  ;;  %v409_v57 = vld [vmem:[%s12291_s0 + $0x1ac] sm:$0xff]  ;;  %v10104_v8 = vld [vmem:[%s12291_s0 + $0x1b5] sm:$0xff]  ;;  %v10132_v17 = vld [vmem:[%s12291_s0 + $0x1be] sm:$0xff] }
 0x12b   :  { %v7316_v58 = vpop.permute.xlu0 %7315  ;;  %v7323_v9 = vunpack.i.h.bf16 %v7321_v51  ;;  %v7322_v10 = vunpack.i.l.bf16 %v7321_v51  ;;  %v10137_v4 = vld [vmem:[%s12291_s0 + $0x1a6] sm:$0xff] }
 0x12c   :  { %7610 = vrot.lane.b32.xlu1 %v7609_v44, %s8169_s13  ;;  %v7318_v14 = vunpack.i.h.bf16 %v7316_v58  ;;  %v7317_v15 = vunpack.i.l.bf16 %v7316_v58 }
 0x12d   :  { %7605 = vrot.lane.b32.xlu0 %v7604_v48, %s8169_s13  ;;  %v2760_v26 = vsel %vm2729_vm5, %v2680_v7, %v7322_v10  ;;  %v2761_v27 = vsel %vm2729_vm5, %v2681_v20, %v7323_v9  ;;  %v10109_v9 = vld [vmem:[%s12291_s0 + $0x1bd] sm:$0xff] }
 0x12e   :  { %v7331_v11 = vpop.permute.xlu1 %7330  ;;  %v2758_v32 = vsel %vm2729_vm5, %v2678_v23, %v7317_v15  ;;  %v2759_v33 = vsel %vm2729_vm5, %v2679_v24, %v7318_v14  ;;  %v75_v7 = vld [vmem:[%s12291_s0 + $0x118] sm:$0xff]  ;;  %v72_v23 = vld [vmem:[%s12291_s0 + $0x100] sm:$0xff]  ;;  %v73_v24 = vld [vmem:[%s12291_s0 + $0x108] sm:$0xff] }
 0x12f   :  { %v7326_v16 = vpop.permute.xlu0 %7325  ;;  %v7333_v5 = vunpack.i.h.bf16 %v7331_v11  ;;  %v7332_v6 = vunpack.i.l.bf16 %v7331_v11  ;;  %v10114_v11 = vld [vmem:[%s12291_s0 + $0x1a5] sm:$0xff] }
 0x130   :  { %7620 = vrot.lane.b32.xlu1 %v7619_v52, %s8170_s24  ;;  %v7328_v21 = vunpack.i.h.bf16 %v7326_v16  ;;  %v7327_v22 = vunpack.i.l.bf16 %v7326_v16 }
 0x131   :  { %7615 = vrot.lane.b32.xlu0 %v7614_v53, %s8170_s24  ;;  %v2840_v37 = vsel %vm2809_vm6, %v2760_v26, %v7332_v6  ;;  %v2841_v38 = vsel %vm2809_vm6, %v2761_v27, %v7333_v5  ;;  %v7649_v53 = vpack.i.bf16 %v174_v34, %v173_v45  ;;  %v10142_v5 = vld [vmem:[%s12291_s0 + $0x1ae] sm:$0xff]  ;;  %v7679_v27 = vpack.i.bf16 %v411_v2, %v410_v1 }
 0x132   :  { %v7341_v28 = vpop.permute.xlu1 %7340  ;;  %v2838_v41 = vsel %vm2809_vm6, %v2758_v32, %v7327_v22  ;;  %v2839_v42 = vsel %vm2809_vm6, %v2759_v33, %v7328_v21  ;;  %v74_v6 = vld [vmem:[%s12291_s0 + $0x110] sm:$0xff]  ;;  %v7664_v22 = vpack.i.bf16 %v330_v63, %v329_v62  ;;  %v7689_v32 = vpack.i.bf16 %v10109_v9, %v10104_v8 }
 0x133   :  { %v7343_v18 = vunpack.i.h.bf16 %v7341_v28  ;;  %v7342_v19 = vunpack.i.l.bf16 %v7341_v28  ;;  %v7336_v36 = vpop.permute.xlu0 %7335  ;;  %v7674_v28 = vpack.i.bf16 %v409_v57, %v10096_v3  ;;  %v7684_v33 = vpack.i.bf16 %v10119_v12, %v10114_v11 }
 0x134   :  { %v7338_v39 = vunpack.i.h.bf16 %v7336_v36  ;;  %v7337_v40 = vunpack.i.l.bf16 %v7336_v36  ;;  %7630 = vrot.lane.b32.xlu1 %v7629_v54, %s8171_s17  ;;  %v7644_v54 = vpack.i.bf16 %v172_v50, %v171_v49 }
 0x135   :  { %v2920_v43 = vsel %vm2889_vm7, %v2840_v37, %v7342_v19  ;;  %v2921_v44 = vsel %vm2889_vm7, %v2841_v38, %v7343_v18  ;;  %7625 = vrot.lane.b32.xlu0 %v7624_v55, %s8171_s17  ;;  %v252_v55 = vld [vmem:[%s12291_s0 + $0x1b2] sm:$0xff]  ;;  %v7699_v37 = vpack.i.bf16 %v10132_v17, %v10124_v13  ;;  %v7694_v38 = vpack.i.bf16 %v10142_v5, %v10137_v4  ;;  %v254_v4 = vld [vmem:[%s12291_s0 + $0x1c2] sm:$0xff]  ;;  %v255_v5 = vld [vmem:[%s12291_s0 + $0x1ca] sm:$0xff] }
 0x136   :  { %v2918_v35 = vsel %vm2889_vm7, %v2838_v41, %v7337_v40  ;;  %v2919_v31 = vsel %vm2889_vm7, %v2839_v42, %v7338_v39  ;;  %v10040_v47 = vpop.permute.xlu1 %7350  ;;  %v2984_v48 = vpack.c.bf16 %v2921_v44, %v2920_v43  ;;  %v177_v17 = vld [vmem:[%s12291_s0 + $0x1d1] sm:$0xff] }
 0x137   :  { %v10048_v51 = vpop.permute.xlu0 %7345  ;;  %v2983_v52 = vpack.c.bf16 %v2919_v31, %v2918_v35  ;;  %v7353_v14 = vunpack.i.h.bf16 %v10040_v47  ;;  %v7352_v15 = vunpack.i.l.bf16 %v10040_v47 }
 0x138   :  { %7640 = vrot.lane.b32.xlu1 %v7639_v59, %s8172_s27  ;;  %v331_v59 = vld [vmem:[%s12291_s0 + $0x1b3] sm:$0xff]  ;;  %v7348_v20 = vunpack.i.h.bf16 %v10048_v51  ;;  %v7347_v21 = vunpack.i.l.bf16 %v10048_v51 }
 0x139   :  { %7635 = vrot.lane.b32.xlu0 %v7634_v60, %s8172_s27  ;;  %6690 = vmatprep.mubr.msk.bf16.mxu0 %vm3036_vm8, %v2983_v52  ;;  %v7659_v60 = vpack.i.bf16 %v253_v46, %v252_v55  ;;  %v7669_v16 = vpack.i.bf16 %v332_v61, %v331_v59  ;;  %v2524_v39 = vsel %vm2489_vm2, %v74_v6, %v7352_v15  ;;  %v178_v6 = vld [vmem:[%s12291_s0 + $0x1d9] sm:$0xff] }
 0x13a   :  { %6691 = vmatmul.mubr.msk.bf16.gmra.mxu0 %vm3036_vm8, %v2984_v48  ;;  %v10063_v25 = vpop.permute.xlu1 %7360  ;;  %v2525_v40 = vsel %vm2489_vm2, %v75_v7, %v7353_v14  ;;  %v2522_v43 = vsel %vm2489_vm2, %v72_v23, %v7347_v21  ;;  %v2523_v44 = vsel %vm2489_vm2, %v73_v24, %v7348_v20  ;;  %v175_v23 = vld [vmem:[%s12291_s0 + $0x1c1] sm:$0xff]  ;;  %v176_v24 = vld [vmem:[%s12291_s0 + $0x1c9] sm:$0xff] }
 0x13b   :  { %v10071_v58 = vpop.permute.xlu0 %7355  ;;  %v7363_v18 = vunpack.i.h.bf16 %v10063_v25  ;;  %v7362_v19 = vunpack.i.l.bf16 %v10063_v25 }
 0x13c   :  { %7650 = vrot.lane.b32.xlu1 %v7649_v53, %s8168_s15  ;;  %v7358_v41 = vunpack.i.h.bf16 %v10071_v58  ;;  %v7357_v42 = vunpack.i.l.bf16 %v10071_v58 }
 0x13d   :  { %7645 = vrot.lane.b32.xlu0 %v7644_v54, %s8168_s15  ;;  %v2604_v50 = vsel %vm2569_vm3, %v2524_v39, %v7362_v19  ;;  %v2605_v51 = vsel %vm2569_vm3, %v2525_v40, %v7363_v18  ;;  %v256_v18 = vld [vmem:[%s12291_s0 + $0x1d2] sm:$0xff]  ;;  %v257_v19 = vld [vmem:[%s12291_s0 + $0x1da] sm:$0xff] }
 0x13e   :  { %v7371_v56 = vpop.permute.xlu1 %7370  ;;  %v2602_v55 = vsel %vm2569_vm3, %v2522_v43, %v7357_v42  ;;  %v2603_v46 = vsel %vm2569_vm3, %v2523_v44, %v7358_v41  ;;  %v335_v40 = vld [vmem:[%s12291_s0 + $0x1d3] sm:$0xff]  ;;  %v336_v41 = vld [vmem:[%s12291_s0 + $0x1db] sm:$0xff]  ;;  %v7719_v43 = vpack.i.bf16 %v257_v19, %v256_v18  ;;  %v333_v44 = vld [vmem:[%s12291_s0 + $0x1c3] sm:$0xff] }
 0x13f   :  { %v7366_v10 = vpop.permute.xlu0 %7365  ;;  %v7373_v45 = vunpack.i.h.bf16 %v7371_v56  ;;  %v7372_v34 = vunpack.i.l.bf16 %v7371_v56 }
 0x140   :  { %7660 = vrot.lane.b32.xlu1 %v7659_v60, %s8167_s14  ;;  %v7368_v35 = vunpack.i.h.bf16 %v7366_v10  ;;  %v7367_v31 = vunpack.i.l.bf16 %v7366_v10 }
 0x141   :  { %7655 = vrot.lane.b32.xlu0 %v7654_v0, %s8167_s14  ;;  %v2684_v30 = vsel %vm2649_vm4, %v2604_v50, %v7372_v34  ;;  %v2685_v58 = vsel %vm2649_vm4, %v2605_v51, %v7373_v45  ;;  %v334_v45 = vld [vmem:[%s12291_s0 + $0x1cb] sm:$0xff]  ;;  %v10263_v34 = vld [vmem:[%s12291_s0 + $0x1d4] sm:$0xff] }
 0x142   :  { %v7381_v26 = vpop.permute.xlu1 %7380  ;;  %v2682_v61 = vsel %vm2649_vm4, %v2602_v55, %v7367_v31  ;;  %v2683_v62 = vsel %vm2649_vm4, %v2603_v46, %v7368_v35  ;;  %v10280_v50 = vld [vmem:[%s12291_s0 + $0x1cc] sm:$0xff] }
 0x143   :  { %v7376_v36 = vpop.permute.xlu0 %7375  ;;  %v7383_v47 = vunpack.i.h.bf16 %v7381_v26  ;;  %v7382_v48 = vunpack.i.l.bf16 %v7381_v26  ;;  %v10297_v55 = vld [vmem:[%s12291_s0 + $0x1c5] sm:$0xff] }
 0x144   :  { %7670 = vrot.lane.b32.xlu1 %v7669_v16, %s8169_s13  ;;  %v7378_v52 = vunpack.i.h.bf16 %v7376_v36  ;;  %v7377_v53 = vunpack.i.l.bf16 %v7376_v36 }
 0x145   :  { %7665 = vrot.lane.b32.xlu0 %v7664_v22, %s8169_s13  ;;  %v2764_v63 = vsel %vm2729_vm5, %v2684_v30, %v7382_v48  ;;  %v2765_v0 = vsel %vm2729_vm5, %v2685_v58, %v7383_v47  ;;  %v7714_v47 = vpack.i.bf16 %v255_v5, %v254_v4  ;;  %v10270_v48 = vld [vmem:[%s12291_s0 + $0x1dc] sm:$0xff]  ;;  %v7729_v30 = vpack.i.bf16 %v336_v41, %v335_v40  ;;  %v10306_v58 = vld [vmem:[%s12291_s0 + $0x1cd] sm:$0xff] }
 0x146   :  { %v7391_v49 = vpop.permute.xlu1 %7390  ;;  %v2762_v2 = vsel %vm2729_vm5, %v2682_v61, %v7377_v53  ;;  %v2763_v3 = vsel %vm2729_vm5, %v2683_v62, %v7378_v52  ;;  %v10287_v53 = vld [vmem:[%s12291_s0 + $0x1d5] sm:$0xff] }
 0x147   :  { %v7386_v54 = vpop.permute.xlu0 %7385  ;;  %v7393_v25 = vunpack.i.h.bf16 %v7391_v49  ;;  %v7392_v29 = vunpack.i.l.bf16 %v7391_v49  ;;  %v10275_v49 = vld [vmem:[%s12291_s0 + $0x1c4] sm:$0xff] }
 0x148   :  { %7680 = vrot.lane.b32.xlu1 %v7679_v27, %s8170_s24  ;;  %v7388_v59 = vunpack.i.h.bf16 %v7386_v54  ;;  %v7387_v60 = vunpack.i.l.bf16 %v7386_v54  ;;  %v10292_v54 = vld [vmem:[%s12291_s0 + $0x1dd] sm:$0xff] }
 0x149   :  { %7675 = vrot.lane.b32.xlu0 %v7674_v28, %s8170_s24  ;;  %v2844_v9 = vsel %vm2809_vm6, %v2764_v63, %v7392_v29  ;;  %v2845_v10 = vsel %vm2809_vm6, %v2765_v0, %v7393_v25  ;;  %v10222_v28 = vld [vmem:[%s12293_s2] ss:$0 sm:$0xff]  ;;  %v7724_v0 = vpack.i.bf16 %v334_v45, %v333_v44 }
 0x14a   :  { %v7401_v1 = vpop.permute.xlu1 %7400  ;;  %v2842_v13 = vsel %vm2809_vm6, %v2762_v2, %v7387_v60  ;;  %v2843_v14 = vsel %vm2809_vm6, %v2763_v3, %v7388_v59  ;;  %v10311_v59 = vld [vmem:[%s12291_s0 + $0x1d6] sm:$0xff]  ;;  %v10316_v60 = vld [vmem:[%s12291_s0 + $0x1de] sm:$0xff]  ;;  %v10326_v2 = vld [vmem:[%s12291_s0 + $0x1c6] sm:$0xff] }
 0x14b   :  { %v7403_v56 = vunpack.i.h.bf16 %v7401_v1  ;;  %v7402_v57 = vunpack.i.l.bf16 %v7401_v1  ;;  %v7396_v8 = vpop.permute.xlu0 %7395  ;;  %v7739_v1 = vpack.i.bf16 %v10270_v48, %v10263_v34  ;;  %v10331_v3 = vld [vmem:[%s12291_s0 + $0x1ce] sm:$0xff] }
 0x14c   :  { %v7398_v11 = vunpack.i.h.bf16 %v7396_v8  ;;  %v7397_v12 = vunpack.i.l.bf16 %v7396_v8  ;;  %7690 = vrot.lane.b32.xlu1 %v7689_v32, %s8171_s17  ;;  %v7709_v32 = vpack.i.bf16 %v178_v6, %v177_v17  ;;  %v7744_v17 = vpack.i.bf16 %v10306_v58, %v10297_v55 }
 0x14d   :  { %v2924_v15 = vsel %vm2889_vm7, %v2844_v9, %v7402_v57  ;;  %v2925_v16 = vsel %vm2889_vm7, %v2845_v10, %v7403_v56  ;;  %7685 = vrot.lane.b32.xlu0 %v7684_v33, %s8171_s17  ;;  %v7704_v33 = vpack.i.bf16 %v176_v24, %v175_v23  ;;  %v78_v56 = vld [vmem:[%s12291_s0 + $0x130] sm:$0xff]  ;;  %v79_v57 = vld [vmem:[%s12291_s0 + $0x138] sm:$0xff]  ;;  %v7759_v6 = vpack.i.bf16 %v10316_v60, %v10311_v59  ;;  %v258_v60 = vld [vmem:[%s12291_s0 + $0x1e2] sm:$0xff] }
 0x14e   :  { %v2922_v7 = vsel %vm2889_vm7, %v2842_v13, %v7397_v12  ;;  %v2923_v20 = vsel %vm2889_vm7, %v2843_v14, %v7398_v11  ;;  %v10208_v21 = vpop.permute.xlu1 %7410  ;;  %v2986_v22 = vpack.c.bf16 %v2925_v16, %v2924_v15  ;;  %v76_v12 = vld [vmem:[%s12291_s0 + $0x120] sm:$0xff]  ;;  %v77_v13 = vld [vmem:[%s12291_s0 + $0x128] sm:$0xff]  ;;  %v7734_v15 = vpack.i.bf16 %v10280_v50, %v10275_v49 }
 0x14f   :  { %v10216_v26 = vpop.permute.xlu0 %7405  ;;  %v2985_v27 = vpack.c.bf16 %v2923_v20, %v2922_v7  ;;  %v7413_v61 = vunpack.i.h.bf16 %v10208_v21  ;;  %v7412_v62 = vunpack.i.l.bf16 %v10208_v21  ;;  %v7749_v16 = vpack.i.bf16 %v10292_v54, %v10287_v53 }
 0x150   :  { %7700 = vrot.lane.b32.xlu1 %v7699_v37, %s8172_s27  ;;  %v7408_v8 = vunpack.i.h.bf16 %v10216_v26  ;;  %v7407_v9 = vunpack.i.l.bf16 %v10216_v26  ;;  %v7754_v23 = vpack.i.bf16 %v10331_v3, %v10326_v2  ;;  %v259_v2 = vld [vmem:[%s12291_s0 + $0x1ea] sm:$0xff] }
 0x151   :  { %7695 = vrot.lane.b32.xlu0 %v7694_v38, %s8172_s27  ;;  %6694 = vmatprep.mubr.msk.bf16.mxu0 %vm3036_vm8, %v2985_v27  ;;  %v2528_v24 = vsel %vm2489_vm2, %v78_v56, %v7412_v62  ;;  %v2529_v26 = vsel %vm2489_vm2, %v79_v57, %v7413_v61 }
 0x152   :  { %v6664_v36 = vpop.f32.mrf.mxu0  ;;  %6695 = vmatmul.mubr.msk.bf16.gmra.mxu0 %vm3036_vm8, %v2986_v22  ;;  %v10236_v37 = vpop.permute.xlu1 %7420  ;;  %v2527_v18 = vsel %vm2489_vm2, %v77_v13, %v7408_v8 }
 0x153   :  { %v3207_v38 = vadd.f32 %v6664_v36, %v10222_v28  ;;  %v10245_v39 = vpop.permute.xlu0 %7415  ;;  %v7423_v7 = vunpack.i.h.bf16 %v10236_v37  ;;  %v7422_v20 = vunpack.i.l.bf16 %v10236_v37 }
 0x154   :  { %v3198_v42 = vpop.f32.mrf.mxu0  ;;  %7710 = vrot.lane.b32.xlu1 %v7709_v32, %s8168_s15  ;;  %v7418_v27 = vunpack.i.h.bf16 %v10245_v39  ;;  %v7417_v32 = vunpack.i.l.bf16 %v10245_v39 }
 0x155   :  { %v3518_v35 = vmax.f32 %v3207_v38, 0.0  ;;  %v3199_v31 = vadd.f32 %v10222_v28, %v3198_v42  ;;  %7705 = vrot.lane.b32.xlu0 %v7704_v33, %s8168_s15  ;;  %v2526_v33 = vsel %vm2489_vm2, %v76_v12, %v7407_v9  ;;  %v2608_v40 = vsel %vm2569_vm3, %v2528_v24, %v7422_v20  ;;  %v181_v9 = vld [vmem:[%s12291_s0 + $0x1f1] sm:$0xff]  ;;  %v261_v24 = vld [vmem:[%s12291_s0 + $0x1fa] sm:$0xff] }
 0x156   :  { %v6665_v51 = vpop.f32.mrf.mxu0  ;;  %v10282_v52 = vpop.permute.xlu1 %7430  ;;  %v2609_v41 = vsel %vm2569_vm3, %v2529_v26, %v7423_v7  ;;  %v2606_v45 = vsel %vm2569_vm3, %v2526_v33, %v7417_v32  ;;  %v2607_v34 = vsel %vm2569_vm3, %v2527_v18, %v7418_v27  ;;  %v340_v27 = vld [vmem:[%s12291_s0 + $0x1fb] sm:$0xff]  ;;  %v337_v18 = vld [vmem:[%s12291_s0 + $0x1e3] sm:$0xff] }
 0x157   :  { %3598 = vst.msk [vmem:[#allocation2 + $0x10] sm:$0xff] %vm3595_vm9, %v3518_v35  ;;  %v3516_v46 = vmax.f32 %v3199_v31, 0.0  ;;  %v3210_v25 = vadd.f32 %v6665_v51, %v10222_v28  ;;  %v10301_v29 = vpop.permute.xlu0 %7425  ;;  %v7433_v19 = vunpack.i.h.bf16 %v10282_v52  ;;  %v7432_v36 = vunpack.i.l.bf16 %v10282_v52 }
 0x158   :  { %v3201_v63 = vpop.f32.mrf.mxu0  ;;  %7720 = vrot.lane.b32.xlu1 %v7719_v43, %s8167_s14  ;;  %v7428_v37 = vunpack.i.h.bf16 %v10301_v29  ;;  %v7427_v4 = vunpack.i.l.bf16 %v10301_v29 }
 0x159   :  { %3596 = vst.msk [vmem:[#allocation2] sm:$0xff] %vm3595_vm9, %v3516_v46  ;;  %v3519_v10 = vmax.f32 %v3210_v25, 0.0  ;;  %v3202_v11 = vadd.f32 %v10222_v28, %v3201_v63  ;;  %7715 = vrot.lane.b32.xlu0 %v7714_v47, %s8167_s14  ;;  %v2688_v47 = vsel %vm2649_vm4, %v2608_v40, %v7432_v36  ;;  %v2689_v48 = vsel %vm2649_vm4, %v2609_v41, %v7433_v19  ;;  %v338_v19 = vld [vmem:[%s12291_s0 + $0x1eb] sm:$0xff]  ;;  %v10459_v36 = vld [vmem:[%s12291_s0 + $0x1f4] sm:$0xff] }
 0x15a   :  { %v7441_v14 = vpop.permute.xlu1 %7440  ;;  %v2686_v51 = vsel %vm2649_vm4, %v2606_v45, %v7427_v4  ;;  %v2687_v52 = vsel %vm2649_vm4, %v2607_v34, %v7428_v37  ;;  %v10476_v40 = vld [vmem:[%s12291_s0 + $0x1ec] sm:$0xff] }
 0x15b   :  { %3599 = vst.msk [vmem:[#allocation2 + $0x18] sm:$0xff] %vm3595_vm9, %v3519_v10  ;;  %v3517_v21 = vmax.f32 %v3202_v11, 0.0  ;;  %v7436_v22 = vpop.permute.xlu0 %7435  ;;  %v7443_v5 = vunpack.i.h.bf16 %v7441_v14  ;;  %v7442_v38 = vunpack.i.l.bf16 %v7441_v14  ;;  %v182_v10 = vld [vmem:[%s12291_s0 + $0x1f9] sm:$0xff]  ;;  %v10493_v45 = vld [vmem:[%s12291_s0 + $0x1e5] sm:$0xff] }
 0x15c   :  { %7730 = vrot.lane.b32.xlu1 %v7729_v30, %s8169_s13  ;;  %v7438_v42 = vunpack.i.h.bf16 %v7436_v22  ;;  %v7437_v43 = vunpack.i.l.bf16 %v7436_v22  ;;  %v7769_v20 = vpack.i.bf16 %v182_v10, %v181_v9  ;;  %v260_v22 = vld [vmem:[%s12291_s0 + $0x1f2] sm:$0xff] }
 0x15d   :  { %3597 = vst.msk [vmem:[#allocation2 + $0x8] sm:$0xff] %vm3595_vm9, %v3517_v21  ;;  %7725 = vrot.lane.b32.xlu0 %v7724_v0, %s8169_s13  ;;  %v2768_v53 = vsel %vm2729_vm5, %v2688_v47, %v7442_v38  ;;  %v2769_v54 = vsel %vm2729_vm5, %v2689_v48, %v7443_v5  ;;  %v7779_v33 = vpack.i.bf16 %v261_v24, %v260_v22  ;;  %v10466_v38 = vld [vmem:[%s12291_s0 + $0x1fc] sm:$0xff]  ;;  %v10502_v48 = vld [vmem:[%s12291_s0 + $0x1ed] sm:$0xff] }
 0x15e   :  { %v7451_v39 = vpop.permute.xlu1 %7450  ;;  %v2766_v46 = vsel %vm2729_vm5, %v2686_v51, %v7437_v43  ;;  %v2767_v25 = vsel %vm2729_vm5, %v2687_v52, %v7438_v42  ;;  %v7774_v5 = vpack.i.bf16 %v259_v2, %v258_v60  ;;  %v10483_v43 = vld [vmem:[%s12291_s0 + $0x1f5] sm:$0xff]  ;;  %v7804_v9 = vpack.i.bf16 %v10502_v48, %v10493_v45 }
 0x15f   :  { %v7446_v44 = vpop.permute.xlu0 %7445  ;;  %v7453_v35 = vunpack.i.h.bf16 %v7451_v39  ;;  %v7452_v31 = vunpack.i.l.bf16 %v7451_v39  ;;  %v10471_v39 = vld [vmem:[%s12291_s0 + $0x1e4] sm:$0xff] }
 0x160   :  { %7740 = vrot.lane.b32.xlu1 %v7739_v1, %s8170_s24  ;;  %v7448_v49 = vunpack.i.h.bf16 %v7446_v44  ;;  %v7447_v50 = vunpack.i.l.bf16 %v7446_v44  ;;  %v10488_v44 = vld [vmem:[%s12291_s0 + $0x1fd] sm:$0xff] }
 0x161   :  { %7735 = vrot.lane.b32.xlu0 %v7734_v15, %s8170_s24  ;;  %v2848_v61 = vsel %vm2809_vm6, %v2768_v53, %v7452_v31  ;;  %v2849_v62 = vsel %vm2809_vm6, %v2769_v54, %v7453_v35  ;;  %v179_v15 = vld [vmem:[%s12291_s0 + $0x1e1] sm:$0xff]  ;;  %v7784_v54 = vpack.i.bf16 %v338_v19, %v337_v18 }
 0x162   :  { %v7461_v55 = vpop.permute.xlu1 %7460  ;;  %v2846_v1 = vsel %vm2809_vm6, %v2766_v46, %v7447_v50  ;;  %v2847_v56 = vsel %vm2809_vm6, %v2767_v25, %v7448_v49  ;;  %v10507_v49 = vld [vmem:[%s12291_s0 + $0x1f6] sm:$0xff]  ;;  %v10512_v50 = vld [vmem:[%s12291_s0 + $0x1fe] sm:$0xff]  ;;  %v10522_v46 = vld [vmem:[%s12291_s0 + $0x1e6] sm:$0xff] }
 0x163   :  { %v7463_v29 = vunpack.i.h.bf16 %v7461_v55  ;;  %v7462_v30 = vunpack.i.l.bf16 %v7461_v55  ;;  %v7456_v58 = vpop.permute.xlu0 %7455  ;;  %v7799_v55 = vpack.i.bf16 %v10466_v38, %v10459_v36  ;;  %v10527_v25 = vld [vmem:[%s12291_s0 + $0x1ee] sm:$0xff]  ;;  %v7819_v10 = vpack.i.bf16 %v10512_v50, %v10507_v49  ;;  %v262_v50 = vld [vmem:[%s12291_s0 + $0x202] sm:$0xff] }
 0x164   :  { %v7458_v63 = vunpack.i.h.bf16 %v7456_v58  ;;  %v7457_v0 = vunpack.i.l.bf16 %v7456_v58  ;;  %7750 = vrot.lane.b32.xlu1 %v7749_v16, %s8171_s17  ;;  %v180_v16 = vld [vmem:[%s12291_s0 + $0x1e9] sm:$0xff] }
 0x165   :  { %v2928_v57 = vsel %vm2889_vm7, %v2848_v61, %v7462_v30  ;;  %v2929_v8 = vsel %vm2889_vm7, %v2849_v62, %v7463_v29  ;;  %7745 = vrot.lane.b32.xlu0 %v7744_v17, %s8171_s17  ;;  %v7764_v21 = vpack.i.bf16 %v180_v16, %v179_v15  ;;  %v82_v29 = vld [vmem:[%s12291_s0 + $0x150] sm:$0xff]  ;;  %v83_v30 = vld [vmem:[%s12291_s0 + $0x158] sm:$0xff]  ;;  %v7814_v15 = vpack.i.bf16 %v10527_v25, %v10522_v46 }
 0x166   :  { %v2926_v11 = vsel %vm2889_vm7, %v2846_v1, %v7457_v0  ;;  %v2927_v12 = vsel %vm2889_vm7, %v2847_v56, %v7458_v63  ;;  %v10406_v13 = vpop.permute.xlu1 %7470  ;;  %v2988_v14 = vpack.c.bf16 %v2929_v8, %v2928_v57  ;;  %v80_v0 = vld [vmem:[%s12291_s0 + $0x140] sm:$0xff]  ;;  %v81_v1 = vld [vmem:[%s12291_s0 + $0x148] sm:$0xff]  ;;  %v7794_v57 = vpack.i.bf16 %v10476_v40, %v10471_v39 }
 0x167   :  { %v10414_v17 = vpop.permute.xlu0 %7465  ;;  %v2987_v7 = vpack.c.bf16 %v2927_v12, %v2926_v11  ;;  %v7473_v51 = vunpack.i.h.bf16 %v10406_v13  ;;  %v7472_v52 = vunpack.i.l.bf16 %v10406_v13  ;;  %v7809_v8 = vpack.i.bf16 %v10488_v44, %v10483_v43  ;;  %v263_v46 = vld [vmem:[%s12291_s0 + $0x20a] sm:$0xff] }
 0x168   :  { %7760 = vrot.lane.b32.xlu1 %v7759_v6, %s8172_s27  ;;  %v7468_v58 = vunpack.i.h.bf16 %v10414_v17  ;;  %v7467_v61 = vunpack.i.l.bf16 %v10414_v17 }
 0x169   :  { %7755 = vrot.lane.b32.xlu0 %v7754_v23, %s8172_s27  ;;  %6698 = vmatprep.mubr.msk.bf16.mxu0 %vm3036_vm8, %v2987_v7  ;;  %v339_v23 = vld [vmem:[%s12291_s0 + $0x1f3] sm:$0xff]  ;;  %v2532_v16 = vsel %vm2489_vm2, %v82_v29, %v7472_v52  ;;  %v2533_v17 = vsel %vm2489_vm2, %v83_v30, %v7473_v51 }
 0x16a   :  { %v6668_v26 = vpop.f32.mrf.mxu0  ;;  %6699 = vmatmul.mubr.msk.bf16.gmra.mxu0 %vm3036_vm8, %v2988_v14  ;;  %v10432_v59 = vpop.permute.xlu1 %7480  ;;  %v7789_v47 = vpack.i.bf16 %v340_v27, %v339_v23  ;;  %v2531_v22 = vsel %vm2489_vm2, %v81_v1, %v7468_v58 }
 0x16b   :  { %v3223_v3 = vadd.f32 %v6668_v26, %v10222_v28  ;;  %v10441_v6 = vpop.permute.xlu0 %7475  ;;  %v7483_v11 = vunpack.i.h.bf16 %v10432_v59  ;;  %v7482_v12 = vunpack.i.l.bf16 %v10432_v59 }
 0x16c   :  { %v3214_v32 = vpop.f32.mrf.mxu0  ;;  %7770 = vrot.lane.b32.xlu1 %v7769_v20, %s8168_s15  ;;  %v7478_v7 = vunpack.i.h.bf16 %v10441_v6  ;;  %v7477_v20 = vunpack.i.l.bf16 %v10441_v6 }
 0x16d   :  { %v3522_v37 = vmax.f32 %v3223_v3, 0.0  ;;  %v3215_v4 = vadd.f32 %v10222_v28, %v3214_v32  ;;  %7765 = vrot.lane.b32.xlu0 %v7764_v21, %s8168_s15  ;;  %v2530_v21 = vsel %vm2489_vm2, %v80_v0, %v7467_v61  ;;  %v2612_v23 = vsel %vm2569_vm3, %v2532_v16, %v7482_v12  ;;  %v185_v61 = vld [vmem:[%s12291_s0 + $0x211] sm:$0xff]  ;;  %v265_v16 = vld [vmem:[%s12291_s0 + $0x21a] sm:$0xff] }
 0x16e   :  { %v6669_v41 = vpop.f32.mrf.mxu0  ;;  %v10478_v42 = vpop.permute.xlu1 %7490  ;;  %v2613_v27 = vsel %vm2569_vm3, %v2533_v17, %v7483_v11  ;;  %v2610_v19 = vsel %vm2569_vm3, %v2530_v21, %v7477_v20  ;;  %v2611_v36 = vsel %vm2569_vm3, %v2531_v22, %v7478_v7  ;;  %v344_v7 = vld [vmem:[%s12291_s0 + $0x21b] sm:$0xff]  ;;  %v341_v22 = vld [vmem:[%s12291_s0 + $0x203] sm:$0xff] }
 0x16f   :  { %3602 = vst.msk [vmem:[#allocation2 + $0x30] sm:$0xff] %vm3595_vm9, %v3522_v37  ;;  %v3520_v34 = vmax.f32 %v3215_v4, 0.0  ;;  %v3226_v35 = vadd.f32 %v6669_v41, %v10222_v28  ;;  %v10497_v31 = vpop.permute.xlu0 %7485  ;;  %v7493_v24 = vunpack.i.h.bf16 %v10478_v42  ;;  %v7492_v26 = vunpack.i.l.bf16 %v10478_v42 }
 0x170   :  { %v3217_v53 = vpop.f32.mrf.mxu0  ;;  %7780 = vrot.lane.b32.xlu1 %v7779_v33, %s8167_s14  ;;  %v7488_v59 = vunpack.i.h.bf16 %v10497_v31  ;;  %v7487_v60 = vunpack.i.l.bf16 %v10497_v31 }
 0x171   :  { %3600 = vst.msk [vmem:[#allocation2 + $0x20] sm:$0xff] %vm3595_vm9, %v3520_v34  ;;  %v3523_v62 = vmax.f32 %v3226_v35, 0.0  ;;  %v3218_v63 = vadd.f32 %v10222_v28, %v3217_v53  ;;  %7775 = vrot.lane.b32.xlu0 %v7774_v5, %s8167_s14  ;;  %v2692_v5 = vsel %vm2649_vm4, %v2612_v23, %v7492_v26  ;;  %v2693_v38 = vsel %vm2649_vm4, %v2613_v27, %v7493_v24  ;;  %v342_v24 = vld [vmem:[%s12291_s0 + $0x20b] sm:$0xff]  ;;  %v10655_v26 = vld [vmem:[%s12291_s0 + $0x214] sm:$0xff] }
 0x172   :  { %v7501_v56 = vpop.permute.xlu1 %7500  ;;  %v2690_v41 = vsel %vm2649_vm4, %v2610_v19, %v7487_v60  ;;  %v2691_v42 = vsel %vm2649_vm4, %v2611_v36, %v7488_v59  ;;  %v10672_v23 = vld [vmem:[%s12291_s0 + $0x20c] sm:$0xff] }
 0x173   :  { %3603 = vst.msk [vmem:[#allocation2 + $0x38] sm:$0xff] %vm3595_vm9, %v3523_v62  ;;  %v3521_v13 = vmax.f32 %v3218_v63, 0.0  ;;  %v7496_v14 = vpop.permute.xlu0 %7495  ;;  %v7503_v2 = vunpack.i.h.bf16 %v7501_v56  ;;  %v7502_v3 = vunpack.i.l.bf16 %v7501_v56  ;;  %v186_v62 = vld [vmem:[%s12291_s0 + $0x219] sm:$0xff]  ;;  %v10689_v19 = vld [vmem:[%s12291_s0 + $0x205] sm:$0xff] }
 0x174   :  { %7790 = vrot.lane.b32.xlu1 %v7789_v47, %s8169_s13  ;;  %v7498_v32 = vunpack.i.h.bf16 %v7496_v14  ;;  %v7497_v33 = vunpack.i.l.bf16 %v7496_v14  ;;  %v7829_v12 = vpack.i.bf16 %v186_v62, %v185_v61  ;;  %v264_v14 = vld [vmem:[%s12291_s0 + $0x212] sm:$0xff] }
 0x175   :  { %3601 = vst.msk [vmem:[#allocation2 + $0x28] sm:$0xff] %vm3595_vm9, %v3521_v13  ;;  %7785 = vrot.lane.b32.xlu0 %v7784_v54, %s8169_s13  ;;  %v2772_v43 = vsel %vm2729_vm5, %v2692_v5, %v7502_v3  ;;  %v2773_v44 = vsel %vm2729_vm5, %v2693_v38, %v7503_v2  ;;  %v7839_v21 = vpack.i.bf16 %v265_v16, %v264_v14  ;;  %v10662_v3 = vld [vmem:[%s12291_s0 + $0x21c] sm:$0xff]  ;;  %v10698_v38 = vld [vmem:[%s12291_s0 + $0x20d] sm:$0xff] }
 0x176   :  { %v7511_v6 = vpop.permute.xlu1 %7510  ;;  %v2770_v34 = vsel %vm2729_vm5, %v2690_v41, %v7497_v33  ;;  %v2771_v35 = vsel %vm2729_vm5, %v2691_v42, %v7498_v32  ;;  %v7834_v2 = vpack.i.bf16 %v263_v46, %v262_v50  ;;  %v10679_v33 = vld [vmem:[%s12291_s0 + $0x215] sm:$0xff]  ;;  %v7864_v61 = vpack.i.bf16 %v10698_v38, %v10689_v19 }
 0x177   :  { %v7506_v18 = vpop.permute.xlu0 %7505  ;;  %v7513_v37 = vunpack.i.h.bf16 %v7511_v6  ;;  %v7512_v4 = vunpack.i.l.bf16 %v7511_v6  ;;  %v10667_v6 = vld [vmem:[%s12291_s0 + $0x204] sm:$0xff] }
 0x178   :  { %7800 = vrot.lane.b32.xlu1 %v7799_v55, %s8170_s24  ;;  %v7508_v39 = vunpack.i.h.bf16 %v7506_v18  ;;  %v7507_v40 = vunpack.i.l.bf16 %v7506_v18  ;;  %v10684_v18 = vld [vmem:[%s12291_s0 + $0x21d] sm:$0xff] }
 0x179   :  { %7795 = vrot.lane.b32.xlu0 %v7794_v57, %s8170_s24  ;;  %v2852_v51 = vsel %vm2809_vm6, %v2772_v43, %v7512_v4  ;;  %v2853_v52 = vsel %vm2809_vm6, %v2773_v44, %v7513_v37  ;;  %v183_v57 = vld [vmem:[%s12291_s0 + $0x201] sm:$0xff]  ;;  %v7844_v44 = vpack.i.bf16 %v342_v24, %v341_v22 }
 0x17a   :  { %v7521_v45 = vpop.permute.xlu1 %7520  ;;  %v2850_v55 = vsel %vm2809_vm6, %v2770_v34, %v7507_v40  ;;  %v2851_v29 = vsel %vm2809_vm6, %v2771_v35, %v7508_v39  ;;  %v10703_v39 = vld [vmem:[%s12291_s0 + $0x216] sm:$0xff]  ;;  %v10708_v40 = vld [vmem:[%s12291_s0 + $0x21e] sm:$0xff]  ;;  %v10718_v34 = vld [vmem:[%s12291_s0 + $0x206] sm:$0xff] }
 0x17b   :  { %v7523_v31 = vunpack.i.h.bf16 %v7521_v45  ;;  %v7522_v47 = vunpack.i.l.bf16 %v7521_v45  ;;  %v7516_v48 = vpop.permute.xlu0 %7515  ;;  %v7859_v45 = vpack.i.bf16 %v10662_v3, %v10655_v26  ;;  %v10723_v35 = vld [vmem:[%s12291_s0 + $0x20e] sm:$0xff]  ;;  %v7879_v62 = vpack.i.bf16 %v10708_v40, %v10703_v39  ;;  %v266_v40 = vld [vmem:[%s12291_s0 + $0x222] sm:$0xff] }
 0x17c   :  { %v7518_v53 = vunpack.i.h.bf16 %v7516_v48  ;;  %v7517_v54 = vunpack.i.l.bf16 %v7516_v48  ;;  %7810 = vrot.lane.b32.xlu1 %v7809_v8, %s8171_s17  ;;  %v184_v8 = vld [vmem:[%s12291_s0 + $0x209] sm:$0xff] }
 0x17d   :  { %v2932_v30 = vsel %vm2889_vm7, %v2852_v51, %v7522_v47  ;;  %v2933_v58 = vsel %vm2889_vm7, %v2853_v52, %v7523_v31  ;;  %7805 = vrot.lane.b32.xlu0 %v7804_v9, %s8171_s17  ;;  %v7824_v13 = vpack.i.bf16 %v184_v8, %v183_v57  ;;  %v86_v31 = vld [vmem:[%s12291_s0 + $0x170] sm:$0xff]  ;;  %v87_v47 = vld [vmem:[%s12291_s0 + $0x178] sm:$0xff]  ;;  %v7874_v57 = vpack.i.bf16 %v10723_v35, %v10718_v34 }
 0x17e   :  { %v2930_v63 = vsel %vm2889_vm7, %v2850_v55, %v7517_v54  ;;  %v2931_v0 = vsel %vm2889_vm7, %v2851_v29, %v7518_v53  ;;  %v10602_v1 = vpop.permute.xlu1 %7530  ;;  %v2990_v56 = vpack.c.bf16 %v2933_v58, %v2932_v30  ;;  %v84_v54 = vld [vmem:[%s12291_s0 + $0x160] sm:$0xff]  ;;  %v85_v55 = vld [vmem:[%s12291_s0 + $0x168] sm:$0xff]  ;;  %v7854_v30 = vpack.i.bf16 %v10672_v23, %v10667_v6 }
 0x17f   :  { %v10610_v9 = vpop.permute.xlu0 %7525  ;;  %v2989_v11 = vpack.c.bf16 %v2931_v0, %v2930_v63  ;;  %v7533_v41 = vunpack.i.h.bf16 %v10602_v1  ;;  %v7532_v42 = vunpack.i.l.bf16 %v10602_v1  ;;  %v7869_v58 = vpack.i.bf16 %v10684_v18, %v10679_v33  ;;  %v267_v34 = vld [vmem:[%s12291_s0 + $0x22a] sm:$0xff] }
 0x180   :  { %7820 = vrot.lane.b32.xlu1 %v7819_v10, %s8172_s27  ;;  %v7528_v48 = vunpack.i.h.bf16 %v10610_v9  ;;  %v7527_v51 = vunpack.i.l.bf16 %v10610_v9 }
 0x181   :  { %7815 = vrot.lane.b32.xlu0 %v7814_v15, %s8172_s27  ;;  %6702 = vmatprep.mubr.msk.bf16.mxu0 %vm3036_vm8, %v2989_v11  ;;  %v343_v15 = vld [vmem:[%s12291_s0 + $0x213] sm:$0xff]  ;;  %v2536_v8 = vsel %vm2489_vm2, %v86_v31, %v7532_v42  ;;  %v2537_v9 = vsel %vm2489_vm2, %v87_v47, %v7533_v41 }
 0x182   :  { %v6672_v17 = vpop.f32.mrf.mxu0  ;;  %6703 = vmatmul.mubr.msk.bf16.gmra.mxu0 %vm3036_vm8, %v2990_v56  ;;  %v10628_v49 = vpop.permute.xlu1 %7540  ;;  %v7849_v5 = vpack.i.bf16 %v344_v7, %v343_v15  ;;  %v2535_v14 = vsel %vm2489_vm2, %v85_v55, %v7528_v48 }
 0x183   :  { %v3239_v25 = vadd.f32 %v6672_v17, %v10222_v28  ;;  %v10637_v10 = vpop.permute.xlu0 %7535  ;;  %v7543_v63 = vunpack.i.h.bf16 %v10628_v49  ;;  %v7542_v0 = vunpack.i.l.bf16 %v10628_v49 }
 0x184   :  { %v3230_v20 = vpop.f32.mrf.mxu0  ;;  %7830 = vrot.lane.b32.xlu1 %v7829_v12, %s8168_s15  ;;  %v7538_v11 = vunpack.i.h.bf16 %v10637_v10  ;;  %v7537_v12 = vunpack.i.l.bf16 %v10637_v10 }
 0x185   :  { %v3526_v59 = vmax.f32 %v3239_v25, 0.0  ;;  %v3231_v60 = vadd.f32 %v10222_v28, %v3230_v20  ;;  %7825 = vrot.lane.b32.xlu0 %v7824_v13, %s8168_s15  ;;  %v2534_v13 = vsel %vm2489_vm2, %v84_v54, %v7527_v51  ;;  %v2616_v15 = vsel %vm2569_vm3, %v2536_v8, %v7542_v0  ;;  %v189_v51 = vld [vmem:[%s12291_s0 + $0x231] sm:$0xff]  ;;  %v269_v8 = vld [vmem:[%s12291_s0 + $0x23a] sm:$0xff] }
 0x186   :  { %v6673_v27 = vpop.f32.mrf.mxu0  ;;  %v10674_v32 = vpop.permute.xlu1 %7550  ;;  %v2617_v7 = vsel %vm2569_vm3, %v2537_v9, %v7543_v63  ;;  %v2614_v24 = vsel %vm2569_vm3, %v2534_v13, %v7537_v12  ;;  %v2615_v26 = vsel %vm2569_vm3, %v2535_v14, %v7538_v11  ;;  %v348_v11 = vld [vmem:[%s12291_s0 + $0x23b] sm:$0xff]  ;;  %v345_v14 = vld [vmem:[%s12291_s0 + $0x223] sm:$0xff] }
 0x187   :  { %3606 = vst.msk [vmem:[#allocation2 + $0x50] sm:$0xff] %vm3595_vm9, %v3526_v59  ;;  %v3524_v36 = vmax.f32 %v3231_v60, 0.0  ;;  %v3242_v37 = vadd.f32 %v6673_v27, %v10222_v28  ;;  %v10693_v4 = vpop.permute.xlu0 %7545  ;;  %v7553_v16 = vunpack.i.h.bf16 %v10674_v32  ;;  %v7552_v17 = vunpack.i.l.bf16 %v10674_v32 }
 0x188   :  { %v3233_v43 = vpop.f32.mrf.mxu0  ;;  %7840 = vrot.lane.b32.xlu1 %v7839_v21, %s8167_s14  ;;  %v7548_v49 = vunpack.i.h.bf16 %v10693_v4  ;;  %v7547_v50 = vunpack.i.l.bf16 %v10693_v4 }
 0x189   :  { %3604 = vst.msk [vmem:[#allocation2 + $0x40] sm:$0xff] %vm3595_vm9, %v3524_v36  ;;  %v3527_v52 = vmax.f32 %v3242_v37, 0.0  ;;  %v3234_v53 = vadd.f32 %v10222_v28, %v3233_v43  ;;  %7835 = vrot.lane.b32.xlu0 %v7834_v2, %s8167_s14  ;;  %v2696_v2 = vsel %vm2649_vm4, %v2616_v15, %v7552_v17  ;;  %v2697_v3 = vsel %vm2649_vm4, %v2617_v7, %v7553_v16  ;;  %v346_v16 = vld [vmem:[%s12291_s0 + $0x22b] sm:$0xff]  ;;  %v10851_v17 = vld [vmem:[%s12291_s0 + $0x234] sm:$0xff] }
 0x18a   :  { %v7561_v29 = vpop.permute.xlu1 %7560  ;;  %v2694_v27 = vsel %vm2649_vm4, %v2614_v24, %v7547_v50  ;;  %v2695_v32 = vsel %vm2649_vm4, %v2615_v26, %v7548_v49  ;;  %v10868_v15 = vld [vmem:[%s12291_s0 + $0x22c] sm:$0xff] }
 0x18b   :  { %3607 = vst.msk [vmem:[#allocation2 + $0x58] sm:$0xff] %vm3595_vm9, %v3527_v52  ;;  %v3525_v1 = vmax.f32 %v3234_v53, 0.0  ;;  %v7556_v56 = vpop.permute.xlu0 %7555  ;;  %v7563_v46 = vunpack.i.h.bf16 %v7561_v29  ;;  %v7562_v25 = vunpack.i.l.bf16 %v7561_v29  ;;  %v190_v52 = vld [vmem:[%s12291_s0 + $0x239] sm:$0xff]  ;;  %v10885_v24 = vld [vmem:[%s12291_s0 + $0x225] sm:$0xff] }
 0x18c   :  { %7850 = vrot.lane.b32.xlu1 %v7849_v5, %s8169_s13  ;;  %v7558_v20 = vunpack.i.h.bf16 %v7556_v56  ;;  %v7557_v21 = vunpack.i.l.bf16 %v7556_v56  ;;  %v7889_v0 = vpack.i.bf16 %v190_v52, %v189_v51  ;;  %v268_v56 = vld [vmem:[%s12291_s0 + $0x232] sm:$0xff] }
 0x18d   :  { %3605 = vst.msk [vmem:[#allocation2 + $0x48] sm:$0xff] %vm3595_vm9, %v3525_v1  ;;  %7845 = vrot.lane.b32.xlu0 %v7844_v44, %s8169_s13  ;;  %v2776_v33 = vsel %vm2729_vm5, %v2696_v2, %v7562_v25  ;;  %v2777_v18 = vsel %vm2729_vm5, %v2697_v3, %v7563_v46  ;;  %v7899_v13 = vpack.i.bf16 %v269_v8, %v268_v56  ;;  %v10858_v25 = vld [vmem:[%s12291_s0 + $0x23c] sm:$0xff]  ;;  %v10894_v3 = vld [vmem:[%s12291_s0 + $0x22d] sm:$0xff] }
 0x18e   :  { %v7571_v10 = vpop.permute.xlu1 %7570  ;;  %v2774_v36 = vsel %vm2729_vm5, %v2694_v27, %v7557_v21  ;;  %v2775_v37 = vsel %vm2729_vm5, %v2695_v32, %v7558_v20  ;;  %v7894_v46 = vpack.i.bf16 %v267_v34, %v266_v40  ;;  %v10875_v21 = vld [vmem:[%s12291_s0 + $0x235] sm:$0xff] }
 0x18f   :  { %v7566_v22 = vpop.permute.xlu0 %7565  ;;  %v7573_v59 = vunpack.i.h.bf16 %v7571_v10  ;;  %v7572_v60 = vunpack.i.l.bf16 %v7571_v10  ;;  %v10863_v10 = vld [vmem:[%s12291_s0 + $0x224] sm:$0xff] }
 0x190   :  { %7860 = vrot.lane.b32.xlu1 %v7859_v45, %s8170_s24  ;;  %v7568_v6 = vunpack.i.h.bf16 %v7566_v22  ;;  %v7567_v23 = vunpack.i.l.bf16 %v7566_v22  ;;  %v10880_v22 = vld [vmem:[%s12291_s0 + $0x23d] sm:$0xff] }
 0x191   :  { %7855 = vrot.lane.b32.xlu0 %v7854_v30, %s8170_s24  ;;  %v2856_v41 = vsel %vm2809_vm6, %v2776_v33, %v7572_v60  ;;  %v2857_v42 = vsel %vm2809_vm6, %v2777_v18, %v7573_v59  ;;  %v187_v30 = vld [vmem:[%s12291_s0 + $0x221] sm:$0xff]  ;;  %v7904_v18 = vpack.i.bf16 %v346_v16, %v345_v14 }
 0x192   :  { %v7581_v19 = vpop.permute.xlu1 %7580  ;;  %v2854_v45 = vsel %vm2809_vm6, %v2774_v36, %v7567_v23  ;;  %v2855_v31 = vsel %vm2809_vm6, %v2775_v37, %v7568_v6  ;;  %v10899_v6 = vld [vmem:[%s12291_s0 + $0x236] sm:$0xff]  ;;  %v10904_v23 = vld [vmem:[%s12291_s0 + $0x23e] sm:$0xff]  ;;  %v10914_v36 = vld [vmem:[%s12291_s0 + $0x226] sm:$0xff] }
 0x193   :  { %v7583_v4 = vunpack.i.h.bf16 %v7581_v19  ;;  %v7582_v5 = vunpack.i.l.bf16 %v7581_v19  ;;  %v7576_v38 = vpop.permute.xlu0 %7575  ;;  %v7919_v19 = vpack.i.bf16 %v10858_v25, %v10851_v17  ;;  %v10919_v37 = vld [vmem:[%s12291_s0 + $0x22e] sm:$0xff]  ;;  %v7939_v51 = vpack.i.bf16 %v10904_v23, %v10899_v6  ;;  %v270_v23 = vld [vmem:[%s12291_s0 + $0x242] sm:$0xff] }
 0x194   :  { %v7578_v43 = vunpack.i.h.bf16 %v7576_v38  ;;  %v7577_v44 = vunpack.i.l.bf16 %v7576_v38  ;;  %7870 = vrot.lane.b32.xlu1 %v7869_v58, %s8171_s17  ;;  %v188_v58 = vld [vmem:[%s12291_s0 + $0x229] sm:$0xff] }
 0x195   :  { %v2936_v47 = vsel %vm2889_vm7, %v2856_v41, %v7582_v5  ;;  %v2937_v48 = vsel %vm2889_vm7, %v2857_v42, %v7583_v4  ;;  %7865 = vrot.lane.b32.xlu0 %v7864_v61, %s8171_s17  ;;  %v7884_v1 = vpack.i.bf16 %v188_v58, %v187_v30  ;;  %v90_v4 = vld [vmem:[%s12291_s0 + $0x190] sm:$0xff]  ;;  %v91_v5 = vld [vmem:[%s12291_s0 + $0x198] sm:$0xff] }
 0x196   :  { %v2934_v53 = vsel %vm2889_vm7, %v2854_v45, %v7577_v44  ;;  %v2935_v54 = vsel %vm2889_vm7, %v2855_v31, %v7578_v43  ;;  %v10798_v55 = vpop.permute.xlu1 %7590  ;;  %v2992_v29 = vpack.c.bf16 %v2937_v48, %v2936_v47  ;;  %v88_v44 = vld [vmem:[%s12291_s0 + $0x180] sm:$0xff]  ;;  %v89_v45 = vld [vmem:[%s12291_s0 + $0x188] sm:$0xff]  ;;  %v7914_v47 = vpack.i.bf16 %v10868_v15, %v10863_v10 }
 0x197   :  { %v10806_v61 = vpop.permute.xlu0 %7585  ;;  %v2991_v63 = vpack.c.bf16 %v2935_v54, %v2934_v53  ;;  %v7593_v27 = vunpack.i.h.bf16 %v10798_v55  ;;  %v7592_v32 = vunpack.i.l.bf16 %v10798_v55  ;;  %v7929_v48 = vpack.i.bf16 %v10880_v22, %v10875_v21 }
 0x198   :  { %7880 = vrot.lane.b32.xlu1 %v7879_v62, %s8172_s27  ;;  %v7588_v38 = vunpack.i.h.bf16 %v10806_v61  ;;  %v7587_v41 = vunpack.i.l.bf16 %v10806_v61 }
 0x199   :  { %7875 = vrot.lane.b32.xlu0 %v7874_v57, %s8172_s27  ;;  %6706 = vmatprep.mubr.msk.bf16.mxu0 %vm3036_vm8, %v2991_v63  ;;  %v347_v57 = vld [vmem:[%s12291_s0 + $0x233] sm:$0xff]  ;;  %v2540_v30 = vsel %vm2489_vm2, %v90_v4, %v7592_v32  ;;  %v2541_v58 = vsel %vm2489_vm2, %v91_v5, %v7593_v27 }
 0x19a   :  { %v6676_v9 = vpop.f32.mrf.mxu0  ;;  %6707 = vmatmul.mubr.msk.bf16.gmra.mxu0 %vm3036_vm8, %v2992_v29  ;;  %v10824_v39 = vpop.permute.xlu1 %7600  ;;  %v7909_v2 = vpack.i.bf16 %v348_v11, %v347_v57  ;;  %v7934_v29 = vpack.i.bf16 %v10919_v37, %v10914_v36  ;;  %v271_v36 = vld [vmem:[%s12291_s0 + $0x24a] sm:$0xff]  ;;  %v11031_v37 = vld [vmem:[%s12291_s0 + $0x253] sm:$0xff] }
 0x19b   :  { %v3255_v35 = vadd.f32 %v6676_v9, %v10222_v28  ;;  %v10833_v62 = vpop.permute.xlu0 %7595  ;;  %v7603_v52 = vunpack.i.h.bf16 %v10824_v39  ;;  %v7602_v53 = vunpack.i.l.bf16 %v10824_v39 }
 0x19c   :  { %v3246_v12 = vpop.f32.mrf.mxu0  ;;  %7890 = vrot.lane.b32.xlu1 %v7889_v0, %s8168_s15  ;;  %v7598_v61 = vunpack.i.h.bf16 %v10833_v62  ;;  %v7597_v63 = vunpack.i.l.bf16 %v10833_v62  ;;  %v2538_v0 = vsel %vm2489_vm2, %v88_v44, %v7587_v41  ;;  %v194_v41 = vld [vmem:[%s12291_s0 + $0x259] sm:$0xff] }
 0x19d   :  { %v3530_v49 = vmax.f32 %v3255_v35, 0.0  ;;  %v3247_v50 = vadd.f32 %v10222_v28, %v3246_v12  ;;  %7885 = vrot.lane.b32.xlu0 %v7884_v1, %s8168_s15  ;;  %v2539_v1 = vsel %vm2489_vm2, %v89_v45, %v7588_v38  ;;  %v2620_v62 = vsel %vm2569_vm3, %v2540_v30, %v7602_v53  ;;  %v193_v38 = vld [vmem:[%s12291_s0 + $0x251] sm:$0xff] }
 0x19e   :  { %v6677_v7 = vpop.f32.mrf.mxu0  ;;  %v10870_v20 = vpop.permute.xlu1 %7610  ;;  %v2621_v57 = vsel %vm2569_vm3, %v2541_v58, %v7603_v52  ;;  %v2618_v14 = vsel %vm2569_vm3, %v2538_v0, %v7597_v63  ;;  %v2619_v16 = vsel %vm2569_vm3, %v2539_v1, %v7598_v61  ;;  %v7949_v52 = vpack.i.bf16 %v194_v41, %v193_v38  ;;  %v352_v61 = vld [vmem:[%s12291_s0 + $0x25b] sm:$0xff]  ;;  %v11047_v63 = vld [vmem:[%s12291_s0 + $0x243] sm:$0xff]  ;;  %v11052_v0 = vld [vmem:[%s12291_s0 + $0x24b] sm:$0xff] }
 0x19f   :  { %3610 = vst.msk [vmem:[#allocation2 + $0x70] sm:$0xff] %vm3595_vm9, %v3530_v49  ;;  %v3528_v26 = vmax.f32 %v3247_v50, 0.0  ;;  %v3258_v59 = vadd.f32 %v6677_v7, %v10222_v28  ;;  %v10889_v60 = vpop.permute.xlu0 %7605  ;;  %v7613_v56 = vunpack.i.h.bf16 %v10870_v20  ;;  %v7612_v8 = vunpack.i.l.bf16 %v10870_v20 }
 0x1a0   :  { %v3249_v33 = vpop.f32.mrf.mxu0  ;;  %7900 = vrot.lane.b32.xlu1 %v7899_v13, %s8167_s14  ;;  %v7608_v9 = vunpack.i.h.bf16 %v10889_v60  ;;  %v7607_v39 = vunpack.i.l.bf16 %v10889_v60 }
 0x1a1   :  { %3608 = vst.msk [vmem:[#allocation2 + $0x60] sm:$0xff] %vm3595_vm9, %v3528_v26  ;;  %v3531_v42 = vmax.f32 %v3258_v59, 0.0  ;;  %v3250_v43 = vadd.f32 %v10222_v28, %v3249_v33  ;;  %7895 = vrot.lane.b32.xlu0 %v7894_v46, %s8167_s14  ;;  %v7924_v28 = vpack.i.bf16 %v10894_v3, %v10885_v24  ;;  %v2700_v50 = vsel %vm2649_vm4, %v2620_v62, %v7612_v8  ;;  %v11058_v8 = vld [vmem:[%s12291_s0 + $0x254] sm:$0xff]  ;;  %v11075_v62 = vld [vmem:[%s12291_s0 + $0x24c] sm:$0xff] }
 0x1a2   :  { %v7621_v31 = vpop.permute.xlu1 %7620  ;;  %v2701_v46 = vsel %vm2649_vm4, %v2621_v57, %v7613_v56  ;;  %v2698_v15 = vsel %vm2649_vm4, %v2618_v14, %v7607_v39  ;;  %v2699_v7 = vsel %vm2649_vm4, %v2619_v16, %v7608_v9  ;;  %v11063_v9 = vld [vmem:[%s12291_s0 + $0x25c] sm:$0xff]  ;;  %v11068_v39 = vld [vmem:[%s12291_s0 + $0x244] sm:$0xff]  ;;  %v11097_v16 = vld [vmem:[%s12291_s0 + $0x24d] sm:$0xff] }
 0x1a3   :  { %3611 = vst.msk [vmem:[#allocation2 + $0x78] sm:$0xff] %vm3595_vm9, %v3531_v42  ;;  %v3529_v54 = vmax.f32 %v3250_v43, 0.0  ;;  %v7616_v55 = vpop.permute.xlu0 %7615  ;;  %v7623_v40 = vunpack.i.h.bf16 %v7621_v31  ;;  %v7622_v34 = vunpack.i.l.bf16 %v7621_v31  ;;  %v191_v31 = vld [vmem:[%s12291_s0 + $0x241] sm:$0xff]  ;;  %v11080_v57 = vld [vmem:[%s12291_s0 + $0x255] sm:$0xff] }
 0x1a4   :  { %7910 = vrot.lane.b32.xlu1 %v7909_v2, %s8169_s13  ;;  %v7618_v11 = vunpack.i.h.bf16 %v7616_v55  ;;  %v7617_v12 = vunpack.i.l.bf16 %v7616_v55  ;;  %v273_v55 = vld [vmem:[%s12291_s0 + $0x25a] sm:$0xff]  ;;  %v11092_v14 = vld [vmem:[%s12291_s0 + $0x245] sm:$0xff] }
 0x1a5   :  { %3609 = vst.msk [vmem:[#allocation2 + $0x68] sm:$0xff] %vm3595_vm9, %v3529_v54  ;;  %7905 = vrot.lane.b32.xlu0 %v7904_v18, %s8169_s13  ;;  %v2780_v20 = vsel %vm2729_vm5, %v2700_v50, %v7622_v34  ;;  %v2781_v21 = vsel %vm2729_vm5, %v2701_v46, %v7623_v40  ;;  %v272_v54 = vld [vmem:[%s12291_s0 + $0x252] sm:$0xff]  ;;  %v7984_v38 = vpack.i.bf16 %v11097_v16, %v11092_v14 }
 0x1a6   :  { %v7631_v35 = vpop.permute.xlu1 %7630  ;;  %v2778_v24 = vsel %vm2729_vm5, %v2698_v15, %v7617_v12  ;;  %v2779_v26 = vsel %vm2729_vm5, %v2699_v7, %v7618_v11  ;;  %v7959_v56 = vpack.i.bf16 %v273_v55, %v272_v54  ;;  %v11085_v11 = vld [vmem:[%s12291_s0 + $0x25d] sm:$0xff]  ;;  %v11118_v7 = vld [vmem:[%s12291_s0 + $0x246] sm:$0xff] }
 0x1a7   :  { %v7626_v13 = vpop.permute.xlu0 %7625  ;;  %v7633_v17 = vunpack.i.h.bf16 %v7631_v35  ;;  %v7632_v49 = vunpack.i.l.bf16 %v7631_v35  ;;  %v7954_v35 = vpack.i.bf16 %v271_v36, %v270_v23  ;;  %v11113_v15 = vld [vmem:[%s12291_s0 + $0x25e] sm:$0xff] }
 0x1a8   :  { %7920 = vrot.lane.b32.xlu1 %v7919_v19, %s8170_s24  ;;  %v7628_v25 = vunpack.i.h.bf16 %v7626_v13  ;;  %v7627_v10 = vunpack.i.l.bf16 %v7626_v13 }
 0x1a9   :  { %7915 = vrot.lane.b32.xlu0 %v7914_v47, %s8170_s24  ;;  %v2860_v3 = vsel %vm2809_vm6, %v2780_v20, %v7632_v49  ;;  %v2861_v27 = vsel %vm2809_vm6, %v2781_v21, %v7633_v17  ;;  %v192_v47 = vld [vmem:[%s12291_s0 + $0x249] sm:$0xff]  ;;  %v11102_v17 = vld [vmem:[%s12291_s0 + $0x256] sm:$0xff] }
 0x1aa   :  { %v7641_v22 = vpop.permute.xlu1 %7640  ;;  %v2858_v18 = vsel %vm2809_vm6, %v2778_v24, %v7627_v10  ;;  %v2859_v19 = vsel %vm2809_vm6, %v2779_v26, %v7628_v25  ;;  %v7944_v53 = vpack.i.bf16 %v192_v47, %v191_v31  ;;  %v7969_v10 = vpack.i.bf16 %v352_v61, %v11031_v37  ;;  %v11123_v20 = vld [vmem:[%s12291_s0 + $0x24e] sm:$0xff] }
 0x1ab   :  { %v7643_v59 = vunpack.i.h.bf16 %v7641_v22  ;;  %v7642_v60 = vunpack.i.l.bf16 %v7641_v22  ;;  %v7636_v2 = vpop.permute.xlu0 %7635  ;;  %v94_v22 = vld [vmem:[%s12291_s0 + $0x1b0] sm:$0xff]  ;;  %v7999_v41 = vpack.i.bf16 %v11113_v15, %v11102_v17  ;;  %v274_v17 = vld [vmem:[%s12291_s0 + $0x262] sm:$0xff] }
 0x1ac   :  { %v7638_v32 = vunpack.i.h.bf16 %v7636_v2  ;;  %v7637_v33 = vunpack.i.l.bf16 %v7636_v2  ;;  %7930 = vrot.lane.b32.xlu1 %v7929_v48, %s8171_s17  ;;  %v95_v2 = vld [vmem:[%s12291_s0 + $0x1b8] sm:$0xff]  ;;  %v275_v15 = vld [vmem:[%s12291_s0 + $0x26a] sm:$0xff] }
 0x1ad   :  { %v2940_v4 = vsel %vm2889_vm7, %v2860_v3, %v7642_v60  ;;  %v2941_v5 = vsel %vm2889_vm7, %v2861_v27, %v7643_v59  ;;  %7925 = vrot.lane.b32.xlu0 %v7924_v28, %s8171_s17  ;;  %v7964_v59 = vpack.i.bf16 %v11052_v0, %v11047_v63  ;;  %v7979_v60 = vpack.i.bf16 %v11063_v9, %v11058_v8  ;;  %v92_v27 = vld [vmem:[%s12291_s0 + $0x1a0] sm:$0xff] }
 0x1ae   :  { %v2938_v42 = vsel %vm2889_vm7, %v2858_v18, %v7637_v33  ;;  %v2939_v43 = vsel %vm2889_vm7, %v2859_v19, %v7638_v32  ;;  %v10994_v44 = vpop.permute.xlu1 %7650  ;;  %v2994_v45 = vpack.c.bf16 %v2941_v5, %v2940_v4  ;;  %v7974_v18 = vpack.i.bf16 %v11075_v62, %v11068_v39  ;;  %v93_v19 = vld [vmem:[%s12291_s0 + $0x1a8] sm:$0xff] }
 0x1af   :  { %v11002_v48 = vpop.permute.xlu0 %7645  ;;  %v2993_v28 = vpack.c.bf16 %v2939_v43, %v2938_v42  ;;  %v7652_v49 = vunpack.i.l.bf16 %v10994_v44  ;;  %v7653_v21 = vunpack.i.h.bf16 %v10994_v44  ;;  %v7989_v5 = vpack.i.bf16 %v11085_v11, %v11080_v57 }
 0x1b0   :  { %7940 = vrot.lane.b32.xlu1 %v7939_v51, %s8172_s27  ;;  %v11036_v51 = vld [vmem:[%s12293_s2] ss:$0 sm:$0xff]  ;;  %v7647_v24 = vunpack.i.l.bf16 %v11002_v48  ;;  %v7648_v3 = vunpack.i.h.bf16 %v11002_v48  ;;  %v7994_v42 = vpack.i.bf16 %v11123_v20, %v11118_v7  ;;  %v8114_v7 = vld [vmem:[%s12294_s3 + $0x28] sm:$0xff]  }
 0x1b1   :  { %7935 = vrot.lane.b32.xlu0 %v7934_v29, %s8172_s27  ;;  %6710 = vmatprep.mubr.msk.bf16.mxu0 %vm3036_vm8, %v2993_v28  ;;  %v2544_v43 = vsel %vm2489_vm2, %v94_v22, %v7652_v49  ;;  %v2545_v48 = vsel %vm2489_vm2, %v95_v2, %v7653_v21  ;;  %v8112_v49 = vld [vmem:[%s12294_s3 + $0x38] sm:$0xff]  }
 0x1b2   :  { %v6680_v30 = vpop.f32.mrf.mxu0  ;;  %6711 = vmatmul.mubr.msk.bf16.gmra.mxu0 %vm3036_vm8, %v2994_v45  ;;  %v11020_v6 = vpop.permute.xlu1 %7660  ;;  %v2542_v28 = vsel %vm2489_vm2, %v92_v27, %v7647_v24  ;;  %v2543_v54 = vsel %vm2489_vm2, %v93_v19, %v7648_v3  ;;  %6742 = vmatprep.subr.bf16.mxu1 %v8112_v49  ;;  %v195_v19 = vld [vmem:[%s12291_s0 + $0x261] sm:$0xff] }
 0x1b3   :  { %v3271_v29 = vadd.f32 %v11036_v51, %v6680_v30  ;;  %v11039_v58 = vpop.permute.xlu0 %7655  ;;  %v7663_v44 = vunpack.i.h.bf16 %v11020_v6  ;;  %v7662_v45 = vunpack.i.l.bf16 %v11020_v6  ;;  %6743 = vmatpush3.bf16.msra.mxu1 %v8112_v49 }
 0x1b4   :  { %v3262_v1 = vpop.f32.mrf.mxu0  ;;  %7950 = vrot.lane.b32.xlu1 %v7949_v52, %s8168_s15  ;;  %v7658_v52 = vunpack.i.h.bf16 %v11039_v58 }
 0x1b5   :  { %v3534_v40 = vmax.f32 %v3271_v29, 0.0  ;;  %v3263_v34 = vadd.f32 %v11036_v51, %v3262_v1  ;;  %7945 = vrot.lane.b32.xlu0 %v7944_v53, %s8168_s15  ;;  %v7657_v53 = vunpack.i.l.bf16 %v11039_v58  ;;  %v2624_v61 = vsel %vm2569_vm3, %v2544_v43, %v7662_v45 }
 0x1b6   :  { %v6681_v12 = vpop.f32.mrf.mxu0  ;;  %v11087_v13 = vpop.permute.xlu1 %7670  ;;  %v2625_v63 = vsel %vm2569_vm3, %v2545_v48, %v7663_v44  ;;  %v2623_v9 = vsel %vm2569_vm3, %v2543_v54, %v7658_v52  ;;  %v197_v44 = vld [vmem:[%s12291_s0 + $0x271] sm:$0xff]  ;;  %v353_v54 = vld [vmem:[%s12291_s0 + $0x263] sm:$0xff] }
 0x1b7   :  { %3614 = vst.msk [vmem:[#allocation2 + $0x90] sm:$0xff] %vm3595_vm9, %v3534_v40  ;;  %v3532_v50 = vmax.f32 %v3263_v34, 0.0  ;;  %v3274_v46 = vadd.f32 %v11036_v51, %v6681_v12  ;;  %v11107_v25 = vpop.permute.xlu0 %7665  ;;  %v7673_v55 = vunpack.i.h.bf16 %v11087_v13  ;;  %v7672_v30 = vunpack.i.l.bf16 %v11087_v13  ;;  %v276_v48 = vld [vmem:[%s12291_s0 + $0x272] sm:$0xff] }
 0x1b8   :  { %v3265_v26 = vpop.f32.mrf.mxu0  ;;  %7960 = vrot.lane.b32.xlu1 %v7959_v56, %s8167_s14  ;;  %v7667_v6 = vunpack.i.l.bf16 %v11107_v25  ;;  %v7668_v23 = vunpack.i.h.bf16 %v11107_v25  ;;  %v2622_v8 = vsel %vm2569_vm3, %v2542_v28, %v7657_v53  ;;  %v8009_v53 = vpack.i.bf16 %v275_v15, %v274_v17 }
 0x1b9   :  { %3612 = vst.msk [vmem:[#allocation2 + $0x80] sm:$0xff] %vm3595_vm9, %v3532_v50  ;;  %v3535_v32 = vmax.f32 %v3274_v46, 0.0  ;;  %v3266_v33 = vadd.f32 %v11036_v51, %v3265_v26  ;;  %7955 = vrot.lane.b32.xlu0 %v7954_v35, %s8167_s14  ;;  %v2704_v34 = vsel %vm2649_vm4, %v2624_v61, %v7672_v30  ;;  %v2705_v35 = vsel %vm2649_vm4, %v2625_v63, %v7673_v55  ;;  %v354_v55 = vld [vmem:[%s12291_s0 + $0x26b] sm:$0xff] }
 0x1ba   :  { %v7681_v4 = vpop.permute.xlu1 %7680  ;;  %v2702_v62 = vsel %vm2649_vm4, %v2622_v8, %v7667_v6  ;;  %v2703_v11 = vsel %vm2649_vm4, %v2623_v9, %v7668_v23  ;;  %v11256_v30 = vld [vmem:[%s12291_s0 + $0x264] sm:$0xff]  ;;  %v11291_v8 = vld [vmem:[%s12291_s0 + $0x26e] sm:$0xff] }
 0x1bb   :  { %3615 = vst.msk [vmem:[#allocation2 + $0x98] sm:$0xff] %vm3595_vm9, %v3535_v32  ;;  %v3533_v31 = vmax.f32 %v3266_v33, 0.0  ;;  %v7676_v47 = vpop.permute.xlu0 %7675  ;;  %v7683_v36 = vunpack.i.h.bf16 %v7681_v4  ;;  %v7682_v37 = vunpack.i.l.bf16 %v7681_v4  ;;  %v196_v4 = vld [vmem:[%s12291_s0 + $0x269] sm:$0xff] }
 0x1bc   :  { %7970 = vrot.lane.b32.xlu1 %v7969_v10, %s8169_s13  ;;  %v7677_v29 = vunpack.i.l.bf16 %v7676_v47  ;;  %v7678_v0 = vunpack.i.h.bf16 %v7676_v47  ;;  %v8004_v45 = vpack.i.bf16 %v196_v4, %v195_v19  ;;  %v434_v4 = vld [vmem:[%s12291_s0 + $0x274] sm:$0xff] }
 0x1bd   :  { %3613 = vst.msk [vmem:[#allocation2 + $0x88] sm:$0xff] %vm3595_vm9, %v3533_v31  ;;  %7965 = vrot.lane.b32.xlu0 %v7964_v59, %s8169_s13  ;;  %v2784_v12 = vsel %vm2729_vm5, %v2704_v34, %v7682_v37  ;;  %v2785_v13 = vsel %vm2729_vm5, %v2705_v35, %v7683_v36  ;;  %v11263_v36 = vld [vmem:[%s12291_s0 + $0x26c] sm:$0xff]  ;;  %v99_v35 = vld [vmem:[%s12291_s0 + $0x1d8] sm:$0xff] }
 0x1be   :  { %v7691_v58 = vpop.permute.xlu1 %7690  ;;  %v2782_v14 = vsel %vm2729_vm5, %v2702_v62, %v7677_v29  ;;  %v2783_v50 = vsel %vm2729_vm5, %v2703_v11, %v7678_v0  ;;  %v11268_v37 = vld [vmem:[%s12291_s0 + $0x265] sm:$0xff] }
 0x1bf   :  { %v7692_v1 = vunpack.i.l.bf16 %v7691_v58  ;;  %v7686_v56 = vpop.permute.xlu0 %7685  ;;  %v7693_v39 = vunpack.i.h.bf16 %v7691_v58  ;;  %v8115_v29 = vld [vmem:[%s12294_s3 + $0x20] sm:$0xff]  }
 0x1c0   :  { %v7687_v40 = vunpack.i.l.bf16 %v7686_v56  ;;  %7980 = vrot.lane.b32.xlu1 %v7979_v60, %s8170_s24  ;;  %v7688_v57 = vunpack.i.h.bf16 %v7686_v56  ;;  %v11286_v56 = vld [vmem:[%s12291_s0 + $0x266] sm:$0xff] }
 0x1c1   :  { %7975 = vrot.lane.b32.xlu0 %v7974_v18, %s8170_s24  ;;  %v2864_v46 = vsel %vm2809_vm6, %v2784_v12, %v7692_v1  ;;  %v2865_v22 = vsel %vm2809_vm6, %v2785_v13, %v7693_v39  ;;  %v11281_v1 = vld [vmem:[%s12291_s0 + $0x26d] sm:$0xff] }
 0x1c2   :  { %v7701_v16 = vpop.permute.xlu1 %7700  ;;  %v2862_v24 = vsel %vm2809_vm6, %v2782_v14, %v7687_v40  ;;  %v2863_v60 = vsel %vm2809_vm6, %v2783_v50, %v7688_v57  ;;  %v98_v39 = vld [vmem:[%s12291_s0 + $0x1d0] sm:$0xff]  ;;  %v96_v57 = vld [vmem:[%s12291_s0 + $0x1c0] sm:$0xff]  ;;  %v8014_v14 = vpack.i.bf16 %v354_v55, %v353_v54  ;;  %v8019_v50 = vpack.i.bf16 %v11263_v36, %v11256_v30 }
 0x1c3   :  { %v7703_v25 = vunpack.i.h.bf16 %v7701_v16  ;;  %v7702_v10 = vunpack.i.l.bf16 %v7701_v16  ;;  %v7696_v21 = vpop.permute.xlu0 %7695  ;;  %v355_v13 = vld [vmem:[%s12291_s0 + $0x273] sm:$0xff]  ;;  %v97_v16 = vld [vmem:[%s12291_s0 + $0x1c8] sm:$0xff] }
 0x1c4   :  { %v7698_v26 = vunpack.i.h.bf16 %v7696_v21  ;;  %v7697_v59 = vunpack.i.l.bf16 %v7696_v21  ;;  %7990 = vrot.lane.b32.xlu1 %v7989_v5, %s8171_s17  ;;  %v8113_v5 = vld [vmem:[%s12294_s3 + $0x30] sm:$0xff]  }
 0x1c5   :  { %v2944_v2 = vsel %vm2889_vm7, %v2864_v46, %v7702_v10  ;;  %v2945_v3 = vsel %vm2889_vm7, %v2865_v22, %v7703_v25  ;;  %7985 = vrot.lane.b32.xlu0 %v7984_v38, %s8171_s17  ;;  %6744 = vmatprep.subr.bf16.mxu1 %v8113_v5  ;;  %v8024_v46 = vpack.i.bf16 %v11281_v1, %v11268_v37  ;;  %v8116_v10 = vld [vmem:[%s12294_s3 + $0x18] sm:$0xff]   ;;  %v4187_v1 = vld [vmem:[#allocation2 + $0x25] ss:$2 sm:$0xff] }
 0x1c6   :  { %v2942_v27 = vsel %vm2889_vm7, %v2862_v24, %v7697_v59  ;;  %v2943_v32 = vsel %vm2889_vm7, %v2863_v60, %v7698_v26  ;;  %v11201_v33 = vpop.permute.xlu1 %7710  ;;  %v2996_v18 = vpack.c.bf16 %v2945_v3, %v2944_v2  ;;  %6745 = vmatpush3.bf16.msra.mxu1 %v8113_v5  ;;  %v8029_v25 = vpack.i.bf16 %v11291_v8, %v11286_v56  ;;  %v513_v30 = vld [vmem:[%s12291_s0 + $0x275] sm:$0xff] }
 0x1c7   :  { %v11212_v38 = vpop.permute.xlu0 %7705  ;;  %v2995_v43 = vpack.c.bf16 %v2943_v32, %v2942_v27  ;;  %6746 = vmatprep.subr.bf16.mxu1 %v8114_v7  ;;  %v7712_v58 = vunpack.i.l.bf16 %v11201_v33  ;;  %v7713_v9 = vunpack.i.h.bf16 %v11201_v33 }
 0x1c8   :  { %8000 = vrot.lane.b32.xlu1 %v7999_v41, %s8172_s27  ;;  %v7707_v40 = vunpack.i.l.bf16 %v11212_v38  ;;  %v7708_v62 = vunpack.i.h.bf16 %v11212_v38 }
 0x1c9   :  { %7995 = vrot.lane.b32.xlu0 %v7994_v42, %s8172_s27  ;;  %6714 = vmatprep.mubr.msk.bf16.mxu0 %vm3036_vm8, %v2995_v43  ;;  %v2548_v21 = vsel %vm2489_vm2, %v98_v39, %v7712_v58  ;;  %v2549_v60 = vsel %vm2489_vm2, %v99_v35, %v7713_v9  ;;  %v11368_v9 = vld [vmem:[#allocation2 + $0x15] ss:$2 sm:$0xff]  ;;  %v11370_v39 = vld [vmem:[#allocation2 + $0x16] ss:$2 sm:$0xff] }
 0x1ca   :  { %v6684_v31 = vpop.f32.mrf.mxu0  ;;  %6715 = vmatmul.mubr.msk.bf16.gmra.mxu0 %vm3036_vm8, %v2996_v18  ;;  %v11227_v47 = vpop.permute.xlu1 %7720  ;;  %6747 = vmatpush3.bf16.msra.mxu1 %v8114_v7  ;;  %v2546_v2 = vsel %vm2489_vm2, %v96_v57, %v7707_v40  ;;  %v2547_v32 = vsel %vm2489_vm2, %v97_v16, %v7708_v62  ;;  %v11372_v40 = vld [vmem:[#allocation2 + $0x17] ss:$2 sm:$0xff]  ;;  %v8118_v16 = vld [vmem:[%s12294_s3 + $0x8] sm:$0xff]  }
 0x1cb   :  { %v3287_v20 = vadd.f32 %v11036_v51, %v6684_v31  ;;  %v11239_v41 = vpop.permute.xlu0 %7715  ;;  %6748 = vmatprep.subr.bf16.mxu1 %v8115_v29  ;;  %v7723_v22 = vunpack.i.h.bf16 %v11227_v47  ;;  %v7722_v24 = vunpack.i.l.bf16 %v11227_v47  ;;  %v8117_v31 = vld [vmem:[%s12294_s3 + $0x10] sm:$0xff]  }
 0x1cc   :  { %v3278_v42 = vpop.f32.mrf.mxu0  ;;  %828 = vrot.lane.b32.xlu1 %v197_v44, %s8168_s15  ;;  %v7718_v3 = vunpack.i.h.bf16 %v11239_v41  ;;  %v7717_v27 = vunpack.i.l.bf16 %v11239_v41 }
 0x1cd   :  { %v3538_v28 = vmax.f32 %v3287_v20, 0.0  ;;  %v3279_v52 = vadd.f32 %v11036_v51, %v3278_v42  ;;  %8005 = vrot.lane.b32.xlu0 %v8004_v45, %s8168_s15  ;;  %v2628_v47 = vsel %vm2569_vm3, %v2548_v21, %v7722_v24  ;;  %v2629_v17 = vsel %vm2569_vm3, %v2549_v60, %v7723_v22  ;;  %v3894_v22 = vld [vmem:[#allocation2 + $0x22] ss:$2 sm:$0xff]  ;;  %v3972_v24 = vld [vmem:[#allocation2 + $0x23] ss:$2 sm:$0xff]  ;;  %s8182_s15 = smov 40  }
 0x1ce   :  { %v6685_v6 = vpop.f32.mrf.mxu0  ;;  %v11258_v23 = vpop.permute.xlu1 %7730  ;;  %6749 = vmatpush3.bf16.msra.mxu1 %v8115_v29  ;;  %v2626_v41 = vsel %vm2569_vm3, %v2546_v2, %v7717_v27  ;;  %v2627_v42 = vsel %vm2569_vm3, %v2547_v32, %v7718_v3  ;;  %v11393_v60 = vld [vmem:[#allocation2 + $0x34] ss:$2 sm:$0xff]  ;;  %v11395_v2 = vld [vmem:[#allocation2 + $0x4] ss:$2 sm:$0xff]  ;;  %v4183_v3 = vld [vmem:[#allocation2 + $0x5] ss:$2 sm:$0xff] }
 0x1cf   :  { %3618 = vst.msk [vmem:[#allocation2 + $0xb0] sm:$0xff] %vm3595_vm9, %v3538_v28  ;;  %v3536_v61 = vmax.f32 %v3279_v52, 0.0  ;;  %v3290_v63 = vadd.f32 %v11036_v51, %v6685_v6  ;;  %v11276_v0 = vpop.permute.xlu0 %7725  ;;  %6750 = vmatprep.subr.bf16.mxu1 %v8116_v10  ;;  %v7733_v33 = vunpack.i.h.bf16 %v11258_v23  ;;  %v7732_v18 = vunpack.i.l.bf16 %v11258_v23  ;;  %v4320_v27 = vld [vmem:[#allocation2 + $0x6] ss:$2 sm:$0xff]  ;;  %v4398_v32 = vld [vmem:[#allocation2 + $0x7] ss:$2 sm:$0xff] }
 0x1d0   :  { %v3281_v34 = vpop.f32.mrf.mxu0  ;;  %1144 = vrot.lane.b32.xlu1 %v276_v48, %s8167_s14  ;;  %v7727_v19 = vunpack.i.l.bf16 %v11276_v0  ;;  %v7728_v5 = vunpack.i.h.bf16 %v11276_v0  ;;  %v11366_v0 = vld [vmem:[#allocation2 + $0x14] ss:$2 sm:$0xff] }
 0x1d1   :  { %3616 = vst.msk [vmem:[#allocation2 + $0xa0] sm:$0xff] %vm3595_vm9, %v3536_v61  ;;  %v3539_v11 = vmax.f32 %v3290_v63, 0.0  ;;  %v3282_v12 = vadd.f32 %v11036_v51, %v3281_v34  ;;  %8010 = vrot.lane.b32.xlu0 %v8009_v53, %s8167_s14  ;;  %v2708_v52 = vsel %vm2649_vm4, %v2628_v47, %v7732_v18  ;;  %v2709_v53 = vsel %vm2649_vm4, %v2629_v17, %v7733_v33  ;;  %v11362_v61 = vld [vmem:[#allocation2 + $0x12] ss:$2 sm:$0xff]  ;;  %v11364_v63 = vld [vmem:[#allocation2 + $0x13] ss:$2 sm:$0xff] }
 0x1d2   :  { %v7741_v49 = vpop.permute.xlu1 %7740  ;;  %6751 = vmatpush3.bf16.msra.mxu1 %v8116_v10  ;;  %v2706_v54 = vsel %vm2649_vm4, %v2626_v41, %v7727_v19  ;;  %v2707_v6 = vsel %vm2649_vm4, %v2627_v42, %v7728_v5  ;;  %v11406_v5 = vld [vmem:[#allocation2 + $0x35] ss:$2 sm:$0xff]  ;;  %v4261_v41 = vmax.f32 %v11366_v0, %v11368_v9  ;;  %v4476_v42 = vmax.f32 %v11370_v39, %v11372_v40  ;;  %v11458_v9 = vld [vmem:[#allocation2 + $0x54] ss:$2 sm:$0xff] }
 0x1d3   :  { %3619 = vst.msk [vmem:[#allocation2 + $0xb8] sm:$0xff] %vm3595_vm9, %v3539_v11  ;;  %v3537_v26 = vmax.f32 %v3282_v12, 0.0  ;;  %v7736_v59 = vpop.permute.xlu0 %7735  ;;  %v7743_v38 = vunpack.i.h.bf16 %v7741_v49  ;;  %v7742_v43 = vunpack.i.l.bf16 %v7741_v49  ;;  %6752 = vmatprep.subr.bf16.mxu1 %v8117_v31  ;;  %v592_v12 = vld [vmem:[%s12291_s0 + $0x276] sm:$0xff]  ;;  %v4402_v17 = vld [vmem:[#allocation2 + $0x27] ss:$2 sm:$0xff]  ;;  %v4475_v0 = vmax.f32 %v4320_v27, %v4398_v32 }
 0x1d4   :  { %1460 = vrot.lane.b32.xlu1 %v355_v13, %s8169_s13  ;;  %v7737_v44 = vunpack.i.l.bf16 %v7736_v59  ;;  %v7738_v15 = vunpack.i.h.bf16 %v7736_v59  ;;  %v11379_v13 = vld [vmem:[#allocation2 + $0x32] ss:$2 sm:$0xff]  ;;  %v11391_v59 = vld [vmem:[#allocation2 + $0x3] ss:$2 sm:$0xff] }
 0x1d5   :  { %3617 = vst.msk [vmem:[#allocation2 + $0xa8] sm:$0xff] %vm3595_vm9, %v3537_v26  ;;  %8015 = vrot.lane.b32.xlu0 %v8014_v14, %s8169_s13  ;;  %v2788_v23 = vsel %vm2729_vm5, %v2708_v52, %v7742_v43  ;;  %v2789_v36 = vsel %vm2729_vm5, %v2709_v53, %v7743_v38  ;;  %v11381_v14 = vld [vmem:[#allocation2 + $0x33] ss:$2 sm:$0xff]  ;;  %v11389_v26 = vld [vmem:[#allocation2 + $0x2] ss:$2 sm:$0xff]  ;;  %s8178_s13 = smov 16  }
 0x1d6   :  { %v7751_v45 = vpop.permute.xlu1 %7750  ;;  %v2786_v29 = vsel %vm2729_vm5, %v2706_v54, %v7737_v44  ;;  %6753 = vmatpush3.bf16.msra.mxu1 %v8117_v31  ;;  %v2787_v34 = vsel %vm2729_vm5, %v2707_v6, %v7738_v15  ;;  %v11408_v38 = vld [vmem:[#allocation2 + $0x36] ss:$2 sm:$0xff]  ;;  %v11410_v43 = vld [vmem:[#allocation2 + $0x37] ss:$2 sm:$0xff]  ;;  %v4048_v37 = vmax.f32 %v11379_v13, %v11381_v14 }
 0x1d7   :  { %v7752_v7 = vunpack.i.l.bf16 %v7751_v45  ;;  %v7746_v20 = vpop.permute.xlu0 %7745  ;;  %v7753_v48 = vunpack.i.h.bf16 %v7751_v45  ;;  %6754 = vmatprep.subr.bf16.mxu1 %v8118_v16  ;;  %v11430_v52 = vld [vmem:[#allocation2 + $0x44] ss:$2 sm:$0xff]  ;;  %v11432_v53 = vld [vmem:[#allocation2 + $0x45] ss:$2 sm:$0xff]  ;;  %v4478_v6 = vmax.f32 %v11408_v38, %v11410_v43  ;;  %v11460_v39 = vld [vmem:[#allocation2 + $0x55] ss:$2 sm:$0xff] }
 0x1d8   :  { %v7747_v28 = vunpack.i.l.bf16 %v7746_v20  ;;  %1776 = vrot.lane.b32.xlu1 %v434_v4, %s8170_s24  ;;  %v7748_v55 = vunpack.i.h.bf16 %v7746_v20  ;;  %v11404_v4 = vld [vmem:[#allocation2 + $0x24] ss:$2 sm:$0xff]  ;;  %v4046_v20 = vmax.f32 %v11362_v61, %v11364_v63  ;;  %v4045_v61 = vmax.f32 %v11389_v26, %v11391_v59  ;;  %v4410_v38 = vld [vmem:[#allocation2 + $0x67] ss:$2 sm:$0xff] }
 0x1d9   :  { %8020 = vrot.lane.b32.xlu0 %v8019_v50, %s8170_s24  ;;  %v2868_v35 = vsel %vm2809_vm6, %v2788_v23, %v7752_v7  ;;  %v2869_v49 = vsel %vm2809_vm6, %v2789_v36, %v7753_v48  ;;  %v11426_v48 = vld [vmem:[#allocation2 + $0x42] ss:$2 sm:$0xff]  ;;  %v11442_v23 = vld [vmem:[#allocation2 + $0x52] ss:$2 sm:$0xff]  ;;  %v11444_v36 = vld [vmem:[#allocation2 + $0x53] ss:$2 sm:$0xff]  ;;  %v4260_v63 = vmax.f32 %v11395_v2, %v4183_v3  ;;  %v4264_v27 = vmax.f32 %v11430_v52, %v11432_v53 }
 0x1da   :  { %v7761_v58 = vpop.permute.xlu1 %7760  ;;  %v2866_v50 = vsel %vm2809_vm6, %v2786_v29, %v7747_v28  ;;  %v2867_v33 = vsel %vm2809_vm6, %v2787_v34, %v7748_v55  ;;  %6755 = vmatpush3.bf16.msra.mxu1 %v8118_v16  ;;  %v11428_v28 = vld [vmem:[#allocation2 + $0x43] ss:$2 sm:$0xff]  ;;  %v4047_v55 = vmax.f32 %v3894_v22, %v3972_v24  ;;  %v11446_v29 = vld [vmem:[#allocation2 + $0x46] ss:$2 sm:$0xff]  ;;  %v11462_v40 = vld [vmem:[#allocation2 + $0x56] ss:$2 sm:$0xff]  ;;  %v4084_v16 = vpack.c.bf16 %v4046_v20, %v4045_v61 }
 0x1db   :  { %v7763_v62 = vunpack.i.h.bf16 %v7761_v58  ;;  %v7762_v57 = vunpack.i.l.bf16 %v7761_v58  ;;  %v7756_v11 = vpop.permute.xlu0 %7755  ;;  %v8119_v54 = vld [vmem:[%s12294_s3] sm:$0xff]   ;;  %s8174_s3 = smov 32   ;;  %v4049_v2 = vmax.f32 %v11426_v48, %v11428_v28 }
 0x1dc   :  { %v7758_v10 = vunpack.i.h.bf16 %v7756_v11  ;;  %v7757_v21 = vunpack.i.l.bf16 %v7756_v11  ;;  %2092 = vrot.lane.b32.xlu1 %v513_v30, %s8171_s17  ;;  %v4263_v30 = vmax.f32 %v11393_v60, %v11406_v5  ;;  %v11448_v58 = vld [vmem:[#allocation2 + $0x47] ss:$2 sm:$0xff]  ;;  %v11464_v34 = vld [vmem:[#allocation2 + $0x57] ss:$2 sm:$0xff]  ;;  %v4085_v8 = vpack.c.bf16 %v4048_v37, %v4047_v55  ;;  %v3904_v11 = vld [vmem:[#allocation2 + $0x72] ss:$2 sm:$0xff]  ;;  %6756 = vmatprep.subr.bf16.mxu1 %v8119_v54 }
 0x1dd   :  { %v2948_v18 = vsel %vm2889_vm7, %v2868_v35, %v7762_v57  ;;  %v2949_v19 = vsel %vm2889_vm7, %v2869_v49, %v7763_v62  ;;  %8025 = vrot.lane.b32.xlu0 %v8024_v46, %s8171_s17  ;;  %v4324_v46 = vld [vmem:[#allocation2 + $0x26] ss:$2 sm:$0xff]  ;;  %v4299_v49 = vpack.c.bf16 %v4261_v41, %v4260_v63  ;;  %v4197_v24 = vld [vmem:[#allocation2 + $0x75] ss:$2 sm:$0xff]  ;;  %v4195_v3 = vld [vmem:[#allocation2 + $0x65] ss:$2 sm:$0xff]  ;;  %v4479_v43 = vmax.f32 %v11446_v29, %v11448_v58 }
 0x1de   :  { %v2946_v44 = vsel %vm2889_vm7, %v2866_v50, %v7757_v21  ;;  %v2947_v45 = vsel %vm2889_vm7, %v2867_v33, %v7758_v10  ;;  %v11414_v31 = vpop.permute.xlu1 %7770  ;;  %v2998_v47 = vpack.c.bf16 %v2949_v19, %v2948_v18  ;;  %v4477_v62 = vmax.f32 %v4324_v46, %v4402_v17  ;;  %v3902_v57 = vld [vmem:[#allocation2 + $0x62] ss:$2 sm:$0xff]  ;;  %v3982_v10 = vld [vmem:[#allocation2 + $0x73] ss:$2 sm:$0xff]  ;;  %6757 = vmatpush3.bf16.msra.mxu1 %v8119_v54  ;;  %s6447_s17 = sshll.u32 %s8191_s26, 4  ;;  %s6448_s17 = int_to_ptr.vmem [resolvable:$true] %s6447_s17 }
 0x1df   :  { %v11418_v15 = vpop.permute.xlu0 %7765  ;;  %v2997_v7 = vpack.c.bf16 %v2947_v45, %v2946_v44  ;;  %v11473_v50 = vpack.c.bf16 %v4476_v42, %v4475_v0  ;;  %v4117_v21 = vld [vmem:[#allocation2 + $0x64] ss:$2 sm:$0xff]  ;;  %v4119_v22 = vld [vmem:[#allocation2 + $0x74] ss:$2 sm:$0xff]  ;;  %v4412_v33 = vld [vmem:[#allocation2 + $0x77] ss:$2 sm:$0xff]  ;;  %v4480_v46 = vmax.f32 %v11462_v40, %v11464_v34  ;;  %v7773_v48 = vunpack.i.h.bf16 %v11414_v31  ;;  %p8150_p1 = scmp.lt.s32.totalorder %s6448_s17, %s6448_s17 }
 0x1e0   :  { %2408 = vrot.lane.b32.xlu1 %v592_v12, %s8172_s27  ;;  %v3980_v12 = vld [vmem:[#allocation2 + $0x63] ss:$2 sm:$0xff]  ;;  %v4515_v60 = vpack.c.bf16 %v4478_v6, %v4477_v62  ;;  %v4334_v32 = vld [vmem:[#allocation2 + $0x76] ss:$2 sm:$0xff]  ;;  %v4332_v5 = vld [vmem:[#allocation2 + $0x66] ss:$2 sm:$0xff]  ;;  %v4267_v37 = vmax.f32 %v4119_v22, %v4197_v24  ;;  %v7772_v28 = vunpack.i.l.bf16 %v11414_v31  ;;  %v4266_v53 = vmax.f32 %v4117_v21, %v4195_v3 }
 0x1e1   :  { %8030 = vrot.lane.b32.xlu0 %v8029_v25, %s8172_s27  ;;  %6718 = vmatprep.mubr.msk.bf16.mxu0 %vm3036_vm8, %v2997_v7  ;;  %v4262_v25 = vmax.f32 %v11404_v4, %v4187_v1  ;;  %v4050_v4 = vmax.f32 %v11442_v23, %v11444_v36  ;;  %v4265_v1 = vmax.f32 %v11458_v9, %v11460_v39  ;;  %s8175_s27 = smov 64   ;;  %v102_v55 = vld [vmem:[%s12291_s0 + $0x1f0] sm:$0xff]  ;;  %v7768_v6 = vunpack.i.h.bf16 %v11418_v15  ;;  %v100_v61 = vld [vmem:[%s12291_s0 + $0x1e0] sm:$0xff]  ;;  %v101_v63 = vld [vmem:[%s12291_s0 + $0x1e8] sm:$0xff] }
 0x1e2   :  { %v6688_v35 = vpop.f32.mrf.mxu0  ;;  %6719 = vmatmul.mubr.msk.bf16.gmra.mxu0 %vm3036_vm8, %v2998_v47  ;;  %v11467_v56 = vpop.permute.xlu1 %7780  ;;  %v4052_v47 = vmax.f32 %v3904_v11, %v3982_v10  ;;  %v4051_v41 = vmax.f32 %v3902_v57, %v3980_v12  ;;  %v4482_v42 = vmax.f32 %v4334_v32, %v4412_v33  ;;  %v4481_v54 = vmax.f32 %v4332_v5, %v4410_v38  ;;  %v4125_v29 = vld [vmem:[#allocation2 + $0xa4] ss:$2 sm:$0xff]  ;;  %v4203_v58 = vld [vmem:[#allocation2 + $0xa5] ss:$2 sm:$0xff] }
 0x1e3   :  { %v3303_v13 = vadd.f32 %v11036_v51, %v6688_v35  ;;  %v11471_v14 = vpop.permute.xlu0 %7775  ;;  %v4300_v59 = vpack.c.bf16 %v4263_v30, %v4262_v25  ;;  %v103_v30 = vld [vmem:[%s12291_s0 + $0x1f8] sm:$0xff]  ;;  %v7767_v23 = vunpack.i.l.bf16 %v11418_v15  ;;  %v4086_v39 = vpack.c.bf16 %v4050_v4, %v4049_v2 }
 0x1e4   :  { %v3294_v26 = vpop.f32.mrf.mxu0  ;;  %4556 = vrot.lane.b32.xlu1 %v4085_v8, %s8174_s3  ;;  %v4087_v9 = vpack.c.bf16 %v4052_v47, %v4051_v41  ;;  %v4302_v35 = vpack.c.bf16 %v4267_v37, %v4266_v53  ;;  %v11516_v15 = vpack.c.bf16 %v4265_v1, %v4264_v27  ;;  %v7783_v8 = vunpack.i.h.bf16 %v11467_v56 }
 0x1e5   :  { %v3542_v18 = vmax.f32 %v3303_v13, 0.0  ;;  %v3295_v19 = vadd.f32 %v11036_v51, %v3294_v26  ;;  %4554 = vrot.lane.b32.xlu0 %v4084_v16, %s8174_s3  ;;  %v7782_v25 = vunpack.i.l.bf16 %v11467_v56  ;;  %v11521_v11 = vpack.c.bf16 %v4482_v42, %v4481_v54 }
 0x1e6   :  { %v6689_v44 = vpop.f32.mrf.mxu0  ;;  %v11486_v45 = vpop.permute.xlu1 %7790  ;;  %v2552_v12 = vsel %vm2489_vm2, %v102_v55, %v7772_v28  ;;  %v2553_v13 = vsel %vm2489_vm2, %v103_v30, %v7773_v48  ;;  %v7778_v16 = vunpack.i.h.bf16 %v11471_v14  ;;  %v2550_v10 = vsel %vm2489_vm2, %v100_v61, %v7767_v23  ;;  %v3908_v23 = vld [vmem:[#allocation2 + $0x92] ss:$2 sm:$0xff] }
 0x1e7   :  { %3622 = vst.msk [vmem:[#allocation2 + $0xd0] sm:$0xff] %vm3595_vm9, %v3542_v18  ;;  %v3540_v17 = vmax.f32 %v3295_v19, 0.0  ;;  %v3306_v7 = vadd.f32 %v11036_v51, %v6689_v44  ;;  %v11494_v20 = vpop.permute.xlu0 %7785  ;;  %v2551_v56 = vsel %vm2489_vm2, %v101_v63, %v7768_v6  ;;  %v7793_v21 = vunpack.i.h.bf16 %v11486_v45 }
 0x1e8   :  { %v3297_v52 = vpop.f32.mrf.mxu0  ;;  %4616 = vrot.lane.b32.xlu1 %v4300_v59, %s8175_s27  ;;  %v7792_v22 = vunpack.i.l.bf16 %v11486_v45  ;;  %v7788_v24 = vunpack.i.h.bf16 %v11494_v20  ;;  %v2632_v2 = vsel %vm2569_vm3, %v2552_v12, %v7782_v25  ;;  %v2633_v3 = vsel %vm2569_vm3, %v2553_v13, %v7783_v8  ;;  %v3906_v12 = vld [vmem:[#allocation2 + $0x82] ss:$2 sm:$0xff]  ;;  %v3984_v13 = vld [vmem:[#allocation2 + $0x83] ss:$2 sm:$0xff] }
 0x1e9   :  { %3620 = vst.msk [vmem:[#allocation2 + $0xc0] sm:$0xff] %vm3595_vm9, %v3540_v17  ;;  %v3543_v31 = vmax.f32 %v3306_v7, 0.0  ;;  %v3298_v36 = vadd.f32 %v11036_v51, %v3297_v52  ;;  %4614 = vrot.lane.b32.xlu0 %v4299_v49, %s8175_s27  ;;  %v7777_v49 = vunpack.i.l.bf16 %v11471_v14  ;;  %v7787_v14 = vunpack.i.l.bf16 %v11494_v20 }
 0x1ea   :  { %v7801_v0 = vpop.permute.xlu1 %7800  ;;  %v2631_v19 = vsel %vm2569_vm3, %v2551_v56, %v7778_v16  ;;  %v2712_v5 = vsel %vm2649_vm4, %v2632_v2, %v7792_v22  ;;  %v2713_v38 = vsel %vm2649_vm4, %v2633_v3, %v7793_v21  ;;  %v4199_v2 = vld [vmem:[#allocation2 + $0x85] ss:$2 sm:$0xff]  ;;  %v4336_v3 = vld [vmem:[#allocation2 + $0x86] ss:$2 sm:$0xff] }
 0x1eb   :  { %3623 = vst.msk [vmem:[#allocation2 + $0xd8] sm:$0xff] %vm3595_vm9, %v3543_v31  ;;  %v3541_v62 = vmax.f32 %v3298_v36, 0.0  ;;  %v7796_v57 = vpop.permute.xlu0 %7795  ;;  %v7803_v26 = vunpack.i.h.bf16 %v7801_v0  ;;  %v7802_v59 = vunpack.i.l.bf16 %v7801_v0  ;;  %v2630_v18 = vsel %vm2569_vm3, %v2550_v10, %v7777_v49  ;;  %v3986_v31 = vld [vmem:[#allocation2 + $0x93] ss:$2 sm:$0xff] }
 0x1ec   :  { %4676 = vrot.lane.b32.xlu1 %v4515_v60, %s8176_s19  ;;  %v7798_v27 = vunpack.i.h.bf16 %v7796_v57  ;;  %v7797_v32 = vunpack.i.l.bf16 %v7796_v57  ;;  %v2710_v47 = vsel %vm2649_vm4, %v2630_v18, %v7787_v14  ;;  %v2711_v37 = vsel %vm2649_vm4, %v2631_v19, %v7788_v24  ;;  %v4123_v24 = vld [vmem:[#allocation2 + $0x94] ss:$2 sm:$0xff]  ;;  %v4201_v14 = vld [vmem:[#allocation2 + $0x95] ss:$2 sm:$0xff] }
 0x1ed   :  { %3621 = vst.msk [vmem:[#allocation2 + $0xc8] sm:$0xff] %vm3595_vm9, %v3541_v62  ;;  %4674 = vrot.lane.b32.xlu0 %v11473_v50, %s8176_s19  ;;  %v2792_v1 = vsel %vm2729_vm5, %v2712_v5, %v7802_v59  ;;  %v2793_v17 = vsel %vm2729_vm5, %v2713_v38, %v7803_v26  ;;  %v4054_v10 = vmax.f32 %v3908_v23, %v3986_v31  ;;  %v4338_v26 = vld [vmem:[#allocation2 + $0x96] ss:$2 sm:$0xff] }
 0x1ee   :  { %v7811_v60 = vpop.permute.xlu1 %7810  ;;  %v2790_v20 = vsel %vm2729_vm5, %v2710_v47, %v7797_v32  ;;  %v2791_v41 = vsel %vm2729_vm5, %v2711_v37, %v7798_v27  ;;  %v4053_v59 = vmax.f32 %v3906_v12, %v3984_v13  ;;  %v4269_v18 = vmax.f32 %v4123_v24, %v4201_v14  ;;  %v104_v13 = vld [vmem:[%s12291_s0 + $0x200] sm:$0xff] }
 0x1ef   :  { %v7806_v33 = vpop.permute.xlu0 %7805  ;;  %v7813_v4 = vunpack.i.h.bf16 %v7811_v60  ;;  %v7812_v50 = vunpack.i.l.bf16 %v7811_v60  ;;  %v4416_v60 = vld [vmem:[#allocation2 + $0x97] ss:$2 sm:$0xff]  ;;  %v4270_v38 = vmax.f32 %v4125_v29, %v4203_v58 }
 0x1f0   :  { %4560 = vrot.lane.b32.xlu1 %v4087_v9, %s8174_s3  ;;  %v7808_v44 = vunpack.i.h.bf16 %v7806_v33  ;;  %v7807_v45 = vunpack.i.l.bf16 %v7806_v33  ;;  %v3912_v52 = vld [vmem:[#allocation2 + $0xb2] ss:$2 sm:$0xff]  ;;  %v3990_v53 = vld [vmem:[#allocation2 + $0xb3] ss:$2 sm:$0xff]  ;;  %v3910_v9 = vld [vmem:[#allocation2 + $0xa2] ss:$2 sm:$0xff]  ;;  %v4088_v33 = vpack.c.bf16 %v4054_v10, %v4053_v59 }
 0x1f1   :  { %4558 = vrot.lane.b32.xlu0 %v4086_v39, %s8174_s3  ;;  %v2872_v54 = vsel %vm2809_vm6, %v2792_v1, %v7812_v50  ;;  %v2873_v55 = vsel %vm2809_vm6, %v2793_v17, %v7813_v4  ;;  %v3988_v39 = vld [vmem:[#allocation2 + $0xa3] ss:$2 sm:$0xff]  ;;  %v4056_v57 = vmax.f32 %v3912_v52, %v3990_v53  ;;  %v4127_v56 = vld [vmem:[#allocation2 + $0xb4] ss:$2 sm:$0xff] }
 0x1f2   :  { %v7821_v7 = vpop.permute.xlu1 %7820  ;;  %v2870_v36 = vsel %vm2809_vm6, %v2790_v20, %v7807_v45  ;;  %v2871_v61 = vsel %vm2809_vm6, %v2791_v41, %v7808_v44  ;;  %v4205_v21 = vld [vmem:[#allocation2 + $0xb5] ss:$2 sm:$0xff]  ;;  %v4055_v22 = vmax.f32 %v3910_v9, %v3988_v39  ;;  %v4342_v19 = vld [vmem:[#allocation2 + $0xb6] ss:$2 sm:$0xff]  ;;  %v4484_v44 = vmax.f32 %v4338_v26, %v4416_v60  ;;  %v4340_v1 = vld [vmem:[#allocation2 + $0xa6] ss:$2 sm:$0xff] }
 0x1f3   :  { %v7823_v42 = vunpack.i.h.bf16 %v7821_v7  ;;  %v7822_v48 = vunpack.i.l.bf16 %v7821_v7  ;;  %v7816_v28 = vpop.permute.xlu0 %7815  ;;  %v4420_v4 = vld [vmem:[#allocation2 + $0xb7] ss:$2 sm:$0xff]  ;;  %v4414_v50 = vld [vmem:[#allocation2 + $0x87] ss:$2 sm:$0xff] }
 0x1f4   :  { %v7818_v30 = vunpack.i.h.bf16 %v7816_v28  ;;  %v7817_v6 = vunpack.i.l.bf16 %v7816_v28  ;;  %4620 = vrot.lane.b32.xlu1 %v4302_v35, %s8175_s27  ;;  %v4418_v17 = vld [vmem:[#allocation2 + $0xa7] ss:$2 sm:$0xff]  ;;  %v4483_v28 = vmax.f32 %v4336_v3, %v4414_v50 }
 0x1f5   :  { %v2952_v63 = vsel %vm2889_vm7, %v2872_v54, %v7822_v48  ;;  %v2953_v0 = vsel %vm2889_vm7, %v2873_v55, %v7823_v42  ;;  %4618 = vrot.lane.b32.xlu0 %v11516_v15, %s8175_s27  ;;  %v4516_v15 = vpack.c.bf16 %v4480_v46, %v4479_v43  ;;  %v4089_v43 = vpack.c.bf16 %v4056_v57, %v4055_v22  ;;  %v106_v52 = vld [vmem:[%s12291_s0 + $0x210] sm:$0xff] }
 0x1f6   :  { %v2950_v8 = vsel %vm2889_vm7, %v2870_v36, %v7817_v6  ;;  %v2951_v25 = vsel %vm2889_vm7, %v2871_v61, %v7818_v30  ;;  %v11562_v35 = vpop.permute.xlu1 %7830  ;;  %v3000_v62 = vpack.c.bf16 %v2953_v0, %v2952_v63  ;;  %v4271_v46 = vmax.f32 %v4127_v56, %v4205_v21  ;;  %v11595_v6 = vld [vmem:[#allocation2 + $0xc2] ss:$2 sm:$0xff]  ;;  %v11597_v23 = vld [vmem:[#allocation2 + $0xc3] ss:$2 sm:$0xff] }
 0x1f7   :  { %v11564_v16 = vpop.permute.xlu0 %7825  ;;  %v2999_v49 = vpack.c.bf16 %v2951_v25, %v2950_v8  ;;  %v7832_v7 = vunpack.i.l.bf16 %v11562_v35  ;;  %v4486_v48 = vmax.f32 %v4342_v19, %v4420_v4  ;;  %v7833_v31 = vunpack.i.h.bf16 %v11562_v35  ;;  %v11611_v25 = vld [vmem:[%s12293_s2] ss:$0 sm:$0xff]  ;;  %v11617_v57 = vld [vmem:[#allocation2 + $0xc5] ss:$2 sm:$0xff] }
 0x1f8   :  { %4680 = vrot.lane.b32.xlu1 %v11521_v11, %s8176_s19  ;;  %v4121_v11 = vld [vmem:[#allocation2 + $0x84] ss:$2 sm:$0xff]  ;;  %v4304_v42 = vpack.c.bf16 %v4271_v46, %v4270_v38  ;;  %v7828_v36 = vunpack.i.h.bf16 %v11564_v16  ;;  %v4485_v63 = vmax.f32 %v4340_v1, %v4418_v17  ;;  %v4518_v0 = vpack.c.bf16 %v4484_v44, %v4483_v28 }
 0x1f9   :  { %6722 = vmatprep.mubr.msk.bf16.mxu0 %vm3036_vm8, %v2999_v49  ;;  %4678 = vrot.lane.b32.xlu0 %v4516_v15, %s8176_s19  ;;  %v4268_v37 = vmax.f32 %v4121_v11, %v4199_v2  ;;  %v7827_v9 = vunpack.i.l.bf16 %v11564_v16  ;;  %v2556_v12 = vsel %vm2489_vm2, %v106_v52, %v7832_v7  ;;  %v105_v16 = vld [vmem:[%s12291_s0 + $0x208] sm:$0xff]  ;;  %v4057_v56 = vmax.f32 %v11595_v6, %v11597_v23 }
 0x1fa   :  { %v6692_v40 = vpop.f32.mrf.mxu0  ;;  %6723 = vmatmul.mubr.msk.bf16.gmra.mxu0 %vm3036_vm8, %v3000_v62  ;;  %v11577_v34 = vpop.permute.xlu1 %7840  ;;  %v11615_v62 = vld [vmem:[#allocation2 + $0xc4] ss:$2 sm:$0xff]  ;;  %v4519_v10 = vpack.c.bf16 %v4486_v48, %v4485_v63 }
 0x1fb   :  { %v3319_v27 = vadd.f32 %v11036_v51, %v6692_v40  ;;  %v11580_v32 = vpop.permute.xlu0 %7835  ;;  %v4303_v30 = vpack.c.bf16 %v4269_v18, %v4268_v37  ;;  %v7842_v39 = vunpack.i.l.bf16 %v11577_v34  ;;  %v7843_v49 = vunpack.i.h.bf16 %v11577_v34 }
 0x1fc   :  { %v3310_v5 = vpop.f32.mrf.mxu0  ;;  %4564 = vrot.lane.b32.xlu1 %v4089_v43, %s8174_s3  ;;  %v7838_v21 = vunpack.i.h.bf16 %v11580_v32  ;;  %v7837_v22 = vunpack.i.l.bf16 %v11580_v32  ;;  %v4272_v60 = vmax.f32 %v11615_v62, %v11617_v57  ;;  %v2554_v40 = vsel %vm2489_vm2, %v104_v13, %v7827_v9 }
 0x1fd   :  { %v3546_v45 = vmax.f32 %v3319_v27, 0.0  ;;  %v3311_v47 = vadd.f32 %v11036_v51, %v3310_v5  ;;  %4562 = vrot.lane.b32.xlu0 %v4088_v33, %s8174_s3  ;;  %v2555_v34 = vsel %vm2489_vm2, %v105_v16, %v7828_v36  ;;  %v2636_v43 = vsel %vm2569_vm3, %v2556_v12, %v7842_v39 }
 0x1fe   :  { %v6693_v20 = vpop.f32.mrf.mxu0  ;;  %v11586_v41 = vpop.permute.xlu1 %7850  ;;  %v2634_v18 = vsel %vm2569_vm3, %v2554_v40, %v7837_v22  ;;  %v2635_v19 = vsel %vm2569_vm3, %v2555_v34, %v7838_v21 }
 0x1ff   :  { %3626 = vst.msk [vmem:[#allocation2 + $0xf0] sm:$0xff] %vm3595_vm9, %v3546_v45  ;;  %v3544_v53 = vmax.f32 %v3311_v47, 0.0  ;;  %v3322_v54 = vadd.f32 %v11036_v51, %v6693_v20  ;;  %v11593_v55 = vpop.permute.xlu0 %7845  ;;  %v107_v51 = vld [vmem:[%s12291_s0 + $0x218] sm:$0xff]  ;;  %v7852_v24 = vunpack.i.l.bf16 %v11586_v41  ;;  %v7853_v29 = vunpack.i.h.bf16 %v11586_v41 }
 0x200   :  { %v3313_v61 = vpop.f32.mrf.mxu0  ;;  %4624 = vrot.lane.b32.xlu1 %v4304_v42, %s8175_s27  ;;  %v2557_v59 = vsel %vm2489_vm2, %v107_v51, %v7833_v31  ;;  %v7847_v58 = vunpack.i.l.bf16 %v11593_v55  ;;  %v7848_v46 = vunpack.i.h.bf16 %v11593_v55 }
 0x201   :  { %3624 = vst.msk [vmem:[#allocation2 + $0xe0] sm:$0xff] %vm3595_vm9, %v3544_v53  ;;  %v3547_v8 = vmax.f32 %v3322_v54, 0.0  ;;  %v3314_v35 = vadd.f32 %v11611_v25, %v3313_v61  ;;  %4622 = vrot.lane.b32.xlu0 %v4303_v30, %s8175_s27  ;;  %v2637_v33 = vsel %vm2569_vm3, %v2557_v59, %v7843_v49  ;;  %v2716_v4 = vsel %vm2649_vm4, %v2636_v43, %v7852_v24  ;;  %v4344_v49 = vld [vmem:[#allocation2 + $0xc6] ss:$2 sm:$0xff] }
 0x202   :  { %v7861_v15 = vpop.permute.xlu1 %7860  ;;  %v2717_v5 = vsel %vm2649_vm4, %v2637_v33, %v7853_v29  ;;  %v2714_v38 = vsel %vm2649_vm4, %v2634_v18, %v7847_v58  ;;  %v2715_v17 = vsel %vm2649_vm4, %v2635_v19, %v7848_v46 }
 0x203   :  { %3627 = vst.msk [vmem:[#allocation2 + $0xf8] sm:$0xff] %vm3595_vm9, %v3547_v8  ;;  %v3545_v14 = vmax.f32 %v3314_v35, 0.0  ;;  %v7856_v26 = vpop.permute.xlu0 %7855  ;;  %v7863_v11 = vunpack.i.h.bf16 %v7861_v15  ;;  %v7862_v2 = vunpack.i.l.bf16 %v7861_v15  ;;  %v4422_v15 = vld [vmem:[#allocation2 + $0xc7] ss:$2 sm:$0xff] }
 0x204   :  { %4684 = vrot.lane.b32.xlu1 %v4519_v10, %s8176_s19  ;;  %v7858_v3 = vunpack.i.h.bf16 %v7856_v26  ;;  %v7857_v27 = vunpack.i.l.bf16 %v7856_v26  ;;  %v4487_v24 = vmax.f32 %v4344_v49, %v4422_v15 }
 0x205   :  { %3625 = vst.msk [vmem:[#allocation2 + $0xe8] sm:$0xff] %vm3595_vm9, %v3545_v14  ;;  %4682 = vrot.lane.b32.xlu0 %v4518_v0, %s8176_s19  ;;  %v2796_v48 = vsel %vm2729_vm5, %v2716_v4, %v7862_v2  ;;  %v2797_v28 = vsel %vm2729_vm5, %v2717_v5, %v7863_v11  ;;  %v110_v2 = vld [vmem:[%s12291_s0 + $0x230] sm:$0xff]  ;;  %v111_v5 = vld [vmem:[%s12291_s0 + $0x238] sm:$0xff] }
 0x206   :  { %v7871_v32 = vpop.permute.xlu1 %7870  ;;  %v2794_v52 = vsel %vm2729_vm5, %v2714_v38, %v7857_v27  ;;  %v2795_v53 = vsel %vm2729_vm5, %v2715_v17, %v7858_v3 }
 0x207   :  { %v7866_v50 = vpop.permute.xlu0 %7865  ;;  %v7873_v44 = vunpack.i.h.bf16 %v7871_v32  ;;  %v7872_v45 = vunpack.i.l.bf16 %v7871_v32 }
 0x208   :  { %v3916_v47 = vld [vmem:[#allocation2 + $0xd2] ss:$2 sm:$0xff]  ;;  %v3994_v37 = vld [vmem:[#allocation2 + $0xd3] ss:$2 sm:$0xff]  ;;  %v7868_v7 = vunpack.i.h.bf16 %v7866_v50  ;;  %v7867_v20 = vunpack.i.l.bf16 %v7866_v50 }
 0x209   :  { %v4131_v1 = vld [vmem:[#allocation2 + $0xd4] ss:$2 sm:$0xff]  ;;  %v4058_v41 = vmax.f32 %v3916_v47, %v3994_v37  ;;  %v4209_v42 = vld [vmem:[#allocation2 + $0xd5] ss:$2 sm:$0xff]  ;;  %v2876_v36 = vsel %vm2809_vm6, %v2796_v48, %v7872_v45  ;;  %v2877_v61 = vsel %vm2809_vm6, %v2797_v28, %v7873_v44 }
 0x20a   :  { %v7881_v54 = vpop.permute.xlu1 %7880  ;;  %v4273_v31 = vmax.f32 %v4131_v1, %v4209_v42  ;;  %v4346_v51 = vld [vmem:[#allocation2 + $0xd6] ss:$2 sm:$0xff]  ;;  %v4424_v9 = vld [vmem:[#allocation2 + $0xd7] ss:$2 sm:$0xff]  ;;  %v2874_v39 = vsel %vm2809_vm6, %v2794_v52, %v7867_v20  ;;  %v2875_v8 = vsel %vm2809_vm6, %v2795_v53, %v7868_v7  ;;  %v109_v20 = vld [vmem:[%s12291_s0 + $0x228] sm:$0xff] }
 0x20b   :  { %v7883_v55 = vunpack.i.h.bf16 %v7881_v54  ;;  %v7882_v30 = vunpack.i.l.bf16 %v7881_v54  ;;  %v7876_v6 = vpop.permute.xlu0 %7875  ;;  %v4090_v23 = vpack.c.bf16 %v4058_v41, %v4057_v56  ;;  %v4488_v22 = vmax.f32 %v4346_v51, %v4424_v9  ;;  %v108_v7 = vld [vmem:[%s12291_s0 + $0x220] sm:$0xff] }
 0x20c   :  { %v7878_v63 = vunpack.i.h.bf16 %v7876_v6  ;;  %v7877_v0 = vunpack.i.l.bf16 %v7876_v6  ;;  %v4305_v21 = vpack.c.bf16 %v4273_v31, %v4272_v60  ;;  %v11676_v33 = vld [vmem:[#allocation2 + $0xe2] ss:$2 sm:$0xff]  ;;  %v11678_v18 = vld [vmem:[#allocation2 + $0xe3] ss:$2 sm:$0xff] }
 0x20d   :  { %v2956_v35 = vsel %vm2889_vm7, %v2876_v36, %v7882_v30  ;;  %v2957_v62 = vsel %vm2889_vm7, %v2877_v61, %v7883_v55  ;;  %4566 = vrot.lane.b32.xlu0 %v4090_v23, %s8174_s3  ;;  %v4520_v58 = vpack.c.bf16 %v4488_v22, %v4487_v24  ;;  %v11685_v37 = vld [vmem:[#allocation2 + $0xe4] ss:$2 sm:$0xff]  ;;  %v11687_v1 = vld [vmem:[#allocation2 + $0xe5] ss:$2 sm:$0xff]  ;;  %v4059_v48 = vmax.f32 %v11676_v33, %v11678_v18 }
 0x20e   :  { %v2954_v57 = vsel %vm2889_vm7, %v2874_v39, %v7877_v0  ;;  %v2955_v12 = vsel %vm2889_vm7, %v2875_v8, %v7878_v63  ;;  %v7891_v13 = vpop.permute.xlu1 %7890  ;;  %v3002_v16 = vpack.c.bf16 %v2957_v62, %v2956_v35  ;;  %v4274_v31 = vmax.f32 %v11685_v37, %v11687_v1 }
 0x20f   :  { %v7886_v10 = vpop.permute.xlu0 %7885  ;;  %v3001_v56 = vpack.c.bf16 %v2955_v12, %v2954_v57  ;;  %v7892_v60 = vunpack.i.l.bf16 %v7891_v13  ;;  %v7893_v19 = vunpack.i.h.bf16 %v7891_v13 }
 0x210   :  { %v7888_v4 = vunpack.i.h.bf16 %v7886_v10  ;;  %v7887_v38 = vunpack.i.l.bf16 %v7886_v10 }
 0x211   :  { %6726 = vmatprep.mubr.msk.bf16.mxu0 %vm3036_vm8, %v3001_v56  ;;  %4626 = vrot.lane.b32.xlu0 %v4305_v21, %s8175_s27  ;;  %v2560_v17 = vsel %vm2489_vm2, %v110_v2, %v7892_v60  ;;  %v2561_v30 = vsel %vm2489_vm2, %v111_v5, %v7893_v19 }
 0x212   :  { %v6696_v14 = vpop.f32.mrf.mxu0  ;;  %6727 = vmatmul.mubr.msk.bf16.gmra.mxu0 %vm3036_vm8, %v3002_v16  ;;  %v7901_v26 = vpop.permute.xlu1 %7900  ;;  %v2558_v36 = vsel %vm2489_vm2, %v108_v7, %v7887_v38  ;;  %v2559_v61 = vsel %vm2489_vm2, %v109_v20, %v7888_v4  ;;  %v4348_v20 = vld [vmem:[#allocation2 + $0xe6] ss:$2 sm:$0xff] }
 0x213   :  { %v3335_v59 = vadd.f32 %v11611_v25, %v6696_v14  ;;  %v7896_v29 = vpop.permute.xlu0 %7895  ;;  %v7902_v44 = vunpack.i.l.bf16 %v7901_v26  ;;  %v7903_v41 = vunpack.i.h.bf16 %v7901_v26 }
 0x214   :  { %v3326_v40 = vpop.f32.mrf.mxu0  ;;  %v7898_v28 = vunpack.i.h.bf16 %v7896_v29  ;;  %v7897_v52 = vunpack.i.l.bf16 %v7896_v29 }
 0x215   :  { %v3550_v34 = vmax.f32 %v3335_v59, 0.0  ;;  %v3327_v43 = vadd.f32 %v11611_v25, %v3326_v40  ;;  %4686 = vrot.lane.b32.xlu0 %v4520_v58, %s8176_s19  ;;  %v2640_v63 = vsel %vm2569_vm3, %v2560_v17, %v7902_v44  ;;  %v2641_v62 = vsel %vm2569_vm3, %v2561_v30, %v7903_v41  ;;  %v4426_v41 = vld [vmem:[#allocation2 + $0xe7] ss:$2 sm:$0xff] }
 0x216   :  { %v6697_v46 = vpop.f32.mrf.mxu0  ;;  %v7911_v11 = vpop.permute.xlu1 %7910  ;;  %v2638_v57 = vsel %vm2569_vm3, %v2558_v36, %v7897_v52  ;;  %v2639_v12 = vsel %vm2569_vm3, %v2559_v61, %v7898_v28 }
 0x217   :  { %3630 = vst.msk [vmem:[#allocation2 + $0x110] sm:$0xff] %vm3595_vm9, %v3550_v34  ;;  %v3548_v3 = vmax.f32 %v3327_v43, 0.0  ;;  %v3338_v27 = vadd.f32 %v11611_v25, %v6697_v46  ;;  %v7906_v32 = vpop.permute.xlu0 %7905  ;;  %v7912_v53 = vunpack.i.l.bf16 %v7911_v11  ;;  %v7913_v6 = vunpack.i.h.bf16 %v7911_v11 }
 0x218   :  { %v3329_v50 = vpop.f32.mrf.mxu0  ;;  %v7907_v23 = vunpack.i.l.bf16 %v7906_v32  ;;  %v7908_v0 = vunpack.i.h.bf16 %v7906_v32 }
 0x219   :  { %3628 = vst.msk [vmem:[#allocation2 + $0x100] sm:$0xff] %vm3595_vm9, %v3548_v3  ;;  %v3551_v45 = vmax.f32 %v3338_v27, 0.0  ;;  %v3330_v47 = vadd.f32 %v11611_v25, %v3329_v50  ;;  %v2720_v13 = vsel %vm2649_vm4, %v2640_v63, %v7912_v53  ;;  %v2721_v49 = vsel %vm2649_vm4, %v2641_v62, %v7913_v6 }
 0x21a   :  { %v7921_v42 = vpop.permute.xlu1 %7920  ;;  %v2718_v15 = vsel %vm2649_vm4, %v2638_v57, %v7907_v23  ;;  %v2719_v14 = vsel %vm2649_vm4, %v2639_v12, %v7908_v0  ;;  %v4489_v53 = vmax.f32 %v4348_v20, %v4426_v41 }
 0x21b   :  { %3631 = vst.msk [vmem:[#allocation2 + $0x118] sm:$0xff] %vm3595_vm9, %v3551_v45  ;;  %v3549_v54 = vmax.f32 %v3330_v47, 0.0  ;;  %v7916_v55 = vpop.permute.xlu0 %7915  ;;  %v7923_v51 = vunpack.i.h.bf16 %v7921_v42  ;;  %v7922_v9 = vunpack.i.l.bf16 %v7921_v42 }
 0x21c   :  { %v7918_v39 = vunpack.i.h.bf16 %v7916_v55  ;;  %v7917_v8 = vunpack.i.l.bf16 %v7916_v55 }
 0x21d   :  { %3629 = vst.msk [vmem:[#allocation2 + $0x108] sm:$0xff] %vm3595_vm9, %v3549_v54  ;;  %v2800_v40 = vsel %vm2729_vm5, %v2720_v13, %v7922_v9  ;;  %v2801_v34 = vsel %vm2729_vm5, %v2721_v49, %v7923_v51  ;;  %v114_v9 = vld [vmem:[%s12291_s0 + $0x250] sm:$0xff]  ;;  %v115_v49 = vld [vmem:[%s12291_s0 + $0x258] sm:$0xff] }
 0x21e   :  { %v7931_v35 = vpop.permute.xlu1 %7930  ;;  %v2798_v43 = vsel %vm2729_vm5, %v2718_v15, %v7917_v8  ;;  %v2799_v60 = vsel %vm2729_vm5, %v2719_v14, %v7918_v39 }
 0x21f   :  { %v7926_v16 = vpop.permute.xlu0 %7925  ;;  %v7933_v10 = vunpack.i.h.bf16 %v7931_v35  ;;  %v7932_v56 = vunpack.i.l.bf16 %v7931_v35 }
 0x220   :  { %v3920_v21 = vld [vmem:[#allocation2 + $0xf2] ss:$2 sm:$0xff]  ;;  %v3998_v22 = vld [vmem:[#allocation2 + $0xf3] ss:$2 sm:$0xff]  ;;  %v7928_v26 = vunpack.i.h.bf16 %v7926_v16  ;;  %v7927_v59 = vunpack.i.l.bf16 %v7926_v16 }
 0x221   :  { %v4135_v24 = vld [vmem:[#allocation2 + $0xf4] ss:$2 sm:$0xff]  ;;  %v4060_v29 = vmax.f32 %v3920_v21, %v3998_v22  ;;  %v4213_v58 = vld [vmem:[#allocation2 + $0xf5] ss:$2 sm:$0xff]  ;;  %v2880_v33 = vsel %vm2809_vm6, %v2800_v40, %v7932_v56  ;;  %v2881_v18 = vsel %vm2809_vm6, %v2801_v34, %v7933_v10 }
 0x222   :  { %v7941_v46 = vpop.permute.xlu1 %7940  ;;  %v4275_v32 = vmax.f32 %v4135_v24, %v4213_v58  ;;  %v4350_v50 = vld [vmem:[#allocation2 + $0xf6] ss:$2 sm:$0xff]  ;;  %v4428_v5 = vld [vmem:[#allocation2 + $0xf7] ss:$2 sm:$0xff]  ;;  %v2878_v38 = vsel %vm2809_vm6, %v2798_v43, %v7927_v59  ;;  %v2879_v44 = vsel %vm2809_vm6, %v2799_v60, %v7928_v26  ;;  %v113_v59 = vld [vmem:[%s12291_s0 + $0x248] sm:$0xff] }
 0x223   :  { %v7943_v11 = vunpack.i.h.bf16 %v7941_v46  ;;  %v7942_v2 = vunpack.i.l.bf16 %v7941_v46  ;;  %v7936_v3 = vpop.permute.xlu0 %7935  ;;  %v4091_v27 = vpack.c.bf16 %v4060_v29, %v4059_v48  ;;  %v4490_v52 = vmax.f32 %v4350_v50, %v4428_v5  ;;  %v112_v26 = vld [vmem:[%s12291_s0 + $0x240] sm:$0xff] }
 0x224   :  { %v7938_v19 = vunpack.i.h.bf16 %v7936_v3  ;;  %v7937_v4 = vunpack.i.l.bf16 %v7936_v3  ;;  %v4306_v28 = vpack.c.bf16 %v4275_v32, %v4274_v31  ;;  %v11737_v62 = vld [vmem:[#allocation2 + $0x102] ss:$2 sm:$0xff]  ;;  %v11739_v57 = vld [vmem:[#allocation2 + $0x103] ss:$2 sm:$0xff] }
 0x225   :  { %v2960_v45 = vsel %vm2889_vm7, %v2880_v33, %v7942_v2  ;;  %v2961_v47 = vsel %vm2889_vm7, %v2881_v18, %v7943_v11  ;;  %4568 = vrot.lane.b32.xlu1 %v4091_v27, %s8174_s3  ;;  %v4521_v23 = vpack.c.bf16 %v4490_v52, %v4489_v53  ;;  %v11746_v22 = vld [vmem:[#allocation2 + $0x104] ss:$2 sm:$0xff]  ;;  %v11748_v24 = vld [vmem:[#allocation2 + $0x105] ss:$2 sm:$0xff]  ;;  %v4061_v40 = vmax.f32 %v11737_v62, %v11739_v57 }
 0x226   :  { %v2958_v37 = vsel %vm2889_vm7, %v2878_v38, %v7937_v4  ;;  %v2959_v1 = vsel %vm2889_vm7, %v2879_v44, %v7938_v19  ;;  %v7951_v17 = vpop.permute.xlu1 %7950  ;;  %v3004_v7 = vpack.c.bf16 %v2961_v47, %v2960_v45  ;;  %v4276_v32 = vmax.f32 %v11746_v22, %v11748_v24 }
 0x227   :  { %v7946_v42 = vpop.permute.xlu0 %7945  ;;  %v3003_v48 = vpack.c.bf16 %v2959_v1, %v2958_v37  ;;  %v7952_v31 = vunpack.i.l.bf16 %v7951_v17  ;;  %v7953_v12 = vunpack.i.h.bf16 %v7951_v17 }
 0x228   :  { %v7948_v13 = vunpack.i.h.bf16 %v7946_v42  ;;  %v7947_v15 = vunpack.i.l.bf16 %v7946_v42 }
 0x229   :  { %6730 = vmatprep.mubr.msk.bf16.mxu0 %vm3036_vm8, %v3003_v48  ;;  %4628 = vrot.lane.b32.xlu1 %v4306_v28, %s8175_s27  ;;  %v2564_v14 = vsel %vm2489_vm2, %v114_v9, %v7952_v31  ;;  %v2565_v2 = vsel %vm2489_vm2, %v115_v49, %v7953_v12 }
 0x22a   :  { %v6700_v54 = vpop.f32.mrf.mxu0  ;;  %6731 = vmatmul.mubr.msk.bf16.gmra.mxu0 %vm3036_vm8, %v3004_v7  ;;  %v7961_v55 = vpop.permute.xlu1 %7960  ;;  %v2562_v33 = vsel %vm2489_vm2, %v112_v26, %v7947_v15  ;;  %v2563_v18 = vsel %vm2489_vm2, %v113_v59, %v7948_v13  ;;  %v4352_v59 = vld [vmem:[#allocation2 + $0x106] ss:$2 sm:$0xff] }
 0x22b   :  { %v3351_v30 = vadd.f32 %v11611_v25, %v6700_v54  ;;  %v7956_v6 = vpop.permute.xlu0 %7955  ;;  %v7962_v10 = vunpack.i.l.bf16 %v7961_v55  ;;  %v7963_v29 = vunpack.i.h.bf16 %v7961_v55 }
 0x22c   :  { %v3342_v36 = vpop.f32.mrf.mxu0  ;;  %v7958_v34 = vunpack.i.h.bf16 %v7956_v6  ;;  %v7957_v43 = vunpack.i.l.bf16 %v7956_v6 }
 0x22d   :  { %v3554_v61 = vmax.f32 %v3351_v30, 0.0  ;;  %v3343_v63 = vadd.f32 %v11611_v25, %v3342_v36  ;;  %4688 = vrot.lane.b32.xlu1 %v4521_v23, %s8176_s19  ;;  %v2644_v19 = vsel %vm2569_vm3, %v2564_v14, %v7962_v10  ;;  %v2645_v47 = vsel %vm2569_vm3, %v2565_v2, %v7963_v29  ;;  %v4430_v29 = vld [vmem:[#allocation2 + $0x107] ss:$2 sm:$0xff] }
 0x22e   :  { %v6701_v0 = vpop.f32.mrf.mxu0  ;;  %v7971_v51 = vpop.permute.xlu1 %7970  ;;  %v2642_v37 = vsel %vm2569_vm3, %v2562_v33, %v7957_v43  ;;  %v2643_v1 = vsel %vm2569_vm3, %v2563_v18, %v7958_v34 }
 0x22f   :  { %3634 = vst.msk [vmem:[#allocation2 + $0x130] sm:$0xff] %vm3595_vm9, %v3554_v61  ;;  %v3552_v39 = vmax.f32 %v3343_v63, 0.0  ;;  %v3354_v8 = vadd.f32 %v11611_v25, %v6701_v0  ;;  %v7966_v35 = vpop.permute.xlu0 %7965  ;;  %v7972_v60 = vunpack.i.l.bf16 %v7971_v51  ;;  %v7973_v3 = vunpack.i.h.bf16 %v7971_v51 }
 0x230   :  { %v3345_v16 = vpop.f32.mrf.mxu0  ;;  %v7967_v27 = vunpack.i.l.bf16 %v7966_v35  ;;  %v7968_v4 = vunpack.i.h.bf16 %v7966_v35 }
 0x231   :  { %3632 = vst.msk [vmem:[#allocation2 + $0x120] sm:$0xff] %vm3595_vm9, %v3552_v39  ;;  %v3555_v56 = vmax.f32 %v3354_v8, 0.0  ;;  %v3346_v21 = vadd.f32 %v11611_v25, %v3345_v16  ;;  %v2724_v17 = vsel %vm2649_vm4, %v2644_v19, %v7972_v60  ;;  %v2725_v20 = vsel %vm2649_vm4, %v2645_v47, %v7973_v3 }
 0x232   :  { %v7981_v58 = vpop.permute.xlu1 %7980  ;;  %v2722_v41 = vsel %vm2649_vm4, %v2642_v37, %v7967_v27  ;;  %v2723_v54 = vsel %vm2649_vm4, %v2643_v1, %v7968_v4  ;;  %v4491_v60 = vmax.f32 %v4352_v59, %v4430_v29  ;;  %v118_v37 = vld [vmem:[%s12291_s0 + $0x270] sm:$0xff] }
 0x233   :  { %3635 = vst.msk [vmem:[#allocation2 + $0x138] sm:$0xff] %vm3595_vm9, %v3555_v56  ;;  %v3553_v46 = vmax.f32 %v3346_v21, 0.0  ;;  %v7976_v11 = vpop.permute.xlu0 %7975  ;;  %v7983_v50 = vunpack.i.h.bf16 %v7981_v58  ;;  %v7982_v5 = vunpack.i.l.bf16 %v7981_v58 }
 0x234   :  { %v7978_v38 = vunpack.i.h.bf16 %v7976_v11  ;;  %v7977_v44 = vunpack.i.l.bf16 %v7976_v11 }
 0x235   :  { %3633 = vst.msk [vmem:[#allocation2 + $0x128] sm:$0xff] %vm3595_vm9, %v3553_v46  ;;  %v2804_v36 = vsel %vm2729_vm5, %v2724_v17, %v7982_v5  ;;  %v2805_v61 = vsel %vm2729_vm5, %v2725_v20, %v7983_v50 }
 0x236   :  { %v7991_v45 = vpop.permute.xlu1 %7990  ;;  %v2802_v63 = vsel %vm2729_vm5, %v2722_v41, %v7977_v44  ;;  %v2803_v31 = vsel %vm2729_vm5, %v2723_v54, %v7978_v38  ;;  %v117_v54 = vld [vmem:[%s12291_s0 + $0x268] sm:$0xff] }
 0x237   :  { %v7986_v7 = vpop.permute.xlu0 %7985  ;;  %v7993_v42 = vunpack.i.h.bf16 %v7991_v45  ;;  %v7992_v48 = vunpack.i.l.bf16 %v7991_v45 }
 0x238   :  { %v3924_v28 = vld [vmem:[#allocation2 + $0x112] ss:$2 sm:$0xff]  ;;  %v4002_v52 = vld [vmem:[#allocation2 + $0x113] ss:$2 sm:$0xff]  ;;  %v7988_v55 = vunpack.i.h.bf16 %v7986_v7  ;;  %v7987_v30 = vunpack.i.l.bf16 %v7986_v7 }
 0x239   :  { %v4139_v53 = vld [vmem:[#allocation2 + $0x114] ss:$2 sm:$0xff]  ;;  %v4062_v6 = vmax.f32 %v3924_v28, %v4002_v52  ;;  %v4217_v23 = vld [vmem:[#allocation2 + $0x115] ss:$2 sm:$0xff]  ;;  %v2884_v62 = vsel %vm2809_vm6, %v2804_v36, %v7992_v48  ;;  %v2885_v57 = vsel %vm2809_vm6, %v2805_v61, %v7993_v42 }
 0x23a   :  { %v8001_v0 = vpop.permute.xlu1 %8000  ;;  %v4277_v35 = vmax.f32 %v4139_v53, %v4217_v23  ;;  %v4354_v16 = vld [vmem:[#allocation2 + $0x116] ss:$2 sm:$0xff]  ;;  %v4432_v49 = vld [vmem:[#allocation2 + $0x117] ss:$2 sm:$0xff]  ;;  %v2882_v15 = vsel %vm2809_vm6, %v2802_v63, %v7987_v30  ;;  %v2883_v10 = vsel %vm2809_vm6, %v2803_v31, %v7988_v55 }
 0x23b   :  { %v8003_v51 = vunpack.i.h.bf16 %v8001_v0  ;;  %v8002_v9 = vunpack.i.l.bf16 %v8001_v0  ;;  %v7996_v39 = vpop.permute.xlu0 %7995  ;;  %v4092_v8 = vpack.c.bf16 %v4062_v6, %v4061_v40  ;;  %v4492_v43 = vmax.f32 %v4354_v16, %v4432_v49  ;;  %v116_v42 = vld [vmem:[%s12291_s0 + $0x260] sm:$0xff] }
 0x23c   :  { %v7998_v12 = vunpack.i.h.bf16 %v7996_v39  ;;  %v7997_v13 = vunpack.i.l.bf16 %v7996_v39  ;;  %v4307_v34 = vpack.c.bf16 %v4277_v35, %v4276_v32  ;;  %v3926_v28 = vld [vmem:[#allocation2 + $0x122] ss:$2 sm:$0xff]  ;;  %v4004_v52 = vld [vmem:[#allocation2 + $0x123] ss:$2 sm:$0xff] }
 0x23d   :  { %v2964_v56 = vsel %vm2889_vm7, %v2884_v62, %v8002_v9  ;;  %v2965_v21 = vsel %vm2889_vm7, %v2885_v57, %v8003_v51  ;;  %4570 = vrot.lane.b32.xlu0 %v4092_v8, %s8174_s3  ;;  %v4522_v27 = vpack.c.bf16 %v4492_v43, %v4491_v60  ;;  %v4063_v31 = vmax.f32 %v3926_v28, %v4004_v52 }
 0x23e   :  { %v2962_v22 = vsel %vm2889_vm7, %v2882_v15, %v7997_v13  ;;  %v2963_v24 = vsel %vm2889_vm7, %v2883_v10, %v7998_v12  ;;  %v829_v14 = vpop.permute.xlu1 %828  ;;  %v3006_v26 = vpack.c.bf16 %v2965_v21, %v2964_v56 }
 0x23f   :  { %v8006_v58 = vpop.permute.xlu0 %8005  ;;  %v3005_v40 = vpack.c.bf16 %v2963_v24, %v2962_v22  ;;  %v2568_v53 = vsel %vm2489_vm2, %v118_v37, %v829_v14  ;;  %v4141_v22 = vld [vmem:[#allocation2 + $0x124] ss:$2 sm:$0xff]  ;;  %v4219_v24 = vld [vmem:[#allocation2 + $0x125] ss:$2 sm:$0xff] }
 0x240   :  { %v8007_v17 = vunpack.i.l.bf16 %v8006_v58  ;;  %v8008_v41 = vunpack.i.h.bf16 %v8006_v58  ;;  %v3679_v58 = vld [vmem:[#allocation2 + $0x20] ss:$2 sm:$0xff]  ;;  %v4434_v37 = vld [vmem:[#allocation2 + $0x127] ss:$2 sm:$0xff] }
 0x241   :  { %6734 = vmatprep.mubr.msk.bf16.mxu0 %vm3036_vm8, %v3005_v40  ;;  %4630 = vrot.lane.b32.xlu0 %v4307_v34, %s8175_s27 }
 0x242   :  { %v6704_v46 = vpop.f32.mrf.mxu0  ;;  %6735 = vmatmul.mubr.msk.bf16.gmra.mxu0 %vm3036_vm8, %v3006_v26  ;;  %v1145_v11 = vpop.permute.xlu1 %1144  ;;  %v2566_v36 = vsel %vm2489_vm2, %v116_v42, %v8007_v17  ;;  %v2567_v0 = vsel %vm2489_vm2, %v117_v54, %v8008_v41  ;;  %v3677_v17 = vld [vmem:[#allocation2 + $0x10] ss:$2 sm:$0xff]  ;;  %vm6034_vm2 = vcmask 457728  }
 0x243   :  { %v3367_v2 = vadd.f32 %v11611_v25, %v6704_v46  ;;  %v8011_v3 = vpop.permute.xlu0 %8010  ;;  %v2648_v51 = vsel %vm2569_vm3, %v2568_v53, %v1145_v11  ;;  %v3757_v11 = vld [vmem:[#allocation2 + $0x21] ss:$2 sm:$0xff] }
 0x244   :  { %v3358_v33 = vpop.f32.mrf.mxu0  ;;  %v8012_v48 = vunpack.i.l.bf16 %v8011_v3  ;;  %v8013_v55 = vunpack.i.h.bf16 %v8011_v3 }
 0x245   :  { %v3558_v18 = vmax.f32 %v3367_v2, 0.0  ;;  %v3359_v19 = vadd.f32 %v11611_v25, %v3358_v33  ;;  %4690 = vrot.lane.b32.xlu0 %v4522_v27, %s8176_s19 }
 0x246   :  { %v6705_v32 = vpop.f32.mrf.mxu0  ;;  %v1461_v4 = vpop.permute.xlu1 %1460  ;;  %v2646_v9 = vsel %vm2569_vm3, %v2566_v36, %v8012_v48  ;;  %v2647_v57 = vsel %vm2569_vm3, %v2567_v0, %v8013_v55  ;;  %vm6037_vm3 = vcmask 588800  }
 0x247   :  { %3638 = vst.msk [vmem:[#allocation2 + $0x150] sm:$0xff] %vm3595_vm9, %v3558_v18  ;;  %v3556_v50 = vmax.f32 %v3359_v19, 0.0  ;;  %v3370_v5 = vadd.f32 %v11611_v25, %v6705_v32  ;;  %v8016_v38 = vpop.permute.xlu0 %8015  ;;  %v2728_v15 = vsel %vm2649_vm4, %v2648_v51, %v1461_v4  ;;  %v3681_v19 = vld [vmem:[#allocation2 + $0x30] ss:$2 sm:$0xff]  ;;  %v3675_v32 = vld [vmem:[#allocation2] ss:$2 sm:$0xff] }
 0x248   :  { %v3361_v44 = vpop.f32.mrf.mxu0  ;;  %v8018_v30 = vunpack.i.h.bf16 %v8016_v38  ;;  %v8017_v6 = vunpack.i.l.bf16 %v8016_v38  ;;  %v3753_v4 = vld [vmem:[#allocation2 + $0x1] ss:$2 sm:$0xff] }
 0x249   :  { %3636 = vst.msk [vmem:[#allocation2 + $0x140] sm:$0xff] %vm3595_vm9, %v3556_v50  ;;  %v3559_v45 = vmax.f32 %v3370_v5, 0.0  ;;  %v3362_v47 = vadd.f32 %v11611_v25, %v3361_v44  ;;  %v4278_v50 = vmax.f32 %v4141_v22, %v4219_v24  ;;  %v3759_v44 = vld [vmem:[#allocation2 + $0x31] ss:$2 sm:$0xff]  ;;  %v3830_v52 = vmax.f32 %v3675_v32, %v3753_v4  ;;  %v3765_v22 = vld [vmem:[#allocation2 + $0x61] ss:$2 sm:$0xff] }
 0x24a   :  { %v1777_v1 = vpop.permute.xlu1 %1776  ;;  %v2726_v10 = vsel %vm2649_vm4, %v2646_v9, %v8017_v6  ;;  %v2727_v56 = vsel %vm2649_vm4, %v2647_v57, %v8018_v30  ;;  %v3833_v53 = vmax.f32 %v3681_v19, %v3759_v44  ;;  %vm6039_vm4 = vcmask 654336  }
 0x24b   :  { %3639 = vst.msk [vmem:[#allocation2 + $0x158] sm:$0xff] %vm3595_vm9, %v3559_v45  ;;  %v3557_v7 = vmax.f32 %v3362_v47, 0.0  ;;  %v8021_v20 = vpop.permute.xlu0 %8020  ;;  %v2808_v14 = vsel %vm2729_vm5, %v2728_v15, %v1777_v1  ;;  %v4356_v47 = vld [vmem:[#allocation2 + $0x126] ss:$2 sm:$0xff]  ;;  %v3832_v1 = vmax.f32 %v3679_v58, %v3757_v11  ;;  %v3767_v58 = vld [vmem:[#allocation2 + $0x71] ss:$2 sm:$0xff] }
 0x24c   :  { %v8022_v61 = vunpack.i.l.bf16 %v8021_v20  ;;  %v8023_v39 = vunpack.i.h.bf16 %v8021_v20  ;;  %v4493_v54 = vmax.f32 %v4356_v47, %v4434_v37 }
 0x24d   :  { %3637 = vst.msk [vmem:[#allocation2 + $0x148] sm:$0xff] %vm3595_vm9, %v3557_v7  ;;  %v3755_v7 = vld [vmem:[#allocation2 + $0x11] ss:$2 sm:$0xff] }
 0x24e   :  { %v2093_v23 = vpop.permute.xlu1 %2092  ;;  %v2806_v26 = vsel %vm2729_vm5, %v2726_v10, %v8022_v61  ;;  %v2807_v34 = vsel %vm2729_vm5, %v2727_v56, %v8023_v39  ;;  %v3831_v55 = vmax.f32 %v3677_v17, %v3755_v7  ;;  %vm6041_vm5 = vcmask 719872  }
 0x24f   :  { %v8026_v63 = vpop.permute.xlu0 %8025  ;;  %v2888_v43 = vsel %vm2809_vm6, %v2808_v14, %v2093_v23  ;;  %v3870_v23 = vpack.c.bf16 %v3833_v53, %v3832_v1 }
 0x250   :  { %v3928_v8 = vld [vmem:[#allocation2 + $0x132] ss:$2 sm:$0xff]  ;;  %v4006_v35 = vld [vmem:[#allocation2 + $0x133] ss:$2 sm:$0xff]  ;;  %v8028_v12 = vunpack.i.h.bf16 %v8026_v63  ;;  %v8027_v13 = vunpack.i.l.bf16 %v8026_v63 }
 0x251   :  { %v4143_v62 = vld [vmem:[#allocation2 + $0x134] ss:$2 sm:$0xff]  ;;  %v4064_v16 = vmax.f32 %v3928_v8, %v4006_v35  ;;  %v4221_v49 = vld [vmem:[#allocation2 + $0x135] ss:$2 sm:$0xff] }
 0x252   :  { %v2409_v21 = vpop.permute.xlu1 %2408  ;;  %v4279_v40 = vmax.f32 %v4143_v62, %v4221_v49  ;;  %v4358_v2 = vld [vmem:[#allocation2 + $0x136] ss:$2 sm:$0xff]  ;;  %v4436_v3 = vld [vmem:[#allocation2 + $0x137] ss:$2 sm:$0xff]  ;;  %v2886_v27 = vsel %vm2809_vm6, %v2806_v26, %v8027_v13  ;;  %v2887_v33 = vsel %vm2809_vm6, %v2807_v34, %v8028_v12  ;;  %vm6044_vm6 = vcmask 850944  }
 0x253   :  { %v8031_v59 = vpop.permute.xlu0 %8030  ;;  %v4093_v29 = vpack.c.bf16 %v4064_v16, %v4063_v31  ;;  %v2968_v18 = vsel %vm2889_vm7, %v2888_v43, %v2409_v21  ;;  %v4494_v48 = vmax.f32 %v4358_v2, %v4436_v3  ;;  %v3869_v31 = vpack.c.bf16 %v3831_v55, %v3830_v52  ;;  %v3687_v21 = vld [vmem:[#allocation2 + $0x60] ss:$2 sm:$0xff] }
 0x254   :  { %v8033_v60 = vunpack.i.h.bf16 %v8031_v59  ;;  %v8032_v46 = vunpack.i.l.bf16 %v8031_v59  ;;  %v4308_v42 = vpack.c.bf16 %v4279_v40, %v4278_v50  ;;  %v3008_v28 = vpack.c.bf16 %v2968_v18, %v2968_v18  ;;  %v3683_v26 = vld [vmem:[#allocation2 + $0x40] ss:$2 sm:$0xff]  ;;  %v3761_v59 = vld [vmem:[#allocation2 + $0x41] ss:$2 sm:$0xff] }
 0x255   :  { %4572 = vrot.lane.b32.xlu1 %v4093_v29, %s8174_s3  ;;  %v4523_v63 = vpack.c.bf16 %v4494_v48, %v4493_v54  ;;  %v3689_v29 = vld [vmem:[#allocation2 + $0x70] ss:$2 sm:$0xff]  ;;  %v3836_v43 = vmax.f32 %v3687_v21, %v3765_v22  ;;  %v3834_v2 = vmax.f32 %v3683_v26, %v3761_v59  ;;  %v4008_v19 = vld [vmem:[#allocation2 + $0x143] ss:$2 sm:$0xff]  ;;  %v3695_v54 = vld [vmem:[#allocation2 + $0xa0] ss:$2 sm:$0xff] }
 0x256   :  { %v2966_v5 = vsel %vm2889_vm7, %v2886_v27, %v8032_v46  ;;  %v2967_v38 = vsel %vm2889_vm7, %v2887_v33, %v8033_v60  ;;  %v4557_v45 = vpop.permute.xlu1 %4556  ;;  %v3685_v60 = vld [vmem:[#allocation2 + $0x50] ss:$2 sm:$0xff]  ;;  %v3763_v46 = vld [vmem:[#allocation2 + $0x51] ss:$2 sm:$0xff]  ;;  %v3837_v3 = vmax.f32 %v3689_v29, %v3767_v58  ;;  %vm6046_vm7 = vcmask 916480  }
 0x257   :  { %v4555_v20 = vpop.permute.xlu0 %4554  ;;  %v3007_v41 = vpack.c.bf16 %v2967_v38, %v2966_v5  ;;  %v4719_v51 = vsel %vm3595_vm9, %v3870_v23, %v4557_v45  ;;  %v3835_v27 = vmax.f32 %v3685_v60, %v3763_v46  ;;  %v3930_v18 = vld [vmem:[#allocation2 + $0x142] ss:$2 sm:$0xff] }
 0x258   :  { %v4716_v8 = vsel %vm3595_vm9, %v3869_v31, %v4555_v20  ;;  %v3872_v32 = vpack.c.bf16 %v3837_v3, %v3836_v43  ;;  %v4065_v47 = vmax.f32 %v3930_v18, %v4008_v19  ;;  %v3769_v31 = vld [vmem:[#allocation2 + $0x81] ss:$2 sm:$0xff] }
 0x259   :  { %6738 = vmatprep.mubr.msk.bf16.mxu0 %vm3036_vm8, %v3007_v41  ;;  %4632 = vrot.lane.b32.xlu1 %v4308_v42, %s8175_s27  ;;  %v3871_v50 = vpack.c.bf16 %v3835_v27, %v3834_v2  ;;  %v4145_v41 = vld [vmem:[#allocation2 + $0x144] ss:$2 sm:$0xff]  ;;  %v4223_v42 = vld [vmem:[#allocation2 + $0x145] ss:$2 sm:$0xff] }
 0x25a   :  { %v6708_v30 = vpop.f32.mrf.mxu0  ;;  %6739 = vmatmul.mubr.msk.bf16.gmra.mxu0 %vm3036_vm8, %v3008_v28  ;;  %v4617_v6 = vpop.permute.xlu1 %4616  ;;  %vm6048_vm8 = vcmask 982016  }
 0x25b   :  { %v3383_v36 = vadd.f32 %v11611_v25, %v6708_v30  ;;  %v4615_v61 = vpop.permute.xlu0 %4614  ;;  %v4778_v35 = vsel %vm4774_vm10, %v4719_v51, %v4617_v6  ;;  %v3773_v6 = vld [vmem:[#allocation2 + $0xa1] ss:$2 sm:$0xff]  ;;  %v3775_v51 = vld [vmem:[#allocation2 + $0xb1] ss:$2 sm:$0xff] }
 0x25c   :  { %v3374_v0 = vpop.f32.mrf.mxu0  ;;  %v4776_v12 = vsel %vm4774_vm10, %v4716_v8, %v4615_v61  ;;  %v3697_v61 = vld [vmem:[#allocation2 + $0xb0] ss:$2 sm:$0xff]  ;;  %v4438_v8 = vld [vmem:[#allocation2 + $0x147] ss:$2 sm:$0xff] }
 0x25d   :  { %v3562_v9 = vmax.f32 %v3383_v36, 0.0  ;;  %v3375_v39 = vadd.f32 %v11611_v25, %v3374_v0  ;;  %4692 = vrot.lane.b32.xlu1 %v4523_v63, %s8176_s19  ;;  %v3691_v63 = vld [vmem:[#allocation2 + $0x80] ss:$2 sm:$0xff]  ;;  %v4280_v0 = vmax.f32 %v4145_v41, %v4223_v42 }
 0x25e   :  { %v6709_v62 = vpop.f32.mrf.mxu0  ;;  %v4677_v57 = vpop.permute.xlu1 %4676 }
 0x25f   :  { %3642 = vst.msk [vmem:[#allocation2 + $0x170] sm:$0xff] %vm3595_vm9, %v3562_v9  ;;  %v3560_v13 = vmax.f32 %v3375_v39, 0.0  ;;  %v3386_v16 = vadd.f32 %v11611_v25, %v6709_v62  ;;  %v4675_v49 = vpop.permute.xlu0 %4674  ;;  %v4820_v15 = vsel %vm4815_vm11, %v4778_v35, %v4677_v57  ;;  %v4360_v39 = vld [vmem:[#allocation2 + $0x146] ss:$2 sm:$0xff]  ;;  %v3840_v35 = vmax.f32 %v3695_v54, %v3773_v6  ;;  %v3771_v57 = vld [vmem:[#allocation2 + $0x91] ss:$2 sm:$0xff] }
 0x260   :  { %v3377_v10 = vpop.f32.mrf.mxu0  ;;  %v4817_v56 = vsel %vm4815_vm11, %v4776_v12, %v4675_v49  ;;  %v3693_v62 = vld [vmem:[#allocation2 + $0x90] ss:$2 sm:$0xff]  ;;  %v3838_v49 = vmax.f32 %v3691_v63, %v3769_v31 }
 0x261   :  { %3640 = vst.msk [vmem:[#allocation2 + $0x160] sm:$0xff] %vm3595_vm9, %v3560_v13  ;;  %v3563_v24 = vmax.f32 %v3386_v16, 0.0  ;;  %v3378_v14 = vadd.f32 %v11611_v25, %v3377_v10  ;;  %6758 = vmatprep.mubr.bf16.mxu1 %v4817_v56  ;;  %v4495_v10 = vmax.f32 %v4360_v39, %v4438_v8  ;;  %v3839_v56 = vmax.f32 %v3693_v62, %v3771_v57 }
 0x262   :  { %6759 = vmatmul.mubr.bf16.vlgmr.msra.gmra.mxu1 %v4820_v15  ;;  %v4561_v40 = vpop.permute.xlu1 %4560  ;;  %v3841_v15 = vmax.f32 %v3697_v61, %v3775_v51 }
 0x263   :  { %3643 = vst.msk [vmem:[#allocation2 + $0x178] sm:$0xff] %vm3595_vm9, %v3563_v24  ;;  %v3561_v34 = vmax.f32 %v3378_v14, 0.0  ;;  %v4559_v11 = vpop.permute.xlu0 %4558  ;;  %v4725_v45 = vsel %vm3595_vm9, %v3872_v32, %v4561_v40  ;;  %v3873_v29 = vpack.c.bf16 %v3839_v56, %v3838_v49 }
 0x264   :  { %v4722_v17 = vsel %vm3595_vm9, %v3871_v50, %v4559_v11  ;;  %v3874_v24 = vpack.c.bf16 %v3841_v15, %v3840_v35 }
 0x265   :  { %3641 = vst.msk [vmem:[#allocation2 + $0x168] sm:$0xff] %vm3595_vm9, %v3561_v34 }
 0x266   :  { %v4621_v33 = vpop.permute.xlu1 %4620 }
 0x267   :  { %v4619_v4 = vpop.permute.xlu0 %4618  ;;  %v4782_v7 = vsel %vm4774_vm10, %v4725_v45, %v4621_v33  ;;  %v11864_v33 = vld [vmem:[%s12293_s2] ss:$0 sm:$0xff]  ;;  %v3777_v45 = vld [vmem:[#allocation2 + $0xc1] ss:$2 sm:$0xff] }
 0x268   :  { %v3932_v5 = vld [vmem:[#allocation2 + $0x152] ss:$2 sm:$0xff]  ;;  %v4010_v38 = vld [vmem:[#allocation2 + $0x153] ss:$2 sm:$0xff]  ;;  %v4780_v48 = vsel %vm4774_vm10, %v4722_v17, %v4619_v4 }
 0x269   :  { %v4147_v44 = vld [vmem:[#allocation2 + $0x154] ss:$2 sm:$0xff]  ;;  %v4066_v37 = vmax.f32 %v3932_v5, %v4010_v38  ;;  %v4225_v1 = vld [vmem:[#allocation2 + $0x155] ss:$2 sm:$0xff] }
 0x26a   :  { %v4681_v20 = vpop.permute.xlu1 %4680  ;;  %v4281_v55 = vmax.f32 %v4147_v44, %v4225_v1  ;;  %v4362_v23 = vld [vmem:[#allocation2 + $0x156] ss:$2 sm:$0xff]  ;;  %v4440_v36 = vld [vmem:[#allocation2 + $0x157] ss:$2 sm:$0xff] }
 0x26b   :  { %v4679_v28 = vpop.permute.xlu0 %4678  ;;  %v4094_v52 = vpack.c.bf16 %v4066_v37, %v4065_v47  ;;  %v4826_v53 = vsel %vm4815_vm11, %v4782_v7, %v4681_v20  ;;  %v4496_v16 = vmax.f32 %v4362_v23, %v4440_v36  ;;  %v3699_v44 = vld [vmem:[#allocation2 + $0xc0] ss:$2 sm:$0xff]  ;;  %v3701_v1 = vld [vmem:[#allocation2 + $0xd0] ss:$2 sm:$0xff]  ;;  %v3779_v17 = vld [vmem:[#allocation2 + $0xd1] ss:$2 sm:$0xff] }
 0x26c   :  { %v4823_v30 = vsel %vm4815_vm11, %v4780_v48, %v4679_v28  ;;  %v4309_v13 = vpack.c.bf16 %v4281_v55, %v4280_v0  ;;  %v3934_v47 = vld [vmem:[#allocation2 + $0x162] ss:$2 sm:$0xff]  ;;  %v4012_v37 = vld [vmem:[#allocation2 + $0x163] ss:$2 sm:$0xff]  ;;  %v3842_v20 = vmax.f32 %v3699_v44, %v3777_v45  ;;  %v3843_v54 = vmax.f32 %v3701_v1, %v3779_v17 }
 0x26d   :  { %4574 = vrot.lane.b32.xlu0 %v4094_v52, %s8174_s3  ;;  %6762 = vmatprep.mubr.bf16.mxu1 %v4823_v30  ;;  %v4524_v59 = vpack.c.bf16 %v4496_v16, %v4495_v10  ;;  %v4067_v28 = vmax.f32 %v3934_v47, %v4012_v37  ;;  %v4149_v55 = vld [vmem:[#allocation2 + $0x164] ss:$2 sm:$0xff]  ;;  %v4227_v30 = vld [vmem:[#allocation2 + $0x165] ss:$2 sm:$0xff] }
 0x26e   :  { %6763 = vmatmul.mubr.bf16.gmra.mxu1 %v4826_v53  ;;  %v4565_v9 = vpop.permute.xlu1 %4564  ;;  %v3875_v61 = vpack.c.bf16 %v3843_v54, %v3842_v20  ;;  %v4282_v0 = vmax.f32 %v4149_v55, %v4227_v30  ;;  %v4442_v39 = vld [vmem:[#allocation2 + $0x167] ss:$2 sm:$0xff] }
 0x26f   :  { %v4563_v12 = vpop.permute.xlu0 %4562  ;;  %v4731_v40 = vsel %vm3595_vm9, %v3874_v24, %v4565_v9  ;;  %v4364_v9 = vld [vmem:[#allocation2 + $0x166] ss:$2 sm:$0xff] }
 0x270   :  { %v4728_v60 = vsel %vm3595_vm9, %v3873_v29, %v4563_v12 }
 0x271   :  { %4634 = vrot.lane.b32.xlu0 %v4309_v13, %s8175_s27  ;;  %v4497_v13 = vmax.f32 %v4364_v9, %v4442_v39 }
 0x272   :  { %v6712_v21 = vpop.f32.mrf.mxu0  ;;  %v4625_v22 = vpop.permute.xlu1 %4624 }
 0x273   :  { %v3399_v14 = vadd.f32 %v11611_v25, %v6712_v21  ;;  %v4623_v26 = vpop.permute.xlu0 %4622  ;;  %v4786_v46 = vsel %vm4774_vm10, %v4731_v40, %v4625_v22  ;;  %v3703_v40 = vld [vmem:[#allocation2 + $0xe0] ss:$2 sm:$0xff] }
 0x274   :  { %v3390_v58 = vpop.f32.mrf.mxu0  ;;  %v4784_v3 = vsel %vm4774_vm10, %v4728_v60, %v4623_v26 }
 0x275   :  { %v3566_v34 = vmax.f32 %v3399_v14, 0.0  ;;  %v3391_v43 = vadd.f32 %v11611_v25, %v3390_v58  ;;  %4694 = vrot.lane.b32.xlu0 %v4524_v59, %s8176_s19 }
 0x276   :  { %v6713_v11 = vpop.f32.mrf.mxu0  ;;  %v4685_v2 = vpop.permute.xlu1 %4684 }
 0x277   :  { %3646 = vst.msk [vmem:[#allocation2 + $0x190] sm:$0xff] %vm3595_vm9, %v3566_v34  ;;  %v3564_v27 = vmax.f32 %v3391_v43, 0.0  ;;  %v3402_v25 = vadd.f32 %v11864_v33, %v6713_v11  ;;  %v4683_v18 = vpop.permute.xlu0 %4682  ;;  %v4832_v19 = vsel %vm4815_vm11, %v4786_v46, %v4685_v2  ;;  %v3781_v34 = vld [vmem:[#allocation2 + $0xe1] ss:$2 sm:$0xff]  ;;  %v3705_v46 = vld [vmem:[#allocation2 + $0xf0] ss:$2 sm:$0xff] }
 0x278   :  { %v3393_v32 = vpop.f32.mrf.mxu0  ;;  %v4829_v4 = vsel %vm4815_vm11, %v4784_v3, %v4683_v18  ;;  %v3783_v11 = vld [vmem:[#allocation2 + $0xf1] ss:$2 sm:$0xff]  ;;  %v3844_v3 = vmax.f32 %v3703_v40, %v3781_v34 }
 0x279   :  { %3644 = vst.msk [vmem:[#allocation2 + $0x180] sm:$0xff] %vm3595_vm9, %v3564_v27  ;;  %v3567_v50 = vmax.f32 %v3402_v25, 0.0  ;;  %v3394_v5 = vadd.f32 %v11864_v33, %v3393_v32  ;;  %6766 = vmatprep.mubr.bf16.mxu1 %v4829_v4 }
 0x27a   :  { %6767 = vmatmul.mubr.bf16.gmra.mxu1 %v4832_v19 }
 0x27b   :  { %3647 = vst.msk [vmem:[#allocation2 + $0x198] sm:$0xff] %vm3595_vm9, %v3567_v50  ;;  %v3565_v38 = vmax.f32 %v3394_v5, 0.0  ;;  %v3845_v50 = vmax.f32 %v3705_v46, %v3783_v11 }
 0x27d   :  { %3645 = vst.msk [vmem:[#allocation2 + $0x188] sm:$0xff] %vm3595_vm9, %v3565_v38  ;;  %v3876_v37 = vpack.c.bf16 %v3845_v50, %v3844_v3 }
 0x27f   :  { %v4567_v7 = vpop.permute.xlu0 %4566 }
 0x280   :  { %v3936_v41 = vld [vmem:[#allocation2 + $0x172] ss:$2 sm:$0xff]  ;;  %v4014_v42 = vld [vmem:[#allocation2 + $0x173] ss:$2 sm:$0xff]  ;;  %v4734_v51 = vsel %vm3595_vm9, %v3875_v61, %v4567_v7 }
 0x281   :  { %v4151_v48 = vld [vmem:[#allocation2 + $0x174] ss:$2 sm:$0xff]  ;;  %v4068_v52 = vmax.f32 %v3936_v41, %v4014_v42  ;;  %v4229_v53 = vld [vmem:[#allocation2 + $0x175] ss:$2 sm:$0xff] }
 0x282   :  { %v4283_v36 = vmax.f32 %v4151_v48, %v4229_v53  ;;  %v4366_v63 = vld [vmem:[#allocation2 + $0x176] ss:$2 sm:$0xff]  ;;  %v4444_v31 = vld [vmem:[#allocation2 + $0x177] ss:$2 sm:$0xff] }
 0x283   :  { %v4627_v6 = vpop.permute.xlu0 %4626  ;;  %v4095_v23 = vpack.c.bf16 %v4068_v52, %v4067_v28  ;;  %v4498_v57 = vmax.f32 %v4366_v63, %v4444_v31 }
 0x284   :  { %v4788_v8 = vsel %vm4774_vm10, %v4734_v51, %v4627_v6  ;;  %v4310_v62 = vpack.c.bf16 %v4283_v36, %v4282_v0  ;;  %v3938_v43 = vld [vmem:[#allocation2 + $0x182] ss:$2 sm:$0xff]  ;;  %v4016_v60 = vld [vmem:[#allocation2 + $0x183] ss:$2 sm:$0xff] }
 0x285   :  { %4576 = vrot.lane.b32.xlu1 %v4095_v23, %s8174_s3  ;;  %v4525_v15 = vpack.c.bf16 %v4498_v57, %v4497_v13  ;;  %v4069_v19 = vmax.f32 %v3938_v43, %v4016_v60  ;;  %v4153_v5 = vld [vmem:[#allocation2 + $0x184] ss:$2 sm:$0xff]  ;;  %v4231_v38 = vld [vmem:[#allocation2 + $0x185] ss:$2 sm:$0xff] }
 0x286   :  { %v4284_v7 = vmax.f32 %v4153_v5, %v4231_v38  ;;  %v4368_v41 = vld [vmem:[#allocation2 + $0x186] ss:$2 sm:$0xff]  ;;  %v4446_v42 = vld [vmem:[#allocation2 + $0x187] ss:$2 sm:$0xff] }
 0x287   :  { %v4687_v35 = vpop.permute.xlu0 %4686  ;;  %v4499_v55 = vmax.f32 %v4368_v41, %v4446_v42  ;;  %v3785_v57 = vld [vmem:[#allocation2 + $0x101] ss:$2 sm:$0xff] }
 0x288   :  { %v4835_v12 = vsel %vm4815_vm11, %v4788_v8, %v4687_v35 }
 0x289   :  { %4636 = vrot.lane.b32.xlu1 %v4310_v62, %s8175_s27  ;;  %6770 = vmatprep.mubr.bf16.mxu1 %v4835_v12  ;;  %v3707_v62 = vld [vmem:[#allocation2 + $0x100] ss:$2 sm:$0xff] }
 0x28a   :  { %v6716_v16 = vpop.f32.mrf.mxu0 }
 0x28b   :  { %v3415_v49 = vadd.f32 %v11864_v33, %v6716_v16  ;;  %v3709_v16 = vld [vmem:[#allocation2 + $0x110] ss:$2 sm:$0xff] }
 0x28c   :  { %v3406_v10 = vpop.f32.mrf.mxu0 }
 0x28d   :  { %v3570_v56 = vmax.f32 %v3415_v49, 0.0  ;;  %v3407_v21 = vadd.f32 %v11864_v33, %v3406_v10  ;;  %4696 = vrot.lane.b32.xlu1 %v4525_v15, %s8176_s19  ;;  %v3787_v49 = vld [vmem:[#allocation2 + $0x111] ss:$2 sm:$0xff]  ;;  %v3846_v10 = vmax.f32 %v3707_v62, %v3785_v57 }
 0x28e   :  { %v6717_v22 = vpop.f32.mrf.mxu0 }
 0x28f   :  { %3650 = vst.msk [vmem:[#allocation2 + $0x1b0] sm:$0xff] %vm3595_vm9, %v3570_v56  ;;  %v3568_v24 = vmax.f32 %v3407_v21, 0.0  ;;  %v3418_v14 = vadd.f32 %v11864_v33, %v6717_v22 }
 0x290   :  { %v3409_v26 = vpop.f32.mrf.mxu0 }
 0x291   :  { %3648 = vst.msk [vmem:[#allocation2 + $0x1a0] sm:$0xff] %vm3595_vm9, %v3568_v24  ;;  %v3571_v59 = vmax.f32 %v3418_v14, 0.0  ;;  %v3410_v29 = vadd.f32 %v11864_v33, %v3409_v26 }
 0x293   :  { %3651 = vst.msk [vmem:[#allocation2 + $0x1b8] sm:$0xff] %vm3595_vm9, %v3571_v59  ;;  %v3569_v58 = vmax.f32 %v3410_v29, 0.0  ;;  %v3847_v59 = vmax.f32 %v3709_v16, %v3787_v49 }
 0x295   :  { %3649 = vst.msk [vmem:[#allocation2 + $0x1a8] sm:$0xff] %vm3595_vm9, %v3569_v58  ;;  %v3877_v60 = vpack.c.bf16 %v3847_v59, %v3846_v10 }
 0x297   :  { %v4569_v2 = vpop.permute.xlu1 %4568 }
 0x298   :  { %v3940_v27 = vld [vmem:[#allocation2 + $0x192] ss:$2 sm:$0xff]  ;;  %v4018_v25 = vld [vmem:[#allocation2 + $0x193] ss:$2 sm:$0xff]  ;;  %v4737_v20 = vsel %vm3595_vm9, %v3876_v37, %v4569_v2 }
 0x299   :  { %v4155_v18 = vld [vmem:[#allocation2 + $0x194] ss:$2 sm:$0xff]  ;;  %v4070_v32 = vmax.f32 %v3940_v27, %v4018_v25  ;;  %v4233_v4 = vld [vmem:[#allocation2 + $0x195] ss:$2 sm:$0xff] }
 0x29a   :  { %v4285_v47 = vmax.f32 %v4155_v18, %v4233_v4  ;;  %v4370_v1 = vld [vmem:[#allocation2 + $0x196] ss:$2 sm:$0xff]  ;;  %v4448_v17 = vld [vmem:[#allocation2 + $0x197] ss:$2 sm:$0xff] }
 0x29b   :  { %v4629_v44 = vpop.permute.xlu1 %4628  ;;  %v4096_v45 = vpack.c.bf16 %v4070_v32, %v4069_v19  ;;  %v4500_v53 = vmax.f32 %v4370_v1, %v4448_v17 }
 0x29c   :  { %v4790_v48 = vsel %vm4774_vm10, %v4737_v20, %v4629_v44  ;;  %v4311_v52 = vpack.c.bf16 %v4285_v47, %v4284_v7  ;;  %v3942_v12 = vld [vmem:[#allocation2 + $0x1a2] ss:$2 sm:$0xff]  ;;  %v4020_v13 = vld [vmem:[#allocation2 + $0x1a3] ss:$2 sm:$0xff] }
 0x29d   :  { %4578 = vrot.lane.b32.xlu0 %v4096_v45, %s8174_s3  ;;  %v4526_v23 = vpack.c.bf16 %v4500_v53, %v4499_v55  ;;  %v4071_v24 = vmax.f32 %v3942_v12, %v4020_v13  ;;  %v4157_v29 = vld [vmem:[#allocation2 + $0x1a4] ss:$2 sm:$0xff]  ;;  %v4235_v58 = vld [vmem:[#allocation2 + $0x1a5] ss:$2 sm:$0xff] }
 0x29e   :  { %v4286_v2 = vmax.f32 %v4157_v29, %v4235_v58  ;;  %v4372_v27 = vld [vmem:[#allocation2 + $0x1a6] ss:$2 sm:$0xff]  ;;  %v4450_v25 = vld [vmem:[#allocation2 + $0x1a7] ss:$2 sm:$0xff] }
 0x29f   :  { %v4689_v28 = vpop.permute.xlu1 %4688  ;;  %v4501_v5 = vmax.f32 %v4372_v27, %v4450_v25  ;;  %v3789_v53 = vld [vmem:[#allocation2 + $0x121] ss:$2 sm:$0xff] }
 0x2a0   :  { %v4838_v54 = vsel %vm4815_vm11, %v4790_v48, %v4689_v28 }
 0x2a1   :  { %4638 = vrot.lane.b32.xlu0 %v4311_v52, %s8175_s27  ;;  %6771 = vmatmul.mubr.bf16.gmra.mxu1 %v4838_v54  ;;  %v3711_v52 = vld [vmem:[#allocation2 + $0x120] ss:$2 sm:$0xff] }
 0x2a2   :  { %v6720_v30 = vpop.f32.mrf.mxu0 }
 0x2a3   :  { %v3431_v6 = vadd.f32 %v11864_v33, %v6720_v30  ;;  %v3713_v30 = vld [vmem:[#allocation2 + $0x130] ss:$2 sm:$0xff] }
 0x2a4   :  { %v3422_v36 = vpop.f32.mrf.mxu0 }
 0x2a5   :  { %v3574_v61 = vmax.f32 %v3431_v6, 0.0  ;;  %v3423_v63 = vadd.f32 %v11864_v33, %v3422_v36  ;;  %4698 = vrot.lane.b32.xlu0 %v4526_v23, %s8176_s19  ;;  %v3791_v6 = vld [vmem:[#allocation2 + $0x131] ss:$2 sm:$0xff]  ;;  %v3848_v36 = vmax.f32 %v3711_v52, %v3789_v53 }
 0x2a6   :  { %v6721_v31 = vpop.f32.mrf.mxu0 }
 0x2a7   :  { %3654 = vst.msk [vmem:[#allocation2 + $0x1d0] sm:$0xff] %vm3595_vm9, %v3574_v61  ;;  %v3572_v0 = vmax.f32 %v3423_v63, 0.0  ;;  %v3434_v51 = vadd.f32 %v11864_v33, %v6721_v31 }
 0x2a8   :  { %v3425_v9 = vpop.f32.mrf.mxu0 }
 0x2a9   :  { %3652 = vst.msk [vmem:[#allocation2 + $0x1c0] sm:$0xff] %vm3595_vm9, %v3572_v0  ;;  %v3575_v39 = vmax.f32 %v3434_v51, 0.0  ;;  %v3426_v8 = vadd.f32 %v11864_v33, %v3425_v9 }
 0x2ab   :  { %3655 = vst.msk [vmem:[#allocation2 + $0x1d8] sm:$0xff] %vm3595_vm9, %v3575_v39  ;;  %v3573_v35 = vmax.f32 %v3426_v8, 0.0  ;;  %v3849_v39 = vmax.f32 %v3713_v30, %v3791_v6 }
 0x2ad   :  { %3653 = vst.msk [vmem:[#allocation2 + $0x1c8] sm:$0xff] %vm3595_vm9, %v3573_v35  ;;  %v3878_v13 = vpack.c.bf16 %v3849_v39, %v3848_v36 }
 0x2af   :  { %v4571_v15 = vpop.permute.xlu0 %4570 }
 0x2b0   :  { %v3944_v56 = vld [vmem:[#allocation2 + $0x1b2] ss:$2 sm:$0xff]  ;;  %v4022_v21 = vld [vmem:[#allocation2 + $0x1b3] ss:$2 sm:$0xff]  ;;  %v4740_v3 = vsel %vm3595_vm9, %v3877_v60, %v4571_v15 }
 0x2b1   :  { %v4159_v22 = vld [vmem:[#allocation2 + $0x1b4] ss:$2 sm:$0xff]  ;;  %v4072_v14 = vmax.f32 %v3944_v56, %v4022_v21  ;;  %v4237_v26 = vld [vmem:[#allocation2 + $0x1b5] ss:$2 sm:$0xff] }
 0x2b2   :  { %v4287_v43 = vmax.f32 %v4159_v22, %v4237_v26  ;;  %v4374_v46 = vld [vmem:[#allocation2 + $0x1b6] ss:$2 sm:$0xff]  ;;  %v4452_v11 = vld [vmem:[#allocation2 + $0x1b7] ss:$2 sm:$0xff] }
 0x2b3   :  { %v4631_v40 = vpop.permute.xlu0 %4630  ;;  %v4097_v34 = vpack.c.bf16 %v4072_v14, %v4071_v24  ;;  %v4502_v4 = vmax.f32 %v4374_v46, %v4452_v11 }
 0x2b4   :  { %v4792_v18 = vsel %vm4774_vm10, %v4740_v3, %v4631_v40  ;;  %v4312_v32 = vpack.c.bf16 %v4287_v43, %v4286_v2  ;;  %v3946_v54 = vld [vmem:[#allocation2 + $0x1c2] ss:$2 sm:$0xff]  ;;  %v4024_v55 = vld [vmem:[#allocation2 + $0x1c3] ss:$2 sm:$0xff] }
 0x2b5   :  { %4580 = vrot.lane.b32.xlu1 %v4097_v34, %s8174_s3  ;;  %v4527_v45 = vpack.c.bf16 %v4502_v4, %v4501_v5  ;;  %v4073_v0 = vmax.f32 %v3946_v54, %v4024_v55  ;;  %v4161_v8 = vld [vmem:[#allocation2 + $0x1c4] ss:$2 sm:$0xff]  ;;  %v4239_v35 = vld [vmem:[#allocation2 + $0x1c5] ss:$2 sm:$0xff] }
 0x2b6   :  { %v4288_v15 = vmax.f32 %v4161_v8, %v4239_v35  ;;  %v4376_v56 = vld [vmem:[#allocation2 + $0x1c6] ss:$2 sm:$0xff]  ;;  %v4454_v21 = vld [vmem:[#allocation2 + $0x1c7] ss:$2 sm:$0xff] }
 0x2b7   :  { %v4691_v19 = vpop.permute.xlu0 %4690  ;;  %v4503_v29 = vmax.f32 %v4376_v56, %v4454_v21  ;;  %v3793_v4 = vld [vmem:[#allocation2 + $0x141] ss:$2 sm:$0xff] }
 0x2b8   :  { %v4841_v50 = vsel %vm4815_vm11, %v4792_v18, %v4691_v19 }
 0x2b9   :  { %4640 = vrot.lane.b32.xlu1 %v4312_v32, %s8175_s27  ;;  %6774 = vmatprep.mubr.bf16.mxu1 %v4841_v50  ;;  %v3715_v32 = vld [vmem:[#allocation2 + $0x140] ss:$2 sm:$0xff] }
 0x2ba   :  { %v6724_v38 = vpop.f32.mrf.mxu0 }
 0x2bb   :  { %v3447_v44 = vadd.f32 %v11864_v33, %v6724_v38  ;;  %v3717_v38 = vld [vmem:[#allocation2 + $0x150] ss:$2 sm:$0xff] }
 0x2bc   :  { %v3438_v47 = vpop.f32.mrf.mxu0 }
 0x2bd   :  { %v3578_v37 = vmax.f32 %v3447_v44, 0.0  ;;  %v3439_v1 = vadd.f32 %v11864_v33, %v3438_v47  ;;  %4700 = vrot.lane.b32.xlu1 %v4527_v45, %s8176_s19  ;;  %v3795_v44 = vld [vmem:[#allocation2 + $0x151] ss:$2 sm:$0xff]  ;;  %v3850_v47 = vmax.f32 %v3715_v32, %v3793_v4 }
 0x2be   :  { %v6725_v17 = vpop.f32.mrf.mxu0 }
 0x2bf   :  { %3658 = vst.msk [vmem:[#allocation2 + $0x1f0] sm:$0xff] %vm3595_vm9, %v3578_v37  ;;  %v3576_v7 = vmax.f32 %v3439_v1, 0.0  ;;  %v3450_v20 = vadd.f32 %v11864_v33, %v6725_v17 }
 0x2c0   :  { %v3441_v41 = vpop.f32.mrf.mxu0 }
 0x2c1   :  { %3656 = vst.msk [vmem:[#allocation2 + $0x1e0] sm:$0xff] %vm3595_vm9, %v3576_v7  ;;  %v3579_v42 = vmax.f32 %v3450_v20, 0.0  ;;  %v3442_v48 = vadd.f32 %v11864_v33, %v3441_v41 }
 0x2c3   :  { %3659 = vst.msk [vmem:[#allocation2 + $0x1f8] sm:$0xff] %vm3595_vm9, %v3579_v42  ;;  %v3577_v28 = vmax.f32 %v3442_v48, 0.0  ;;  %v3851_v42 = vmax.f32 %v3717_v38, %v3795_v44 }
 0x2c5   :  { %3657 = vst.msk [vmem:[#allocation2 + $0x1e8] sm:$0xff] %vm3595_vm9, %v3577_v28  ;;  %v3879_v55 = vpack.c.bf16 %v3851_v42, %v3850_v47 }
 0x2c7   :  { %v4573_v23 = vpop.permute.xlu1 %4572 }
 0x2c8   :  { %v3948_v61 = vld [vmem:[#allocation2 + $0x1d2] ss:$2 sm:$0xff]  ;;  %v4026_v63 = vld [vmem:[#allocation2 + $0x1d3] ss:$2 sm:$0xff]  ;;  %v4743_v10 = vsel %vm3595_vm9, %v3878_v13, %v4573_v23 }
 0x2c9   :  { %v4163_v31 = vld [vmem:[#allocation2 + $0x1d4] ss:$2 sm:$0xff]  ;;  %v4074_v51 = vmax.f32 %v3948_v61, %v4026_v63  ;;  %v4241_v9 = vld [vmem:[#allocation2 + $0x1d5] ss:$2 sm:$0xff] }
 0x2ca   :  { %v4289_v12 = vmax.f32 %v4163_v31, %v4241_v9  ;;  %v4378_v16 = vld [vmem:[#allocation2 + $0x1d6] ss:$2 sm:$0xff]  ;;  %v4456_v49 = vld [vmem:[#allocation2 + $0x1d7] ss:$2 sm:$0xff] }
 0x2cb   :  { %v4633_v62 = vpop.permute.xlu1 %4632  ;;  %v4098_v57 = vpack.c.bf16 %v4074_v51, %v4073_v0  ;;  %v4504_v26 = vmax.f32 %v4378_v16, %v4456_v49 }
 0x2cc   :  { %v4794_v22 = vsel %vm4774_vm10, %v4743_v10, %v4633_v62  ;;  %v4313_v14 = vpack.c.bf16 %v4289_v12, %v4288_v15  ;;  %v3950_v50 = vld [vmem:[#allocation2 + $0x1e2] ss:$2 sm:$0xff]  ;;  %v4028_v5 = vld [vmem:[#allocation2 + $0x1e3] ss:$2 sm:$0xff] }
 0x2cd   :  { %4582 = vrot.lane.b32.xlu0 %v4098_v57, %s8174_s3  ;;  %v4528_v34 = vpack.c.bf16 %v4504_v26, %v4503_v29  ;;  %v4075_v7 = vmax.f32 %v3950_v50, %v4028_v5  ;;  %v4165_v48 = vld [vmem:[#allocation2 + $0x1e4] ss:$2 sm:$0xff]  ;;  %v4243_v28 = vld [vmem:[#allocation2 + $0x1e5] ss:$2 sm:$0xff] }
 0x2ce   :  { %v4290_v23 = vmax.f32 %v4165_v48, %v4243_v28  ;;  %v4380_v61 = vld [vmem:[#allocation2 + $0x1e6] ss:$2 sm:$0xff]  ;;  %v4458_v63 = vld [vmem:[#allocation2 + $0x1e7] ss:$2 sm:$0xff] }
 0x2cf   :  { %v4693_v24 = vpop.permute.xlu1 %4692  ;;  %v4505_v8 = vmax.f32 %v4380_v61, %v4458_v63  ;;  %v3797_v26 = vld [vmem:[#allocation2 + $0x161] ss:$2 sm:$0xff] }
 0x2d0   :  { %v4844_v59 = vsel %vm4815_vm11, %v4794_v22, %v4693_v24 }
 0x2d1   :  { %4642 = vrot.lane.b32.xlu0 %v4313_v14, %s8175_s27  ;;  %6775 = vmatmul.mubr.bf16.gmra.mxu1 %v4844_v59  ;;  %v3719_v14 = vld [vmem:[#allocation2 + $0x160] ss:$2 sm:$0xff] }
 0x2d2   :  { %v6728_v58 = vpop.f32.mrf.mxu0 }
 0x2d3   :  { %v3463_v40 = vadd.f32 %v11864_v33, %v6728_v58  ;;  %v3721_v58 = vld [vmem:[#allocation2 + $0x170] ss:$2 sm:$0xff] }
 0x2d4   :  { %v3454_v43 = vpop.f32.mrf.mxu0 }
 0x2d5   :  { %v3582_v60 = vmax.f32 %v3463_v40, 0.0  ;;  %v3455_v46 = vadd.f32 %v11864_v33, %v3454_v43  ;;  %4702 = vrot.lane.b32.xlu0 %v4528_v34, %s8176_s19  ;;  %v3799_v40 = vld [vmem:[#allocation2 + $0x171] ss:$2 sm:$0xff]  ;;  %v3852_v43 = vmax.f32 %v3719_v14, %v3797_v26 }
 0x2d6   :  { %v6729_v11 = vpop.f32.mrf.mxu0 }
 0x2d7   :  { %3662 = vst.msk [vmem:[#allocation2 + $0x210] sm:$0xff] %vm3595_vm9, %v3582_v60  ;;  %v3580_v2 = vmax.f32 %v3455_v46, 0.0  ;;  %v3466_v3 = vadd.f32 %v11864_v33, %v6729_v11 }
 0x2d8   :  { %v3457_v27 = vpop.f32.mrf.mxu0 }
 0x2d9   :  { %3660 = vst.msk [vmem:[#allocation2 + $0x200] sm:$0xff] %vm3595_vm9, %v3580_v2  ;;  %v3583_v25 = vmax.f32 %v3466_v3, 0.0  ;;  %v3458_v18 = vadd.f32 %v11864_v33, %v3457_v27 }
 0x2db   :  { %3663 = vst.msk [vmem:[#allocation2 + $0x218] sm:$0xff] %vm3595_vm9, %v3583_v25  ;;  %v3581_v19 = vmax.f32 %v3458_v18, 0.0  ;;  %v3853_v25 = vmax.f32 %v3721_v58, %v3799_v40 }
 0x2dd   :  { %3661 = vst.msk [vmem:[#allocation2 + $0x208] sm:$0xff] %vm3595_vm9, %v3581_v19  ;;  %v3880_v5 = vpack.c.bf16 %v3853_v25, %v3852_v43 }
 0x2df   :  { %v4575_v45 = vpop.permute.xlu0 %4574 }
 0x2e0   :  { %v3952_v37 = vld [vmem:[#allocation2 + $0x1f2] ss:$2 sm:$0xff]  ;;  %v4030_v1 = vld [vmem:[#allocation2 + $0x1f3] ss:$2 sm:$0xff]  ;;  %v4746_v36 = vsel %vm3595_vm9, %v3879_v55, %v4575_v45 }
 0x2e1   :  { %v4167_v17 = vld [vmem:[#allocation2 + $0x1f4] ss:$2 sm:$0xff]  ;;  %v4076_v20 = vmax.f32 %v3952_v37, %v4030_v1  ;;  %v4245_v41 = vld [vmem:[#allocation2 + $0x1f5] ss:$2 sm:$0xff] }
 0x2e2   :  { %v4291_v54 = vmax.f32 %v4167_v17, %v4245_v41  ;;  %v4382_v30 = vld [vmem:[#allocation2 + $0x1f6] ss:$2 sm:$0xff]  ;;  %v4460_v6 = vld [vmem:[#allocation2 + $0x1f7] ss:$2 sm:$0xff] }
 0x2e3   :  { %v4635_v52 = vpop.permute.xlu0 %4634  ;;  %v4099_v53 = vpack.c.bf16 %v4076_v20, %v4075_v7  ;;  %v4506_v9 = vmax.f32 %v4382_v30, %v4460_v6 }
 0x2e4   :  { %v4796_v31 = vsel %vm4774_vm10, %v4746_v36, %v4635_v52  ;;  %v4314_v51 = vpack.c.bf16 %v4291_v54, %v4290_v23  ;;  %v3954_v59 = vld [vmem:[#allocation2 + $0x202] ss:$2 sm:$0xff]  ;;  %v4032_v29 = vld [vmem:[#allocation2 + $0x203] ss:$2 sm:$0xff] }
 0x2e5   :  { %4584 = vrot.lane.b32.xlu1 %v4099_v53, %s8174_s3  ;;  %v4529_v57 = vpack.c.bf16 %v4506_v9, %v4505_v8  ;;  %v4077_v2 = vmax.f32 %v3954_v59, %v4032_v29  ;;  %v4169_v18 = vld [vmem:[#allocation2 + $0x204] ss:$2 sm:$0xff]  ;;  %v4247_v19 = vld [vmem:[#allocation2 + $0x205] ss:$2 sm:$0xff] }
 0x2e6   :  { %v4292_v45 = vmax.f32 %v4169_v18, %v4247_v19  ;;  %v4384_v37 = vld [vmem:[#allocation2 + $0x206] ss:$2 sm:$0xff]  ;;  %v4462_v1 = vld [vmem:[#allocation2 + $0x207] ss:$2 sm:$0xff] }
 0x2e7   :  { %v4695_v0 = vpop.permute.xlu0 %4694  ;;  %v4507_v48 = vmax.f32 %v4384_v37, %v4462_v1  ;;  %v3801_v9 = vld [vmem:[#allocation2 + $0x181] ss:$2 sm:$0xff]  ;;  %v11969_v37 = vld [vmem:[%s12295_s4] ss:$0 sm:$0xff]  ;;  %s8187_s4 = smov 104  }
 0x2e8   :  { %v4847_v39 = vsel %vm4815_vm11, %v4796_v31, %v4695_v0 }
 0x2e9   :  { %4644 = vrot.lane.b32.xlu1 %v4314_v51, %s8175_s27  ;;  %6778 = vmatprep.mubr.bf16.mxu1 %v4847_v39  ;;  %v3723_v51 = vld [vmem:[#allocation2 + $0x180] ss:$2 sm:$0xff] }
 0x2ea   :  { %v6732_v35 = vpop.f32.mrf.mxu0 }
 0x2eb   :  { %v3479_v62 = vadd.f32 %v11864_v33, %v6732_v35  ;;  %v3725_v35 = vld [vmem:[#allocation2 + $0x190] ss:$2 sm:$0xff] }
 0x2ec   :  { %v3470_v12 = vpop.f32.mrf.mxu0 }
 0x2ed   :  { %v3586_v13 = vmax.f32 %v3479_v62, 0.0  ;;  %v3471_v16 = vadd.f32 %v11864_v33, %v3470_v12  ;;  %4704 = vrot.lane.b32.xlu1 %v4529_v57, %s8176_s19  ;;  %v3803_v62 = vld [vmem:[#allocation2 + $0x191] ss:$2 sm:$0xff]  ;;  %v3854_v12 = vmax.f32 %v3723_v51, %v3801_v9 }
 0x2ee   :  { %v6733_v49 = vpop.f32.mrf.mxu0 }
 0x2ef   :  { %3666 = vst.msk [vmem:[#allocation2 + $0x230] sm:$0xff] %vm3595_vm9, %v3586_v13  ;;  %v3584_v15 = vmax.f32 %v3471_v16, 0.0  ;;  %v3482_v10 = vadd.f32 %v11864_v33, %v6733_v49 }
 0x2f0   :  { %v3473_v56 = vpop.f32.mrf.mxu0 }
 0x2f1   :  { %3664 = vst.msk [vmem:[#allocation2 + $0x220] sm:$0xff] %vm3595_vm9, %v3584_v15  ;;  %v3587_v21 = vmax.f32 %v3482_v10, 0.0  ;;  %v3474_v22 = vadd.f32 %v11864_v33, %v3473_v56 }
 0x2f3   :  { %3667 = vst.msk [vmem:[#allocation2 + $0x238] sm:$0xff] %vm3595_vm9, %v3587_v21  ;;  %v3585_v24 = vmax.f32 %v3474_v22, 0.0  ;;  %v3855_v21 = vmax.f32 %v3725_v35, %v3803_v62 }
 0x2f5   :  { %3665 = vst.msk [vmem:[#allocation2 + $0x228] sm:$0xff] %vm3595_vm9, %v3585_v24  ;;  %v3881_v29 = vpack.c.bf16 %v3855_v21, %v3854_v12 }
 0x2f7   :  { %v4577_v34 = vpop.permute.xlu1 %4576 }
 0x2f8   :  { %v3956_v60 = vld [vmem:[#allocation2 + $0x212] ss:$2 sm:$0xff]  ;;  %v4034_v46 = vld [vmem:[#allocation2 + $0x213] ss:$2 sm:$0xff]  ;;  %v4749_v47 = vsel %vm3595_vm9, %v3880_v5, %v4577_v34 }
 0x2f9   :  { %v4171_v11 = vld [vmem:[#allocation2 + $0x214] ss:$2 sm:$0xff]  ;;  %v4078_v3 = vmax.f32 %v3956_v60, %v4034_v46  ;;  %v4249_v27 = vld [vmem:[#allocation2 + $0x215] ss:$2 sm:$0xff] }
 0x2fa   :  { %v4293_v50 = vmax.f32 %v4171_v11, %v4249_v27  ;;  %v4386_v38 = vld [vmem:[#allocation2 + $0x216] ss:$2 sm:$0xff]  ;;  %v4464_v44 = vld [vmem:[#allocation2 + $0x217] ss:$2 sm:$0xff] }
 0x2fb   :  { %v4637_v32 = vpop.permute.xlu1 %4636  ;;  %v4100_v4 = vpack.c.bf16 %v4078_v3, %v4077_v2  ;;  %v4508_v41 = vmax.f32 %v4386_v38, %v4464_v44 }
 0x2fc   :  { %v4798_v17 = vsel %vm4774_vm10, %v4749_v47, %v4637_v32  ;;  %v4315_v20 = vpack.c.bf16 %v4293_v50, %v4292_v45  ;;  %v3958_v39 = vld [vmem:[#allocation2 + $0x222] ss:$2 sm:$0xff]  ;;  %v4036_v8 = vld [vmem:[#allocation2 + $0x223] ss:$2 sm:$0xff] }
 0x2fd   :  { %4586 = vrot.lane.b32.xlu0 %v4100_v4, %s8174_s3  ;;  %v4530_v53 = vpack.c.bf16 %v4508_v41, %v4507_v48  ;;  %v4079_v15 = vmax.f32 %v3958_v39, %v4036_v8  ;;  %v4173_v22 = vld [vmem:[#allocation2 + $0x224] ss:$2 sm:$0xff]  ;;  %v4251_v24 = vld [vmem:[#allocation2 + $0x225] ss:$2 sm:$0xff] }
 0x2fe   :  { %v4294_v34 = vmax.f32 %v4173_v22, %v4251_v24  ;;  %v4388_v60 = vld [vmem:[#allocation2 + $0x226] ss:$2 sm:$0xff]  ;;  %v4466_v46 = vld [vmem:[#allocation2 + $0x227] ss:$2 sm:$0xff] }
 0x2ff   :  { %v4697_v7 = vpop.permute.xlu1 %4696  ;;  %v4509_v18 = vmax.f32 %v4388_v60, %v4466_v46  ;;  %v3805_v48 = vld [vmem:[#allocation2 + $0x1a1] ss:$2 sm:$0xff] }
 0x300   :  { %v4850_v42 = vsel %vm4815_vm11, %v4798_v17, %v4697_v7 }
 0x301   :  { %4646 = vrot.lane.b32.xlu0 %v4315_v20, %s8175_s27  ;;  %6779 = vmatmul.mubr.bf16.gmra.mxu1 %v4850_v42  ;;  %v3727_v42 = vld [vmem:[#allocation2 + $0x1a0] ss:$2 sm:$0xff] }
 0x302   :  { %v6736_v28 = vpop.f32.mrf.mxu0 }
 0x303   :  { %v3495_v52 = vadd.f32 %v11864_v33, %v6736_v28 }
 0x304   :  { %v3486_v54 = vpop.f32.mrf.mxu0 }
 0x305   :  { %v3590_v55 = vmax.f32 %v3495_v52, 0.0  ;;  %v3487_v30 = vadd.f32 %v11864_v33, %v3486_v54  ;;  %4706 = vrot.lane.b32.xlu0 %v4530_v53, %s8176_s19  ;;  %v3729_v53 = vld [vmem:[#allocation2 + $0x1b0] ss:$2 sm:$0xff]  ;;  %v3807_v54 = vld [vmem:[#allocation2 + $0x1b1] ss:$2 sm:$0xff] }
 0x306   :  { %v6737_v6 = vpop.f32.mrf.mxu0 }
 0x307   :  { %3670 = vst.msk [vmem:[#allocation2 + $0x250] sm:$0xff] %vm3595_vm9, %v3590_v55  ;;  %v3588_v23 = vmax.f32 %v3487_v30, 0.0  ;;  %v3498_v36 = vadd.f32 %v11864_v33, %v6737_v6 }
 0x308   :  { %v3489_v61 = vpop.f32.mrf.mxu0 }
 0x309   :  { %3668 = vst.msk [vmem:[#allocation2 + $0x240] sm:$0xff] %vm3595_vm9, %v3588_v23  ;;  %v3591_v63 = vmax.f32 %v3498_v36, 0.0  ;;  %v3490_v31 = vadd.f32 %v11864_v33, %v3489_v61  ;;  %v3856_v36 = vmax.f32 %v3727_v42, %v3805_v48 }
 0x30b   :  { %3671 = vst.msk [vmem:[#allocation2 + $0x258] sm:$0xff] %vm3595_vm9, %v3591_v63  ;;  %v3589_v0 = vmax.f32 %v3490_v31, 0.0  ;;  %v3857_v63 = vmax.f32 %v3729_v53, %v3807_v54  ;;  %v8120_v53 = vld [vmem:[%s12296_s5 + $0x8] ss:$0 sps:$4 sm:$0xff]  }
 0x30c   :  { %6838 = vmatprep.subr.msk.bf16.mxu1 %vm5683_vm13, %v8120_v53 }
 0x30d   :  { %3669 = vst.msk [vmem:[#allocation2 + $0x248] sm:$0xff] %vm3595_vm9, %v3589_v0 }
 0x30f   :  { %v4579_v57 = vpop.permute.xlu0 %4578 }
 0x310   :  { %v3960_v13 = vld [vmem:[#allocation2 + $0x232] ss:$2 sm:$0xff]  ;;  %v4038_v16 = vld [vmem:[#allocation2 + $0x233] ss:$2 sm:$0xff]  ;;  %v4752_v43 = vsel %vm3595_vm9, %v3881_v29, %v4579_v57 }
 0x311   :  { %v4175_v49 = vld [vmem:[#allocation2 + $0x234] ss:$2 sm:$0xff]  ;;  %v4080_v10 = vmax.f32 %v3960_v13, %v4038_v16  ;;  %v4253_v56 = vld [vmem:[#allocation2 + $0x235] ss:$2 sm:$0xff]  ;;  %v3882_v16 = vpack.c.bf16 %v3857_v63, %v3856_v36 }
 0x312   :  { %v4295_v59 = vmax.f32 %v4175_v49, %v4253_v56  ;;  %v4390_v58 = vld [vmem:[#allocation2 + $0x236] ss:$2 sm:$0xff]  ;;  %v4468_v40 = vld [vmem:[#allocation2 + $0x237] ss:$2 sm:$0xff] }
 0x313   :  { %v4639_v14 = vpop.permute.xlu0 %4638  ;;  %v4101_v26 = vpack.c.bf16 %v4080_v10, %v4079_v15  ;;  %v4510_v27 = vmax.f32 %v4390_v58, %v4468_v40 }
 0x314   :  { %v4800_v11 = vsel %vm4774_vm10, %v4752_v43, %v4639_v14  ;;  %v4316_v3 = vpack.c.bf16 %v4295_v59, %v4294_v34  ;;  %v3962_v30 = vld [vmem:[#allocation2 + $0x242] ss:$2 sm:$0xff]  ;;  %v4040_v6 = vld [vmem:[#allocation2 + $0x243] ss:$2 sm:$0xff] }
 0x315   :  { %4588 = vrot.lane.b32.xlu1 %v4101_v26, %s8174_s3  ;;  %v4531_v4 = vpack.c.bf16 %v4510_v27, %v4509_v18  ;;  %v4081_v35 = vmax.f32 %v3962_v30, %v4040_v6  ;;  %v4177_v12 = vld [vmem:[#allocation2 + $0x244] ss:$2 sm:$0xff]  ;;  %v4255_v13 = vld [vmem:[#allocation2 + $0x245] ss:$2 sm:$0xff] }
 0x316   :  { %v4296_v58 = vmax.f32 %v4177_v12, %v4255_v13  ;;  %v4392_v34 = vld [vmem:[#allocation2 + $0x246] ss:$2 sm:$0xff]  ;;  %v4470_v43 = vld [vmem:[#allocation2 + $0x247] ss:$2 sm:$0xff] }
 0x317   :  { %v4699_v2 = vpop.permute.xlu0 %4698 }
 0x318   :  { %v4853_v25 = vsel %vm4815_vm11, %v4800_v11, %v4699_v2 }
 0x319   :  { %4648 = vrot.lane.b32.xlu1 %v4316_v3, %s8175_s27  ;;  %6782 = vmatprep.mubr.bf16.mxu1 %v4853_v25 }
 0x31a   :  { %v6740_v19 = vpop.f32.mrf.mxu0 }
 0x31b   :  { %v3511_v32 = vadd.f32 %v11864_v33, %v6740_v19 }
 0x31c   :  { %v3502_v50 = vpop.f32.mrf.mxu0 }
 0x31d   :  { %v3594_v5 = vmax.f32 %v3511_v32, 0.0  ;;  %v3503_v38 = vadd.f32 %v11864_v33, %v3502_v50  ;;  %4708 = vrot.lane.b32.xlu1 %v4531_v4, %s8176_s19  ;;  %v4511_v4 = vmax.f32 %v4392_v34, %v4470_v43 }
 0x31e   :  { %v6741_v44 = vpop.f32.mrf.mxu0 }
 0x31f   :  { %3674 = vst.msk [vmem:[#allocation2 + $0x270] sm:$0xff] %vm3595_vm9, %v3594_v5  ;;  %v3592_v45 = vmax.f32 %v3503_v38, 0.0 }
 0x320   :  { %v3505_v47 = vpop.f32.mrf.mxu0 }
 0x321   :  { %3672 = vst.msk [vmem:[#allocation2 + $0x260] sm:$0xff] %vm3595_vm9, %v3592_v45  ;;  %v3506_v1 = vadd.f32 %v11864_v33, %v3505_v47 }
 0x322   :  { %v6760_v17 = vpop.f32.mrf.mxu1 }
 0x323   :  { %v3593_v7 = vmax.f32 %v3506_v1, 0.0  ;;  %v4990_v20 = vadd.f32 %v6760_v17, %v11969_v37 }
 0x324   :  { %v4981_v41 = vpop.f32.mrf.mxu1 }
 0x325   :  { %3673 = vst.msk [vmem:[#allocation2 + $0x268] sm:$0xff] %vm3595_vm9, %v3593_v7  ;;  %v5141_v28 = vmax.f32 %v4990_v20, 0.0  ;;  %v4982_v52 = vadd.f32 %v11969_v37, %v4981_v41 }
 0x326   :  { %v6761_v55 = vpop.f32.mrf.mxu1 }
 0x327   :  { %5181 = vst.msk [vmem:[#allocation3 + $0x10] sm:$0xff] %vm5178_vm12, %v5141_v28  ;;  %v5139_v33 = vmax.f32 %v4982_v52, 0.0  ;;  %v4993_v23 = vadd.f32 %v6761_v55, %v11969_v37  ;;  %v4581_v61 = vpop.permute.xlu1 %4580 }
 0x328   :  { %v4984_v31 = vpop.f32.mrf.mxu1  ;;  %v3964_v0 = vld [vmem:[#allocation2 + $0x252] ss:$2 sm:$0xff]  ;;  %v4042_v51 = vld [vmem:[#allocation2 + $0x253] ss:$2 sm:$0xff]  ;;  %v4755_v59 = vsel %vm3595_vm9, %v3882_v16, %v4581_v61 }
 0x329   :  { %v4179_v9 = vld [vmem:[#allocation2 + $0x254] ss:$2 sm:$0xff]  ;;  %5179 = vst.msk [vmem:[#allocation3] sm:$0xff] %vm5178_vm12, %v5139_v33  ;;  %v5142_v39 = vmax.f32 %v4993_v23, 0.0  ;;  %v4985_v8 = vadd.f32 %v11969_v37, %v4984_v31  ;;  %v4082_v62 = vmax.f32 %v3964_v0, %v4042_v51  ;;  %v4257_v57 = vld [vmem:[#allocation2 + $0x255] ss:$2 sm:$0xff] }
 0x32a   :  { %v4297_v56 = vmax.f32 %v4179_v9, %v4257_v57  ;;  %v4394_v21 = vld [vmem:[#allocation2 + $0x256] ss:$2 sm:$0xff]  ;;  %v4472_v22 = vld [vmem:[#allocation2 + $0x257] ss:$2 sm:$0xff]  ;;  %v5685_v23 = vsel %vm5683_vm13, %v8120_v53, 0 }
 0x32b   :  { %5182 = vst.msk [vmem:[#allocation3 + $0x18] sm:$0xff] %vm5178_vm12, %v5142_v39  ;;  %v5140_v49 = vmax.f32 %v4985_v8, 0.0  ;;  %v4641_v15 = vpop.permute.xlu1 %4640  ;;  %v4102_v10 = vpack.c.bf16 %v4082_v62, %v4081_v35  ;;  %v4512_v11 = vmax.f32 %v4394_v21, %v4472_v22  ;;  %v3731_v33 = vld [vmem:[#allocation2 + $0x1c0] ss:$2 sm:$0xff]  ;;  %6799 = vmatpush3.bf16.msra.mxu1 %v5685_v23  ;;  %v3809_v9 = vld [vmem:[#allocation2 + $0x1c1] ss:$2 sm:$0xff] }
 0x32c   :  { %v3966_v24 = vld [vmem:[#allocation2 + $0x262] ss:$2 sm:$0xff]  ;;  %v4044_v14 = vld [vmem:[#allocation2 + $0x263] ss:$2 sm:$0xff]  ;;  %v4802_v60 = vsel %vm4774_vm10, %v4755_v59, %v4641_v15  ;;  %v4317_v25 = vpack.c.bf16 %v4297_v56, %v4296_v58  ;;  %v3858_v22 = vmax.f32 %v3731_v33, %v3809_v9 }
 0x32d   :  { %v4181_v26 = vld [vmem:[#allocation2 + $0x264] ss:$2 sm:$0xff]  ;;  %5180 = vst.msk [vmem:[#allocation3 + $0x8] sm:$0xff] %vm5178_vm12, %v5140_v49  ;;  %4590 = vrot.lane.b32.xlu0 %v4102_v10, %s8174_s3  ;;  %v4083_v29 = vmax.f32 %v3966_v24, %v4044_v14  ;;  %v4259_v40 = vld [vmem:[#allocation2 + $0x265] ss:$2 sm:$0xff]  ;;  %v4532_v47 = vpack.c.bf16 %v4512_v11, %v4511_v4 }
 0x32e   :  { %v6764_v46 = vpop.f32.mrf.mxu1  ;;  %v4298_v18 = vmax.f32 %v4181_v26, %v4259_v40  ;;  %v4396_v50 = vld [vmem:[#allocation2 + $0x266] ss:$2 sm:$0xff]  ;;  %v4474_v5 = vld [vmem:[#allocation2 + $0x267] ss:$2 sm:$0xff] }
 0x32f   :  { %v5006_v2 = vadd.f32 %v6764_v46, %v11969_v37  ;;  %v4701_v3 = vpop.permute.xlu1 %4700  ;;  %v4103_v27 = vpack.c.bf16 %v4083_v29, %v4083_v29  ;;  %v4513_v20 = vmax.f32 %v4396_v50, %v4474_v5  ;;  %v3733_v49 = vld [vmem:[#allocation2 + $0x1d0] ss:$2 sm:$0xff]  ;;  %v3811_v15 = vld [vmem:[#allocation2 + $0x1d1] ss:$2 sm:$0xff] }
 0x330   :  { %v4997_v19 = vpop.f32.mrf.mxu1  ;;  %v4856_v32 = vsel %vm4815_vm11, %v4802_v60, %v4701_v3  ;;  %v4318_v7 = vpack.c.bf16 %v4298_v18, %v4298_v18  ;;  %v3859_v29 = vmax.f32 %v3733_v49, %v3811_v15  ;;  %v8121_v60 = vld [vmem:[%s12296_s5] sm:$0xff]   ;;  %v3741_v49 = vld [vmem:[#allocation2 + $0x210] ss:$2 sm:$0xff]  ;;  %v3819_v15 = vld [vmem:[#allocation2 + $0x211] ss:$2 sm:$0xff] }
 0x331   :  { %v5145_v38 = vmax.f32 %v5006_v2, 0.0  ;;  %v4998_v44 = vadd.f32 %v11969_v37, %v4997_v19  ;;  %4592 = vrot.lane.b32.xlu1 %v4103_v27, %s8174_s3  ;;  %4650 = vrot.lane.b32.xlu0 %v4317_v25, %s8175_s27  ;;  %v4533_v52 = vpack.c.bf16 %v4513_v20, %v4513_v20  ;;  %v3813_v20 = vld [vmem:[#allocation2 + $0x1e1] ss:$2 sm:$0xff] }
 0x332   :  { %6783 = vmatmul.mubr.bf16.gmra.mxu1 %v4856_v32  ;;  %v6765_v45 = vpop.f32.mrf.mxu1  ;;  %v3883_v43 = vpack.c.bf16 %v3859_v29, %v3858_v22  ;;  %6800 = vmatprep.subr.bf16.mxu1 %v8121_v60 }
 0x333   :  { %5185 = vst.msk [vmem:[#allocation3 + $0x30] sm:$0xff] %vm5178_vm12, %v5145_v38  ;;  %v5143_v1 = vmax.f32 %v4998_v44, 0.0  ;;  %v5009_v17 = vadd.f32 %v6765_v45, %v11969_v37  ;;  %6801 = vmatpush3.bf16.msra.mxu1 %v8121_v60 }
 0x334   :  { %v5000_v41 = vpop.f32.mrf.mxu1  ;;  %v5323_v55 = vld [vmem:[#allocation3 + $0x2] ss:$2 sm:$0xff]  ;;  %v5361_v30 = vld [vmem:[#allocation3 + $0x3] ss:$2 sm:$0xff] }
 0x335   :  { %5183 = vst.msk [vmem:[#allocation3 + $0x20] sm:$0xff] %vm5178_vm12, %v5143_v1  ;;  %v5146_v42 = vmax.f32 %v5009_v17, 0.0  ;;  %v5001_v48 = vadd.f32 %v11969_v37, %v5000_v41  ;;  %4652 = vrot.lane.b32.xlu1 %v4318_v7, %s8175_s27  ;;  %4710 = vrot.lane.b32.xlu0 %v4532_v47, %s8176_s19  ;;  %v5398_v39 = vmax.f32 %v5323_v55, %v5361_v30  ;;  %v5428_v57 = vld [vmem:[#allocation3 + $0x4] ss:$2 sm:$0xff]  ;;  %v5466_v12 = vld [vmem:[#allocation3 + $0x5] ss:$2 sm:$0xff] }
 0x336   :  { %v5503_v59 = vmax.f32 %v5428_v57, %v5466_v12  ;;  %v3735_v7 = vld [vmem:[#allocation2 + $0x1e0] ss:$2 sm:$0xff]  ;;  %v3737_v41 = vld [vmem:[#allocation2 + $0x1f0] ss:$2 sm:$0xff]  ;;  %v3817_v12 = vld [vmem:[#allocation2 + $0x201] ss:$2 sm:$0xff] }
 0x337   :  { %5186 = vst.msk [vmem:[#allocation3 + $0x38] sm:$0xff] %vm5178_vm12, %v5146_v42  ;;  %v5144_v28 = vmax.f32 %v5001_v48, 0.0  ;;  %v3815_v42 = vld [vmem:[#allocation2 + $0x1f1] ss:$2 sm:$0xff]  ;;  %v3739_v57 = vld [vmem:[#allocation2 + $0x200] ss:$2 sm:$0xff] }
 0x339   :  { %5184 = vst.msk [vmem:[#allocation3 + $0x28] sm:$0xff] %vm5178_vm12, %v5144_v28  ;;  %4712 = vrot.lane.b32.xlu1 %v4533_v52, %s8176_s19  ;;  %v3860_v28 = vmax.f32 %v3735_v7, %v3813_v20  ;;  %v3861_v52 = vmax.f32 %v3737_v41, %v3815_v42 }
 0x33a   :  { %v6768_v54 = vpop.f32.mrf.mxu1 }
 0x33b   :  { %v5022_v6 = vadd.f32 %v6768_v54, %v11969_v37  ;;  %v3884_v54 = vpack.c.bf16 %v3861_v52, %v3860_v28 }
 0x33c   :  { %v5013_v36 = vpop.f32.mrf.mxu1  ;;  %v5325_v61 = vld [vmem:[#allocation3 + $0x12] ss:$2 sm:$0xff]  ;;  %v5363_v63 = vld [vmem:[#allocation3 + $0x13] ss:$2 sm:$0xff] }
 0x33d   :  { %v5430_v31 = vld [vmem:[#allocation3 + $0x14] ss:$2 sm:$0xff]  ;;  %v5149_v0 = vmax.f32 %v5022_v6, 0.0  ;;  %v5014_v51 = vadd.f32 %v11969_v37, %v5013_v36  ;;  %v5399_v8 = vmax.f32 %v5325_v61, %v5363_v63  ;;  %v5468_v35 = vld [vmem:[#allocation3 + $0x15] ss:$2 sm:$0xff] }
 0x33e   :  { %v6769_v62 = vpop.f32.mrf.mxu1  ;;  %v5504_v21 = vmax.f32 %v5430_v31, %v5468_v35 }
 0x33f   :  { %5189 = vst.msk [vmem:[#allocation3 + $0x50] sm:$0xff] %vm5178_vm12, %v5149_v0  ;;  %v5147_v13 = vmax.f32 %v5014_v51, 0.0  ;;  %v5025_v16 = vadd.f32 %v6769_v62, %v11969_v37  ;;  %v4583_v10 = vpop.permute.xlu0 %4582  ;;  %v5417_v56 = vpack.c.bf16 %v5399_v8, %v5398_v39 }
 0x340   :  { %v5016_v24 = vpop.f32.mrf.mxu1  ;;  %v5522_v34 = vpack.c.bf16 %v5504_v21, %v5503_v59  ;;  %v4758_v46 = vsel %vm3595_vm9, %v3883_v43, %v4583_v10  ;;  %v5327_v11 = vld [vmem:[#allocation3 + $0x22] ss:$2 sm:$0xff]  ;;  %v5365_v2 = vld [vmem:[#allocation3 + $0x23] ss:$2 sm:$0xff] }
 0x341   :  { %5187 = vst.msk [vmem:[#allocation3 + $0x40] sm:$0xff] %vm5178_vm12, %v5147_v13  ;;  %v5150_v14 = vmax.f32 %v5025_v16, 0.0  ;;  %v5017_v26 = vadd.f32 %v11969_v37, %v5016_v24  ;;  %5542 = vrot.lane.b32.xlu0 %v5417_v56, %s8177_s18  ;;  %v5400_v4 = vmax.f32 %v5327_v11, %v5365_v2  ;;  %v5432_v38 = vld [vmem:[#allocation3 + $0x24] ss:$2 sm:$0xff]  ;;  %v5470_v44 = vld [vmem:[#allocation3 + $0x25] ss:$2 sm:$0xff]  ;;  %v3862_v24 = vmax.f32 %v3739_v57, %v3817_v12 }
 0x342   :  { %v5505_v1 = vmax.f32 %v5432_v38, %v5470_v44  ;;  %v3751_v57 = vld [vmem:[#allocation2 + $0x260] ss:$2 sm:$0xff] }
 0x343   :  { %5190 = vst.msk [vmem:[#allocation3 + $0x58] sm:$0xff] %vm5178_vm12, %v5150_v14  ;;  %v5148_v58 = vmax.f32 %v5017_v26, 0.0  ;;  %v4643_v40 = vpop.permute.xlu0 %4642 }
 0x344   :  { %v4804_v3 = vsel %vm4774_vm10, %v4758_v46, %v4643_v40  ;;  %v3863_v40 = vmax.f32 %v3741_v49, %v3819_v15  ;;  %v3829_v49 = vld [vmem:[#allocation2 + $0x261] ss:$2 sm:$0xff] }
 0x345   :  { %5188 = vst.msk [vmem:[#allocation3 + $0x48] sm:$0xff] %vm5178_vm12, %v5148_v58  ;;  %5572 = vrot.lane.b32.xlu0 %v5522_v34, %s8178_s13 }
 0x346   :  { %v3885_v46 = vpack.c.bf16 %v3863_v40, %v3862_v24 }
 0x347   :  { %v4703_v27 = vpop.permute.xlu0 %4702 }
 0x348   :  { %v4859_v25 = vsel %vm4815_vm11, %v4804_v3, %v4703_v27  ;;  %v5329_v18 = vld [vmem:[#allocation3 + $0x32] ss:$2 sm:$0xff]  ;;  %v5367_v19 = vld [vmem:[#allocation3 + $0x33] ss:$2 sm:$0xff] }
 0x349   :  { %v5434_v32 = vld [vmem:[#allocation3 + $0x34] ss:$2 sm:$0xff]  ;;  %6786 = vmatprep.mubr.bf16.mxu1 %v4859_v25  ;;  %v5401_v50 = vmax.f32 %v5329_v18, %v5367_v19  ;;  %v5472_v5 = vld [vmem:[#allocation3 + $0x35] ss:$2 sm:$0xff] }
 0x34a   :  { %v5506_v47 = vmax.f32 %v5434_v32, %v5472_v5  ;;  %v3743_v19 = vld [vmem:[#allocation2 + $0x220] ss:$2 sm:$0xff]  ;;  %v3821_v32 = vld [vmem:[#allocation2 + $0x221] ss:$2 sm:$0xff] }
 0x34b   :  { %v5418_v45 = vpack.c.bf16 %v5401_v50, %v5400_v4  ;;  %v3745_v4 = vld [vmem:[#allocation2 + $0x230] ss:$2 sm:$0xff]  ;;  %v3823_v50 = vld [vmem:[#allocation2 + $0x231] ss:$2 sm:$0xff]  ;;  %v3864_v38 = vmax.f32 %v3743_v19, %v3821_v32  ;;  %v5256_v19 = vld [vmem:[#allocation3 + $0x1] ss:$2 sm:$0xff] }
 0x34c   :  { %v5523_v17 = vpack.c.bf16 %v5506_v47, %v5505_v1  ;;  %v5331_v13 = vld [vmem:[#allocation3 + $0x42] ss:$2 sm:$0xff]  ;;  %v5369_v16 = vld [vmem:[#allocation3 + $0x43] ss:$2 sm:$0xff]  ;;  %v3865_v44 = vmax.f32 %v3745_v4, %v3823_v50 }
 0x34d   :  { %5544 = vrot.lane.b32.xlu1 %v5418_v45, %s8177_s18  ;;  %v5402_v14 = vmax.f32 %v5331_v13, %v5369_v16  ;;  %v5436_v29 = vld [vmem:[#allocation3 + $0x44] ss:$2 sm:$0xff]  ;;  %v5474_v58 = vld [vmem:[#allocation3 + $0x45] ss:$2 sm:$0xff] }
 0x34e   :  { %v5507_v11 = vmax.f32 %v5436_v29, %v5474_v58  ;;  %v3886_v47 = vpack.c.bf16 %v3865_v44, %v3864_v38  ;;  %v5220_v32 = vld [vmem:[#allocation3 + $0x10] ss:$2 sm:$0xff]  ;;  %v5258_v4 = vld [vmem:[#allocation3 + $0x11] ss:$2 sm:$0xff] }
 0x351   :  { %5574 = vrot.lane.b32.xlu1 %v5523_v17, %s8178_s13 }
 0x357   :  { %v4585_v48 = vpop.permute.xlu1 %4584 }
 0x358   :  { %v4761_v55 = vsel %vm3595_vm9, %v3884_v54, %v4585_v48 }
 0x35b   :  { %v4645_v53 = vpop.permute.xlu1 %4644 }
 0x35c   :  { %v4806_v30 = vsel %vm4774_vm10, %v4761_v55, %v4645_v53 }
 0x35f   :  { %v4705_v6 = vpop.permute.xlu1 %4704 }
 0x360   :  { %v4862_v33 = vsel %vm4815_vm11, %v4806_v30, %v4705_v6 }
 0x361   :  { %v6772_v23 = vpop.f32.mrf.mxu1  ;;  %6787 = vmatmul.mubr.bf16.gmra.mxu1 %v4862_v33 }
 0x362   :  { %v5038_v36 = vadd.f32 %v6772_v23, %v11969_v37 }
 0x363   :  { %v5029_v61 = vpop.f32.mrf.mxu1 }
 0x364   :  { %v5153_v63 = vmax.f32 %v5038_v36, 0.0  ;;  %v5030_v31 = vadd.f32 %v11969_v37, %v5029_v61  ;;  %v3747_v36 = vld [vmem:[#allocation2 + $0x240] ss:$2 sm:$0xff]  ;;  %v3825_v61 = vld [vmem:[#allocation2 + $0x241] ss:$2 sm:$0xff] }
 0x365   :  { %v6773_v0 = vpop.f32.mrf.mxu1 }
 0x366   :  { %5193 = vst.msk [vmem:[#allocation3 + $0x70] sm:$0xff] %vm5178_vm12, %v5153_v63  ;;  %v5151_v51 = vmax.f32 %v5030_v31, 0.0  ;;  %v5041_v9 = vadd.f32 %v6773_v0, %v11969_v37  ;;  %v3749_v0 = vld [vmem:[#allocation2 + $0x250] ss:$2 sm:$0xff] }
 0x367   :  { %v5032_v39 = vpop.f32.mrf.mxu1 }
 0x368   :  { %5191 = vst.msk [vmem:[#allocation3 + $0x60] sm:$0xff] %vm5178_vm12, %v5151_v51  ;;  %v5154_v8 = vmax.f32 %v5041_v9, 0.0  ;;  %v5033_v35 = vadd.f32 %v11969_v37, %v5032_v39  ;;  %v3827_v51 = vld [vmem:[#allocation2 + $0x251] ss:$2 sm:$0xff] }
 0x36a   :  { %5194 = vst.msk [vmem:[#allocation3 + $0x78] sm:$0xff] %vm5178_vm12, %v5154_v8  ;;  %v5152_v62 = vmax.f32 %v5033_v35, 0.0 }
 0x36c   :  { %5192 = vst.msk [vmem:[#allocation3 + $0x68] sm:$0xff] %vm5178_vm12, %v5152_v62  ;;  %v3866_v62 = vmax.f32 %v3747_v36, %v3825_v61 }
 0x36f   :  { %v4587_v10 = vpop.permute.xlu0 %4586  ;;  %v5333_v56 = vld [vmem:[#allocation3 + $0x52] ss:$2 sm:$0xff]  ;;  %v5371_v21 = vld [vmem:[#allocation3 + $0x53] ss:$2 sm:$0xff] }
 0x370   :  { %v5438_v22 = vld [vmem:[#allocation3 + $0x54] ss:$2 sm:$0xff]  ;;  %v5403_v26 = vmax.f32 %v5333_v56, %v5371_v21  ;;  %v5476_v59 = vld [vmem:[#allocation3 + $0x55] ss:$2 sm:$0xff]  ;;  %v4764_v2 = vsel %vm3595_vm9, %v3885_v46, %v4587_v10  ;;  %v3867_v56 = vmax.f32 %v3749_v0, %v3827_v51 }
 0x371   :  { %v5508_v43 = vmax.f32 %v5438_v22, %v5476_v59  ;;  %v3868_v59 = vmax.f32 %v3751_v57, %v3829_v49 }
 0x372   :  { %v5419_v34 = vpack.c.bf16 %v5403_v26, %v5402_v14  ;;  %v3887_v26 = vpack.c.bf16 %v3867_v56, %v3866_v62 }
 0x373   :  { %v4647_v60 = vpop.permute.xlu0 %4646  ;;  %v5524_v3 = vpack.c.bf16 %v5508_v43, %v5507_v11  ;;  %v5335_v63 = vld [vmem:[#allocation3 + $0x62] ss:$2 sm:$0xff]  ;;  %v5373_v31 = vld [vmem:[#allocation3 + $0x63] ss:$2 sm:$0xff]  ;;  %v3888_v46 = vpack.c.bf16 %v3868_v59, %v3868_v59 }
 0x374   :  { %5546 = vrot.lane.b32.xlu0 %v5419_v34, %s8177_s18  ;;  %v4808_v27 = vsel %vm4774_vm10, %v4764_v2, %v4647_v60  ;;  %v5404_v12 = vmax.f32 %v5335_v63, %v5373_v31  ;;  %v5440_v15 = vld [vmem:[#allocation3 + $0x64] ss:$2 sm:$0xff]  ;;  %v5478_v10 = vld [vmem:[#allocation3 + $0x65] ss:$2 sm:$0xff] }
 0x375   :  { %v5509_v29 = vmax.f32 %v5440_v15, %v5478_v10  ;;  %v5228_v59 = vld [vmem:[#allocation3 + $0x50] ss:$2 sm:$0xff] }
 0x377   :  { %v4707_v25 = vpop.permute.xlu0 %4706 }
 0x378   :  { %5576 = vrot.lane.b32.xlu0 %v5524_v3, %s8178_s13  ;;  %v4865_v18 = vsel %vm4815_vm11, %v4808_v27, %v4707_v25 }
 0x379   :  { %6790 = vmatprep.mubr.bf16.mxu1 %v4865_v18  ;;  %v5218_v18 = vld [vmem:[#allocation3] ss:$2 sm:$0xff] }
 0x37a   :  { %v5293_v50 = vmax.f32 %v5218_v18, %v5256_v19 }
 0x387   :  { %v4589_v5 = vpop.permute.xlu1 %4588 }
 0x388   :  { %v4767_v1 = vsel %vm3595_vm9, %v3886_v47, %v4589_v5  ;;  %v5294_v5 = vmax.f32 %v5220_v32, %v5258_v4 }
 0x38a   :  { %v5312_v44 = vpack.c.bf16 %v5294_v5, %v5293_v50 }
 0x38b   :  { %v4649_v45 = vpop.permute.xlu1 %4648 }
 0x38c   :  { %v4810_v17 = vsel %vm4774_vm10, %v4767_v1, %v4649_v45 }
 0x38f   :  { %v4709_v7 = vpop.permute.xlu1 %4708 }
 0x390   :  { %v4868_v20 = vsel %vm4815_vm11, %v4810_v17, %v4709_v7  ;;  %v5222_v17 = vld [vmem:[#allocation3 + $0x20] ss:$2 sm:$0xff]  ;;  %v5260_v7 = vld [vmem:[#allocation3 + $0x21] ss:$2 sm:$0xff] }
 0x391   :  { %v6776_v41 = vpop.f32.mrf.mxu1  ;;  %6791 = vmatmul.mubr.bf16.gmra.mxu1 %v4868_v20  ;;  %v5224_v20 = vld [vmem:[#allocation3 + $0x30] ss:$2 sm:$0xff] }
 0x392   :  { %v5054_v42 = vadd.f32 %v6776_v41, %v11969_v37  ;;  %v5262_v41 = vld [vmem:[#allocation3 + $0x31] ss:$2 sm:$0xff] }
 0x393   :  { %v5045_v48 = vpop.f32.mrf.mxu1 }
 0x394   :  { %v5157_v28 = vmax.f32 %v5054_v42, 0.0  ;;  %v5046_v52 = vadd.f32 %v11969_v37, %v5045_v48  ;;  %v5295_v42 = vmax.f32 %v5222_v17, %v5260_v7  ;;  %v5296_v48 = vmax.f32 %v5224_v20, %v5262_v41 }
 0x395   :  { %v6777_v53 = vpop.f32.mrf.mxu1 }
 0x396   :  { %5197 = vst.msk [vmem:[#allocation3 + $0x90] sm:$0xff] %vm5178_vm12, %v5157_v28  ;;  %v5155_v54 = vmax.f32 %v5046_v52, 0.0  ;;  %v5057_v55 = vadd.f32 %v6777_v53, %v11969_v37  ;;  %v5313_v52 = vpack.c.bf16 %v5296_v48, %v5295_v42 }
 0x397   :  { %v5048_v30 = vpop.f32.mrf.mxu1 }
 0x398   :  { %5195 = vst.msk [vmem:[#allocation3 + $0x80] sm:$0xff] %vm5178_vm12, %v5155_v54  ;;  %v5158_v6 = vmax.f32 %v5057_v55, 0.0  ;;  %v5049_v33 = vadd.f32 %v11969_v37, %v5048_v30 }
 0x39a   :  { %5198 = vst.msk [vmem:[#allocation3 + $0x98] sm:$0xff] %vm5178_vm12, %v5158_v6  ;;  %v5156_v23 = vmax.f32 %v5049_v33, 0.0 }
 0x39c   :  { %5196 = vst.msk [vmem:[#allocation3 + $0x88] sm:$0xff] %vm5178_vm12, %v5156_v23 }
 0x39f   :  { %v4591_v9 = vpop.permute.xlu0 %4590  ;;  %v5337_v39 = vld [vmem:[#allocation3 + $0x72] ss:$2 sm:$0xff]  ;;  %v5375_v8 = vld [vmem:[#allocation3 + $0x73] ss:$2 sm:$0xff] }
 0x3a0   :  { %v5442_v35 = vld [vmem:[#allocation3 + $0x74] ss:$2 sm:$0xff]  ;;  %v5405_v13 = vmax.f32 %v5337_v39, %v5375_v8  ;;  %v5480_v16 = vld [vmem:[#allocation3 + $0x75] ss:$2 sm:$0xff]  ;;  %v4770_v58 = vsel %vm3595_vm9, %v3887_v26, %v4591_v9 }
 0x3a1   :  { %v5510_v22 = vmax.f32 %v5442_v35, %v5480_v16  ;;  %v5264_v26 = vld [vmem:[#allocation3 + $0x41] ss:$2 sm:$0xff] }
 0x3a2   :  { %v5420_v21 = vpack.c.bf16 %v5405_v13, %v5404_v12 }
 0x3a3   :  { %v4593_v24 = vpop.permute.xlu1 %4592  ;;  %v4651_v14 = vpop.permute.xlu0 %4650  ;;  %v5525_v40 = vpack.c.bf16 %v5510_v22, %v5509_v29  ;;  %v5339_v8 = vld [vmem:[#allocation3 + $0x82] ss:$2 sm:$0xff]  ;;  %v5377_v35 = vld [vmem:[#allocation3 + $0x83] ss:$2 sm:$0xff] }
 0x3a4   :  { %5548 = vrot.lane.b32.xlu1 %v5420_v21, %s8177_s18  ;;  %v4812_v34 = vsel %vm4774_vm10, %v4770_v58, %v4651_v14  ;;  %v4773_v2 = vsel %vm3595_vm9, %v3888_v46, %v4593_v24  ;;  %v5406_v13 = vmax.f32 %v5339_v8, %v5377_v35  ;;  %v5444_v15 = vld [vmem:[#allocation3 + $0x84] ss:$2 sm:$0xff]  ;;  %v5482_v10 = vld [vmem:[#allocation3 + $0x85] ss:$2 sm:$0xff] }
 0x3a5   :  { %v5511_v22 = vmax.f32 %v5444_v15, %v5482_v10  ;;  %v5226_v14 = vld [vmem:[#allocation3 + $0x40] ss:$2 sm:$0xff]  ;;  %v5266_v29 = vld [vmem:[#allocation3 + $0x51] ss:$2 sm:$0xff] }
 0x3a6   :  { %v5297_v58 = vmax.f32 %v5226_v14, %v5264_v26 }
 0x3a7   :  { %v4653_v43 = vpop.permute.xlu1 %4652  ;;  %v4711_v60 = vpop.permute.xlu0 %4710 }
 0x3a8   :  { %5578 = vrot.lane.b32.xlu1 %v5525_v40, %s8178_s13  ;;  %v4871_v11 = vsel %vm4815_vm11, %v4812_v34, %v4711_v60  ;;  %v4814_v3 = vsel %vm4774_vm10, %v4773_v2, %v4653_v43  ;;  %v5298_v40 = vmax.f32 %v5228_v59, %v5266_v29 }
 0x3a9   :  { %6794 = vmatprep.mubr.bf16.mxu1 %v4871_v11 }
 0x3aa   :  { %v5314_v43 = vpack.c.bf16 %v5298_v40, %v5297_v58 }
 0x3ab   :  { %v4713_v27 = vpop.permute.xlu1 %4712 }
 0x3ac   :  { %v4874_v25 = vsel %vm4815_vm11, %v4814_v3, %v4713_v27 }
 0x3ad   :  { %6795 = vmatmul.mubr.bf16.gmra.mxu1 %v4874_v25 }
 0x3b3   :  { %v5543_v38 = vpop.permute.xlu0 %5542 }
 0x3b4   :  { %v5594_v45 = vsel %vm5178_vm12, %v5312_v44, %v5543_v38 }
 0x3b7   :  { %v5573_v47 = vpop.permute.xlu0 %5572 }
 0x3b8   :  { %v5624_v1 = vsel %vm5622_vm14, %v5594_v45, %v5573_v47 }
 0x3b9   :  { %6802 = vmatprep.mubr.msk.bf16.mxu1 %vm5662_vm15, %v5624_v1 }
 0x3bf   :  { %v5545_v28 = vpop.permute.xlu1 %5544 }
 0x3c0   :  { %v5597_v55 = vsel %vm5178_vm12, %v5313_v52, %v5545_v28 }
 0x3c1   :  { %v6780_v53 = vpop.f32.mrf.mxu1 }
 0x3c2   :  { %v5070_v54 = vadd.f32 %v6780_v53, %v11969_v37 }
 0x3c3   :  { %v5061_v30 = vpop.f32.mrf.mxu1  ;;  %v5575_v6 = vpop.permute.xlu1 %5574 }
 0x3c4   :  { %v5161_v33 = vmax.f32 %v5070_v54, 0.0  ;;  %v5062_v23 = vadd.f32 %v11969_v37, %v5061_v30  ;;  %v5626_v36 = vsel %vm5622_vm14, %v5597_v55, %v5575_v6  ;;  %v5230_v30 = vld [vmem:[#allocation3 + $0x60] ss:$2 sm:$0xff]  ;;  %v5268_v6 = vld [vmem:[#allocation3 + $0x61] ss:$2 sm:$0xff] }
 0x3c5   :  { %v6781_v61 = vpop.f32.mrf.mxu1  ;;  %6803 = vmatmul.mubr.msk.bf16.vlgmr.msra.gmra.mxu1 %vm5662_vm15, %v5626_v36  ;;  %v5299_v36 = vmax.f32 %v5230_v30, %v5268_v6 }
 0x3c6   :  { %5201 = vst.msk [vmem:[#allocation3 + $0xb0] sm:$0xff] %vm5178_vm12, %v5161_v33  ;;  %v5159_v63 = vmax.f32 %v5062_v23, 0.0  ;;  %v5073_v31 = vadd.f32 %v6781_v61, %v11969_v37  ;;  %v5232_v33 = vld [vmem:[#allocation3 + $0x70] ss:$2 sm:$0xff]  ;;  %v5270_v23 = vld [vmem:[#allocation3 + $0x71] ss:$2 sm:$0xff] }
 0x3c7   :  { %v5064_v0 = vpop.f32.mrf.mxu1  ;;  %v5300_v61 = vmax.f32 %v5232_v33, %v5270_v23 }
 0x3c8   :  { %5199 = vst.msk [vmem:[#allocation3 + $0xa0] sm:$0xff] %vm5178_vm12, %v5159_v63  ;;  %v5162_v51 = vmax.f32 %v5073_v31, 0.0  ;;  %v5065_v9 = vadd.f32 %v11969_v37, %v5064_v0 }
 0x3c9   :  { %v5315_v31 = vpack.c.bf16 %v5300_v61, %v5299_v36 }
 0x3ca   :  { %5202 = vst.msk [vmem:[#allocation3 + $0xb8] sm:$0xff] %vm5178_vm12, %v5162_v51  ;;  %v5160_v39 = vmax.f32 %v5065_v9, 0.0 }
 0x3cc   :  { %5200 = vst.msk [vmem:[#allocation3 + $0xa8] sm:$0xff] %vm5178_vm12, %v5160_v39 }
 0x3cf   :  { %v5341_v62 = vld [vmem:[#allocation3 + $0x92] ss:$2 sm:$0xff]  ;;  %v5379_v57 = vld [vmem:[#allocation3 + $0x93] ss:$2 sm:$0xff] }
 0x3d0   :  { %v5446_v12 = vld [vmem:[#allocation3 + $0x94] ss:$2 sm:$0xff]  ;;  %v5407_v16 = vmax.f32 %v5341_v62, %v5379_v57  ;;  %v5484_v49 = vld [vmem:[#allocation3 + $0x95] ss:$2 sm:$0xff] }
 0x3d1   :  { %v5512_v21 = vmax.f32 %v5446_v12, %v5484_v49 }
 0x3d2   :  { %v5421_v56 = vpack.c.bf16 %v5407_v16, %v5406_v13 }
 0x3d3   :  { %v5526_v24 = vpack.c.bf16 %v5512_v21, %v5511_v22  ;;  %v5343_v45 = vld [vmem:[#allocation3 + $0xa2] ss:$2 sm:$0xff]  ;;  %v5381_v47 = vld [vmem:[#allocation3 + $0xa3] ss:$2 sm:$0xff] }
 0x3d4   :  { %5550 = vrot.lane.b32.xlu0 %v5421_v56, %s8177_s18  ;;  %v5408_v20 = vmax.f32 %v5343_v45, %v5381_v47  ;;  %v5448_v48 = vld [vmem:[#allocation3 + $0xa4] ss:$2 sm:$0xff]  ;;  %v5486_v28 = vld [vmem:[#allocation3 + $0xa5] ss:$2 sm:$0xff] }
 0x3d5   :  { %v5513_v54 = vmax.f32 %v5448_v48, %v5486_v28 }
 0x3d8   :  { %5580 = vrot.lane.b32.xlu0 %v5526_v24, %s8178_s13 }
 0x3e6   :  { %v5547_v34 = vpop.permute.xlu0 %5546 }
 0x3e7   :  { %v5600_v60 = vsel %vm5178_vm12, %v5314_v43, %v5547_v34 }
 0x3ea   :  { %v5577_v46 = vpop.permute.xlu0 %5576 }
 0x3eb   :  { %v5628_v11 = vsel %vm5622_vm14, %v5600_v60, %v5577_v46 }
 0x3ec   :  { %6806 = vmatprep.mubr.msk.bf16.mxu1 %vm5662_vm15, %v5628_v11 }
 0x3f2   :  { %v6784_v2 = vpop.f32.mrf.mxu1 }
 0x3f3   :  { %v5086_v3 = vadd.f32 %v6784_v2, %v11969_v37  ;;  %v5234_v2 = vld [vmem:[#allocation3 + $0x80] ss:$2 sm:$0xff] }
 0x3f4   :  { %v5077_v27 = vpop.f32.mrf.mxu1 }
 0x3f5   :  { %v5165_v25 = vmax.f32 %v5086_v3, 0.0  ;;  %v5078_v18 = vadd.f32 %v11969_v37, %v5077_v27  ;;  %v5272_v3 = vld [vmem:[#allocation3 + $0x81] ss:$2 sm:$0xff]  ;;  %v5236_v27 = vld [vmem:[#allocation3 + $0x90] ss:$2 sm:$0xff] }
 0x3f6   :  { %v6785_v19 = vpop.f32.mrf.mxu1 }
 0x3f7   :  { %5205 = vst.msk [vmem:[#allocation3 + $0xd0] sm:$0xff] %vm5178_vm12, %v5165_v25  ;;  %v5163_v32 = vmax.f32 %v5078_v18, 0.0  ;;  %v5089_v4 = vadd.f32 %v6785_v19, %v11969_v37  ;;  %v5274_v25 = vld [vmem:[#allocation3 + $0x91] ss:$2 sm:$0xff]  ;;  %v5301_v18 = vmax.f32 %v5234_v2, %v5272_v3 }
 0x3f8   :  { %v5080_v50 = vpop.f32.mrf.mxu1  ;;  %v5302_v19 = vmax.f32 %v5236_v27, %v5274_v25 }
 0x3f9   :  { %5203 = vst.msk [vmem:[#allocation3 + $0xc0] sm:$0xff] %vm5178_vm12, %v5163_v32  ;;  %v5166_v5 = vmax.f32 %v5089_v4, 0.0  ;;  %v5081_v38 = vadd.f32 %v11969_v37, %v5080_v50 }
 0x3fa   :  { %v5316_v4 = vpack.c.bf16 %v5302_v19, %v5301_v18 }
 0x3fb   :  { %5206 = vst.msk [vmem:[#allocation3 + $0xd8] sm:$0xff] %vm5178_vm12, %v5166_v5  ;;  %v5164_v44 = vmax.f32 %v5081_v38, 0.0 }
 0x3fd   :  { %5204 = vst.msk [vmem:[#allocation3 + $0xc8] sm:$0xff] %vm5178_vm12, %v5164_v44 }
 0x400   :  { %v5345_v1 = vld [vmem:[#allocation3 + $0xb2] ss:$2 sm:$0xff]  ;;  %v5383_v17 = vld [vmem:[#allocation3 + $0xb3] ss:$2 sm:$0xff] }
 0x401   :  { %v5450_v7 = vld [vmem:[#allocation3 + $0xb4] ss:$2 sm:$0xff]  ;;  %v5409_v41 = vmax.f32 %v5345_v1, %v5383_v17  ;;  %v5488_v42 = vld [vmem:[#allocation3 + $0xb5] ss:$2 sm:$0xff] }
 0x402   :  { %v5514_v53 = vmax.f32 %v5450_v7, %v5488_v42 }
 0x403   :  { %v5422_v52 = vpack.c.bf16 %v5409_v41, %v5408_v20 }
 0x404   :  { %v5527_v55 = vpack.c.bf16 %v5514_v53, %v5513_v54  ;;  %v5347_v21 = vld [vmem:[#allocation3 + $0xc2] ss:$2 sm:$0xff]  ;;  %v5385_v22 = vld [vmem:[#allocation3 + $0xc3] ss:$2 sm:$0xff] }
 0x405   :  { %5552 = vrot.lane.b32.xlu1 %v5422_v52, %s8177_s18  ;;  %v5410_v59 = vmax.f32 %v5347_v21, %v5385_v22  ;;  %v5452_v40 = vld [vmem:[#allocation3 + $0xc4] ss:$2 sm:$0xff]  ;;  %v5490_v34 = vld [vmem:[#allocation3 + $0xc5] ss:$2 sm:$0xff] }
 0x406   :  { %v5515_v46 = vmax.f32 %v5452_v40, %v5490_v34  ;;  %v5278_v21 = vld [vmem:[#allocation3 + $0xb1] ss:$2 sm:$0xff] }
 0x409   :  { %5582 = vrot.lane.b32.xlu1 %v5527_v55, %s8178_s13 }
 0x416   :  { %v5549_v63 = vpop.permute.xlu1 %5548 }
 0x417   :  { %v5603_v0 = vsel %vm5178_vm12, %v5315_v31, %v5549_v63 }
 0x41a   :  { %v5579_v51 = vpop.permute.xlu1 %5578 }
 0x41b   :  { %v5630_v9 = vsel %vm5622_vm14, %v5603_v0, %v5579_v51 }
 0x41c   :  { %6807 = vmatmul.mubr.msk.bf16.gmra.mxu1 %vm5662_vm15, %v5630_v9 }
 0x421   :  { %v6788_v39 = vpop.f32.mrf.mxu1 }
 0x422   :  { %v5102_v8 = vadd.f32 %v6788_v39, %v11969_v37 }
 0x423   :  { %v5093_v35 = vpop.f32.mrf.mxu1 }
 0x424   :  { %v5169_v62 = vmax.f32 %v5102_v8, 0.0  ;;  %v5094_v57 = vadd.f32 %v11969_v37, %v5093_v35 }
 0x425   :  { %v6789_v12 = vpop.f32.mrf.mxu1 }
 0x426   :  { %5209 = vst.msk [vmem:[#allocation3 + $0xf0] sm:$0xff] %vm5178_vm12, %v5169_v62  ;;  %v5167_v13 = vmax.f32 %v5094_v57, 0.0  ;;  %v5105_v16 = vadd.f32 %v6789_v12, %v11969_v37 }
 0x427   :  { %v5096_v49 = vpop.f32.mrf.mxu1 }
 0x428   :  { %5207 = vst.msk [vmem:[#allocation3 + $0xe0] sm:$0xff] %vm5178_vm12, %v5167_v13  ;;  %v5170_v15 = vmax.f32 %v5105_v16, 0.0  ;;  %v5097_v10 = vadd.f32 %v11969_v37, %v5096_v49  ;;  %v5238_v16 = vld [vmem:[#allocation3 + $0xa0] ss:$2 sm:$0xff]  ;;  %v5276_v49 = vld [vmem:[#allocation3 + $0xa1] ss:$2 sm:$0xff] }
 0x429   :  { %v5303_v22 = vmax.f32 %v5238_v16, %v5276_v49 }
 0x42a   :  { %5210 = vst.msk [vmem:[#allocation3 + $0xf8] sm:$0xff] %vm5178_vm12, %v5170_v15  ;;  %v5168_v56 = vmax.f32 %v5097_v10, 0.0 }
 0x42c   :  { %5208 = vst.msk [vmem:[#allocation3 + $0xe8] sm:$0xff] %vm5178_vm12, %v5168_v56  ;;  %v5240_v56 = vld [vmem:[#allocation3 + $0xb0] ss:$2 sm:$0xff] }
 0x42f   :  { %v5349_v24 = vld [vmem:[#allocation3 + $0xd2] ss:$2 sm:$0xff]  ;;  %v5387_v14 = vld [vmem:[#allocation3 + $0xd3] ss:$2 sm:$0xff] }
 0x430   :  { %v5454_v26 = vld [vmem:[#allocation3 + $0xd4] ss:$2 sm:$0xff]  ;;  %v5411_v29 = vmax.f32 %v5349_v24, %v5387_v14  ;;  %v5492_v58 = vld [vmem:[#allocation3 + $0xd5] ss:$2 sm:$0xff]  ;;  %v5304_v14 = vmax.f32 %v5240_v56, %v5278_v21 }
 0x431   :  { %v5516_v60 = vmax.f32 %v5454_v26, %v5492_v58  ;;  %v5248_v56 = vld [vmem:[#allocation3 + $0xf0] ss:$2 sm:$0xff]  ;;  %v5286_v21 = vld [vmem:[#allocation3 + $0xf1] ss:$2 sm:$0xff] }
 0x432   :  { %v5423_v43 = vpack.c.bf16 %v5411_v29, %v5410_v59  ;;  %v5317_v59 = vpack.c.bf16 %v5304_v14, %v5303_v22 }
 0x433   :  { %v5528_v11 = vpack.c.bf16 %v5516_v60, %v5515_v46  ;;  %v5351_v53 = vld [vmem:[#allocation3 + $0xe2] ss:$2 sm:$0xff]  ;;  %v5389_v54 = vld [vmem:[#allocation3 + $0xe3] ss:$2 sm:$0xff] }
 0x434   :  { %5554 = vrot.lane.b32.xlu0 %v5423_v43, %s8177_s18  ;;  %v5412_v33 = vmax.f32 %v5351_v53, %v5389_v54  ;;  %v5456_v61 = vld [vmem:[#allocation3 + $0xe4] ss:$2 sm:$0xff]  ;;  %v5494_v63 = vld [vmem:[#allocation3 + $0xe5] ss:$2 sm:$0xff] }
 0x435   :  { %v5517_v51 = vmax.f32 %v5456_v61, %v5494_v63 }
 0x438   :  { %5584 = vrot.lane.b32.xlu0 %v5528_v11, %s8178_s13 }
 0x446   :  { %v5551_v32 = vpop.permute.xlu0 %5550 }
 0x447   :  { %v5606_v50 = vsel %vm5178_vm12, %v5316_v4, %v5551_v32 }
 0x44a   :  { %v5581_v5 = vpop.permute.xlu0 %5580 }
 0x44b   :  { %v5632_v38 = vsel %vm5622_vm14, %v5606_v50, %v5581_v5 }
 0x44c   :  { %6810 = vmatprep.mubr.msk.bf16.mxu1 %vm5662_vm15, %v5632_v38 }
 0x451   :  { %v6792_v44 = vpop.f32.mrf.mxu1 }
 0x452   :  { %v5118_v45 = vadd.f32 %v6792_v44, %v11969_v37 }
 0x453   :  { %v5109_v47 = vpop.f32.mrf.mxu1 }
 0x454   :  { %v5173_v1 = vmax.f32 %v5118_v45, 0.0  ;;  %v5110_v17 = vadd.f32 %v11969_v37, %v5109_v47 }
 0x455   :  { %v6793_v7 = vpop.f32.mrf.mxu1 }
 0x456   :  { %5213 = vst.msk [vmem:[#allocation3 + $0x110] sm:$0xff] %vm5178_vm12, %v5173_v1  ;;  %v5171_v20 = vmax.f32 %v5110_v17, 0.0  ;;  %v5121_v41 = vadd.f32 %v6793_v7, %v11969_v37  ;;  %v12125_v17 = vld [vmem:[%s12297_s6] ss:$0 sm:$0xff]  ;;  %s8180_s6 = smov 24  }
 0x457   :  { %v5112_v42 = vpop.f32.mrf.mxu1 }
 0x458   :  { %5211 = vst.msk [vmem:[#allocation3 + $0x100] sm:$0xff] %vm5178_vm12, %v5171_v20  ;;  %v5174_v48 = vmax.f32 %v5121_v41, 0.0  ;;  %v5113_v28 = vadd.f32 %v11969_v37, %v5112_v42 }
 0x45a   :  { %5214 = vst.msk [vmem:[#allocation3 + $0x118] sm:$0xff] %vm5178_vm12, %v5174_v48  ;;  %v5172_v52 = vmax.f32 %v5113_v28, 0.0 }
 0x45c   :  { %5212 = vst.msk [vmem:[#allocation3 + $0x108] sm:$0xff] %vm5178_vm12, %v5172_v52 }
 0x45f   :  { %v5353_v55 = vld [vmem:[#allocation3 + $0xf2] ss:$2 sm:$0xff]  ;;  %v5391_v30 = vld [vmem:[#allocation3 + $0xf3] ss:$2 sm:$0xff] }
 0x460   :  { %v5458_v6 = vld [vmem:[#allocation3 + $0xf4] ss:$2 sm:$0xff]  ;;  %v5413_v23 = vmax.f32 %v5353_v55, %v5391_v30  ;;  %v5496_v36 = vld [vmem:[#allocation3 + $0xf5] ss:$2 sm:$0xff] }
 0x461   :  { %v5518_v0 = vmax.f32 %v5458_v6, %v5496_v36 }
 0x462   :  { %v5424_v31 = vpack.c.bf16 %v5413_v23, %v5412_v33 }
 0x463   :  { %v5529_v9 = vpack.c.bf16 %v5518_v0, %v5517_v51  ;;  %v5355_v29 = vld [vmem:[#allocation3 + $0x102] ss:$2 sm:$0xff]  ;;  %v5393_v58 = vld [vmem:[#allocation3 + $0x103] ss:$2 sm:$0xff] }
 0x464   :  { %5556 = vrot.lane.b32.xlu1 %v5424_v31, %s8177_s18  ;;  %v5460_v27 = vld [vmem:[#allocation3 + $0x104] ss:$2 sm:$0xff]  ;;  %v5498_v25 = vld [vmem:[#allocation3 + $0x105] ss:$2 sm:$0xff] }
 0x465   :  { %v5519_v38 = vmax.f32 %v5460_v27, %v5498_v25  ;;  %v5242_v51 = vld [vmem:[#allocation3 + $0xc0] ss:$2 sm:$0xff] }
 0x468   :  { %5586 = vrot.lane.b32.xlu1 %v5529_v9, %s8178_s13  ;;  %v5280_v9 = vld [vmem:[#allocation3 + $0xc1] ss:$2 sm:$0xff] }
 0x46d   :  { %v6796_v39 = vpop.f32.mrf.mxu1 }
 0x46e   :  { %v5134_v8 = vadd.f32 %v6796_v39, %v11969_v37  ;;  %v5244_v39 = vld [vmem:[#allocation3 + $0xd0] ss:$2 sm:$0xff] }
 0x46f   :  { %v5125_v35 = vpop.f32.mrf.mxu1 }
 0x470   :  { %v5177_v62 = vmax.f32 %v5134_v8, 0.0  ;;  %v5126_v57 = vadd.f32 %v11969_v37, %v5125_v35  ;;  %v5282_v8 = vld [vmem:[#allocation3 + $0xd1] ss:$2 sm:$0xff]  ;;  %v5305_v35 = vmax.f32 %v5242_v51, %v5280_v9 }
 0x471   :  { %v6797_v12 = vpop.f32.mrf.mxu1 }
 0x472   :  { %5217 = vst.msk [vmem:[#allocation3 + $0x130] sm:$0xff] %vm5178_vm12, %v5177_v62  ;;  %v5175_v13 = vmax.f32 %v5126_v57, 0.0  ;;  %v5306_v62 = vmax.f32 %v5244_v39, %v5282_v8 }
 0x473   :  { %v5128_v15 = vpop.f32.mrf.mxu1 }
 0x474   :  { %5215 = vst.msk [vmem:[#allocation3 + $0x120] sm:$0xff] %vm5178_vm12, %v5175_v13  ;;  %v5129_v10 = vadd.f32 %v11969_v37, %v5128_v15  ;;  %v5414_v37 = vmax.f32 %v5355_v29, %v5393_v58  ;;  %v5318_v12 = vpack.c.bf16 %v5306_v62, %v5305_v35  ;;  %v5246_v15 = vld [vmem:[#allocation3 + $0xe0] ss:$2 sm:$0xff]  ;;  %v8179_v35 = vmov 0.0  }
 0x475   :  { %5837 = vst.msk [vmem:[#allocation4 + $0x98] sm:$0xff] %vm5178_vm12, %v8179_v35 }
 0x476   :  { %v5176_v24 = vmax.f32 %v5129_v10, 0.0  ;;  %v5284_v10 = vld [vmem:[#allocation3 + $0xe1] ss:$2 sm:$0xff] }
 0x477   :  { %v5553_v26 = vpop.permute.xlu1 %5552  ;;  %v5307_v22 = vmax.f32 %v5246_v15, %v5284_v10 }
 0x478   :  { %5216 = vst.msk [vmem:[#allocation3 + $0x128] sm:$0xff] %vm5178_vm12, %v5176_v24  ;;  %v5609_v40 = vsel %vm5178_vm12, %v5317_v59, %v5553_v26  ;;  %v5308_v24 = vmax.f32 %v5248_v56, %v5286_v21 }
 0x47a   :  { %v5319_v26 = vpack.c.bf16 %v5308_v24, %v5307_v22 }
 0x47b   :  { %v5583_v34 = vpop.permute.xlu1 %5582  ;;  %v5357_v43 = vld [vmem:[#allocation3 + $0x112] ss:$2 sm:$0xff]  ;;  %v5395_v60 = vld [vmem:[#allocation3 + $0x113] ss:$2 sm:$0xff] }
 0x47c   :  { %v5462_v46 = vld [vmem:[#allocation3 + $0x114] ss:$2 sm:$0xff]  ;;  %v5634_v11 = vsel %vm5622_vm14, %v5609_v40, %v5583_v34  ;;  %v5415_v2 = vmax.f32 %v5357_v43, %v5395_v60  ;;  %v5500_v3 = vld [vmem:[#allocation3 + $0x115] ss:$2 sm:$0xff] }
 0x47d   :  { %6811 = vmatmul.mubr.msk.bf16.gmra.mxu1 %vm5662_vm15, %v5634_v11  ;;  %v5520_v19 = vmax.f32 %v5462_v46, %v5500_v3 }
 0x47e   :  { %v5425_v18 = vpack.c.bf16 %v5415_v2, %v5414_v37 }
 0x47f   :  { %v5359_v32 = vld [vmem:[#allocation3 + $0x122] ss:$2 sm:$0xff]  ;;  %v5397_v4 = vld [vmem:[#allocation3 + $0x123] ss:$2 sm:$0xff]  ;;  %v5530_v47 = vpack.c.bf16 %v5520_v19, %v5519_v38 }
 0x480   :  { %v5464_v50 = vld [vmem:[#allocation3 + $0x124] ss:$2 sm:$0xff]  ;;  %5558 = vrot.lane.b32.xlu0 %v5425_v18, %s8177_s18  ;;  %v5416_v5 = vmax.f32 %v5359_v32, %v5397_v4  ;;  %v5502_v44 = vld [vmem:[#allocation3 + $0x125] ss:$2 sm:$0xff] }
 0x481   :  { %v5521_v1 = vmax.f32 %v5464_v50, %v5502_v44  ;;  %v5250_v50 = vld [vmem:[#allocation3 + $0x100] ss:$2 sm:$0xff] }
 0x482   :  { %v5426_v45 = vpack.c.bf16 %v5416_v5, %v5416_v5  ;;  %v5288_v5 = vld [vmem:[#allocation3 + $0x101] ss:$2 sm:$0xff] }
 0x483   :  { %v5531_v41 = vpack.c.bf16 %v5521_v1, %v5521_v1  ;;  %v5290_v1 = vld [vmem:[#allocation3 + $0x111] ss:$2 sm:$0xff] }
 0x484   :  { %5560 = vrot.lane.b32.xlu1 %v5426_v45, %s8177_s18  ;;  %5588 = vrot.lane.b32.xlu0 %v5530_v47, %s8178_s13  ;;  %v5252_v47 = vld [vmem:[#allocation3 + $0x110] ss:$2 sm:$0xff] }
 0x485   :  { %v6804_v7 = vpop.f32.mrf.mxu1 }
 0x486   :  { %v5730_v20 = vadd.f32 %v6804_v7, %v12125_v17  ;;  %v5309_v7 = vmax.f32 %v5250_v50, %v5288_v5 }
 0x487   :  { %v5721_v42 = vpop.f32.mrf.mxu1 }
 0x488   :  { %v5801_v48 = vmax.f32 %v5730_v20, 0.0  ;;  %v5722_v28 = vadd.f32 %v12125_v17, %v5721_v42  ;;  %5590 = vrot.lane.b32.xlu1 %v5531_v41, %s8178_s13  ;;  %v5254_v20 = vld [vmem:[#allocation3 + $0x120] ss:$2 sm:$0xff]  ;;  %v5292_v41 = vld [vmem:[#allocation3 + $0x121] ss:$2 sm:$0xff]  ;;  %v5310_v42 = vmax.f32 %v5252_v47, %v5290_v1 }
 0x489   :  { %v6805_v52 = vpop.f32.mrf.mxu1 }
 0x48a   :  { %5820 = vst.msk [vmem:[#allocation4 + $0x10] sm:$0xff] %vm5178_vm12, %v5801_v48  ;;  %v5799_v53 = vmax.f32 %v5722_v28, 0.0  ;;  %v5733_v54 = vadd.f32 %v6805_v52, %v12125_v17  ;;  %v5320_v28 = vpack.c.bf16 %v5310_v42, %v5309_v7  ;;  %v5311_v52 = vmax.f32 %v5254_v20, %v5292_v41 }
 0x48b   :  { %v5724_v55 = vpop.f32.mrf.mxu1 }
 0x48c   :  { %5818 = vst.msk [vmem:[#allocation4] sm:$0xff] %vm5178_vm12, %v5799_v53  ;;  %v5802_v30 = vmax.f32 %v5733_v54, 0.0  ;;  %v5725_v6 = vadd.f32 %v12125_v17, %v5724_v55 }
 0x48e   :  { %5821 = vst.msk [vmem:[#allocation4 + $0x18] sm:$0xff] %vm5178_vm12, %v5802_v30  ;;  %v5800_v33 = vmax.f32 %v5725_v6, 0.0  ;;  %v5321_v6 = vpack.c.bf16 %v5311_v52, %v5311_v52 }
 0x490   :  { %5819 = vst.msk [vmem:[#allocation4 + $0x8] sm:$0xff] %vm5178_vm12, %v5800_v33 }
 0x495   :  { %v5840_v23 = vld [vmem:[#allocation4 + $0x10] ss:$2 sm:$0xff]  ;;  %v5860_v36 = vld [vmem:[#allocation4 + $0x11] ss:$2 sm:$0xff] }
 0x496   :  { %v5878_v61 = vmax.f32 %v5840_v23, %v5860_v36 }
 0x497   :  { %v5838_v63 = vld [vmem:[#allocation4] ss:$2 sm:$0xff]  ;;  %v5858_v31 = vld [vmem:[#allocation4 + $0x1] ss:$2 sm:$0xff] }
 0x498   :  { %5888 = vst.msk [vmem:[#allocation5 + $0x8] sm:$0xff] %vm5178_vm12, %v5878_v61  ;;  %v5877_v0 = vmax.f32 %v5838_v63, %v5858_v31 }
 0x49a   :  { %5887 = vst.msk [vmem:[#allocation5] sm:$0xff] %vm5178_vm12, %v5877_v0 }
 0x4a6   :  { %v5555_v57 = vpop.permute.xlu0 %5554 }
 0x4a7   :  { %v5612_v13 = vsel %vm5178_vm12, %v5318_v12, %v5555_v57 }
 0x4aa   :  { %v5585_v16 = vpop.permute.xlu0 %5584 }
 0x4ab   :  { %v5636_v49 = vsel %vm5622_vm14, %v5612_v13, %v5585_v16 }
 0x4ac   :  { %6814 = vmatprep.mubr.msk.bf16.mxu1 %vm5662_vm15, %v5636_v49 }
 0x4d6   :  { %v5557_v14 = vpop.permute.xlu1 %5556 }
 0x4d7   :  { %v5615_v59 = vsel %vm5178_vm12, %v5319_v26, %v5557_v14 }
 0x4da   :  { %v5587_v29 = vpop.permute.xlu1 %5586 }
 0x4db   :  { %v5638_v58 = vsel %vm5622_vm14, %v5615_v59, %v5587_v29 }
 0x4dc   :  { %v6808_v40 = vpop.f32.mrf.mxu1  ;;  %6815 = vmatmul.mubr.msk.bf16.gmra.mxu1 %vm5662_vm15, %v5638_v58 }
 0x4dd   :  { %v5746_v34 = vadd.f32 %v6808_v40, %v12125_v17 }
 0x4de   :  { %v5737_v43 = vpop.f32.mrf.mxu1 }
 0x4df   :  { %v5805_v60 = vmax.f32 %v5746_v34, 0.0  ;;  %v5738_v46 = vadd.f32 %v12125_v17, %v5737_v43 }
 0x4e0   :  { %v6809_v11 = vpop.f32.mrf.mxu1 }
 0x4e1   :  { %5824 = vst.msk [vmem:[#allocation4 + $0x30] sm:$0xff] %vm5178_vm12, %v5805_v60  ;;  %v5803_v37 = vmax.f32 %v5738_v46, 0.0  ;;  %v5749_v2 = vadd.f32 %v6809_v11, %v12125_v17 }
 0x4e2   :  { %v5740_v3 = vpop.f32.mrf.mxu1 }
 0x4e3   :  { %5822 = vst.msk [vmem:[#allocation4 + $0x20] sm:$0xff] %vm5178_vm12, %v5803_v37  ;;  %v5806_v27 = vmax.f32 %v5749_v2, 0.0  ;;  %v5741_v25 = vadd.f32 %v12125_v17, %v5740_v3 }
 0x4e5   :  { %5825 = vst.msk [vmem:[#allocation4 + $0x38] sm:$0xff] %vm5178_vm12, %v5806_v27  ;;  %v5804_v18 = vmax.f32 %v5741_v25, 0.0 }
 0x4e7   :  { %5823 = vst.msk [vmem:[#allocation4 + $0x28] sm:$0xff] %vm5178_vm12, %v5804_v18 }
 0x4ec   :  { %v5844_v19 = vld [vmem:[#allocation4 + $0x30] ss:$2 sm:$0xff]  ;;  %v5864_v32 = vld [vmem:[#allocation4 + $0x31] ss:$2 sm:$0xff] }
 0x4ed   :  { %v5880_v4 = vmax.f32 %v5844_v19, %v5864_v32 }
 0x4ee   :  { %v5842_v38 = vld [vmem:[#allocation4 + $0x20] ss:$2 sm:$0xff]  ;;  %v5862_v44 = vld [vmem:[#allocation4 + $0x21] ss:$2 sm:$0xff] }
 0x4ef   :  { %5890 = vst.msk [vmem:[#allocation5 + $0x18] sm:$0xff] %vm5178_vm12, %v5880_v4  ;;  %v5879_v45 = vmax.f32 %v5842_v38, %v5862_v44 }
 0x4f1   :  { %5889 = vst.msk [vmem:[#allocation5 + $0x10] sm:$0xff] %vm5178_vm12, %v5879_v45 }
 0x4f2   :  { %v5559_v48 = vpop.permute.xlu0 %5558 }
 0x4f3   :  { %v5618_v53 = vsel %vm5178_vm12, %v5320_v28, %v5559_v48 }
 0x4f6   :  { %v5561_v54 = vpop.permute.xlu1 %5560  ;;  %v5589_v55 = vpop.permute.xlu0 %5588 }
 0x4f7   :  { %v5640_v30 = vsel %vm5622_vm14, %v5618_v53, %v5589_v55  ;;  %v5621_v33 = vsel %vm5178_vm12, %v5321_v6, %v5561_v54  ;;  %v8122_v54 = vld [vmem:[%s12298_s7 + $0x78] sm:$0xff]  }
 0x4f8   :  { %6818 = vmatprep.mubr.msk.bf16.mxu1 %vm5662_vm15, %v5640_v30  ;;  %v8123_v55 = vld [vmem:[%s12298_s7 + $0x38] sm:$0xff]   ;;  %6628 = vmatprep.subr.bf16.mxu1 %v8122_v54 }
 0x4f9   :  { %6629 = vmatpush3.bf16.msra.mxu1 %v8123_v55 }
 0x4fa   :  { %v5591_v23 = vpop.permute.xlu1 %5590 }
 0x4fb   :  { %v5642_v36 = vsel %vm5622_vm14, %v5621_v33, %v5591_v23 }
 0x4fc   :  { %6819 = vmatmul.mubr.msk.bf16.gmra.mxu1 %vm5662_vm15, %v5642_v36  ;;  %v8124_v36 = vld [vmem:[%s12298_s7 + $0x70] sm:$0xff]  }
 0x4fd   :  { %6630 = vmatprep.subr.bf16.mxu1 %v8124_v36 }
 0x53d   :  { %v6812_v61 = vpop.f32.mrf.mxu1 }
 0x53e   :  { %v5762_v63 = vadd.f32 %v6812_v61, %v12125_v17 }
 0x53f   :  { %v5753_v31 = vpop.f32.mrf.mxu1 }
 0x540   :  { %v5809_v0 = vmax.f32 %v5762_v63, 0.0  ;;  %v5754_v51 = vadd.f32 %v12125_v17, %v5753_v31 }
 0x541   :  { %v6813_v9 = vpop.f32.mrf.mxu1 }
 0x542   :  { %5828 = vst.msk [vmem:[#allocation4 + $0x50] sm:$0xff] %vm5178_vm12, %v5809_v0  ;;  %v5807_v39 = vmax.f32 %v5754_v51, 0.0  ;;  %v5765_v8 = vadd.f32 %v6813_v9, %v12125_v17  ;;  %v8125_v9 = vld [vmem:[%s12298_s7 + $0x30] sm:$0xff]  }
 0x543   :  { %v5756_v62 = vpop.f32.mrf.mxu1  ;;  %6631 = vmatpush3.bf16.msra.mxu1 %v8125_v9 }
 0x544   :  { %5826 = vst.msk [vmem:[#allocation4 + $0x40] sm:$0xff] %vm5178_vm12, %v5807_v39  ;;  %v5810_v57 = vmax.f32 %v5765_v8, 0.0  ;;  %v5757_v12 = vadd.f32 %v12125_v17, %v5756_v62  ;;  %v8126_v62 = vld [vmem:[%s12298_s7 + $0x68] sm:$0xff]  }
 0x545   :  { %6632 = vmatprep.subr.bf16.mxu1 %v8126_v62 }
 0x546   :  { %5829 = vst.msk [vmem:[#allocation4 + $0x58] sm:$0xff] %vm5178_vm12, %v5810_v57  ;;  %v5808_v13 = vmax.f32 %v5757_v12, 0.0  ;;  %v8127_v12 = vld [vmem:[%s12298_s7 + $0x28] sm:$0xff]  }
 0x547   :  { %6633 = vmatpush3.bf16.msra.mxu1 %v8127_v12 }
 0x548   :  { %5827 = vst.msk [vmem:[#allocation4 + $0x48] sm:$0xff] %vm5178_vm12, %v5808_v13 }
 0x54d   :  { %v5848_v16 = vld [vmem:[#allocation4 + $0x50] ss:$2 sm:$0xff]  ;;  %v5868_v49 = vld [vmem:[#allocation4 + $0x51] ss:$2 sm:$0xff] }
 0x54e   :  { %v5882_v15 = vmax.f32 %v5848_v16, %v5868_v49 }
 0x54f   :  { %v5846_v10 = vld [vmem:[#allocation4 + $0x40] ss:$2 sm:$0xff]  ;;  %v5866_v56 = vld [vmem:[#allocation4 + $0x41] ss:$2 sm:$0xff] }
 0x550   :  { %5892 = vst.msk [vmem:[#allocation5 + $0x28] sm:$0xff] %vm5178_vm12, %v5882_v15  ;;  %v5881_v21 = vmax.f32 %v5846_v10, %v5866_v56  ;;  %v8129_v15 = vld [vmem:[%s12298_s7 + $0x20] sm:$0xff]   ;;  %v8130_v10 = vld [vmem:[%s12298_s7 + $0x58] sm:$0xff]  }
 0x552   :  { %5891 = vst.msk [vmem:[#allocation5 + $0x20] sm:$0xff] %vm5178_vm12, %v5881_v21 }
 0x557   :  { %v5901_v18 = vld [vmem:[#allocation5 + $0x2] ss:$40 sm:$0x3]  ;;  %v5899_v19 = vld [vmem:[#allocation5 + $0x1] ss:$40 sm:$0x3] }
 0x558   :  { %v5905_v45 = vld [vmem:[#allocation5 + $0x4] ss:$40 sm:$0x3]  ;;  %v5903_v47 = vld [vmem:[#allocation5 + $0x3] ss:$40 sm:$0x3] }
 0x559   :  { %v5909_v28 = vld [vmem:[#allocation5 + $0x6] ss:$40 sm:$0x3]  ;;  %v5907_v53 = vld [vmem:[#allocation5 + $0x5] ss:$40 sm:$0x3] }
 0x55a   :  { %v5911_v51 = vld [vmem:[#allocation5 + $0x7] ss:$40 sm:$0x3]  ;;  %v5897_v36 = vld [vmem:[#allocation5] ss:$40 sm:$0x3] }
 0x59c   :  { %v6816_v22 = vpop.f32.mrf.mxu1 }
 0x59d   :  { %v5778_v24 = vadd.f32 %v6816_v22, %v12125_v17  ;;  %v8131_v22 = vld [vmem:[%s12298_s7 + $0x18] sm:$0xff]  }
 0x59e   :  { %v5769_v14 = vpop.f32.mrf.mxu1 }
 0x59f   :  { %v5813_v26 = vmax.f32 %v5778_v24, 0.0  ;;  %v5770_v59 = vadd.f32 %v12125_v17, %v5769_v14  ;;  %v8132_v14 = vld [vmem:[%s12298_s7 + $0x50] sm:$0xff]  }
 0x5a0   :  { %v6817_v29 = vpop.f32.mrf.mxu1 }
 0x5a1   :  { %5832 = vst.msk [vmem:[#allocation4 + $0x70] sm:$0xff] %vm5178_vm12, %v5813_v26  ;;  %v5811_v58 = vmax.f32 %v5770_v59, 0.0  ;;  %v5781_v40 = vadd.f32 %v6817_v29, %v12125_v17  ;;  %v8133_v26 = vld [vmem:[%s12298_s7 + $0x10] sm:$0xff]  }
 0x5a2   :  { %v5772_v34 = vpop.f32.mrf.mxu1 }
 0x5a3   :  { %5830 = vst.msk [vmem:[#allocation4 + $0x60] sm:$0xff] %vm5178_vm12, %v5811_v58  ;;  %v5814_v43 = vmax.f32 %v5781_v40, 0.0  ;;  %v5773_v60 = vadd.f32 %v12125_v17, %v5772_v34 }
 0x5a5   :  { %5833 = vst.msk [vmem:[#allocation4 + $0x78] sm:$0xff] %vm5178_vm12, %v5814_v43  ;;  %v5812_v46 = vmax.f32 %v5773_v60, 0.0 }
 0x5a7   :  { %5831 = vst.msk [vmem:[#allocation4 + $0x68] sm:$0xff] %vm5178_vm12, %v5812_v46 }
 0x5ac   :  { %v5852_v11 = vld [vmem:[#allocation4 + $0x70] ss:$2 sm:$0xff]  ;;  %v5872_v37 = vld [vmem:[#allocation4 + $0x71] ss:$2 sm:$0xff] }
 0x5ad   :  { %v5884_v2 = vmax.f32 %v5852_v11, %v5872_v37 }
 0x5ae   :  { %v5850_v3 = vld [vmem:[#allocation4 + $0x60] ss:$2 sm:$0xff]  ;;  %v5870_v27 = vld [vmem:[#allocation4 + $0x61] ss:$2 sm:$0xff] }
 0x5af   :  { %5894 = vst.msk [vmem:[#allocation5 + $0x38] sm:$0xff] %vm5178_vm12, %v5884_v2  ;;  %v5883_v25 = vmax.f32 %v5850_v3, %v5870_v27  ;;  %v8134_v2 = vld [vmem:[%s12298_s7 + $0x48] sm:$0xff]  }
 0x5b0   :  { %v8135_v3 = vld [vmem:[%s12298_s7 + $0x8] sm:$0xff]  }
 0x5b1   :  { %5893 = vst.msk [vmem:[#allocation5 + $0x30] sm:$0xff] %vm5178_vm12, %v5883_v25 }
 0x5b6   :  { %v5933_v32 = vld [vmem:[#allocation5 + $0x12] ss:$40 sm:$0x3]  ;;  %v5931_v4 = vld [vmem:[#allocation5 + $0x11] ss:$40 sm:$0x3] }
 0x5b7   :  { %v8039_v50 = vpack.i.bf16 %v5901_v18, %v5933_v32  ;;  %v8034_v5 = vpack.i.bf16 %v5899_v19, %v5931_v4  ;;  %v5937_v38 = vld [vmem:[#allocation5 + $0x14] ss:$40 sm:$0x3]  ;;  %v5935_v44 = vld [vmem:[#allocation5 + $0x13] ss:$40 sm:$0x3] }
 0x5b8   :  { %v8049_v1 = vpack.i.bf16 %v5905_v45, %v5937_v38  ;;  %v8044_v7 = vpack.i.bf16 %v5903_v47, %v5935_v44  ;;  %v5941_v41 = vld [vmem:[#allocation5 + $0x16] ss:$40 sm:$0x3]  ;;  %v5939_v42 = vld [vmem:[#allocation5 + $0x15] ss:$40 sm:$0x3] }
 0x5b9   :  { %8040 = vrot.lane.b32.xlu1 %v8039_v50, %s8178_s13  ;;  %8035 = vrot.lane.b32.xlu0 %v8034_v5, %s8177_s18  ;;  %v8059_v33 = vpack.i.bf16 %v5909_v28, %v5941_v41  ;;  %v8054_v23 = vpack.i.bf16 %v5907_v53, %v5939_v42  ;;  %v5943_v63 = vld [vmem:[#allocation5 + $0x17] ss:$40 sm:$0x3]  ;;  %v5913_v59 = vld [vmem:[#allocation5 + $0x8] ss:$40 sm:$0x3] }
 0x5ba   :  { %v8064_v8 = vpack.i.bf16 %v5911_v51, %v5943_v63  ;;  %v5915_v29 = vld [vmem:[#allocation5 + $0x9] ss:$40 sm:$0x3]  ;;  %v5917_v11 = vld [vmem:[#allocation5 + $0xa] ss:$40 sm:$0x3] }
 0x5bb   :  { %v5919_v37 = vld [vmem:[#allocation5 + $0xb] ss:$40 sm:$0x3]  ;;  %v8136_v32 = vld [vmem:[%s12298_s7 + $0x40] sm:$0xff]  }
 0x5bc   :  { %v6820_v20 = vpop.f32.mrf.mxu1  ;;  %v5921_v4 = vld [vmem:[#allocation5 + $0xc] ss:$40 sm:$0x3]  ;;  %v5923_v50 = vld [vmem:[#allocation5 + $0xd] ss:$40 sm:$0x3] }
 0x5bd   :  { %v5794_v48 = vadd.f32 %v6820_v20, %v12125_v17  ;;  %8050 = vrot.lane.b32.xlu1 %v8049_v1, %s8174_s3  ;;  %8045 = vrot.lane.b32.xlu0 %v8044_v7, %s8180_s6  ;;  %s8184_s3 = smov 72   ;;  %v8137_v5 = vld [vmem:[%s12298_s7] sm:$0xff]   ;;  %v5925_v1 = vld [vmem:[#allocation5 + $0xe] ss:$40 sm:$0x3] }
 0x5be   :  { %v5785_v52 = vpop.f32.mrf.mxu1  ;;  %v5927_v7 = vld [vmem:[#allocation5 + $0xf] ss:$40 sm:$0x3] }
 0x5bf   :  { %v5817_v30 = vmax.f32 %v5794_v48, 0.0  ;;  %v5786_v6 = vadd.f32 %v12125_v17, %v5785_v52 }
 0x5c0   :  { %v6821_v61 = vpop.f32.mrf.mxu1 }
 0x5c1   :  { %5836 = vst.msk [vmem:[#allocation4 + $0x90] sm:$0xff] %vm5178_vm12, %v5817_v30  ;;  %v5815_v31 = vmax.f32 %v5786_v6, 0.0  ;;  %8060 = vrot.lane.b32.xlu1 %v8059_v33, %s8181_s28  ;;  %8055 = vrot.lane.b32.xlu0 %v8054_v23, %s8182_s15  ;;  %v5929_v23 = vld [vmem:[#allocation5 + $0x10] ss:$40 sm:$0x3] }
 0x5c2   :  { %v5788_v0 = vpop.f32.mrf.mxu1 }
 0x5c3   :  { %5834 = vst.msk [vmem:[#allocation4 + $0x80] sm:$0xff] %vm5178_vm12, %v5815_v31  ;;  %v5789_v39 = vadd.f32 %v12125_v17, %v5788_v0  ;;  %v8128_v17 = vld [vmem:[%s12298_s7 + $0x60] sm:$0xff]  }
 0x5c4   :  { %6634 = vmatprep.subr.bf16.mxu1 %v8128_v17 }
 0x5c5   :  { %v5816_v57 = vmax.f32 %v5789_v39, 0.0  ;;  %8065 = vrot.lane.b32.xlu0 %v8064_v8, %s8183_s16  ;;  %6635 = vmatpush3.bf16.msra.mxu1 %v8129_v15  ;;  %s8186_s16 = smov 88  }
 0x5c6   :  { %6636 = vmatprep.subr.bf16.mxu1 %v8130_v10 }
 0x5c7   :  { %5835 = vst.msk [vmem:[#allocation4 + $0x88] sm:$0xff] %vm5178_vm12, %v5816_v57 }
 0x5c8   :  { %v5856_v13 = vld [vmem:[#allocation4 + $0x90] ss:$2 sm:$0xff]  ;;  %v5876_v16 = vld [vmem:[#allocation4 + $0x91] ss:$2 sm:$0xff] }
 0x5c9   :  { %v5886_v49 = vmax.f32 %v5856_v13, %v5876_v16  ;;  %6637 = vmatpush3.bf16.msra.mxu1 %v8131_v22 }
 0x5ca   :  { %6638 = vmatprep.subr.bf16.mxu1 %v8132_v14 }
 0x5cb   :  { %5896 = vst.msk [vmem:[#allocation5 + $0x48] sm:$0xff] %vm5178_vm12, %v5886_v49 }
 0x5cd   :  { %6639 = vmatpush3.bf16.msra.mxu1 %v8133_v26 }
 0x5ce   :  { %v5854_v56 = vld [vmem:[#allocation4 + $0x80] ss:$2 sm:$0xff]  ;;  %v5874_v21 = vld [vmem:[#allocation4 + $0x81] ss:$2 sm:$0xff]  ;;  %6640 = vmatprep.subr.bf16.mxu1 %v8134_v2 }
 0x5cf   :  { %v5885_v24 = vmax.f32 %v5854_v56, %v5874_v21 }
 0x5d1   :  { %5895 = vst.msk [vmem:[#allocation5 + $0x40] sm:$0xff] %vm5178_vm12, %v5885_v24  ;;  %6641 = vmatpush3.bf16.msra.mxu1 %v8135_v3 }
 0x5d2   :  { %6642 = vmatprep.subr.bf16.mxu1 %v8136_v32  ;;  %v5963_v42 = vld [vmem:[#allocation5 + $0x21] ss:$40 sm:$0x3]  ;;  %v5965_v48 = vld [vmem:[#allocation5 + $0x22] ss:$40 sm:$0x3] }
 0x5d5   :  { %6643 = vmatpush3.bf16.msra.mxu1 %v8137_v5 }
 0x5d6   :  { %6822 = vmatprep.subr.bf16.mxu1 %v8179_v35 }
 0x5d8   :  { %v5945_v58 = vld [vmem:[#allocation5 + $0x18] ss:$40 sm:$0x3]  ;;  %v5947_v40 = vld [vmem:[#allocation5 + $0x19] ss:$40 sm:$0x3] }
 0x5d9   :  { %v8069_v34 = vpack.i.bf16 %v5913_v59, %v5945_v58  ;;  %v8074_v43 = vpack.i.bf16 %v5915_v29, %v5947_v40  ;;  %v5949_v60 = vld [vmem:[#allocation5 + $0x1a] ss:$40 sm:$0x3]  ;;  %v5951_v46 = vld [vmem:[#allocation5 + $0x1b] ss:$40 sm:$0x3] }
 0x5da   :  { %v8079_v27 = vpack.i.bf16 %v5917_v11, %v5949_v60  ;;  %v8084_v25 = vpack.i.bf16 %v5919_v37, %v5951_v46  ;;  %v5953_v18 = vld [vmem:[#allocation5 + $0x1c] ss:$40 sm:$0x3]  ;;  %v5955_v19 = vld [vmem:[#allocation5 + $0x1d] ss:$40 sm:$0x3] }
 0x5db   :  { %8070 = vrot.lane.b32.xlu1 %v8069_v34, %s8175_s27  ;;  %8075 = vrot.lane.b32.xlu0 %v8074_v43, %s8184_s3  ;;  %s8185_s27 = smov 80   ;;  %v8089_v38 = vpack.i.bf16 %v5921_v4, %v5953_v18  ;;  %v8094_v44 = vpack.i.bf16 %v5923_v50, %v5955_v19  ;;  %v5957_v45 = vld [vmem:[#allocation5 + $0x1e] ss:$40 sm:$0x3] }
 0x5dc   :  { %v5959_v47 = vld [vmem:[#allocation5 + $0x1f] ss:$40 sm:$0x3]  ;;  %v8099_v20 = vpack.i.bf16 %v5925_v1, %v5957_v45 }
 0x5dd   :  { %v8104_v41 = vpack.i.bf16 %v5927_v7, %v5959_v47 }
 0x5df   :  { %8080 = vrot.lane.b32.xlu1 %v8079_v27, %s8185_s27  ;;  %8085 = vrot.lane.b32.xlu0 %v8084_v25, %s8186_s16 }
 0x5e3   :  { %8090 = vrot.lane.b32.xlu1 %v8089_v38, %s8176_s19  ;;  %8095 = vrot.lane.b32.xlu0 %v8094_v44, %s8187_s4 }
 0x5e7   :  { %8100 = vrot.lane.b32.xlu1 %v8099_v20, %s8188_s1  ;;  %8105 = vrot.lane.b32.xlu0 %v8104_v41, %s8189_s20 }
 0x5eb   :  { %6126 = vrot.lane.b32.xlu1 %v5963_v42, %s8177_s18  ;;  %6130 = vrot.lane.b32.xlu0 %v5965_v48, %s8178_s13 }
 0x62b   :  { %v8036_v28 = vpop.permute.xlu0 %8035  ;;  %v8041_v52 = vpop.permute.xlu1 %8040 }
 0x62c   :  { %v8038_v54 = vunpack.i.h.bf16 %v8036_v28  ;;  %v8037_v55 = vunpack.i.l.bf16 %v8036_v28  ;;  %v8043_v6 = vunpack.i.h.bf16 %v8041_v52  ;;  %v8042_v33 = vunpack.i.l.bf16 %v8041_v52 }
 0x62e   :  { %v6026_v63 = vsel %vm5178_vm12, %v5897_v36, %v8038_v54  ;;  %v6110_v31 = vsel %vm5178_vm12, %v5929_v23, %v8037_v55 }
 0x62f   :  { %v8046_v53 = vpop.permute.xlu0 %8045  ;;  %v8051_v30 = vpop.permute.xlu1 %8050  ;;  %v6027_v8 = vsel %vm5622_vm14, %v6026_v63, %v8043_v6  ;;  %v6111_v62 = vsel %vm5622_vm14, %v6110_v31, %v8042_v33 }
 0x630   :  { %v8048_v0 = vunpack.i.h.bf16 %v8046_v53  ;;  %v8047_v51 = vunpack.i.l.bf16 %v8046_v53  ;;  %v8053_v9 = vunpack.i.h.bf16 %v8051_v30  ;;  %v8052_v39 = vunpack.i.l.bf16 %v8051_v30 }
 0x632   :  { %v6028_v57 = vsel %vm5662_vm15, %v6027_v8, %v8048_v0  ;;  %v6112_v12 = vsel %vm5662_vm15, %v6111_v62, %v8047_v51 }
 0x633   :  { %v8056_v61 = vpop.permute.xlu0 %8055  ;;  %v8061_v17 = vpop.permute.xlu1 %8060  ;;  %v6029_v56 = vsel %vm3595_vm9, %v6028_v57, %v8053_v9  ;;  %v6113_v21 = vsel %vm3595_vm9, %v6112_v12, %v8052_v39  ;;  %v5961_v57 = vld [vmem:[#allocation5 + $0x20] ss:$40 sm:$0x3] }
 0x634   :  { %v8058_v13 = vunpack.i.h.bf16 %v8056_v61  ;;  %v8057_v16 = vunpack.i.l.bf16 %v8056_v61  ;;  %v8063_v15 = vunpack.i.h.bf16 %v8061_v17  ;;  %v8062_v10 = vunpack.i.l.bf16 %v8061_v17  ;;  %v8138_v61 = vld [vmem:[%s12298_s7 + $0x88] ss:$0 sps:$4 sm:$0xff]  }
 0x635   :  { %v6289_v62 = vsel %vm5683_vm13, %v8138_v61, 0 }
 0x636   :  { %v6031_v22 = vsel %vm6030_vm0, %v6029_v56, %v8058_v13  ;;  %v6114_v24 = vsel %vm6030_vm0, %v6113_v21, %v8057_v16  ;;  %v8139_v13 = vld [vmem:[%s12298_s7 + $0x80] sm:$0xff]  }
 0x637   :  { %v8066_v49 = vpop.permute.xlu0 %8065  ;;  %v6033_v58 = vsel %vm6032_vm1, %v6031_v22, %v8063_v15  ;;  %v6115_v40 = vsel %vm6032_vm1, %v6114_v24, %v8062_v10  ;;  %v8140_v15 = vld [vmem:[%s12300_s9 + $0x8] sm:$0xff]   ;;  %v8141_v10 = vld [vmem:[%s12300_s9] sm:$0xff]  }
 0x638   :  { %v8068_v14 = vunpack.i.h.bf16 %v8066_v49  ;;  %v8067_v26 = vunpack.i.l.bf16 %v8066_v49 }
 0x63a   :  { %v6035_v60 = vsel %vm6034_vm2, %v6033_v58, %v8068_v14  ;;  %v6116_v46 = vsel %vm6034_vm2, %v6115_v40, %v8067_v26  ;;  %v6521_v14 = vld [vmem:[%s12299_s8] ss:$0 sm:$0xff]  ;;  %s8145_s8 = scalar_lea.vmem %s6448_s17, 32 }
 0x63b   :  { %p8146_p0 = scmp.ne.s32.totalorder %s6448_s17, %s8145_s8  ;;  %p8151_p2 = scmp.lt.s32.totalorder %s8145_s8, %s8145_s8 }
 0x63d   :  { %p8152_p3 = por %p8151_p2, %p8150_p1 }
 0x63f   :  { %p8153_p4 = pnand %p8152_p3, %p8146_p0 }
 0x64d   :  { %v8071_v59 = vpop.permute.xlu1 %8070  ;;  %v8076_v29 = vpop.permute.xlu0 %8075 }
 0x64e   :  { %v8073_v34 = vunpack.i.h.bf16 %v8071_v59  ;;  %v8072_v43 = vunpack.i.l.bf16 %v8071_v59  ;;  %v8078_v11 = vunpack.i.h.bf16 %v8076_v29  ;;  %v8077_v37 = vunpack.i.l.bf16 %v8076_v29 }
 0x650   :  { %v6036_v2 = vsel %vm4774_vm10, %v6035_v60, %v8073_v34  ;;  %v6117_v3 = vsel %vm4774_vm10, %v6116_v46, %v8072_v43  ;;  %vm8190_vm10 = vmmov 0   ;;  %v6541_v46 = vld [vmem:[%s12301_s10] ss:$0 sm:$0xff] }
 0x651   :  { %v8081_v27 = vpop.permute.xlu1 %8080  ;;  %v8086_v25 = vpop.permute.xlu0 %8085  ;;  %v6038_v32 = vsel %vm6037_vm3, %v6036_v2, %v8078_v11  ;;  %v6118_v4 = vsel %vm6037_vm3, %v6117_v3, %v8077_v37 }
 0x652   :  { %v8083_v18 = vunpack.i.h.bf16 %v8081_v27  ;;  %v8082_v19 = vunpack.i.l.bf16 %v8081_v27  ;;  %v8088_v50 = vunpack.i.h.bf16 %v8086_v25  ;;  %v8087_v5 = vunpack.i.l.bf16 %v8086_v25 }
 0x654   :  { %v6040_v38 = vsel %vm6039_vm4, %v6038_v32, %v8083_v18  ;;  %v6119_v44 = vsel %vm6039_vm4, %v6118_v4, %v8082_v19 }
 0x655   :  { %v8091_v45 = vpop.permute.xlu1 %8090  ;;  %v8096_v47 = vpop.permute.xlu0 %8095  ;;  %v6042_v20 = vsel %vm6041_vm5, %v6040_v38, %v8088_v50  ;;  %v6120_v41 = vsel %vm6041_vm5, %v6119_v44, %v8087_v5 }
 0x656   :  { %v8093_v1 = vunpack.i.h.bf16 %v8091_v45  ;;  %v8092_v7 = vunpack.i.l.bf16 %v8091_v45  ;;  %v8098_v42 = vunpack.i.h.bf16 %v8096_v47  ;;  %v8097_v48 = vunpack.i.l.bf16 %v8096_v47 }
 0x658   :  { %v6043_v28 = vsel %vm4815_vm11, %v6042_v20, %v8093_v1  ;;  %v6121_v52 = vsel %vm4815_vm11, %v6120_v41, %v8092_v7  ;;  %vm6439_vm11 = vcmask 9216  }
 0x659   :  { %v8101_v53 = vpop.permute.xlu1 %8100  ;;  %v8106_v54 = vpop.permute.xlu0 %8105  ;;  %v6045_v23 = vsel %vm6044_vm6, %v6043_v28, %v8098_v42  ;;  %v6122_v36 = vsel %vm6044_vm6, %v6121_v52, %v8097_v48 }
 0x65a   :  { %v8103_v55 = vunpack.i.h.bf16 %v8101_v53  ;;  %v8102_v30 = vunpack.i.l.bf16 %v8101_v53  ;;  %v8108_v6 = vunpack.i.h.bf16 %v8106_v54  ;;  %v8107_v33 = vunpack.i.l.bf16 %v8106_v54 }
 0x65c   :  { %v6047_v63 = vsel %vm6046_vm7, %v6045_v23, %v8103_v55  ;;  %v6123_v31 = vsel %vm6046_vm7, %v6122_v36, %v8102_v30 }
 0x65d   :  { %v6049_v0 = vsel %vm6048_vm8, %v6047_v63, %v8108_v6  ;;  %v6124_v51 = vsel %vm6048_vm8, %v6123_v31, %v8107_v33  ;;  %v6127_v39 = vpop.permute.xlu1 %6126  ;;  %v6131_v17 = vpop.permute.xlu0 %6130 }
 0x65e   :  { %v6135_v9 = vpack.c.bf16 %v6049_v0, %v6049_v0  ;;  %v6136_v8 = vpack.c.bf16 %v6124_v51, %v6124_v51  ;;  %v6133_v12 = vsel %vm5178_vm12, %v5961_v57, %v6127_v39 }
 0x65f   :  { %v6134_v16 = vsel %vm5622_vm14, %v6133_v12, %v6131_v17 }
 0x660   :  { %6323 = vmatprep.mubr.bf16.mxu1 %v6136_v8  ;;  %v6137_v49 = vpack.c.bf16 %v6134_v16, %v6134_v16 }
 0x661   :  { %6324 = vmatmul.mubr.bf16.vlgmr.msra.gmra.mxu1 %v6135_v9 }
 0x662   :  { %6823 = vmatpush3.bf16.msra.mxu1 %v6289_v62  ;;  %6826 = vmatprep.mubr.msk.bf16.mxu1 %vm8190_vm10, %v8179_v35 }
 0x663   :  { %6824 = vmatprep.subr.bf16.mxu1 %v8179_v35 }
 0x666   :  { %6825 = vmatpush3.bf16.msra.mxu1 %v8139_v13 }
 0x667   :  { %6830 = vmatprep.subr.bf16.mxu1 %v8179_v35 }
 0x669   :  { %6827 = vmatmul.mubr.msk.bf16.vlgmr.msra.gmra.mxu1 %vm5662_vm15, %v6137_v49 }
 0x66a   :  { %6834 = vmatprep.mubr.msk.bf16.mxu1 %vm8190_vm10, %v8179_v35  ;;  %6831 = vmatpush3.bf16.msra.mxu1 %v8140_v15 }
 0x66b   :  { %6832 = vmatprep.subr.bf16.mxu1 %v8179_v35 }
 0x66e   :  { %6833 = vmatpush3.bf16.msra.mxu1 %v8141_v10 }
 0x721   :  { %v6644_v56 = vpop.f32.mrf.mxu1 }
 0x723   :  { %v6645_v21 = vpop.f32.mrf.mxu1 }
 0x724   :  { %v6646_v22 = vadd.f32 %v6645_v21, %v6644_v56 }
 0x725   :  { %v6647_v24 = vpop.f32.mrf.mxu1 }
 0x726   :  { %v6326_v59 = vadd.f32 %v6646_v22, %v6521_v14 }
 0x727   :  { %v6648_v26 = vpop.f32.mrf.mxu1 }
 0x729   :  { %v6365_v29 = vpop.f32.mrf.mxu1 }
 0x72a   :  { %v6366_v58 = vadd.f32 %v6365_v29, %v6326_v59 }
 0x72b   :  { %v6828_v40 = vpop.f32.mrf.mxu1 }
 0x72c   :  { %v6371_v34 = vmax.f32 %v6366_v58, 0.0 }
 0x72d   :  { %v6368_v35 = vpop.f32.mrf.mxu1 }
 0x72e   :  { %v6372_v43 = vpack.c.bf16 %v6371_v34, %v6371_v34 }
 0x72f   :  { %v6829_v60 = vpop.f32.mrf.mxu1 }
 0x730   :  { %6835 = vmatmul.mubr.msk.bf16.vlgmr.msra.gmra.mxu1 %vm3595_vm9, %v6372_v43 }
 0x7f0   :  { %v6433_v11 = vpop.f32.mrf.mxu1 }
 0x7f1   :  { %v6434_v37 = vadd.f32 %v6541_v46, %v6433_v11 }
 0x7f2   :  { %v6836_v2 = vpop.f32.mrf.mxu1 }
 0x7f3   :  { %6440 = vst.msk [vmem:[#allocation6] sm:$0x3] %vm6439_vm11, %v6434_v37 }
 0x7f4   :  { %v6436_v3 = vpop.f32.mrf.mxu1 }
 0x7f5   :  { %8156 = shalt.err (!%p8153_p4)
}
 0x7f6   :  { %6450 = dma.vmem_to_hbm [thread:$0]  %s6448_s17, 32, %s12302_s11, [#allocation7]   ;;  %v6837_v27 = vpop.f32.mrf.mxu1 }
 0x7f7   :  { %8165 = dma.done.wait [#allocation7], 32  }
 0x7f8   :  { %8166 = vsyncadd [#allocation7], 4294967264 }
 0x7f9   :  { %6454 = vsyncpa [#allocation7], 1 }

</bundles_post_ra>
